<compile_context>
chip_gen: v5e
topology: v5e:2x2
jax: 0.10.0
libtpu: 0.0.40
codegen_flags: <defaults>
</compile_context>

<pallas_src>
import functools

import jax
import jax.numpy as jnp
from jax.experimental import pallas as pl
from jax.experimental.pallas import tpu as pltpu


_BETA = 0.4
_EPS = 1e-5

# (name, Cin, Cout, normalize) for the four stride-2 blocks; final layer below.
_BLOCKS = (
    ("c0", 3, 64, False),
    ("c1", 64, 128, True),
    ("c2", 128, 256, True),
    ("c3", 256, 512, True),
)
_FINAL = ("c4", 512, 1)


def _round_up(x, m):
    return ((x + m - 1) // m) * m


def _detect_vmem_limit():
    """Generation-aware scoped-VMEM budget (48 MiB on v7x, ~100 MiB on v5e/v6e)."""
    cap = None
    try:
        cap = getattr(pltpu.get_tpu_info(), "vmem_capacity_bytes", None)
    except Exception:
        cap = None
    if cap is None:
        cap = 128 * 1024 * 1024
    if cap <= 64 * 1024 * 1024:            # v7x: 64 MiB physical per TC
        return 48 * 1024 * 1024
    return 100 * 1024 * 1024               # v5e / v6e: 128 MiB physical


_VMEM_LIMIT = _detect_vmem_limit()


# --------------------------- Pallas kernels ---------------------------------

def _matmul_bias_act_kernel(x_ref, w_ref, b_ref, o_ref, acc_ref, *, activation, beta):
    # x: (tm, tk) bf16   w: (tk, Cp) bf16   b: (1, Cp) f32
    # o: (tm, Cp)        acc: (tm, Cp) f32 scratch (resident across k)
    k = pl.program_id(1)

    @pl.when(k == 0)
    def _():
        acc_ref[...] = jnp.zeros_like(acc_ref)

    acc_ref[...] += jnp.dot(x_ref[...], w_ref[...],
                            preferred_element_type=jnp.float32)

    @pl.when(k == pl.num_programs(1) - 1)
    def _():
        y = acc_ref[...] + b_ref[...]
        if activation == "swish":
            y = y * jax.nn.sigmoid(beta * y)
        elif activation == "sigmoid":
            y = jax.nn.sigmoid(y)
        o_ref[...] = y.astype(o_ref.dtype)


def _conv_norm_swish_kernel(x_ref, w_ref, b_ref, o_ref, acc_ref, *, beta, eps):
    # Per-image fused conv + InstanceNorm2d(affine=False) + Swish(beta).
    # x: (HW, tk) bf16   w: (tk, C) bf16   b: (1, C) f32
    # o: (HW, C) bf16    acc: (HW, C) f32 scratch
    k = pl.program_id(1)

    @pl.when(k == 0)
    def _():
        acc_ref[...] = jnp.zeros_like(acc_ref)

    acc_ref[...] += jnp.dot(x_ref[...], w_ref[...],
                            preferred_element_type=jnp.float32)

    @pl.when(k == pl.num_programs(1) - 1)
    def _():
        y = acc_ref[...] + b_ref[...]
        mean = jnp.mean(y, axis=0, keepdims=True)
        var = jnp.mean((y - mean) ** 2, axis=0, keepdims=True)   # biased variance
        yn = (y - mean) * jax.lax.rsqrt(var + eps)
        o_ref[...] = (yn * jax.nn.sigmoid(beta * yn)).astype(o_ref.dtype)


def _instnorm_swish_kernel(x_ref, o_ref, *, beta, eps):
    # Fallback (non-fused) InstanceNorm + Swish: bf16 load, f32 stats, bf16 store.
    x = x_ref[...].astype(jnp.float32)
    mean = jnp.mean(x, axis=1, keepdims=True)
    var = jnp.mean((x - mean) ** 2, axis=1, keepdims=True)
    xn = (x - mean) * jax.lax.rsqrt(var + eps)
    o_ref[...] = (xn * jax.nn.sigmoid(beta * xn)).astype(o_ref.dtype)


# --------------------------- Pallas wrappers ---------------------------------

def _pick_tk(k, max_tk=2048):
    if k <= max_tk:
        return k
    tk = max_tk
    while k % tk:
        tk //= 2
    return tk


def _pick_tm(m, tm_max=512):
    tm = min(tm_max, _round_up(m, 16))          # bf16 packs 16 sublanes / vreg
    if pl.cdiv(m, tm) < 2 and m >= 32:
        tm = _round_up(pl.cdiv(m, 2), 16)       # keep v7x's 2nd TC busy
    return tm


def conv_matmul(patches, w_packed, b_packed, activation, out_dtype):
    """(M, K) bf16 x (K, Cp) bf16 + bias [+ swish/sigmoid]; M- and K-tiled MXU matmul."""
    m, k = patches.shape
    cp = w_packed.shape[1]
    tm = _pick_tm(m)
    tk = _pick_tk(k)
    grid = (pl.cdiv(m, tm), k // tk)
    return pl.pallas_call(
        functools.partial(_matmul_bias_act_kernel, activation=activation, beta=_BETA),
        out_shape=jax.ShapeDtypeStruct((m, cp), out_dtype),
        grid=grid,
        in_specs=[
            pl.BlockSpec((tm, tk), lambda i, j: (i, j)),     # row/K tile
            pl.BlockSpec((tk, cp), lambda i, j: (j, 0)),     # weight K-slab
            pl.BlockSpec((1, cp), lambda i, j: (0, 0)),      # resident bias
        ],
        out_specs=pl.BlockSpec((tm, cp), lambda i, j: (i, 0)),
        scratch_shapes=[pltpu.VMEM((tm, cp), jnp.float32)],
        compiler_params=pltpu.CompilerParams(
            dimension_semantics=("parallel", "arbitrary"),
            vmem_limit_bytes=_VMEM_LIMIT,
        ),
    )(patches, w_packed, b_packed)


def conv_norm_swish(patches3, w_packed, b_packed):
    """Fused per-image conv + InstanceNorm + Swish. patches3: (N, HW, K) bf16."""
    n, hw, k = patches3.shape
    c = w_packed.shape[1]
    tk = _pick_tk(k)
    grid = (n, k // tk)
    return pl.pallas_call(
        functools.partial(_conv_norm_swish_kernel, beta=_BETA, eps=_EPS),
        out_shape=jax.ShapeDtypeStruct((n, hw, c), jnp.bfloat16),
        grid=grid,
        in_specs=[
            pl.BlockSpec((None, hw, tk), lambda b, j: (b, 0, j)),
            pl.BlockSpec((tk, c), lambda b, j: (j, 0)),
            pl.BlockSpec((1, c), lambda b, j: (0, 0)),
        ],
        out_specs=pl.BlockSpec((None, hw, c), lambda b, j: (b, 0, 0)),
        scratch_shapes=[pltpu.VMEM((hw, c), jnp.float32)],
        compiler_params=pltpu.CompilerParams(
            dimension_semantics=("parallel", "arbitrary"),
            vmem_limit_bytes=_VMEM_LIMIT,
        ),
    )(patches3, w_packed, b_packed)


def norm_swish(x_mc, n, ho, wo, out_dtype=jnp.bfloat16):
    """Fallback InstanceNorm2d(affine=False) + Swish on (M, C) = (N*Ho*Wo, C)."""
    c = x_mc.shape[1]
    hw = ho * wo
    x3 = x_mc.reshape(n, hw, c)
    tc = min(c, 128)
    out = pl.pallas_call(
        functools.partial(_instnorm_swish_kernel, beta=_BETA, eps=_EPS),
        out_shape=jax.ShapeDtypeStruct((n, hw, c), out_dtype),
        grid=(n, c // tc),
        in_specs=[pl.BlockSpec((1, hw, tc), lambda b, j: (b, 0, j))],
        out_specs=pl.BlockSpec((1, hw, tc), lambda b, j: (b, 0, j)),
        compiler_params=pltpu.CompilerParams(
            dimension_semantics=("parallel", "parallel"),
            vmem_limit_bytes=_VMEM_LIMIT,
        ),
    )(x3)
    return out.reshape(n, ho, wo, c)


# --------------------------- plain-JAX glue ----------------------------------

def space_to_depth_pad1(x):
    """Pad by 1 each side and 2x space-to-depth: (N,H,W,C) -> (N,H/2+1,W/2+1,4C).

    Turns a 4x4/stride-2/pad-1 conv into a 2x2/stride-1 conv, dropping the
    im2col expansion from 16x to 4x of the activation bytes.
    """
    n, h, w, c = x.shape
    xp = jnp.pad(x, ((0, 0), (1, 1), (1, 1), (0, 0)))
    hp, wp = h + 2, w + 2
    y = xp.reshape(n, hp // 2, 2, wp // 2, 2, c)
    y = jnp.transpose(y, (0, 1, 3, 2, 4, 5))          # (N, Hs, Ws, a, b, C)
    return y.reshape(n, hp // 2, wp // 2, 4 * c)


def im2col_2x2(x):
    """im2col for a 2x2 / stride-1 / no-pad conv on the space-to-depth tensor.

    K ordering is (dp, dq, a, b, cin), matching the packed s2d weights.
    # TODO(synk): gather the 2x2 taps inside the matmul kernel (extra grid axis
    # with per-tap index_map) to drop the remaining 4x im2col HBM traffic.
    """
    n, hs, ws, c4 = x.shape
    ho, wo = hs - 1, ws - 1
    cols = [x[:, dp:dp + ho, dq:dq + wo, :] for dp in range(2) for dq in range(2)]
    p = jnp.stack(cols, axis=3)                        # (N, Ho, Wo, 4, 4C)
    return p.reshape(n, ho * wo, 4 * c4), ho, wo


def im2col_4x4_s1(x, pad):
    """im2col for the final 4x4 / stride-1 conv; K ordered (kh, kw, cin)."""
    n, h, w, c = x.shape
    xp = jnp.pad(x, ((0, 0), pad[0], pad[1], (0, 0)))
    hp = h + pad[0][0] + pad[0][1]
    wp = w + pad[1][0] + pad[1][1]
    ho, wo = hp - 3, wp - 3
    cols = [xp[:, i:i + ho, j:j + wo, :] for i in range(4) for j in range(4)]
    p = jnp.stack(cols, axis=3)                        # (N, Ho, Wo, 16, C)
    return p.reshape(n * ho * wo, 16 * c), ho, wo


# --------------------------- parameters --------------------------------------

def init_params(key):
    """PyTorch-style Conv2d init, weights in PyTorch (Cout, Cin, kh, kw) layout."""
    layers = list(_BLOCKS) + [(_FINAL[0], _FINAL[1], _FINAL[2], False)]
    params = {}
    for i, (name, cin, cout, _) in enumerate(layers):
        kw_, kb_ = jax.random.split(jax.random.fold_in(key, i))
        scale = 1.0 / float(jnp.sqrt(cin * 4 * 4))
        w = jax.random.uniform(kw_, (cout, cin, 4, 4), jnp.float32, -scale, scale)
        b = jax.random.uniform(kb_, (cout,), jnp.float32, -scale, scale)
        params[name] = (w, b)
    return params


def pack_params(params):
    """One-time repack to bf16 matmul layout (done once, not per forward call).

    Stride-2 layers: space-to-depth ordering (dp, dq, a, b, cin) x cout.
    Final layer:     (kh, kw, cin) x cout with Cout padded to a full 128-lane.
    """
    packed = {}
    for name, (w, b) in params.items():
        cout, cin, kh, kw = w.shape
        k = kh * kw * cin
        if name == _FINAL[0]:
            cp = cout if (cout % 128 == 0 or cout == 64) else _round_up(cout, 128)
            w2d = jnp.transpose(w, (2, 3, 1, 0)).reshape(k, cout)
        else:
            cp = cout
            w6 = w.reshape(cout, cin, 2, 2, 2, 2)        # (cout, cin, dp, a, dq, b)
            w2d = jnp.transpose(w6, (2, 4, 3, 5, 1, 0)).reshape(k, cout)
        w2d = w2d.astype(jnp.bfloat16)
        if cp != cout:
            w2d = jnp.zeros((k, cp), jnp.bfloat16).at[:, :cout].set(w2d)
        bp = jnp.zeros((1, cp), jnp.float32).at[0, :cout].set(b.astype(jnp.float32))
        packed[name] = (w2d, bp)
    return packed


# --------------------------- model -------------------------------------------

def _fused_norm_fits(hw, k, cout, tk):
    # acc (f32) + double-buffered patch & weight tiles + output block, with margin.
    need = (hw * cout * 4 + 2 * hw * tk * 2 + 2 * tk * cout * 2 + 2 * hw * cout * 2)
    return need <= _VMEM_LIMIT // 2


def discriminator_forward(img_nchw, packed):
    n = img_nchw.shape[0]
    x = jnp.transpose(img_nchw, (0, 2, 3, 1)).astype(jnp.bfloat16)   # NHWC bf16

    # four blocks: Conv(4, s=2, p=1) [+ InstanceNorm] + Swish(0.4)
    for name, _, cout, normalize in _BLOCKS:
        wp, bp = packed[name]
        patches3, ho, wo = im2col_2x2(space_to_depth_pad1(x))        # (N, HW, K)
        hw, k = patches3.shape[1], patches3.shape[2]
        if normalize:
            if _fused_norm_fits(hw, k, cout, _pick_tk(k)):
                y = conv_norm_swish(patches3, wp, bp)                # (N, HW, C) bf16
                x = y.reshape(n, ho, wo, cout)
            else:
                # huge-image fallback: bf16 conv writeback + separate norm kernel
                y2 = conv_matmul(patches3.reshape(n * hw, k), wp, bp,
                                 "none", jnp.bfloat16)
                x = norm_swish(y2[:, :cout], n, ho, wo)
        else:
            y = conv_matmul(patches3.reshape(n * hw, k), wp, bp,
                            "swish", jnp.bfloat16)                   # fused Swish
            x = y[:, :cout].reshape(n, ho, wo, cout)

    # ZeroPad2d((1,0,1,0)) + Conv2d(512,1,4,padding=1) + Sigmoid
    # combined padding: top/left = 1+1 = 2, bottom/right = 0+1 = 1
    name, _, cout = _FINAL
    wp, bp = packed[name]
    patches, ho, wo = im2col_4x4_s1(x, ((2, 1), (2, 1)))
    y = conv_matmul(patches, wp, bp, "sigmoid", jnp.float32)
    y = y[:, :cout].reshape(n, ho, wo, cout)
    return jnp.transpose(y, (0, 3, 1, 2))                            # NCHW


if __name__ == "__main__":
    key_in = jax.random.PRNGKey(0)
    key_p = jax.random.PRNGKey(1)
    img = jax.random.normal(key_in, (2, 3, 32, 32), jnp.float32)     # NCHW
    params = init_params(key_p)
    packed = pack_params(params)

    fwd = jax.jit(discriminator_forward)
    out = jax.block_until_ready(fwd(img, packed))

    assert out.shape == (2, 1, 2, 2), out.shape
    assert bool(jnp.all(jnp.isfinite(out)))
    assert bool(jnp.all((out >= 0.0) & (out <= 1.0)))                # sigmoid range
    print("KERNEL_OK")
</pallas_src>

<mosaic_0001>
module attributes {stable_mosaic.version = 11 : i64} {
  func.func @_matmul_bias_act_kernel(%arg0: i32, %arg1: i32, %arg2: memref<256x48xbf16, #tpu.memory_space<vmem>>, %arg3: memref<48x64xbf16, #tpu.memory_space<vmem>>, %arg4: memref<1x64xf32, #tpu.memory_space<vmem>>, %arg5: memref<256x64xbf16, #tpu.memory_space<vmem>>, %arg6: memref<256x64xf32, #tpu.memory_space<vmem>>) attributes {dimension_semantics = [#tpu.dimension_semantics<parallel>, #tpu.dimension_semantics<arbitrary>], iteration_bounds = array<i64: 2, 1>, scalar_prefetch = 0 : i64, scratch_operands = 1 : i64, tpu.core_type = #tpu.core_type<tc>, window_params = [{transform_indices = @transform_0, window_bounds = array<i64: 256, 48>}, {transform_indices = @transform_1, window_bounds = array<i64: 48, 64>}, {pipeline_mode = #tpu.pipeline_mode<synchronous>, transform_indices = @transform_2, window_bounds = array<i64: 1, 64>}, {transform_indices = @transform_3, window_bounds = array<i64: 256, 64>}]} {
    %c0_i32 = arith.constant 0 : i32
    %0 = arith.cmpi eq, %arg1, %c0_i32 : i32
    %1 = arith.extui %0 : i1 to i32
    %c0_i32_0 = arith.constant 0 : i32
    %2 = arith.cmpi ne, %1, %c0_i32_0 : i32
    scf.if %2 {
      %cst_10 = arith.constant 0.000000e+00 : f32
      %12 = vector.broadcast %cst_10 : f32 to vector<256x64xf32>
      %c0_11 = arith.constant 0 : index
      %c0_12 = arith.constant 0 : index
      %13 = vector.load %arg6[%c0_11, %c0_12] : memref<256x64xf32, #tpu.memory_space<vmem>>, vector<256x64xf32>
      tpu.vector_store %arg6[%c0_11, %c0_12], %12 {strides = array<i32>} : memref<256x64xf32, #tpu.memory_space<vmem>>, vector<256x64xf32>,
    } else {
    }
    %c0 = arith.constant 0 : index
    %c0_1 = arith.constant 0 : index
    %3 = vector.load %arg6[%c0, %c0_1] : memref<256x64xf32, #tpu.memory_space<vmem>>, vector<256x64xf32>
    %c0_2 = arith.constant 0 : index
    %c0_3 = arith.constant 0 : index
    %4 = vector.load %arg2[%c0_2, %c0_3] : memref<256x48xbf16, #tpu.memory_space<vmem>>, vector<256x48xbf16>
    %c0_4 = arith.constant 0 : index
    %c0_5 = arith.constant 0 : index
    %5 = vector.load %arg3[%c0_4, %c0_5] : memref<48x64xbf16, #tpu.memory_space<vmem>>, vector<48x64xbf16>
    %cst = arith.constant dense<0.000000e+00> : vector<256x64xf32>
    %6 = tpu.matmul %4, %5, %cst {dimension_numbers = #tpu.dot_dimension_numbers<[1], [0], [0], [1], [0, 0, 1, 1], [], []>} : vector<256x48xbf16>, vector<48x64xbf16>, vector<256x64xf32> -> vector<256x64xf32>
    %7 = arith.addf %3, %6 : vector<256x64xf32>
    %c0_6 = arith.constant 0 : index
    %c0_7 = arith.constant 0 : index
    %8 = vector.load %arg6[%c0_6, %c0_7] : memref<256x64xf32, #tpu.memory_space<vmem>>, vector<256x64xf32>
    tpu.vector_store %arg6[%c0_6, %c0_7], %7 {strides = array<i32>} : memref<256x64xf32, #tpu.memory_space<vmem>>, vector<256x64xf32>,
    %c0_i32_8 = arith.constant 0 : i32
    %9 = arith.cmpi eq, %arg1, %c0_i32_8 : i32
    %10 = arith.extui %9 : i1 to i32
    %c0_i32_9 = arith.constant 0 : i32
    %11 = arith.cmpi ne, %10, %c0_i32_9 : i32
    scf.if %11 {
      %c0_10 = arith.constant 0 : index
      %c0_11 = arith.constant 0 : index
      %12 = vector.load %arg6[%c0_10, %c0_11] : memref<256x64xf32, #tpu.memory_space<vmem>>, vector<256x64xf32>
      %c0_12 = arith.constant 0 : index
      %c0_13 = arith.constant 0 : index
      %13 = vector.load %arg4[%c0_12, %c0_13] : memref<1x64xf32, #tpu.memory_space<vmem>>, vector<1x64xf32>
      %14 = vector.broadcast %13 : vector<1x64xf32> to vector<256x64xf32>
      %15 = arith.addf %12, %14 : vector<256x64xf32>
      %cst_14 = arith.constant 4.000000e-01 : f32
      %16 = vector.broadcast %cst_14 : f32 to vector<256x64xf32>
      %17 = arith.mulf %16, %15 : vector<256x64xf32>
      %18 = arith.negf %17 : vector<256x64xf32>
      %19 = math.exp %18 : vector<256x64xf32>
      %cst_15 = arith.constant 1.000000e+00 : f32
      %20 = vector.broadcast %cst_15 : f32 to vector<256x64xf32>
      %21 = arith.addf %20, %19 : vector<256x64xf32>
      %22 = arith.divf %20, %21 : vector<256x64xf32>
      %23 = arith.mulf %15, %22 : vector<256x64xf32>
      %24 = arith.truncf %23 : vector<256x64xf32> to vector<256x64xbf16>
      %c0_16 = arith.constant 0 : index
      %c0_17 = arith.constant 0 : index
      %25 = vector.load %arg5[%c0_16, %c0_17] : memref<256x64xbf16, #tpu.memory_space<vmem>>, vector<256x64xbf16>
      tpu.vector_store %arg5[%c0_16, %c0_17], %24 {strides = array<i32>} : memref<256x64xbf16, #tpu.memory_space<vmem>>, vector<256x64xbf16>,
    } else {
    }
    return
  }
  func.func @transform_0(%arg0: i32, %arg1: i32) -> (i32, i32) {
    %c0_i32 = arith.constant 0 : i32
    return %arg0, %arg1 : i32, i32
  }
  func.func @transform_1(%arg0: i32, %arg1: i32) -> (i32, i32) {
    %c0_i32 = arith.constant 0 : i32
    %c0_i32_0 = arith.constant 0 : i32
    return %arg1, %c0_i32 : i32, i32
  }
  func.func @transform_2(%arg0: i32, %arg1: i32) -> (i32, i32) {
    %c0_i32 = arith.constant 0 : i32
    %c0_i32_0 = arith.constant 0 : i32
    %c0_i32_1 = arith.constant 0 : i32
    return %c0_i32, %c0_i32_0 : i32, i32
  }
  func.func @transform_3(%arg0: i32, %arg1: i32) -> (i32, i32) {
    %c0_i32 = arith.constant 0 : i32
    %c0_i32_0 = arith.constant 0 : i32
    return %arg0, %c0_i32 : i32, i32
  }
}

module attributes {stable_mosaic.version = 11 : i64} {
  func.func @_conv_norm_swish_kernel(%arg0: i32, %arg1: i32, %arg2: memref<1x64x1024xbf16, #tpu.memory_space<vmem>>, %arg3: memref<1024x128xbf16, #tpu.memory_space<vmem>>, %arg4: memref<1x128xf32, #tpu.memory_space<vmem>>, %arg5: memref<1x64x128xbf16, #tpu.memory_space<vmem>>, %arg6: memref<64x128xf32, #tpu.memory_space<vmem>>) attributes {dimension_semantics = [#tpu.dimension_semantics<parallel>, #tpu.dimension_semantics<arbitrary>], iteration_bounds = array<i64: 2, 1>, scalar_prefetch = 0 : i64, scratch_operands = 1 : i64, tpu.core_type = #tpu.core_type<tc>, window_params = [{transform_indices = @transform_0, window_bounds = array<i64: 1, 64, 1024>}, {transform_indices = @transform_1, window_bounds = array<i64: 1024, 128>}, {pipeline_mode = #tpu.pipeline_mode<synchronous>, transform_indices = @transform_2, window_bounds = array<i64: 1, 128>}, {transform_indices = @transform_3, window_bounds = array<i64: 1, 64, 128>}]} {
    %c0_i32 = arith.constant 0 : i32
    %0 = arith.cmpi eq, %arg1, %c0_i32 : i32
    %1 = arith.extui %0 : i1 to i32
    %c0_i32_0 = arith.constant 0 : i32
    %2 = arith.cmpi ne, %1, %c0_i32_0 : i32
    scf.if %2 {
      %cst_11 = arith.constant 0.000000e+00 : f32
      %13 = vector.broadcast %cst_11 : f32 to vector<64x128xf32>
      %c0_12 = arith.constant 0 : index
      %c0_13 = arith.constant 0 : index
      %14 = vector.load %arg6[%c0_12, %c0_13] : memref<64x128xf32, #tpu.memory_space<vmem>>, vector<64x128xf32>
      tpu.vector_store %arg6[%c0_12, %c0_13], %13 {strides = array<i32>} : memref<64x128xf32, #tpu.memory_space<vmem>>, vector<64x128xf32>,
    } else {
    }
    %c0 = arith.constant 0 : index
    %c0_1 = arith.constant 0 : index
    %3 = vector.load %arg6[%c0, %c0_1] : memref<64x128xf32, #tpu.memory_space<vmem>>, vector<64x128xf32>
    %c0_2 = arith.constant 0 : index
    %c0_3 = arith.constant 0 : index
    %c0_4 = arith.constant 0 : index
    %4 = vector.load %arg2[%c0_2, %c0_3, %c0_4] : memref<1x64x1024xbf16, #tpu.memory_space<vmem>>, vector<1x64x1024xbf16>
    %5 = vector.shape_cast %4 : vector<1x64x1024xbf16> to vector<64x1024xbf16>
    %c0_5 = arith.constant 0 : index
    %c0_6 = arith.constant 0 : index
    %6 = vector.load %arg3[%c0_5, %c0_6] : memref<1024x128xbf16, #tpu.memory_space<vmem>>, vector<1024x128xbf16>
    %cst = arith.constant dense<0.000000e+00> : vector<64x128xf32>
    %7 = tpu.matmul %5, %6, %cst {dimension_numbers = #tpu.dot_dimension_numbers<[1], [0], [0], [1], [0, 0, 1, 1], [], []>} : vector<64x1024xbf16>, vector<1024x128xbf16>, vector<64x128xf32> -> vector<64x128xf32>
    %8 = arith.addf %3, %7 : vector<64x128xf32>
    %c0_7 = arith.constant 0 : index
    %c0_8 = arith.constant 0 : index
    %9 = vector.load %arg6[%c0_7, %c0_8] : memref<64x128xf32, #tpu.memory_space<vmem>>, vector<64x128xf32>
    tpu.vector_store %arg6[%c0_7, %c0_8], %8 {strides = array<i32>} : memref<64x128xf32, #tpu.memory_space<vmem>>, vector<64x128xf32>,
    %c0_i32_9 = arith.constant 0 : i32
    %10 = arith.cmpi eq, %arg1, %c0_i32_9 : i32
    %11 = arith.extui %10 : i1 to i32
    %c0_i32_10 = arith.constant 0 : i32
    %12 = arith.cmpi ne, %11, %c0_i32_10 : i32
    scf.if %12 {
      %c0_11 = arith.constant 0 : index
      %c0_12 = arith.constant 0 : index
      %13 = vector.load %arg6[%c0_11, %c0_12] : memref<64x128xf32, #tpu.memory_space<vmem>>, vector<64x128xf32>
      %c0_13 = arith.constant 0 : index
      %c0_14 = arith.constant 0 : index
      %14 = vector.load %arg4[%c0_13, %c0_14] : memref<1x128xf32, #tpu.memory_space<vmem>>, vector<1x128xf32>
      %15 = vector.broadcast %14 : vector<1x128xf32> to vector<64x128xf32>
      %16 = arith.addf %13, %15 : vector<64x128xf32>
      %cst_15 = arith.constant dense<0.000000e+00> : vector<128xf32>
      %17 = vector.multi_reduction <add>, %16, %cst_15 [0] : vector<64x128xf32> to vector<128xf32>
      %18 = vector.shape_cast %17 : vector<128xf32> to vector<1x128xf32>
      %cst_16 = arith.constant 6.400000e+01 : f32
      %19 = vector.broadcast %cst_16 : f32 to vector<1x128xf32>
      %20 = arith.divf %18, %19 : vector<1x128xf32>
      %21 = vector.broadcast %20 : vector<1x128xf32> to vector<64x128xf32>
      %22 = arith.subf %16, %21 : vector<64x128xf32>
      %23 = arith.mulf %22, %22 : vector<64x128xf32>
      %cst_17 = arith.constant dense<0.000000e+00> : vector<128xf32>
      %24 = vector.multi_reduction <add>, %23, %cst_17 [0] : vector<64x128xf32> to vector<128xf32>
      %25 = vector.shape_cast %24 : vector<128xf32> to vector<1x128xf32>
      %cst_18 = arith.constant 6.400000e+01 : f32
      %26 = vector.broadcast %cst_18 : f32 to vector<1x128xf32>
      %27 = arith.divf %25, %26 : vector<1x128xf32>
      %28 = vector.broadcast %20 : vector<1x128xf32> to vector<64x128xf32>
      %29 = arith.subf %16, %28 : vector<64x128xf32>
      %cst_19 = arith.constant 9.99999974E-6 : f32
      %30 = vector.broadcast %cst_19 : f32 to vector<1x128xf32>
      %31 = arith.addf %27, %30 : vector<1x128xf32>
      %32 = math.rsqrt %31 : vector<1x128xf32>
      %33 = vector.broadcast %32 : vector<1x128xf32> to vector<64x128xf32>
      %34 = arith.mulf %29, %33 : vector<64x128xf32>
      %cst_20 = arith.constant 4.000000e-01 : f32
      %35 = vector.broadcast %cst_20 : f32 to vector<64x128xf32>
      %36 = arith.mulf %35, %34 : vector<64x128xf32>
      %37 = arith.negf %36 : vector<64x128xf32>
      %38 = math.exp %37 : vector<64x128xf32>
      %cst_21 = arith.constant 1.000000e+00 : f32
      %39 = vector.broadcast %cst_21 : f32 to vector<64x128xf32>
      %40 = arith.addf %39, %38 : vector<64x128xf32>
      %41 = arith.divf %39, %40 : vector<64x128xf32>
      %42 = arith.mulf %34, %41 : vector<64x128xf32>
      %43 = arith.truncf %42 : vector<64x128xf32> to vector<64x128xbf16>
      %c0_22 = arith.constant 0 : index
      %c0_23 = arith.constant 0 : index
      %c0_24 = arith.constant 0 : index
      %44 = vector.load %arg5[%c0_22, %c0_23, %c0_24] : memref<1x64x128xbf16, #tpu.memory_space<vmem>>, vector<1x64x128xbf16>
      %45 = vector.shape_cast %44 : vector<1x64x128xbf16> to vector<64x128xbf16>
      %46 = vector.shape_cast %43 : vector<64x128xbf16> to vector<1x64x128xbf16>
      tpu.vector_store %arg5[%c0_22, %c0_23, %c0_24], %46 {strides = array<i32>} : memref<1x64x128xbf16, #tpu.memory_space<vmem>>, vector<1x64x128xbf16>,
    } else {
    }
    return
  }
  func.func @transform_0(%arg0: i32, %arg1: i32) -> (i32, i32, i32) {
    %c0_i32 = arith.constant 0 : i32
    %c0_i32_0 = arith.constant 0 : i32
    return %arg0, %c0_i32, %arg1 : i32, i32, i32
  }
  func.func @transform_1(%arg0: i32, %arg1: i32) -> (i32, i32) {
    %c0_i32 = arith.constant 0 : i32
    %c0_i32_0 = arith.constant 0 : i32
    return %arg1, %c0_i32 : i32, i32
  }
  func.func @transform_2(%arg0: i32, %arg1: i32) -> (i32, i32) {
    %c0_i32 = arith.constant 0 : i32
    %c0_i32_0 = arith.constant 0 : i32
    %c0_i32_1 = arith.constant 0 : i32
    return %c0_i32, %c0_i32_0 : i32, i32
  }
  func.func @transform_3(%arg0: i32, %arg1: i32) -> (i32, i32, i32) {
    %c0_i32 = arith.constant 0 : i32
    %c0_i32_0 = arith.constant 0 : i32
    %c0_i32_1 = arith.constant 0 : i32
    return %arg0, %c0_i32, %c0_i32_0 : i32, i32, i32
  }
}

module attributes {stable_mosaic.version = 11 : i64} {
  func.func @_conv_norm_swish_kernel(%arg0: i32, %arg1: i32, %arg2: memref<1x16x2048xbf16, #tpu.memory_space<vmem>>, %arg3: memref<2048x256xbf16, #tpu.memory_space<vmem>>, %arg4: memref<1x256xf32, #tpu.memory_space<vmem>>, %arg5: memref<1x16x256xbf16, #tpu.memory_space<vmem>>, %arg6: memref<16x256xf32, #tpu.memory_space<vmem>>) attributes {dimension_semantics = [#tpu.dimension_semantics<parallel>, #tpu.dimension_semantics<arbitrary>], iteration_bounds = array<i64: 2, 1>, scalar_prefetch = 0 : i64, scratch_operands = 1 : i64, tpu.core_type = #tpu.core_type<tc>, window_params = [{transform_indices = @transform_0, window_bounds = array<i64: 1, 16, 2048>}, {transform_indices = @transform_1, window_bounds = array<i64: 2048, 256>}, {pipeline_mode = #tpu.pipeline_mode<synchronous>, transform_indices = @transform_2, window_bounds = array<i64: 1, 256>}, {transform_indices = @transform_3, window_bounds = array<i64: 1, 16, 256>}]} {
    %c0_i32 = arith.constant 0 : i32
    %0 = arith.cmpi eq, %arg1, %c0_i32 : i32
    %1 = arith.extui %0 : i1 to i32
    %c0_i32_0 = arith.constant 0 : i32
    %2 = arith.cmpi ne, %1, %c0_i32_0 : i32
    scf.if %2 {
      %cst_11 = arith.constant 0.000000e+00 : f32
      %13 = vector.broadcast %cst_11 : f32 to vector<16x256xf32>
      %c0_12 = arith.constant 0 : index
      %c0_13 = arith.constant 0 : index
      %14 = vector.load %arg6[%c0_12, %c0_13] : memref<16x256xf32, #tpu.memory_space<vmem>>, vector<16x256xf32>
      tpu.vector_store %arg6[%c0_12, %c0_13], %13 {strides = array<i32>} : memref<16x256xf32, #tpu.memory_space<vmem>>, vector<16x256xf32>,
    } else {
    }
    %c0 = arith.constant 0 : index
    %c0_1 = arith.constant 0 : index
    %3 = vector.load %arg6[%c0, %c0_1] : memref<16x256xf32, #tpu.memory_space<vmem>>, vector<16x256xf32>
    %c0_2 = arith.constant 0 : index
    %c0_3 = arith.constant 0 : index
    %c0_4 = arith.constant 0 : index
    %4 = vector.load %arg2[%c0_2, %c0_3, %c0_4] : memref<1x16x2048xbf16, #tpu.memory_space<vmem>>, vector<1x16x2048xbf16>
    %5 = vector.shape_cast %4 : vector<1x16x2048xbf16> to vector<16x2048xbf16>
    %c0_5 = arith.constant 0 : index
    %c0_6 = arith.constant 0 : index
    %6 = vector.load %arg3[%c0_5, %c0_6] : memref<2048x256xbf16, #tpu.memory_space<vmem>>, vector<2048x256xbf16>
    %cst = arith.constant dense<0.000000e+00> : vector<16x256xf32>
    %7 = tpu.matmul %5, %6, %cst {dimension_numbers = #tpu.dot_dimension_numbers<[1], [0], [0], [1], [0, 0, 1, 1], [], []>} : vector<16x2048xbf16>, vector<2048x256xbf16>, vector<16x256xf32> -> vector<16x256xf32>
    %8 = arith.addf %3, %7 : vector<16x256xf32>
    %c0_7 = arith.constant 0 : index
    %c0_8 = arith.constant 0 : index
    %9 = vector.load %arg6[%c0_7, %c0_8] : memref<16x256xf32, #tpu.memory_space<vmem>>, vector<16x256xf32>
    tpu.vector_store %arg6[%c0_7, %c0_8], %8 {strides = array<i32>} : memref<16x256xf32, #tpu.memory_space<vmem>>, vector<16x256xf32>,
    %c0_i32_9 = arith.constant 0 : i32
    %10 = arith.cmpi eq, %arg1, %c0_i32_9 : i32
    %11 = arith.extui %10 : i1 to i32
    %c0_i32_10 = arith.constant 0 : i32
    %12 = arith.cmpi ne, %11, %c0_i32_10 : i32
    scf.if %12 {
      %c0_11 = arith.constant 0 : index
      %c0_12 = arith.constant 0 : index
      %13 = vector.load %arg6[%c0_11, %c0_12] : memref<16x256xf32, #tpu.memory_space<vmem>>, vector<16x256xf32>
      %c0_13 = arith.constant 0 : index
      %c0_14 = arith.constant 0 : index
      %14 = vector.load %arg4[%c0_13, %c0_14] : memref<1x256xf32, #tpu.memory_space<vmem>>, vector<1x256xf32>
      %15 = vector.broadcast %14 : vector<1x256xf32> to vector<16x256xf32>
      %16 = arith.addf %13, %15 : vector<16x256xf32>
      %cst_15 = arith.constant dense<0.000000e+00> : vector<256xf32>
      %17 = vector.multi_reduction <add>, %16, %cst_15 [0] : vector<16x256xf32> to vector<256xf32>
      %18 = vector.shape_cast %17 : vector<256xf32> to vector<1x256xf32>
      %cst_16 = arith.constant 1.600000e+01 : f32
      %19 = vector.broadcast %cst_16 : f32 to vector<1x256xf32>
      %20 = arith.divf %18, %19 : vector<1x256xf32>
      %21 = vector.broadcast %20 : vector<1x256xf32> to vector<16x256xf32>
      %22 = arith.subf %16, %21 : vector<16x256xf32>
      %23 = arith.mulf %22, %22 : vector<16x256xf32>
      %cst_17 = arith.constant dense<0.000000e+00> : vector<256xf32>
      %24 = vector.multi_reduction <add>, %23, %cst_17 [0] : vector<16x256xf32> to vector<256xf32>
      %25 = vector.shape_cast %24 : vector<256xf32> to vector<1x256xf32>
      %cst_18 = arith.constant 1.600000e+01 : f32
      %26 = vector.broadcast %cst_18 : f32 to vector<1x256xf32>
      %27 = arith.divf %25, %26 : vector<1x256xf32>
      %28 = vector.broadcast %20 : vector<1x256xf32> to vector<16x256xf32>
      %29 = arith.subf %16, %28 : vector<16x256xf32>
      %cst_19 = arith.constant 9.99999974E-6 : f32
      %30 = vector.broadcast %cst_19 : f32 to vector<1x256xf32>
      %31 = arith.addf %27, %30 : vector<1x256xf32>
      %32 = math.rsqrt %31 : vector<1x256xf32>
      %33 = vector.broadcast %32 : vector<1x256xf32> to vector<16x256xf32>
      %34 = arith.mulf %29, %33 : vector<16x256xf32>
      %cst_20 = arith.constant 4.000000e-01 : f32
      %35 = vector.broadcast %cst_20 : f32 to vector<16x256xf32>
      %36 = arith.mulf %35, %34 : vector<16x256xf32>
      %37 = arith.negf %36 : vector<16x256xf32>
      %38 = math.exp %37 : vector<16x256xf32>
      %cst_21 = arith.constant 1.000000e+00 : f32
      %39 = vector.broadcast %cst_21 : f32 to vector<16x256xf32>
      %40 = arith.addf %39, %38 : vector<16x256xf32>
      %41 = arith.divf %39, %40 : vector<16x256xf32>
      %42 = arith.mulf %34, %41 : vector<16x256xf32>
      %43 = arith.truncf %42 : vector<16x256xf32> to vector<16x256xbf16>
      %c0_22 = arith.constant 0 : index
      %c0_23 = arith.constant 0 : index
      %c0_24 = arith.constant 0 : index
      %44 = vector.load %arg5[%c0_22, %c0_23, %c0_24] : memref<1x16x256xbf16, #tpu.memory_space<vmem>>, vector<1x16x256xbf16>
      %45 = vector.shape_cast %44 : vector<1x16x256xbf16> to vector<16x256xbf16>
      %46 = vector.shape_cast %43 : vector<16x256xbf16> to vector<1x16x256xbf16>
      tpu.vector_store %arg5[%c0_22, %c0_23, %c0_24], %46 {strides = array<i32>} : memref<1x16x256xbf16, #tpu.memory_space<vmem>>, vector<1x16x256xbf16>,
    } else {
    }
    return
  }
  func.func @transform_0(%arg0: i32, %arg1: i32) -> (i32, i32, i32) {
    %c0_i32 = arith.constant 0 : i32
    %c0_i32_0 = arith.constant 0 : i32
    return %arg0, %c0_i32, %arg1 : i32, i32, i32
  }
  func.func @transform_1(%arg0: i32, %arg1: i32) -> (i32, i32) {
    %c0_i32 = arith.constant 0 : i32
    %c0_i32_0 = arith.constant 0 : i32
    return %arg1, %c0_i32 : i32, i32
  }
  func.func @transform_2(%arg0: i32, %arg1: i32) -> (i32, i32) {
    %c0_i32 = arith.constant 0 : i32
    %c0_i32_0 = arith.constant 0 : i32
    %c0_i32_1 = arith.constant 0 : i32
    return %c0_i32, %c0_i32_0 : i32, i32
  }
  func.func @transform_3(%arg0: i32, %arg1: i32) -> (i32, i32, i32) {
    %c0_i32 = arith.constant 0 : i32
    %c0_i32_0 = arith.constant 0 : i32
    %c0_i32_1 = arith.constant 0 : i32
    return %arg0, %c0_i32, %c0_i32_0 : i32, i32, i32
  }
}

module attributes {stable_mosaic.version = 11 : i64} {
  func.func @_conv_norm_swish_kernel(%arg0: i32, %arg1: i32, %arg2: memref<1x4x2048xbf16, #tpu.memory_space<vmem>>, %arg3: memref<2048x512xbf16, #tpu.memory_space<vmem>>, %arg4: memref<1x512xf32, #tpu.memory_space<vmem>>, %arg5: memref<1x4x512xbf16, #tpu.memory_space<vmem>>, %arg6: memref<4x512xf32, #tpu.memory_space<vmem>>) attributes {dimension_semantics = [#tpu.dimension_semantics<parallel>, #tpu.dimension_semantics<arbitrary>], iteration_bounds = array<i64: 2, 2>, scalar_prefetch = 0 : i64, scratch_operands = 1 : i64, tpu.core_type = #tpu.core_type<tc>, window_params = [{transform_indices = @transform_0, window_bounds = array<i64: 1, 4, 2048>}, {transform_indices = @transform_1, window_bounds = array<i64: 2048, 512>}, {pipeline_mode = #tpu.pipeline_mode<synchronous>, transform_indices = @transform_2, window_bounds = array<i64: 1, 512>}, {transform_indices = @transform_3, window_bounds = array<i64: 1, 4, 512>}]} {
    %c0_i32 = arith.constant 0 : i32
    %0 = arith.cmpi eq, %arg1, %c0_i32 : i32
    %1 = arith.extui %0 : i1 to i32
    %c0_i32_0 = arith.constant 0 : i32
    %2 = arith.cmpi ne, %1, %c0_i32_0 : i32
    scf.if %2 {
      %cst_10 = arith.constant 0.000000e+00 : f32
      %13 = vector.broadcast %cst_10 : f32 to vector<4x512xf32>
      %c0_11 = arith.constant 0 : index
      %c0_12 = arith.constant 0 : index
      %14 = vector.load %arg6[%c0_11, %c0_12] : memref<4x512xf32, #tpu.memory_space<vmem>>, vector<4x512xf32>
      tpu.vector_store %arg6[%c0_11, %c0_12], %13 {strides = array<i32>} : memref<4x512xf32, #tpu.memory_space<vmem>>, vector<4x512xf32>,
    } else {
    }
    %c0 = arith.constant 0 : index
    %c0_1 = arith.constant 0 : index
    %3 = vector.load %arg6[%c0, %c0_1] : memref<4x512xf32, #tpu.memory_space<vmem>>, vector<4x512xf32>
    %c0_2 = arith.constant 0 : index
    %c0_3 = arith.constant 0 : index
    %c0_4 = arith.constant 0 : index
    %4 = vector.load %arg2[%c0_2, %c0_3, %c0_4] : memref<1x4x2048xbf16, #tpu.memory_space<vmem>>, vector<1x4x2048xbf16>
    %5 = vector.shape_cast %4 : vector<1x4x2048xbf16> to vector<4x2048xbf16>
    %c0_5 = arith.constant 0 : index
    %c0_6 = arith.constant 0 : index
    %6 = vector.load %arg3[%c0_5, %c0_6] : memref<2048x512xbf16, #tpu.memory_space<vmem>>, vector<2048x512xbf16>
    %cst = arith.constant dense<0.000000e+00> : vector<4x512xf32>
    %7 = tpu.matmul %5, %6, %cst {dimension_numbers = #tpu.dot_dimension_numbers<[1], [0], [0], [1], [0, 0, 1, 1], [], []>} : vector<4x2048xbf16>, vector<2048x512xbf16>, vector<4x512xf32> -> vector<4x512xf32>
    %8 = arith.addf %3, %7 : vector<4x512xf32>
    %c0_7 = arith.constant 0 : index
    %c0_8 = arith.constant 0 : index
    %9 = vector.load %arg6[%c0_7, %c0_8] : memref<4x512xf32, #tpu.memory_space<vmem>>, vector<4x512xf32>
    tpu.vector_store %arg6[%c0_7, %c0_8], %8 {strides = array<i32>} : memref<4x512xf32, #tpu.memory_space<vmem>>, vector<4x512xf32>,
    %c1_i32 = arith.constant 1 : i32
    %10 = arith.cmpi eq, %arg1, %c1_i32 : i32
    %11 = arith.extui %10 : i1 to i32
    %c0_i32_9 = arith.constant 0 : i32
    %12 = arith.cmpi ne, %11, %c0_i32_9 : i32
    scf.if %12 {
      %c0_10 = arith.constant 0 : index
      %c0_11 = arith.constant 0 : index
      %13 = vector.load %arg6[%c0_10, %c0_11] : memref<4x512xf32, #tpu.memory_space<vmem>>, vector<4x512xf32>
      %c0_12 = arith.constant 0 : index
      %c0_13 = arith.constant 0 : index
      %14 = vector.load %arg4[%c0_12, %c0_13] : memref<1x512xf32, #tpu.memory_space<vmem>>, vector<1x512xf32>
      %15 = vector.broadcast %14 : vector<1x512xf32> to vector<4x512xf32>
      %16 = arith.addf %13, %15 : vector<4x512xf32>
      %cst_14 = arith.constant dense<0.000000e+00> : vector<512xf32>
      %17 = vector.multi_reduction <add>, %16, %cst_14 [0] : vector<4x512xf32> to vector<512xf32>
      %18 = vector.shape_cast %17 : vector<512xf32> to vector<1x512xf32>
      %cst_15 = arith.constant 4.000000e+00 : f32
      %19 = vector.broadcast %cst_15 : f32 to vector<1x512xf32>
      %20 = arith.divf %18, %19 : vector<1x512xf32>
      %21 = vector.broadcast %20 : vector<1x512xf32> to vector<4x512xf32>
      %22 = arith.subf %16, %21 : vector<4x512xf32>
      %23 = arith.mulf %22, %22 : vector<4x512xf32>
      %cst_16 = arith.constant dense<0.000000e+00> : vector<512xf32>
      %24 = vector.multi_reduction <add>, %23, %cst_16 [0] : vector<4x512xf32> to vector<512xf32>
      %25 = vector.shape_cast %24 : vector<512xf32> to vector<1x512xf32>
      %cst_17 = arith.constant 4.000000e+00 : f32
      %26 = vector.broadcast %cst_17 : f32 to vector<1x512xf32>
      %27 = arith.divf %25, %26 : vector<1x512xf32>
      %28 = vector.broadcast %20 : vector<1x512xf32> to vector<4x512xf32>
      %29 = arith.subf %16, %28 : vector<4x512xf32>
      %cst_18 = arith.constant 9.99999974E-6 : f32
      %30 = vector.broadcast %cst_18 : f32 to vector<1x512xf32>
      %31 = arith.addf %27, %30 : vector<1x512xf32>
      %32 = math.rsqrt %31 : vector<1x512xf32>
      %33 = vector.broadcast %32 : vector<1x512xf32> to vector<4x512xf32>
      %34 = arith.mulf %29, %33 : vector<4x512xf32>
      %cst_19 = arith.constant 4.000000e-01 : f32
      %35 = vector.broadcast %cst_19 : f32 to vector<4x512xf32>
      %36 = arith.mulf %35, %34 : vector<4x512xf32>
      %37 = arith.negf %36 : vector<4x512xf32>
      %38 = math.exp %37 : vector<4x512xf32>
      %cst_20 = arith.constant 1.000000e+00 : f32
      %39 = vector.broadcast %cst_20 : f32 to vector<4x512xf32>
      %40 = arith.addf %39, %38 : vector<4x512xf32>
      %41 = arith.divf %39, %40 : vector<4x512xf32>
      %42 = arith.mulf %34, %41 : vector<4x512xf32>
      %43 = arith.truncf %42 : vector<4x512xf32> to vector<4x512xbf16>
      %c0_21 = arith.constant 0 : index
      %c0_22 = arith.constant 0 : index
      %c0_23 = arith.constant 0 : index
      %44 = vector.load %arg5[%c0_21, %c0_22, %c0_23] : memref<1x4x512xbf16, #tpu.memory_space<vmem>>, vector<1x4x512xbf16>
      %45 = vector.shape_cast %44 : vector<1x4x512xbf16> to vector<4x512xbf16>
      %46 = vector.shape_cast %43 : vector<4x512xbf16> to vector<1x4x512xbf16>
      tpu.vector_store %arg5[%c0_21, %c0_22, %c0_23], %46 {strides = array<i32>} : memref<1x4x512xbf16, #tpu.memory_space<vmem>>, vector<1x4x512xbf16>,
    } else {
    }
    return
  }
  func.func @transform_0(%arg0: i32, %arg1: i32) -> (i32, i32, i32) {
    %c0_i32 = arith.constant 0 : i32
    %c0_i32_0 = arith.constant 0 : i32
    return %arg0, %c0_i32, %arg1 : i32, i32, i32
  }
  func.func @transform_1(%arg0: i32, %arg1: i32) -> (i32, i32) {
    %c0_i32 = arith.constant 0 : i32
    %c0_i32_0 = arith.constant 0 : i32
    return %arg1, %c0_i32 : i32, i32
  }
  func.func @transform_2(%arg0: i32, %arg1: i32) -> (i32, i32) {
    %c0_i32 = arith.constant 0 : i32
    %c0_i32_0 = arith.constant 0 : i32
    %c0_i32_1 = arith.constant 0 : i32
    return %c0_i32, %c0_i32_0 : i32, i32
  }
  func.func @transform_3(%arg0: i32, %arg1: i32) -> (i32, i32, i32) {
    %c0_i32 = arith.constant 0 : i32
    %c0_i32_0 = arith.constant 0 : i32
    %c0_i32_1 = arith.constant 0 : i32
    return %arg0, %c0_i32, %c0_i32_0 : i32, i32, i32
  }
}

module attributes {stable_mosaic.version = 11 : i64} {
  func.func @_matmul_bias_act_kernel(%arg0: i32, %arg1: i32, %arg2: memref<16x2048xbf16, #tpu.memory_space<vmem>>, %arg3: memref<2048x128xbf16, #tpu.memory_space<vmem>>, %arg4: memref<1x128xf32, #tpu.memory_space<vmem>>, %arg5: memref<16x128xf32, #tpu.memory_space<vmem>>, %arg6: memref<16x128xf32, #tpu.memory_space<vmem>>) attributes {dimension_semantics = [#tpu.dimension_semantics<parallel>, #tpu.dimension_semantics<arbitrary>], iteration_bounds = array<i64: 1, 4>, scalar_prefetch = 0 : i64, scratch_operands = 1 : i64, tpu.core_type = #tpu.core_type<tc>, window_params = [{transform_indices = @transform_0, window_bounds = array<i64: 16, 2048>}, {transform_indices = @transform_1, window_bounds = array<i64: 2048, 128>}, {pipeline_mode = #tpu.pipeline_mode<synchronous>, transform_indices = @transform_2, window_bounds = array<i64: 1, 128>}, {transform_indices = @transform_3, window_bounds = array<i64: 16, 128>}]} {
    %c0_i32 = arith.constant 0 : i32
    %0 = arith.cmpi eq, %arg1, %c0_i32 : i32
    %1 = arith.extui %0 : i1 to i32
    %c0_i32_0 = arith.constant 0 : i32
    %2 = arith.cmpi ne, %1, %c0_i32_0 : i32
    scf.if %2 {
      %cst_9 = arith.constant 0.000000e+00 : f32
      %12 = vector.broadcast %cst_9 : f32 to vector<16x128xf32>
      %c0_10 = arith.constant 0 : index
      %c0_11 = arith.constant 0 : index
      %13 = vector.load %arg6[%c0_10, %c0_11] : memref<16x128xf32, #tpu.memory_space<vmem>>, vector<16x128xf32>
      tpu.vector_store %arg6[%c0_10, %c0_11], %12 {strides = array<i32>} : memref<16x128xf32, #tpu.memory_space<vmem>>, vector<16x128xf32>,
    } else {
    }
    %c0 = arith.constant 0 : index
    %c0_1 = arith.constant 0 : index
    %3 = vector.load %arg6[%c0, %c0_1] : memref<16x128xf32, #tpu.memory_space<vmem>>, vector<16x128xf32>
    %c0_2 = arith.constant 0 : index
    %c0_3 = arith.constant 0 : index
    %4 = vector.load %arg2[%c0_2, %c0_3] : memref<16x2048xbf16, #tpu.memory_space<vmem>>, vector<16x2048xbf16>
    %c0_4 = arith.constant 0 : index
    %c0_5 = arith.constant 0 : index
    %5 = vector.load %arg3[%c0_4, %c0_5] : memref<2048x128xbf16, #tpu.memory_space<vmem>>, vector<2048x128xbf16>
    %cst = arith.constant dense<0.000000e+00> : vector<16x128xf32>
    %6 = tpu.matmul %4, %5, %cst {dimension_numbers = #tpu.dot_dimension_numbers<[1], [0], [0], [1], [0, 0, 1, 1], [], []>} : vector<16x2048xbf16>, vector<2048x128xbf16>, vector<16x128xf32> -> vector<16x128xf32>
    %7 = arith.addf %3, %6 : vector<16x128xf32>
    %c0_6 = arith.constant 0 : index
    %c0_7 = arith.constant 0 : index
    %8 = vector.load %arg6[%c0_6, %c0_7] : memref<16x128xf32, #tpu.memory_space<vmem>>, vector<16x128xf32>
    tpu.vector_store %arg6[%c0_6, %c0_7], %7 {strides = array<i32>} : memref<16x128xf32, #tpu.memory_space<vmem>>, vector<16x128xf32>,
    %c3_i32 = arith.constant 3 : i32
    %9 = arith.cmpi eq, %arg1, %c3_i32 : i32
    %10 = arith.extui %9 : i1 to i32
    %c0_i32_8 = arith.constant 0 : i32
    %11 = arith.cmpi ne, %10, %c0_i32_8 : i32
    scf.if %11 {
      %c0_9 = arith.constant 0 : index
      %c0_10 = arith.constant 0 : index
      %12 = vector.load %arg6[%c0_9, %c0_10] : memref<16x128xf32, #tpu.memory_space<vmem>>, vector<16x128xf32>
      %c0_11 = arith.constant 0 : index
      %c0_12 = arith.constant 0 : index
      %13 = vector.load %arg4[%c0_11, %c0_12] : memref<1x128xf32, #tpu.memory_space<vmem>>, vector<1x128xf32>
      %14 = vector.broadcast %13 : vector<1x128xf32> to vector<16x128xf32>
      %15 = arith.addf %12, %14 : vector<16x128xf32>
      %16 = arith.negf %15 : vector<16x128xf32>
      %17 = math.exp %16 : vector<16x128xf32>
      %cst_13 = arith.constant 1.000000e+00 : f32
      %18 = vector.broadcast %cst_13 : f32 to vector<16x128xf32>
      %19 = arith.addf %18, %17 : vector<16x128xf32>
      %20 = arith.divf %18, %19 : vector<16x128xf32>
      %c0_14 = arith.constant 0 : index
      %c0_15 = arith.constant 0 : index
      %21 = vector.load %arg5[%c0_14, %c0_15] : memref<16x128xf32, #tpu.memory_space<vmem>>, vector<16x128xf32>
      tpu.vector_store %arg5[%c0_14, %c0_15], %20 {strides = array<i32>} : memref<16x128xf32, #tpu.memory_space<vmem>>, vector<16x128xf32>,
    } else {
    }
    return
  }
  func.func @transform_0(%arg0: i32, %arg1: i32) -> (i32, i32) {
    %c0_i32 = arith.constant 0 : i32
    return %arg0, %arg1 : i32, i32
  }
  func.func @transform_1(%arg0: i32, %arg1: i32) -> (i32, i32) {
    %c0_i32 = arith.constant 0 : i32
    %c0_i32_0 = arith.constant 0 : i32
    return %arg1, %c0_i32 : i32, i32
  }
  func.func @transform_2(%arg0: i32, %arg1: i32) -> (i32, i32) {
    %c0_i32 = arith.constant 0 : i32
    %c0_i32_0 = arith.constant 0 : i32
    %c0_i32_1 = arith.constant 0 : i32
    return %c0_i32, %c0_i32_0 : i32, i32
  }
  func.func @transform_3(%arg0: i32, %arg1: i32) -> (i32, i32) {
    %c0_i32 = arith.constant 0 : i32
    %c0_i32_0 = arith.constant 0 : i32
    return %arg0, %c0_i32 : i32, i32
  }
}

</mosaic_0001>

<bundles_post_ra>
// kernel: discriminator_forward.5
= control target key start
LH: loop header
LB: loop body
LE: loop exit
PB: predicated region body
PF: predicated region fallthrough
CT: control target
= control target key end

     0   :  { %s1883_s12 = smov 0   ;;  %s1885_s13 = smov 0   ;;  %s2704_s0 = inlined_call_operand.vmem [shape: bf16[512,48], index: 0, kind: input, shape index: {}]   ;;  %s2705_s1 = inlined_call_operand.vmem [shape: bf16[48,64], index: 1, kind: input, shape index: {}]   ;;  %s2706_s2 = inlined_call_operand.vmem [shape: f32[1,64], index: 2, kind: input, shape index: {}]   ;;  %s2707_s3 = inlined_call_operand.vmem [shape: bf16[512,64], index: 3, kind: output, shape index: {}]  }
   0x1   :  { %s1887_s14 = smov 0  }
   0x2 LB: > { %s25_s15 = sadd.s32 1, %s1856_s13  ;;  %p1524_p0 = scmp.ge.s32.totalorder %s1860_s14, 1  ;;  %s1860_s14 = sphi %s1887_s14, %s13_s14   ;;  %s1856_s13 = sphi %s1885_s13, %s2757_s13   ;;  %s1852_s12 = sphi %s1883_s12, %s2756_s12  }
   0x3   : > { %p27_p1 = scmp.ge.s32.totalorder %s25_s15, 2  ;;  %p166_p2 = scmp.lt.s32.totalorder %s1860_s14, 3 }
   0x5   : > { %s2759_s15 = smov (%p27_p1, %s25_s15), 0  ;;  %p167_p3 = pnand %p1524_p0, %p166_p2 }
   0x6   : > { %s1525_s18 = sshll.u32 (!%p167_p3), %s1852_s12, 5 }
   0x7   : > { %170 = sbr.rel (%p167_p3) target bundleno = 354 (0x162), region = 32  ;;  %p199_p4 = scmp.lt.s32.totalorder (!%p167_p3), %s1525_s18, 63 }
   0xc   : > { %v1673_v0 = vld [vmem:[%s2705_s1 + $0x10] sm:$0xff]  ;;  %v1672_v1 = vld [vmem:[%s2705_s1 + $0x8] sm:$0xff]  ;;  %s2761_s18 = smov (!%p199_p4, %s1525_s18), 63  ;;  %v1671_v2 = vld [vmem:[%s2705_s1] sm:$0xff]  ;;  %vm425_vm0 = vcmask 392192   ;;  %vm224_vm1 = vcmask 523264  }
   0xd   : > { %479 = vmatpush.bf16.msra.mxu0 %v1673_v0  ;;  %1674 = vmatpush.bf16.msra.mxu1 %v1673_v0  ;;  %s1526_s21 = sshll.u32 %s2761_s18, 2  ;;  %v1862_v11 = vmov 0.0   ;;  %v1989_v30 = vld [vmem:[%s2706_s2] ss:$0 sm:$0xff]  ;;  %vm1403_vm7 = vcmask 519168  }
   0xe   : > { %1675 = vmatpush.bf16.msra.mxu2 %v1673_v0  ;;  %1676 = vmatpush.bf16.msra.mxu3 %v1673_v0  ;;  %s1918_s26 = scalar_lea.vmem %s2704_s0, %s1526_s21  ;;  %225 = vst.msk [vmem:[#allocation2] sm:$0xff] %vm224_vm1, %v1862_v11  ;;  %s2109_s4 = scalar_lea.vmem %s2707_s3, %s1526_s21 }
   0xf   : > { %v1655_v3 = vld [vmem:[%s1918_s26] sm:$0xff]  ;;  %v1656_v7 = vld [vmem:[%s1918_s26 + $0x8] sm:$0xff]  ;;  %226 = vst.msk [vmem:[#allocation2 + $0x8] sm:$0xff] %vm224_vm1, %v1862_v11  ;;  %v1657_v12 = vld [vmem:[%s1918_s26 + $0x10] sm:$0xff] }
  0x10   : > { %v1659_v4 = vld [vmem:[%s1918_s26 + $0x20] sm:$0xff]  ;;  %v1660_v8 = vld [vmem:[%s1918_s26 + $0x28] sm:$0xff]  ;;  %227 = vst.msk [vmem:[#allocation2 + $0x10] sm:$0xff] %vm224_vm1, %v1862_v11  ;;  %v1661_v13 = vld [vmem:[%s1918_s26 + $0x30] sm:$0xff] }
  0x11   : > { %480 = vmatpush.bf16.msra.mxu0 %v1672_v1  ;;  %1677 = vmatpush.bf16.msra.mxu1 %v1672_v1  ;;  %v1663_v5 = vld [vmem:[%s1918_s26 + $0x40] sm:$0xff]  ;;  %v1664_v9 = vld [vmem:[%s1918_s26 + $0x48] sm:$0xff]  ;;  %228 = vst.msk [vmem:[#allocation2 + $0x18] sm:$0xff] %vm224_vm1, %v1862_v11  ;;  %v1665_v14 = vld [vmem:[%s1918_s26 + $0x50] sm:$0xff] }
  0x12   : > { %1678 = vmatpush.bf16.msra.mxu2 %v1672_v1  ;;  %1679 = vmatpush.bf16.msra.mxu3 %v1672_v1  ;;  %v1667_v6 = vld [vmem:[%s1918_s26 + $0x60] sm:$0xff]  ;;  %v1668_v10 = vld [vmem:[%s1918_s26 + $0x68] sm:$0xff]  ;;  %229 = vst.msk [vmem:[#allocation2 + $0x20] sm:$0xff] %vm224_vm1, %v1862_v11  ;;  %v1669_v15 = vld [vmem:[%s1918_s26 + $0x70] sm:$0xff] }
  0x13   : > { %230 = vst.msk [vmem:[#allocation2 + $0x28] sm:$0xff] %vm224_vm1, %v1862_v11  ;;  %v1658_v16 = vld [vmem:[%s1918_s26 + $0x18] sm:$0xff] }
  0x14   : > { %231 = vst.msk [vmem:[#allocation2 + $0x30] sm:$0xff] %vm224_vm1, %v1862_v11  ;;  %v1662_v17 = vld [vmem:[%s1918_s26 + $0x38] sm:$0xff] }
  0x15   : > { %481 = vmatpush.bf16.msra.mxu0 %v1671_v2  ;;  %1680 = vmatpush.bf16.msra.mxu1 %v1671_v2  ;;  %232 = vst.msk [vmem:[#allocation2 + $0x38] sm:$0xff] %vm224_vm1, %v1862_v11  ;;  %v1666_v18 = vld [vmem:[%s1918_s26 + $0x58] sm:$0xff]  ;;  %v257_v20 = vld [vmem:[#allocation2] sm:$0xff] }
  0x16   : > { %1681 = vmatpush.bf16.msra.mxu2 %v1671_v2  ;;  %1682 = vmatpush.bf16.msra.mxu3 %v1671_v2  ;;  %233 = vst.msk [vmem:[#allocation2 + $0x40] sm:$0xff] %vm224_vm1, %v1862_v11  ;;  %v1670_v19 = vld [vmem:[%s1918_s26 + $0x78] sm:$0xff]  ;;  %v258_v28 = vld [vmem:[#allocation2 + $0x8] sm:$0xff] }
  0x17   : > { %234 = vst.msk [vmem:[#allocation2 + $0x48] sm:$0xff] %vm224_vm1, %v1862_v11  ;;  %v259_v47 = vld [vmem:[#allocation2 + $0x10] sm:$0xff] }
  0x18   : > { %1605 = vmatmul.msk.bf16.vlgmr.msra.gmra.mxu0 %vm425_vm0, %v1655_v3  ;;  %1609 = vmatmul.msk.bf16.vlgmr.msra.gmra.mxu1 %vm425_vm0, %v1659_v4  ;;  %235 = vst.msk [vmem:[#allocation2 + $0x50] sm:$0xff] %vm224_vm1, %v1862_v11 }
  0x19   : > { %1613 = vmatmul.msk.bf16.vlgmr.msra.gmra.mxu2 %vm425_vm0, %v1663_v5  ;;  %1617 = vmatmul.msk.bf16.vlgmr.msra.gmra.mxu3 %vm425_vm0, %v1667_v6  ;;  %236 = vst.msk [vmem:[#allocation2 + $0x58] sm:$0xff] %vm224_vm1, %v1862_v11 }
  0x1a   : > { %237 = vst.msk [vmem:[#allocation2 + $0x60] sm:$0xff] %vm224_vm1, %v1862_v11 }
  0x1b   : > { %238 = vst.msk [vmem:[#allocation2 + $0x68] sm:$0xff] %vm224_vm1, %v1862_v11 }
  0x1c   : > { %239 = vst.msk [vmem:[#allocation2 + $0x70] sm:$0xff] %vm224_vm1, %v1862_v11 }
  0x1d   : > { %240 = vst.msk [vmem:[#allocation2 + $0x78] sm:$0xff] %vm224_vm1, %v1862_v11  ;;  %v265_v21 = vld [vmem:[#allocation2 + $0x40] sm:$0xff] }
  0x1e   : > { %241 = vst.msk [vmem:[#allocation2 + $0x80] sm:$0xff] %vm224_vm1, %v1862_v11  ;;  %v266_v29 = vld [vmem:[#allocation2 + $0x48] sm:$0xff] }
  0x1f   : > { %242 = vst.msk [vmem:[#allocation2 + $0x88] sm:$0xff] %vm224_vm1, %v1862_v11  ;;  %v267_v48 = vld [vmem:[#allocation2 + $0x50] sm:$0xff] }
  0x20   : > { %243 = vst.msk [vmem:[#allocation2 + $0x90] sm:$0xff] %vm224_vm1, %v1862_v11 }
  0x21   : > { %244 = vst.msk [vmem:[#allocation2 + $0x98] sm:$0xff] %vm224_vm1, %v1862_v11 }
  0x22   : > { %245 = vst.msk [vmem:[#allocation2 + $0xa0] sm:$0xff] %vm224_vm1, %v1862_v11 }
  0x23   : > { %246 = vst.msk [vmem:[#allocation2 + $0xa8] sm:$0xff] %vm224_vm1, %v1862_v11 }
  0x24   : > { %247 = vst.msk [vmem:[#allocation2 + $0xb0] sm:$0xff] %vm224_vm1, %v1862_v11 }
  0x25   : > { %248 = vst.msk [vmem:[#allocation2 + $0xb8] sm:$0xff] %vm224_vm1, %v1862_v11  ;;  %v273_v26 = vld [vmem:[#allocation2 + $0x80] sm:$0xff] }
  0x26   : > { %249 = vst.msk [vmem:[#allocation2 + $0xc0] sm:$0xff] %vm224_vm1, %v1862_v11  ;;  %v274_v44 = vld [vmem:[#allocation2 + $0x88] sm:$0xff] }
  0x27   : > { %250 = vst.msk [vmem:[#allocation2 + $0xc8] sm:$0xff] %vm224_vm1, %v1862_v11  ;;  %v275_v5 = vld [vmem:[#allocation2 + $0x90] sm:$0xff] }
  0x28   : > { %1606 = vmatmul.msk.bf16.gmra.mxu0 %vm425_vm0, %v1656_v7  ;;  %1610 = vmatmul.msk.bf16.gmra.mxu1 %vm425_vm0, %v1660_v8  ;;  %251 = vst.msk [vmem:[#allocation2 + $0xd0] sm:$0xff] %vm224_vm1, %v1862_v11 }
  0x29   : > { %1614 = vmatmul.msk.bf16.gmra.mxu2 %vm425_vm0, %v1664_v9  ;;  %1618 = vmatmul.msk.bf16.gmra.mxu3 %vm425_vm0, %v1668_v10  ;;  %252 = vst.msk [vmem:[#allocation2 + $0xd8] sm:$0xff] %vm224_vm1, %v1862_v11 }
  0x2a   : > { %253 = vst.msk [vmem:[#allocation2 + $0xe0] sm:$0xff] %vm224_vm1, %v1862_v11 }
  0x2b   : > { %254 = vst.msk [vmem:[#allocation2 + $0xe8] sm:$0xff] %vm224_vm1, %v1862_v11 }
  0x2c   : > { %255 = vst.msk [vmem:[#allocation2 + $0xf0] sm:$0xff] %vm224_vm1, %v1862_v11 }
  0x2d   : > { %256 = vst.msk [vmem:[#allocation2 + $0xf8] sm:$0xff] %vm224_vm1, %v1862_v11  ;;  %v281_v27 = vld [vmem:[#allocation2 + $0xc0] sm:$0xff] }
  0x2e   : > { %v282_v45 = vld [vmem:[#allocation2 + $0xc8] sm:$0xff] }
  0x2f   : > { %v283_v8 = vld [vmem:[#allocation2 + $0xd0] sm:$0xff] }
  0x38   : > { %1607 = vmatmul.msk.bf16.gmra.mxu0 %vm425_vm0, %v1657_v12  ;;  %1611 = vmatmul.msk.bf16.gmra.mxu1 %vm425_vm0, %v1661_v13 }
  0x39   : > { %1615 = vmatmul.msk.bf16.gmra.mxu2 %vm425_vm0, %v1665_v14  ;;  %1619 = vmatmul.msk.bf16.gmra.mxu3 %vm425_vm0, %v1669_v15 }
  0x48   : > { %1608 = vmatmul.msk.bf16.gmra.mxu0 %vm425_vm0, %v1658_v16  ;;  %1612 = vmatmul.msk.bf16.gmra.mxu1 %vm425_vm0, %v1662_v17 }
  0x49   : > { %1616 = vmatmul.msk.bf16.gmra.mxu2 %vm425_vm0, %v1666_v18  ;;  %1620 = vmatmul.msk.bf16.gmra.mxu3 %vm425_vm0, %v1670_v19 }
  0x95   : > { %v483_v22 = vpop.f32.mrf.mxu0  ;;  %v503_v23 = vpop.f32.mrf.mxu1 }
  0x96   : > { %v563_v24 = vadd.f32 %v483_v22, %v257_v20  ;;  %v571_v25 = vadd.f32 %v503_v23, %v265_v21  ;;  %v260_v22 = vld [vmem:[#allocation2 + $0x18] sm:$0xff] }
  0x98   : > { %596 = vst.msk [vmem:[#allocation2] sm:$0xff] %vm224_vm1, %v563_v24 }
  0x99   : > { %604 = vst.msk [vmem:[#allocation2 + $0x40] sm:$0xff] %vm224_vm1, %v571_v25 }
  0x9c   : > { %v523_v31 = vpop.f32.mrf.mxu2  ;;  %v543_v32 = vpop.f32.mrf.mxu3 }
  0x9d   : > { %v579_v33 = vadd.f32 %v523_v31, %v273_v26  ;;  %v587_v34 = vadd.f32 %v543_v32, %v281_v27  ;;  %v485_v35 = vpop.f32.mrf.mxu0  ;;  %v505_v36 = vpop.f32.mrf.mxu1  ;;  %v268_v26 = vld [vmem:[#allocation2 + $0x58] sm:$0xff] }
  0x9e   : > { %v564_v37 = vadd.f32 %v485_v35, %v258_v28  ;;  %v572_v38 = vadd.f32 %v505_v36, %v266_v29 }
  0x9f   : > { %v631_v39 = vld [vmem:[#allocation2] sm:$0xff]  ;;  %612 = vst.msk [vmem:[#allocation2 + $0x80] sm:$0xff] %vm224_vm1, %v579_v33 }
  0xa0   : > { %v1993_v40 = vadd.f32 %v1989_v30, %v631_v39  ;;  %v639_v41 = vld [vmem:[#allocation2 + $0x40] sm:$0xff]  ;;  %620 = vst.msk [vmem:[#allocation2 + $0xc0] sm:$0xff] %vm224_vm1, %v587_v34 }
  0xa1   : > { %v1997_v42 = vadd.f32 %v1989_v30, %v639_v41  ;;  %597 = vst.msk [vmem:[#allocation2 + $0x8] sm:$0xff] %vm224_vm1, %v564_v37 }
  0xa2   : > { %v1621_v43 = vmul.f32 -0.4, %v1993_v40  ;;  %605 = vst.msk [vmem:[#allocation2 + $0x48] sm:$0xff] %vm224_vm1, %v572_v38 }
  0xa3   : > { %v1629_v46 = vmul.f32 -0.4, %v1997_v42 }
  0xa4   : > { %v763_v49 = vmul.f32 1.442695, %v1621_v43  ;;  %v525_v50 = vpop.f32.mrf.mxu2  ;;  %v545_v51 = vpop.f32.mrf.mxu3 }
  0xa5   : > { %v779_v52 = vmul.f32 1.442695, %v1629_v46  ;;  %v580_v53 = vadd.f32 %v525_v50, %v274_v44  ;;  %v588_v54 = vadd.f32 %v545_v51, %v282_v45  ;;  %v488_v55 = vpop.f32.mrf.mxu0  ;;  %v508_v56 = vpop.f32.mrf.mxu1 }
  0xa6   : > { %1709 = vpow2.f32 %v763_v49  ;;  %v647_v57 = vld [vmem:[#allocation2 + $0x80] sm:$0xff]  ;;  %v565_v58 = vadd.f32 %v488_v55, %v259_v47  ;;  %v573_v59 = vadd.f32 %v508_v56, %v267_v48 }
  0xa7   : > { %1711 = vpow2.f32 %v779_v52  ;;  %v2004_v60 = vadd.f32 %v1989_v30, %v647_v57  ;;  %v655_v61 = vld [vmem:[#allocation2 + $0xc0] sm:$0xff]  ;;  %613 = vst.msk [vmem:[#allocation2 + $0x88] sm:$0xff] %vm224_vm1, %v580_v53 }
  0xa8   : > { %v2008_v62 = vadd.f32 %v1989_v30, %v655_v61  ;;  %v632_v63 = vld [vmem:[#allocation2 + $0x8] sm:$0xff]  ;;  %621 = vst.msk [vmem:[#allocation2 + $0xc8] sm:$0xff] %vm224_vm1, %v588_v54 }
  0xa9   : > { %v1637_v0 = vmul.f32 -0.4, %v2004_v60  ;;  %v2013_v1 = vadd.f32 %v1989_v30, %v632_v63  ;;  %v640_v2 = vld [vmem:[#allocation2 + $0x48] sm:$0xff]  ;;  %598 = vst.msk [vmem:[#allocation2 + $0x10] sm:$0xff] %vm224_vm1, %v565_v58 }
  0xaa   : > { %v1645_v3 = vmul.f32 -0.4, %v2008_v62  ;;  %v2018_v4 = vadd.f32 %v1989_v30, %v640_v2  ;;  %606 = vst.msk [vmem:[#allocation2 + $0x50] sm:$0xff] %vm224_vm1, %v573_v59 }
  0xab   : > { %v795_v6 = vmul.f32 1.442695, %v1637_v0  ;;  %v1622_v7 = vmul.f32 -0.4, %v2013_v1 }
  0xac   : > { %v1710_v9 = vpop.eup %1709  ;;  %v811_v10 = vmul.f32 1.442695, %v1645_v3  ;;  %v1630_v11 = vmul.f32 -0.4, %v2018_v4  ;;  %v528_v12 = vpop.f32.mrf.mxu2 }
  0xad   : > { %v548_v13 = vpop.f32.mrf.mxu3  ;;  %v1712_v14 = vpop.eup %1711  ;;  %v2023_v15 = vadd.f32 1.0, %v1710_v9  ;;  %1713 = vpow2.f32 %v795_v6  ;;  %v765_v16 = vmul.f32 1.442695, %v1622_v7  ;;  %v581_v17 = vadd.f32 %v528_v12, %v275_v5 }
  0xae   : > { %v2025_v18 = vadd.f32 1.0, %v1712_v14  ;;  %1715 = vpow2.f32 %v811_v10  ;;  %v781_v19 = vmul.f32 1.442695, %v1630_v11  ;;  %v648_v20 = vld [vmem:[#allocation2 + $0x88] sm:$0xff]  ;;  %v589_v21 = vadd.f32 %v548_v13, %v283_v8  ;;  %v490_v23 = vpop.f32.mrf.mxu0  ;;  %v510_v27 = vpop.f32.mrf.mxu1 }
  0xaf   : > { %1717 = vrcp.f32 %v2023_v15  ;;  %614 = vst.msk [vmem:[#allocation2 + $0x90] sm:$0xff] %vm224_vm1, %v581_v17  ;;  %v2032_v24 = vadd.f32 %v1989_v30, %v648_v20  ;;  %v656_v25 = vld [vmem:[#allocation2 + $0xc8] sm:$0xff]  ;;  %v868_v28 = vand.u32 2147483647, %v2023_v15  ;;  %v870_v29 = vand.u32 2147483648, %v2023_v15 }
  0xb0   : > { %1719 = vrcp.f32 %v2025_v18  ;;  %622 = vst.msk [vmem:[#allocation2 + $0xd0] sm:$0xff] %vm224_vm1, %v589_v21  ;;  %v988_v32 = vand.u32 2147483647, %v2025_v18  ;;  %v990_v33 = vand.u32 2147483648, %v2025_v18  ;;  %v566_v35 = vadd.f32 %v490_v23, %v260_v22  ;;  %v633_v39 = vld [vmem:[#allocation2 + $0x10] sm:$0xff] }
  0xb1   : > { %1721 = vpow2.f32 %v765_v16  ;;  %v1638_v34 = vmul.f32 -0.4, %v2032_v24  ;;  %v2042_v38 = vadd.f32 %v1989_v30, %v656_v25  ;;  %v574_v41 = vadd.f32 %v510_v27, %v268_v26  ;;  %v641_v45 = vld [vmem:[#allocation2 + $0x50] sm:$0xff] }
  0xb2   : > { %1723 = vpow2.f32 %v781_v19  ;;  %vm864_vm2 = vweird.f32 %v2023_v15  ;;  %vm984_vm3 = vweird.f32 %v2025_v18  ;;  %599 = vst.msk [vmem:[#allocation2 + $0x18] sm:$0xff] %vm224_vm1, %v566_v35  ;;  %vm2050_vm4 = vcmp.eq.f32.partialorder %v868_v28, 8.507059e+37 }
  0xb3   : > { %v1714_v31 = vpop.eup %1713  ;;  %v871_v49 = vor.u32 1.1754944e-38, %v870_v29  ;;  %607 = vst.msk [vmem:[#allocation2 + $0x58] sm:$0xff] %vm224_vm1, %v574_v41  ;;  %vm2057_vm5 = vcmp.eq.f32.partialorder %v988_v32, 8.507059e+37  ;;  %v991_v53 = vor.u32 1.1754944e-38, %v990_v33  ;;  %v797_v54 = vmul.f32 1.442695, %v1638_v34 }
  0xb4   : > { %v1716_v36 = vpop.eup %1715  ;;  %v2039_v37 = vadd.f32 1.0, %v1714_v31  ;;  %v2062_v55 = vadd.f32 %v1989_v30, %v633_v39  ;;  %v1646_v58 = vmul.f32 -0.4, %v2042_v38  ;;  %v2067_v59 = vadd.f32 %v1989_v30, %v641_v45 }
  0xb5   : > { %v1718_v43 = vpop.eup %1717  ;;  %v2046_v44 = vadd.f32 1.0, %v1716_v36 }
  0xb6   : > { %v1720_v46 = vpop.eup %1719  ;;  %v860_v47 = vmul.f32 %v1718_v43, %v2023_v15  ;;  %1725 = vrcp.f32 %v2039_v37  ;;  %vm865_vm6 = vweird.f32 %v1718_v43  ;;  %v1108_v63 = vand.u32 2147483647, %v2039_v37  ;;  %v649_v14 = vld [vmem:[#allocation2 + $0x90] sm:$0xff] }
  0xb7   : > { %v1722_v50 = vpop.eup %1721  ;;  %v980_v51 = vmul.f32 %v1720_v46, %v2025_v18  ;;  %1727 = vrcp.f32 %v2046_v44  ;;  %v1110_v0 = vand.u32 2147483648, %v2039_v37  ;;  %v1230_v3 = vand.u32 2147483648, %v2046_v44  ;;  %vm866_vm10 = vmor %vm864_vm2, %vm865_vm6 }
  0xb8   : > { %v1724_v56 = vpop.eup %1723  ;;  %v861_v57 = vsub.f32 1.0, %v860_v47  ;;  %v2072_v5 = vadd.f32 1.0, %v1722_v50  ;;  %vm985_vm8 = vweird.f32 %v1720_v46  ;;  %v1228_v8 = vand.u32 2147483647, %v2046_v44 }
  0xb9   : > { %v981_v61 = vsub.f32 1.0, %v980_v51  ;;  %v2074_v6 = vadd.f32 1.0, %v1724_v56  ;;  %1729 = vpow2.f32 %v797_v54  ;;  %vm1104_vm9 = vweird.f32 %v2039_v37  ;;  %vm986_vm13 = vmor %vm984_vm3, %vm985_vm8  ;;  %v634_v26 = vld [vmem:[#allocation2 + $0x18] sm:$0xff] }
  0xba   : > { %v862_v2 = vmul.f32 %v1718_v43, %v861_v57  ;;  %1731 = vrcp.f32 %v2072_v5  ;;  %v1623_v11 = vmul.f32 -0.4, %v2062_v55  ;;  %vm2084_vm11 = vcmp.eq.f32.partialorder %v1108_v63, 8.507059e+37 }
  0xbb   : > { %v982_v7 = vmul.f32 %v1720_v46, %v981_v61  ;;  %v1111_v16 = vor.u32 1.1754944e-38, %v1110_v0  ;;  %vm1224_vm12 = vweird.f32 %v2046_v44  ;;  %v1231_v20 = vor.u32 1.1754944e-38, %v1230_v3 }
  0xbc   : > { %v1726_v9 = vpop.eup %1725  ;;  %v863_v10 = vadd.f32 %v1718_v43, %v862_v2  ;;  %1733 = vrcp.f32 %v2074_v6  ;;  %v813_v15 = vmul.f32 1.442695, %v1646_v58  ;;  %vm2096_vm14 = vcmp.eq.f32.partialorder %v1228_v8, 8.507059e+37 }
  0xbd   : > { %v983_v12 = vadd.f32 %v1720_v46, %v982_v7  ;;  %v1100_v13 = vmul.f32 %v1726_v9, %v2039_v37  ;;  %v1728_v17 = vpop.eup %1727  ;;  %vm1105_vm15 = vweird.f32 %v1726_v9  ;;  %v883_v28 = vand.u32 2147483647, %v2072_v5 }
  0xbe   : > { %v867_v19 = vsel %vm866_vm10, %v1718_v43, %v863_v10  ;;  %v1220_v25 = vmul.f32 %v1728_v17, %v2046_v44  ;;  %vm1225_vm0 = vweird.f32 %v1728_v17  ;;  %1735 = vpow2.f32 %v813_v15  ;;  %vm1106_vm2 = vmor %vm1104_vm9, %vm1105_vm15 }
  0xbf   : > { %v872_v21 = vsel %vm2050_vm4, %v871_v49, %v867_v19  ;;  %v987_v22 = vsel %vm986_vm13, %v1720_v46, %v983_v12  ;;  %v1101_v23 = vsub.f32 1.0, %v1100_v13  ;;  %v1730_v29 = vpop.eup %1729  ;;  %vm879_vm3 = vweird.f32 %v2072_v5  ;;  %vm1226_vm6 = vmor %vm1224_vm12, %vm1225_vm0 }
  0xc0   : > { %v1339_v27 = vmul.f32 %v872_v21, %v1993_v40  ;;  %v992_v18 = vsel %vm2057_vm5, %v991_v53, %v987_v22  ;;  %v1221_v33 = vsub.f32 1.0, %v1220_v25  ;;  %v885_v40 = vand.u32 2147483648, %v2072_v5  ;;  %v1732_v34 = vpop.eup %1731  ;;  %v657_v21 = vld [vmem:[#allocation2 + $0xd0] sm:$0xff] }
  0xc1   : > { %v1347_v31 = vmul.f32 %v992_v18, %v1997_v42  ;;  %v1102_v32 = vmul.f32 %v1726_v9, %v1101_v23  ;;  %v2113_v36 = vadd.f32 1.0, %v1730_v29  ;;  %v875_v45 = vmul.f32 %v1732_v34, %v2072_v5  ;;  %v276_v29 = vld [vmem:[#allocation2 + $0x98] sm:$0xff] }
  0xc2   : > { %v1371_v35 = vpack.c.bf16 %v1339_v27, %v1339_v27  ;;  %v1222_v43 = vmul.f32 %v1728_v17, %v1221_v33  ;;  %v1734_v46 = vpop.eup %1733  ;;  %vm2122_vm4 = vcmp.eq.f32.partialorder %v883_v28, 8.507059e+37  ;;  %vm999_vm5 = vweird.f32 %v2074_v6  ;;  %v642_v28 = vld [vmem:[#allocation2 + $0x58] sm:$0xff] }
  0xc3   : > { %v1379_v39 = vpack.c.bf16 %v1347_v31, %v1347_v31  ;;  %v1103_v41 = vadd.f32 %v1726_v9, %v1102_v32  ;;  %1737 = vrcp.f32 %v2113_v36  ;;  %v876_v49 = vsub.f32 1.0, %v875_v45  ;;  %v530_v31 = vpop.f32.mrf.mxu2 }
  0xc4   : > { %1404 = vst.msk [vmem:[%s2109_s4] sm:$0xf] %vm1403_vm7, %v1371_v35  ;;  %v1223_v48 = vadd.f32 %v1728_v17, %v1222_v43  ;;  %v995_v50 = vmul.f32 %v1734_v46, %v2074_v6  ;;  %vm880_vm8 = vweird.f32 %v1732_v34  ;;  %v886_v51 = vor.u32 1.1754944e-38, %v885_v40  ;;  %v1736_v58 = vpop.eup %1735  ;;  %v550_v35 = vpop.f32.mrf.mxu3 }
  0xc5   : > { %1412 = vst.msk [vmem:[%s2109_s4 + $0x20] sm:$0xf] %vm1403_vm7, %v1379_v39  ;;  %v1107_v47 = vsel %vm1106_vm2, %v1726_v9, %v1103_v41  ;;  %v1003_v52 = vand.u32 2147483647, %v2074_v6  ;;  %v877_v56 = vmul.f32 %v1732_v34, %v876_v49  ;;  %vm1000_vm9 = vweird.f32 %v1734_v46  ;;  %vm881_vm10 = vmor %vm879_vm3, %vm880_vm8 }
  0xc6   : > { %v1112_v37 = vsel %vm2084_vm11, %v1111_v16, %v1107_v47  ;;  %v1227_v54 = vsel %vm1226_vm6, %v1728_v17, %v1223_v48  ;;  %v996_v57 = vsub.f32 1.0, %v995_v50  ;;  %v1005_v63 = vand.u32 2147483648, %v2074_v6  ;;  %vm1001_vm12 = vmor %vm999_vm5, %vm1000_vm9 }
  0xc7   : > { %v1355_v53 = vmul.f32 %v1112_v37, %v2004_v60  ;;  %v1232_v61 = vsel %vm2096_vm14, %v1231_v20, %v1227_v54  ;;  %v767_v0 = vmul.f32 1.442695, %v1623_v11  ;;  %v878_v3 = vadd.f32 %v1732_v34, %v877_v56  ;;  %v284_v56 = vld [vmem:[#allocation2 + $0xd8] sm:$0xff] }
  0xc8   : > { %v1363_v2 = vmul.f32 %v1232_v61, %v2008_v62  ;;  %v997_v7 = vmul.f32 %v1734_v46, %v996_v57  ;;  %vm2145_vm11 = vcmp.eq.f32.partialorder %v1003_v52, 8.507059e+37  ;;  %v2149_v9 = vadd.f32 1.0, %v1736_v58  ;;  %v261_v57 = vld [vmem:[#allocation2 + $0x20] sm:$0xff]  ;;  %v493_v58 = vpop.f32.mrf.mxu0 }
  0xc9   : > { %v1387_v44 = vpack.c.bf16 %v1355_v53, %v1355_v53  ;;  %v1738_v8 = vpop.eup %1737  ;;  %1739 = vpow2.f32 %v767_v0  ;;  %v1631_v10 = vmul.f32 -0.4, %v2067_v59  ;;  %v882_v11 = vsel %vm881_vm10, %v1732_v34, %v878_v3 }
  0xca   : > { %v1395_v62 = vpack.c.bf16 %v1363_v2, %v1363_v2  ;;  %v998_v12 = vadd.f32 %v1734_v46, %v997_v7  ;;  %v1115_v13 = vmul.f32 %v1738_v8, %v2113_v36  ;;  %v887_v5 = vsel %vm2122_vm4, %v886_v51, %v882_v11 }
  0xcb   : > { %1420 = vst.msk [vmem:[%s2109_s4 + $0x40] sm:$0xf] %vm1403_vm7, %v1387_v44  ;;  %v1006_v16 = vor.u32 1.1754944e-38, %v1005_v63  ;;  %v1125_v17 = vand.u32 2147483648, %v2113_v36  ;;  %1741 = vrcp.f32 %v2149_v9  ;;  %v1340_v19 = vmul.f32 %v887_v5, %v2013_v1 }
  0xcc   : > { %1428 = vst.msk [vmem:[%s2109_s4 + $0x60] sm:$0xf] %vm1403_vm7, %v1395_v62  ;;  %v1002_v20 = vsel %vm1001_vm12, %v1734_v46, %v998_v12  ;;  %v1116_v15 = vsub.f32 1.0, %v1115_v13  ;;  %vm1119_vm13 = vweird.f32 %v2113_v36  ;;  %v1123_v6 = vand.u32 2147483647, %v2113_v36  ;;  %v513_v62 = vpop.f32.mrf.mxu1 }
  0xcd   : > { %v1007_v22 = vsel %vm2145_vm11, %v1006_v16, %v1002_v20  ;;  %v783_v23 = vmul.f32 1.442695, %v1631_v10  ;;  %v2170_v25 = vadd.f32 %v1989_v30, %v649_v14  ;;  %v1372_v27 = vpack.c.bf16 %v1340_v19, %v1340_v19  ;;  %v269_v10 = vld [vmem:[#allocation2 + $0x60] sm:$0xff]  ;;  %v533_v20 = vpop.f32.mrf.mxu2 }
  0xce   : > { %v1348_v18 = vmul.f32 %v1007_v22, %v2018_v4  ;;  %v1117_v1 = vmul.f32 %v1738_v8, %v1116_v15  ;;  %vm1120_vm14 = vweird.f32 %v1738_v8  ;;  %v1126_v33 = vor.u32 1.1754944e-38, %v1125_v17  ;;  %v277_v19 = vld [vmem:[#allocation2 + $0xa0] sm:$0xff] }
  0xcf   : > { %v1740_v32 = vpop.eup %1739  ;;  %1743 = vpow2.f32 %v783_v23  ;;  %v1639_v40 = vmul.f32 -0.4, %v2170_v25  ;;  %v2175_v34 = vadd.f32 %v1989_v30, %v657_v21  ;;  %1405 = vst.msk [vmem:[%s2109_s4 + $0x4] sm:$0xf] %vm1403_vm7, %v1372_v27  ;;  %v2182_v43 = vadd.f32 %v1989_v30, %v634_v26  ;;  %vm1121_vm15 = vmor %vm1119_vm13, %vm1120_vm14  ;;  %v285_v15 = vld [vmem:[#allocation2 + $0xe0] sm:$0xff]  ;;  %v553_v21 = vpop.f32.mrf.mxu3 }
  0xd0   : > { %v1380_v39 = vpack.c.bf16 %v1348_v18, %v1348_v18  ;;  %v1118_v41 = vadd.f32 %v1738_v8, %v1117_v1  ;;  %v2179_v4 = vadd.f32 1.0, %v1740_v32  ;;  %v2189_v47 = vadd.f32 %v1989_v30, %v642_v28 }
  0xd1   : > { %v1742_v45 = vpop.eup %1741  ;;  %v799_v46 = vmul.f32 1.442695, %v1639_v40  ;;  %v1647_v42 = vmul.f32 -0.4, %v2175_v34  ;;  %v582_v48 = vadd.f32 %v530_v31, %v276_v29  ;;  %vm1124_vm0 = vcmp.eq.f32.partialorder %v1123_v6, 8.507059e+37 }
  0xd2   : > { %1413 = vst.msk [vmem:[%s2109_s4 + $0x24] sm:$0xf] %vm1403_vm7, %v1380_v39  ;;  %v1122_v49 = vsel %vm1121_vm15, %v1738_v8, %v1118_v41  ;;  %v1235_v50 = vmul.f32 %v1742_v45, %v2149_v9  ;;  %1745 = vrcp.f32 %v2179_v4  ;;  %v1243_v51 = vand.u32 2147483647, %v2149_v9 }
  0xd3   : > { %v1127_v37 = vsel %vm1124_vm0, %v1126_v33, %v1122_v49  ;;  %v1245_v36 = vand.u32 2147483648, %v2149_v9  ;;  %615 = vst.msk [vmem:[#allocation2 + $0x98] sm:$0xff] %vm224_vm1, %v582_v48  ;;  %1747 = vpow2.f32 %v799_v46  ;;  %v815_v54 = vmul.f32 1.442695, %v1647_v42 }
  0xd4   : > { %v1356_v52 = vmul.f32 %v1127_v37, %v2032_v24  ;;  %v1236_v53 = vsub.f32 1.0, %v1235_v50  ;;  %vm1239_vm2 = vweird.f32 %v2149_v9  ;;  %vm1240_vm3 = vweird.f32 %v1742_v45 }
  0xd5   : > { %v1744_v61 = vpop.eup %1743  ;;  %v1624_v63 = vmul.f32 -0.4, %v2182_v43  ;;  %v1632_v0 = vmul.f32 -0.4, %v2189_v47  ;;  %1749 = vpow2.f32 %v815_v54  ;;  %v590_v8 = vadd.f32 %v550_v35, %v284_v56  ;;  %vm2214_vm5 = vmor %vm1239_vm2, %vm1240_vm3 }
  0xd6   : > { %v1388_v44 = vpack.c.bf16 %v1356_v52, %v1356_v52  ;;  %v1237_v2 = vmul.f32 %v1742_v45, %v1236_v53  ;;  %v2202_v3 = vadd.f32 1.0, %v1744_v61  ;;  %v567_v60 = vadd.f32 %v493_v58, %v261_v57 }
  0xd7   : > { %v769_v24 = vmul.f32 1.442695, %v1624_v63  ;;  %v785_v7 = vmul.f32 1.442695, %v1632_v0  ;;  %vm2206_vm4 = vcmp.eq.f32.partialorder %v1243_v51, 8.507059e+37  ;;  %v1246_v14 = vor.u32 1.1754944e-38, %v1245_v36 }
  0xd8   : > { %v1746_v11 = vpop.eup %1745  ;;  %1421 = vst.msk [vmem:[%s2109_s4 + $0x44] sm:$0xf] %vm1403_vm7, %v1388_v44  ;;  %v1238_v12 = vadd.f32 %v1742_v45, %v1237_v2  ;;  %1751 = vrcp.f32 %v2202_v3  ;;  %vm894_vm6 = vweird.f32 %v2179_v4  ;;  %v898_v17 = vand.u32 2147483647, %v2179_v4 }
  0xd9   : > { %v890_v16 = vmul.f32 %v1746_v11, %v2179_v4  ;;  %1753 = vpow2.f32 %v769_v24  ;;  %623 = vst.msk [vmem:[#allocation2 + $0xd8] sm:$0xff] %vm224_vm1, %v590_v8  ;;  %v1748_v22 = vpop.eup %1747  ;;  %v900_v6 = vand.u32 2147483648, %v2179_v4  ;;  %v575_v26 = vadd.f32 %v513_v62, %v269_v10 }
  0xda   : > { %v1242_v9 = vsel %vm2214_vm5, %v1742_v45, %v1238_v12  ;;  %1755 = vpow2.f32 %v785_v7  ;;  %v650_v23 = vld [vmem:[#allocation2 + $0x98] sm:$0xff]  ;;  %600 = vst.msk [vmem:[#allocation2 + $0x20] sm:$0xff] %vm224_vm1, %v567_v60  ;;  %v1018_v1 = vand.u32 2147483647, %v2202_v3  ;;  %v2229_v28 = vadd.f32 1.0, %v1748_v22 }
  0xdb   : > { %v1247_v27 = vsel %vm2206_vm4, %v1246_v14, %v1242_v9  ;;  %v891_v18 = vsub.f32 1.0, %v890_v16  ;;  %v1750_v29 = vpop.eup %1749  ;;  %v2233_v32 = vadd.f32 %v1989_v30, %v650_v23  ;;  %608 = vst.msk [vmem:[#allocation2 + $0x60] sm:$0xff] %vm224_vm1, %v575_v26  ;;  %v583_v33 = vadd.f32 %v533_v20, %v277_v19  ;;  %v278_v20 = vld [vmem:[#allocation2 + $0xa8] sm:$0xff] }
  0xdc   : > { %v1364_v31 = vmul.f32 %v1247_v27, %v2042_v38  ;;  %v591_v40 = vadd.f32 %v553_v21, %v285_v15  ;;  %vm895_vm8 = vweird.f32 %v1746_v11  ;;  %v1020_v39 = vand.u32 2147483648, %v2202_v3 }
  0xdd   : > { %v892_v35 = vmul.f32 %v1746_v11, %v891_v18  ;;  %1757 = vrcp.f32 %v2229_v28  ;;  %vm2238_vm9 = vcmp.eq.f32.partialorder %v898_v17, 8.507059e+37  ;;  %v901_v38 = vor.u32 1.1754944e-38, %v900_v6  ;;  %616 = vst.msk [vmem:[#allocation2 + $0xa0] sm:$0xff] %vm224_vm1, %v583_v33  ;;  %vm896_vm11 = vmor %vm894_vm6, %vm895_vm8 }
  0xde   : > { %v1752_v41 = vpop.eup %1751  ;;  %v1396_v45 = vpack.c.bf16 %v1364_v31, %v1364_v31  ;;  %v2242_v42 = vadd.f32 1.0, %v1750_v29  ;;  %vm1014_vm10 = vweird.f32 %v2202_v3  ;;  %v1138_v37 = vand.u32 2147483647, %v2229_v28  ;;  %624 = vst.msk [vmem:[#allocation2 + $0xe0] sm:$0xff] %vm224_vm1, %v591_v40 }
  0xdf   : > { %v1754_v48 = vpop.eup %1753  ;;  %v893_v49 = vadd.f32 %v1746_v11, %v892_v35  ;;  %v1010_v50 = vmul.f32 %v1752_v41, %v2202_v3  ;;  %vm2254_vm12 = vcmp.eq.f32.partialorder %v1018_v1, 8.507059e+37  ;;  %v1140_v52 = vand.u32 2147483648, %v2229_v28 }
  0xe0   : > { %v1756_v51 = vpop.eup %1755  ;;  %1429 = vst.msk [vmem:[%s2109_s4 + $0x64] sm:$0xf] %vm1403_vm7, %v1396_v45  ;;  %1759 = vrcp.f32 %v2242_v42  ;;  %v1640_v53 = vmul.f32 -0.4, %v2233_v32  ;;  %v1021_v57 = vor.u32 1.1754944e-38, %v1020_v39  ;;  %v2261_v58 = vadd.f32 1.0, %v1754_v48 }
  0xe1   : > { %v897_v54 = vsel %vm896_vm11, %v1746_v11, %v893_v49  ;;  %v1011_v56 = vsub.f32 1.0, %v1010_v50  ;;  %vm1015_vm13 = vweird.f32 %v1752_v41  ;;  %vm1134_vm14 = vweird.f32 %v2229_v28  ;;  %v658_v16 = vld [vmem:[#allocation2 + $0xd8] sm:$0xff]  ;;  %v635_v9 = vld [vmem:[#allocation2 + $0x20] sm:$0xff] }
  0xe2   : > { %v902_v61 = vsel %vm2238_vm9, %v901_v38, %v897_v54  ;;  %v1260_v4 = vand.u32 2147483648, %v2242_v42  ;;  %v2267_v63 = vadd.f32 1.0, %v1756_v51  ;;  %v1258_v24 = vand.u32 2147483647, %v2242_v42  ;;  %vm1016_vm0 = vmor %vm1014_vm10, %vm1015_vm13 }
  0xe3   : > { %v1758_v0 = vpop.eup %1757  ;;  %v1341_v44 = vmul.f32 %v902_v61, %v2062_v55  ;;  %v1012_v2 = vmul.f32 %v1752_v41, %v1011_v56  ;;  %1761 = vrcp.f32 %v2261_v58  ;;  %vm2273_vm15 = vcmp.eq.f32.partialorder %v1138_v37, 8.507059e+37 }
  0xe4   : > { %v1130_v7 = vmul.f32 %v1758_v0, %v2229_v28  ;;  %v1141_v60 = vor.u32 1.1754944e-38, %v1140_v52  ;;  %v801_v10 = vmul.f32 1.442695, %v1640_v53  ;;  %v915_v12 = vand.u32 2147483648, %v2261_v58  ;;  %v651_v48 = vld [vmem:[#allocation2 + $0xa0] sm:$0xff] }
  0xe5   : > { %v1373_v62 = vpack.c.bf16 %v1341_v44, %v1341_v44  ;;  %v1013_v11 = vadd.f32 %v1752_v41, %v1012_v2  ;;  %1763 = vrcp.f32 %v2267_v63  ;;  %vm1254_vm2 = vweird.f32 %v2242_v42  ;;  %v659_v2 = vld [vmem:[#allocation2 + $0xe0] sm:$0xff] }
  0xe6   : > { %v1760_v55 = vpop.eup %1759  ;;  %v1131_v13 = vsub.f32 1.0, %v1130_v7  ;;  %v1261_v14 = vor.u32 1.1754944e-38, %v1260_v4  ;;  %v913_v5 = vand.u32 2147483647, %v2261_v58  ;;  %vm1135_vm3 = vweird.f32 %v1758_v0  ;;  %v495_v4 = vpop.f32.mrf.mxu0 }
  0xe7   : > { %1406 = vst.msk [vmem:[%s2109_s4 + $0x8] sm:$0xf] %vm1403_vm7, %v1373_v62  ;;  %v1017_v17 = vsel %vm1016_vm0, %v1752_v41, %v1013_v11  ;;  %v1250_v19 = vmul.f32 %v1760_v55, %v2242_v42  ;;  %vm2287_vm4 = vcmp.eq.f32.partialorder %v1258_v24, 8.507059e+37  ;;  %v1033_v3 = vand.u32 2147483647, %v2267_v63  ;;  %vm1136_vm11 = vmor %vm1134_vm14, %vm1135_vm3  ;;  %v643_v41 = vld [vmem:[#allocation2 + $0x60] sm:$0xff]  ;;  %v515_v24 = vpop.f32.mrf.mxu1  ;;  %v535_v7 = vpop.f32.mrf.mxu2 }
  0xe8   : > { %v1022_v15 = vsel %vm2254_vm12, %v1021_v57, %v1017_v17  ;;  %v1132_v21 = vmul.f32 %v1758_v0, %v1131_v13  ;;  %vm1255_vm5 = vweird.f32 %v1760_v55  ;;  %vm909_vm6 = vweird.f32 %v2261_v58  ;;  %v555_v62 = vpop.f32.mrf.mxu3 }
  0xe9   : > { %v916_v22 = vor.u32 1.1754944e-38, %v915_v12  ;;  %v1762_v6 = vpop.eup %1761  ;;  %v1349_v23 = vmul.f32 %v1022_v15, %v2067_v59  ;;  %v1251_v26 = vsub.f32 1.0, %v1250_v19  ;;  %1765 = vpow2.f32 %v801_v10  ;;  %vm1256_vm13 = vmor %vm1254_vm2, %vm1255_vm5  ;;  %v270_v19 = vld [vmem:[#allocation2 + $0x68] sm:$0xff] }
  0xea   : > { %v2297_v27 = vadd.f32 %v1989_v30, %v658_v16  ;;  %v1133_v18 = vadd.f32 %v1758_v0, %v1132_v21  ;;  %v905_v1 = vmul.f32 %v1762_v6, %v2261_v58  ;;  %vm910_vm8 = vweird.f32 %v1762_v6 }
  0xeb   : > { %vm2300_vm9 = vcmp.eq.f32.partialorder %v913_v5, 8.507059e+37  ;;  %vm1029_vm10 = vweird.f32 %v2267_v63  ;;  %v1035_v31 = vand.u32 2147483648, %v2267_v63  ;;  %v1764_v33 = vpop.eup %1763  ;;  %v1381_v59 = vpack.c.bf16 %v1349_v23, %v1349_v23  ;;  %vm911_vm14 = vmor %vm909_vm6, %vm910_vm8 }
  0xec   : > { %v1252_v40 = vmul.f32 %v1760_v55, %v1251_v26  ;;  %v1648_v35 = vmul.f32 -0.4, %v2297_v27  ;;  %v2311_v39 = vadd.f32 %v1989_v30, %v635_v9  ;;  %v1137_v45 = vsel %vm1136_vm11, %v1758_v0, %v1133_v18 }
  0xed   : > { %v906_v46 = vsub.f32 1.0, %v905_v1  ;;  %v1025_v38 = vmul.f32 %v1764_v33, %v2267_v63  ;;  %vm1030_vm12 = vweird.f32 %v1764_v33  ;;  %1414 = vst.msk [vmem:[%s2109_s4 + $0x28] sm:$0xf] %vm1403_vm7, %v1381_v59  ;;  %v1142_v49 = vsel %vm2273_vm15, %v1141_v60, %v1137_v45  ;;  %v263_v59 = vld [vmem:[#allocation2 + $0x30] sm:$0xff] }
  0xee   : > { %v1253_v28 = vadd.f32 %v1760_v55, %v1252_v40  ;;  %v817_v50 = vmul.f32 1.442695, %v1648_v35  ;;  %v1625_v37 = vmul.f32 -0.4, %v2311_v39  ;;  %v1357_v51 = vmul.f32 %v1142_v49, %v2170_v25  ;;  %vm1031_vm15 = vmor %vm1029_vm10, %vm1030_vm12  ;;  %v498_v40 = vpop.f32.mrf.mxu0  ;;  %v271_v45 = vld [vmem:[#allocation2 + $0x70] sm:$0xff] }
  0xef   : > { %v907_v36 = vmul.f32 %v1762_v6, %v906_v46  ;;  %v1026_v52 = vsub.f32 1.0, %v1025_v38  ;;  %v2324_v53 = vadd.f32 %v1989_v30, %v643_v41  ;;  %v1766_v54 = vpop.eup %1765  ;;  %v2327_v61 = vadd.f32 %v1989_v30, %v651_v48  ;;  %v518_v46 = vpop.f32.mrf.mxu1  ;;  %v279_v38 = vld [vmem:[#allocation2 + $0xb0] sm:$0xff] }
  0xf0   : > { %v1257_v56 = vsel %vm1256_vm13, %v1760_v55, %v1253_v28  ;;  %1767 = vpow2.f32 %v817_v50  ;;  %v771_v57 = vmul.f32 1.442695, %v1625_v37  ;;  %v1389_v0 = vpack.c.bf16 %v1357_v51, %v1357_v51  ;;  %v538_v48 = vpop.f32.mrf.mxu2  ;;  %v287_v37 = vld [vmem:[#allocation2 + $0xf0] sm:$0xff]  ;;  %v558_v51 = vpop.f32.mrf.mxu3 }
  0xf1   : > { %v1262_v25 = vsel %vm2287_vm4, %v1261_v14, %v1257_v56  ;;  %v908_v42 = vadd.f32 %v1762_v6, %v907_v36  ;;  %v1027_v44 = vmul.f32 %v1764_v33, %v1026_v52  ;;  %v2335_v60 = vadd.f32 1.0, %v1766_v54  ;;  %v262_v14 = vld [vmem:[#allocation2 + $0x28] sm:$0xff] }
  0xf2   : > { %v1365_v8 = vmul.f32 %v1262_v25, %v2175_v34  ;;  %1769 = vpow2.f32 %v771_v57  ;;  %v1633_v10 = vmul.f32 -0.4, %v2324_v53  ;;  %1422 = vst.msk [vmem:[%s2109_s4 + $0x48] sm:$0xf] %vm1403_vm7, %v1389_v0  ;;  %v1036_v55 = vor.u32 1.1754944e-38, %v1035_v31 }
  0xf3   : > { %v912_v11 = vsel %vm911_vm14, %v1762_v6, %v908_v42  ;;  %v1028_v12 = vadd.f32 %v1764_v33, %v1027_v44  ;;  %v1641_v13 = vmul.f32 -0.4, %v2327_v61  ;;  %1771 = vrcp.f32 %v2335_v60 }
  0xf4   : > { %v1397_v34 = vpack.c.bf16 %v1365_v8, %v1365_v8  ;;  %v917_v58 = vsel %vm2300_vm9, %v916_v22, %v912_v11  ;;  %v2348_v5 = vadd.f32 %v1989_v30, %v659_v2  ;;  %vm1034_vm0 = vcmp.eq.f32.partialorder %v1033_v3, 8.507059e+37 }
  0xf5   : > { %v1342_v16 = vmul.f32 %v917_v58, %v2182_v43  ;;  %v1032_v17 = vsel %vm1031_vm15, %v1764_v33, %v1028_v12  ;;  %v787_v22 = vmul.f32 1.442695, %v1633_v10  ;;  %v803_v9 = vmul.f32 1.442695, %v1641_v13  ;;  %v286_v33 = vld [vmem:[#allocation2 + $0xe8] sm:$0xff] }
  0xf6   : > { %v1768_v15 = vpop.eup %1767  ;;  %1430 = vst.msk [vmem:[%s2109_s4 + $0x68] sm:$0xf] %vm1403_vm7, %v1397_v34  ;;  %v1037_v21 = vsel %vm1034_vm0, %v1036_v55, %v1032_v17  ;;  %v568_v6 = vadd.f32 %v495_v4, %v262_v14  ;;  %v1153_v26 = vand.u32 2147483647, %v2335_v60  ;;  %v1649_v63 = vmul.f32 -0.4, %v2348_v5 }
  0xf7   : > { %v1374_v23 = vpack.c.bf16 %v1342_v16, %v1342_v16  ;;  %v1350_v30 = vmul.f32 %v1037_v21, %v2189_v47  ;;  %v2357_v18 = vadd.f32 1.0, %v1768_v15  ;;  %1773 = vpow2.f32 %v787_v22 }
  0xf8   : > { %v1770_v43 = vpop.eup %1769  ;;  %601 = vst.msk [vmem:[#allocation2 + $0x28] sm:$0xff] %vm224_vm1, %v568_v6  ;;  %v576_v3 = vadd.f32 %v515_v24, %v270_v19  ;;  %1775 = vpow2.f32 %v803_v9  ;;  %v584_v31 = vadd.f32 %v535_v7, %v278_v20  ;;  %v1155_v41 = vand.u32 2147483648, %v2335_v60 }
  0xf9   : > { %1407 = vst.msk [vmem:[%s2109_s4 + $0xc] sm:$0xf] %vm1403_vm7, %v1374_v23  ;;  %v1382_v1 = vpack.c.bf16 %v1350_v30, %v1350_v30  ;;  %v2363_v29 = vadd.f32 1.0, %v1770_v43  ;;  %v2365_v47 = vpop.eup %1771  ;;  %1777 = vrcp.f32 %v2357_v18  ;;  %vm1149_vm2 = vweird.f32 %v2335_v60 }
  0xfa   : > { %609 = vst.msk [vmem:[#allocation2 + $0x68] sm:$0xff] %vm224_vm1, %v576_v3  ;;  %v1145_v35 = vmul.f32 %v2365_v47, %v2335_v60  ;;  %vm2376_vm3 = vcmp.eq.f32.partialorder %v1153_v26, 8.507059e+37  ;;  %v1273_v28 = vand.u32 2147483647, %v2357_v18  ;;  %v1275_v50 = vand.u32 2147483648, %v2357_v18 }
  0xfb   : > { %1415 = vst.msk [vmem:[%s2109_s4 + $0x2c] sm:$0xf] %vm1403_vm7, %v1382_v1  ;;  %1779 = vrcp.f32 %v2363_v29  ;;  %v819_v52 = vmul.f32 1.442695, %v1649_v63  ;;  %v592_v54 = vadd.f32 %v555_v62, %v286_v33  ;;  %v569_v56 = vadd.f32 %v498_v40, %v263_v59  ;;  %v2418_v60 = vld [vmem:[%s2706_s2] ss:$0 sm:$0xff] }
  0xfc   : > { %617 = vst.msk [vmem:[#allocation2 + $0xa8] sm:$0xff] %vm224_vm1, %v584_v31  ;;  %v1146_v36 = vsub.f32 1.0, %v1145_v35  ;;  %vm1150_vm4 = vweird.f32 %v2365_v47  ;;  %v928_v4 = vand.u32 2147483647, %v2363_v29  ;;  %v577_v0 = vadd.f32 %v518_v46, %v271_v45 }
  0xfd   : > { %v1774_v57 = vpop.eup %1773  ;;  %v585_v25 = vadd.f32 %v538_v48, %v279_v38  ;;  %1781 = vpow2.f32 %v819_v52  ;;  %625 = vst.msk [vmem:[#allocation2 + $0xe8] sm:$0xff] %vm224_vm1, %v592_v54  ;;  %v593_v24 = vadd.f32 %v558_v51, %v287_v37  ;;  %v1156_v8 = vor.u32 1.1754944e-38, %v1155_v41  ;;  %vm1151_vm8 = vmor %vm1149_vm2, %vm1150_vm4 }
  0xfe   : > { %v1776_v42 = vpop.eup %1775  ;;  %v1147_v44 = vmul.f32 %v2365_v47, %v1146_v36  ;;  %v2386_v2 = vadd.f32 1.0, %v1774_v57  ;;  %vm1269_vm5 = vweird.f32 %v2357_v18  ;;  %vm924_vm6 = vweird.f32 %v2363_v29  ;;  %602 = vst.msk [vmem:[#allocation2 + $0x30] sm:$0xff] %vm224_vm1, %v569_v56 }
  0xff   : > { %v1778_v7 = vpop.eup %1777  ;;  %v2391_v10 = vadd.f32 1.0, %v1776_v42  ;;  %v636_v62 = vld [vmem:[#allocation2 + $0x28] sm:$0xff]  ;;  %v930_v13 = vand.u32 2147483648, %v2363_v29  ;;  %610 = vst.msk [vmem:[#allocation2 + $0x70] sm:$0xff] %vm224_vm1, %v577_v0  ;;  %vm2403_vm9 = vcmp.eq.f32.partialorder %v1273_v28, 8.507059e+37  ;;  %v1276_v34 = vor.u32 1.1754944e-38, %v1275_v50 }
 0x100   : > { %v1148_v12 = vadd.f32 %v2365_v47, %v1147_v44  ;;  %v1265_v55 = vmul.f32 %v1778_v7, %v2357_v18  ;;  %1783 = vrcp.f32 %v2386_v2  ;;  %vm2408_vm10 = vcmp.eq.f32.partialorder %v928_v4, 8.507059e+37  ;;  %618 = vst.msk [vmem:[#allocation2 + $0xb0] sm:$0xff] %vm224_vm1, %v585_v25 }
 0x101   : > { %v1780_v11 = vpop.eup %1779  ;;  %1785 = vrcp.f32 %v2391_v10  ;;  %v2421_v20 = vadd.f32 %v2418_v60, %v636_v62  ;;  %626 = vst.msk [vmem:[#allocation2 + $0xf0] sm:$0xff] %vm224_vm1, %v593_v24  ;;  %v1048_v22 = vand.u32 2147483647, %v2386_v2  ;;  %v1050_v9 = vand.u32 2147483648, %v2386_v2  ;;  %v644_v1 = vld [vmem:[#allocation2 + $0x68] sm:$0xff] }
 0x102   : > { %v920_v58 = vmul.f32 %v1780_v11, %v2363_v29  ;;  %v1152_v17 = vsel %vm1151_vm8, %v2365_v47, %v1148_v12  ;;  %v1266_v19 = vsub.f32 1.0, %v1265_v55  ;;  %vm1270_vm11 = vweird.f32 %v1778_v7 }
 0x103   : > { %v1157_v15 = vsel %vm2376_vm3, %v1156_v8, %v1152_v17  ;;  %v1782_v6 = vpop.eup %1781  ;;  %v931_v26 = vor.u32 1.1754944e-38, %v930_v13  ;;  %vm925_vm12 = vweird.f32 %v1780_v11  ;;  %v1168_v63 = vand.u32 2147483647, %v2391_v10  ;;  %vm1271_vm14 = vmor %vm1269_vm5, %vm1270_vm11  ;;  %v652_v51 = vld [vmem:[#allocation2 + $0xa8] sm:$0xff] }
 0x104   : > { %v921_v21 = vsub.f32 1.0, %v920_v58  ;;  %v1358_v23 = vmul.f32 %v1157_v15, %v2233_v32  ;;  %v1267_v30 = vmul.f32 %v1778_v7, %v1266_v19  ;;  %v2430_v3 = vadd.f32 1.0, %v1782_v6  ;;  %vm926_vm2 = vmor %vm924_vm6, %vm925_vm12  ;;  %v660_v0 = vld [vmem:[#allocation2 + $0xe8] sm:$0xff] }
 0x105   : > { %vm1044_vm13 = vweird.f32 %v2386_v2  ;;  %v1170_v59 = vand.u32 2147483648, %v2391_v10  ;;  %vm2437_vm15 = vcmp.eq.f32.partialorder %v1048_v22, 8.507059e+37  ;;  %v1051_v41 = vor.u32 1.1754944e-38, %v1050_v9 }
 0x106   : > { %v922_v43 = vmul.f32 %v1780_v11, %v921_v21  ;;  %v1784_v31 = vpop.eup %1783  ;;  %v1390_v47 = vpack.c.bf16 %v1358_v23, %v1358_v23  ;;  %v1268_v33 = vadd.f32 %v1778_v7, %v1267_v30  ;;  %vm1164_vm0 = vweird.f32 %v2391_v10  ;;  %v645_v16 = vld [vmem:[#allocation2 + $0x70] sm:$0xff] }
 0x107   : > { %v1040_v40 = vmul.f32 %v1784_v31, %v2386_v2  ;;  %v1626_v45 = vmul.f32 -0.4, %v2421_v20  ;;  %v1786_v46 = vpop.eup %1785  ;;  %vm1045_vm3 = vweird.f32 %v1784_v31  ;;  %1787 = vrcp.f32 %v2430_v3  ;;  %v653_v6 = vld [vmem:[#allocation2 + $0xb0] sm:$0xff] }
 0x108   : > { %v923_v32 = vadd.f32 %v1780_v11, %v922_v43  ;;  %1423 = vst.msk [vmem:[%s2109_s4 + $0x4c] sm:$0xf] %vm1403_vm7, %v1390_v47  ;;  %v1272_v38 = vsel %vm1271_vm14, %v1778_v7, %v1268_v33  ;;  %v2450_v18 = vadd.f32 %v2418_v60, %v644_v1  ;;  %v1160_v50 = vmul.f32 %v1786_v46, %v2391_v10  ;;  %vm1046_vm6 = vmor %vm1044_vm13, %vm1045_vm3  ;;  %v264_v1 = vld [vmem:[#allocation2 + $0x38] sm:$0xff] }
 0x109   : > { %v1277_v48 = vsel %vm2403_vm9, %v1276_v34, %v1272_v38  ;;  %v1041_v28 = vsub.f32 1.0, %v1040_v40  ;;  %vm2455_vm4 = vcmp.eq.f32.partialorder %v1168_v63, 8.507059e+37  ;;  %v1171_v52 = vor.u32 1.1754944e-38, %v1170_v59 }
 0x10a   : > { %v927_v49 = vsel %vm926_vm2, %v1780_v11, %v923_v32  ;;  %v1366_v29 = vmul.f32 %v1277_v48, %v2297_v27  ;;  %v1288_v54 = vand.u32 2147483647, %v2430_v3  ;;  %v1161_v4 = vsub.f32 1.0, %v1160_v50  ;;  %v637_v11 = vld [vmem:[#allocation2 + $0x30] sm:$0xff] }
 0x10b   : > { %v932_v36 = vsel %vm2408_vm10, %v931_v26, %v927_v49  ;;  %v1042_v57 = vmul.f32 %v1784_v31, %v1041_v28  ;;  %vm1165_vm5 = vweird.f32 %v1786_v46  ;;  %v773_v42 = vmul.f32 1.442695, %v1626_v45 }
 0x10c   : > { %v1343_v56 = vmul.f32 %v932_v36, %v2311_v39  ;;  %v1398_v25 = vpack.c.bf16 %v1366_v29, %v1366_v29  ;;  %v1634_v44 = vmul.f32 -0.4, %v2450_v18  ;;  %v2466_v27 = vadd.f32 %v2418_v60, %v652_v51  ;;  %vm1166_vm9 = vmor %vm1164_vm0, %vm1165_vm5 }
 0x10d   : > { %v1043_v7 = vadd.f32 %v1784_v31, %v1042_v57  ;;  %v1162_v8 = vmul.f32 %v1786_v46, %v1161_v4  ;;  %v1290_v62 = vand.u32 2147483648, %v2430_v3  ;;  %v1788_v12 = vpop.eup %1787  ;;  %1789 = vpow2.f32 %v773_v42  ;;  %v272_v57 = vld [vmem:[#allocation2 + $0x78] sm:$0xff]  ;;  %v520_v4 = vpop.f32.mrf.mxu1 }
 0x10e   : > { %v1375_v24 = vpack.c.bf16 %v1343_v56, %v1343_v56  ;;  %1431 = vst.msk [vmem:[%s2109_s4 + $0x6c] sm:$0xf] %vm1403_vm7, %v1398_v25  ;;  %v789_v39 = vmul.f32 1.442695, %v1634_v44  ;;  %v1642_v55 = vmul.f32 -0.4, %v2466_v27  ;;  %v2476_v13 = vadd.f32 %v2418_v60, %v660_v0  ;;  %v540_v25 = vpop.f32.mrf.mxu2 }
 0x10f   : > { %v1047_v14 = vsel %vm1046_vm6, %v1784_v31, %v1043_v7  ;;  %v1163_v34 = vadd.f32 %v1786_v46, %v1162_v8  ;;  %v1280_v58 = vmul.f32 %v1788_v12, %v2430_v3  ;;  %vm1285_vm8 = vweird.f32 %v1788_v12  ;;  %v500_v31 = vpop.f32.mrf.mxu0  ;;  %v280_v0 = vld [vmem:[#allocation2 + $0xb8] sm:$0xff] }
 0x110   : > { %1408 = vst.msk [vmem:[%s2109_s4 + $0x10] sm:$0xf] %vm1403_vm7, %v1375_v24  ;;  %v1052_v17 = vsel %vm2437_vm15, %v1051_v41, %v1047_v14  ;;  %1791 = vpow2.f32 %v789_v39  ;;  %v805_v2 = vmul.f32 1.442695, %v1642_v55  ;;  %v1650_v19 = vmul.f32 -0.4, %v2476_v13 }
 0x111   : > { %v1351_v15 = vmul.f32 %v1052_v17, %v2324_v53  ;;  %v1167_v21 = vsel %vm1166_vm9, %v1786_v46, %v1163_v34  ;;  %v1281_v22 = vsub.f32 1.0, %v1280_v58  ;;  %v2489_v9 = vadd.f32 %v2418_v60, %v637_v11  ;;  %v661_v41 = vld [vmem:[#allocation2 + $0xf0] sm:$0xff] }
 0x112   : > { %v1172_v23 = vsel %vm2455_vm4, %v1171_v52, %v1167_v21  ;;  %1793 = vpow2.f32 %v805_v2  ;;  %v821_v30 = vmul.f32 1.442695, %v1650_v19  ;;  %v2494_v10 = vadd.f32 %v2418_v60, %v645_v16 }
 0x113   : > { %v1383_v26 = vpack.c.bf16 %v1351_v15, %v1351_v15  ;;  %v1359_v43 = vmul.f32 %v1172_v23, %v2327_v61  ;;  %v1282_v63 = vmul.f32 %v1788_v12, %v1281_v22  ;;  %v1627_v53 = vmul.f32 -0.4, %v2489_v9  ;;  %v1790_v47 = vpop.eup %1789 }
 0x114   : > { %vm1284_vm10 = vweird.f32 %v2430_v3  ;;  %1795 = vpow2.f32 %v821_v30  ;;  %v1635_v33 = vmul.f32 -0.4, %v2494_v10  ;;  %v2501_v59 = vadd.f32 %v2418_v60, %v653_v6 }
 0x115   : > { %1416 = vst.msk [vmem:[%s2109_s4 + $0x30] sm:$0xf] %vm1403_vm7, %v1383_v26  ;;  %v1391_v32 = vpack.c.bf16 %v1359_v43, %v1359_v43  ;;  %v1283_v40 = vadd.f32 %v1788_v12, %v1282_v63  ;;  %v2505_v61 = vadd.f32 1.0, %v1790_v47  ;;  %v775_v35 = vmul.f32 1.442695, %v1627_v53  ;;  %vm1286_vm11 = vmor %vm1284_vm10, %vm1285_vm8 }
 0x116   : > { %v1792_v45 = vpop.eup %1791  ;;  %v1291_v46 = vor.u32 1.1754944e-38, %v1290_v62  ;;  %v791_v38 = vmul.f32 1.442695, %v1635_v33  ;;  %v570_v48 = vadd.f32 %v500_v31, %v264_v1  ;;  %vm1289_vm12 = vcmp.eq.f32.partialorder %v1288_v54, 8.507059e+37  ;;  %v288_v31 = vld [vmem:[#allocation2 + $0xf8] sm:$0xff] }
 0x117   : > { %1424 = vst.msk [vmem:[%s2109_s4 + $0x50] sm:$0xf] %vm1403_vm7, %v1391_v32  ;;  %v1287_v49 = vsel %vm1286_vm11, %v1788_v12, %v1283_v40  ;;  %1797 = vrcp.f32 %v2505_v61  ;;  %v2513_v37 = vadd.f32 1.0, %v1792_v45  ;;  %v2516_v51 = vadd.f32 %v2418_v60, %v661_v41 }
 0x118   : > { %v1794_v28 = vpop.eup %1793  ;;  %v1292_v50 = vsel %vm1289_vm12, %v1291_v46, %v1287_v49  ;;  %1799 = vpow2.f32 %v775_v35  ;;  %603 = vst.msk [vmem:[#allocation2 + $0x38] sm:$0xff] %vm224_vm1, %v570_v48  ;;  %v1643_v3 = vmul.f32 -0.4, %v2501_v59  ;;  %v943_v54 = vand.u32 2147483647, %v2505_v61 }
 0x119   : > { %v1367_v29 = vmul.f32 %v1292_v50, %v2348_v5  ;;  %v2520_v36 = vadd.f32 1.0, %v1794_v28  ;;  %1801 = vpow2.f32 %v791_v38  ;;  %v945_v56 = vand.u32 2147483648, %v2505_v61 }
 0x11a   : > { %v1796_v52 = vpop.eup %1795  ;;  %1803 = vrcp.f32 %v2513_v37  ;;  %v2530_v44 = vmul.f32 -0.4, %v2516_v51  ;;  %v1063_v7 = vand.u32 2147483647, %v2513_v37  ;;  %v807_v8 = vmul.f32 1.442695, %v1643_v3 }
 0x11b   : > { %v1399_v42 = vpack.c.bf16 %v1367_v29, %v1367_v29  ;;  %1805 = vrcp.f32 %v2520_v36  ;;  %v2527_v5 = vadd.f32 1.0, %v1796_v52  ;;  %v578_v62 = vadd.f32 %v520_v4, %v272_v57 }
 0x11c   : > { %v586_v11 = vadd.f32 %v540_v25, %v280_v0  ;;  %vm939_vm13 = vweird.f32 %v2505_v61  ;;  %vm2537_vm14 = vcmp.eq.f32.partialorder %v943_v54, 8.507059e+37  ;;  %v946_v14 = vor.u32 1.1754944e-38, %v945_v56 }
 0x11d   : > { %v1798_v24 = vpop.eup %1797  ;;  %1432 = vst.msk [vmem:[%s2109_s4 + $0x70] sm:$0xf] %vm1403_vm7, %v1399_v42  ;;  %vm1059_vm15 = vweird.f32 %v2513_v37  ;;  %v1065_v58 = vand.u32 2147483648, %v2513_v37  ;;  %v1183_v16 = vand.u32 2147483647, %v2520_v36  ;;  %v1185_v17 = vand.u32 2147483648, %v2520_v36 }
 0x11e   : > { %v1800_v12 = vpop.eup %1799  ;;  %v935_v39 = vmul.f32 %v1798_v24, %v2505_v61  ;;  %1807 = vrcp.f32 %v2527_v5  ;;  %611 = vst.msk [vmem:[#allocation2 + $0x78] sm:$0xff] %vm224_vm1, %v578_v62  ;;  %vm1179_vm0 = vweird.f32 %v2520_v36  ;;  %vm940_vm2 = vweird.f32 %v1798_v24 }
 0x11f   : > { %v1802_v34 = vpop.eup %1801  ;;  %v2548_v15 = vadd.f32 1.0, %v1800_v12  ;;  %1809 = vpow2.f32 %v807_v8  ;;  %619 = vst.msk [vmem:[#allocation2 + $0xb8] sm:$0xff] %vm224_vm1, %v586_v11  ;;  %vm2554_vm3 = vcmp.eq.f32.partialorder %v1063_v7, 8.507059e+37  ;;  %v1305_v30 = vand.u32 2147483648, %v2527_v5  ;;  %vm941_vm8 = vmor %vm939_vm13, %vm940_vm2 }
 0x120   : > { %v1804_v2 = vpop.eup %1803  ;;  %v936_v19 = vsub.f32 1.0, %v935_v39  ;;  %v2550_v21 = vadd.f32 1.0, %v1802_v34  ;;  %v1303_v63 = vand.u32 2147483647, %v2527_v5  ;;  %v1066_v1 = vor.u32 1.1754944e-38, %v1065_v58  ;;  %v638_v58 = vld [vmem:[#allocation2 + $0x38] sm:$0xff] }
 0x121   : > { %v1806_v22 = vpop.eup %1805  ;;  %v1055_v6 = vmul.f32 %v1804_v2, %v2513_v37  ;;  %1811 = vrcp.f32 %v2548_v15  ;;  %vm2562_vm4 = vcmp.eq.f32.partialorder %v1183_v16, 8.507059e+37  ;;  %v1186_v47 = vor.u32 1.1754944e-38, %v1185_v17 }
 0x122   : > { %v937_v26 = vmul.f32 %v1798_v24, %v936_v19  ;;  %v1175_v43 = vmul.f32 %v1806_v22, %v2520_v36  ;;  %vm1060_vm5 = vweird.f32 %v1804_v2  ;;  %vm1299_vm6 = vweird.f32 %v2527_v5 }
 0x123   : > { %v1056_v53 = vsub.f32 1.0, %v1055_v6  ;;  %1813 = vrcp.f32 %v2550_v21  ;;  %vm1180_vm9 = vweird.f32 %v1806_v22  ;;  %v1306_v41 = vor.u32 1.1754944e-38, %v1305_v30  ;;  %vm1061_vm13 = vmor %vm1059_vm15, %vm1060_vm5 }
 0x124   : > { %v938_v33 = vadd.f32 %v1798_v24, %v937_v26  ;;  %v1176_v32 = vsub.f32 1.0, %v1175_v43  ;;  %v1808_v40 = vpop.eup %1807  ;;  %v958_v45 = vand.u32 2147483647, %v2548_v15  ;;  %vm2573_vm10 = vcmp.eq.f32.partialorder %v1303_v63, 8.507059e+37 }
 0x125   : > { %v1057_v35 = vmul.f32 %v1804_v2, %v1056_v53  ;;  %v1810_v46 = vpop.eup %1809  ;;  %v1295_v49 = vmul.f32 %v1808_v40, %v2527_v5  ;;  %vm954_vm11 = vweird.f32 %v2548_v15  ;;  %v960_v29 = vand.u32 2147483648, %v2548_v15 }
 0x126   : > { %v942_v38 = vsel %vm941_vm8, %v1798_v24, %v938_v33  ;;  %v1177_v48 = vmul.f32 %v1806_v22, %v1176_v32  ;;  %vm1074_vm12 = vweird.f32 %v2550_v21  ;;  %v2586_v57 = vadd.f32 1.0, %v1810_v46  ;;  %v654_v23 = vld [vmem:[#allocation2 + $0xb8] sm:$0xff] }
 0x127   : > { %v947_v61 = vsel %vm2537_vm14, %v946_v14, %v942_v38  ;;  %v1058_v50 = vadd.f32 %v1804_v2, %v1057_v35  ;;  %v1812_v3 = vpop.eup %1811  ;;  %v1296_v56 = vsub.f32 1.0, %v1295_v49  ;;  %vm1181_vm14 = vmor %vm1179_vm0, %vm1180_vm9  ;;  %vm1300_vm2 = vweird.f32 %v1808_v40 }
 0x128   : > { %v1344_v52 = vmul.f32 %v947_v61, %v2421_v20  ;;  %v1178_v54 = vadd.f32 %v1806_v22, %v1177_v48  ;;  %v950_v0 = vmul.f32 %v1812_v3, %v2548_v15  ;;  %vm2592_vm8 = vcmp.eq.f32.partialorder %v958_v45, 8.507059e+37  ;;  %vm1301_vm15 = vmor %vm1299_vm6, %vm1300_vm2 }
 0x129   : > { %v1062_v4 = vsel %vm1061_vm13, %v1804_v2, %v1058_v50  ;;  %v1814_v20 = vpop.eup %1813  ;;  %v1297_v7 = vmul.f32 %v1808_v40, %v1296_v56  ;;  %v1080_v55 = vand.u32 2147483648, %v2550_v21  ;;  %1815 = vrcp.f32 %v2586_v57  ;;  %v646_v2 = vld [vmem:[#allocation2 + $0x78] sm:$0xff] }
 0x12a   : > { %v1376_v37 = vpack.c.bf16 %v1344_v52, %v1344_v52  ;;  %v1067_v42 = vsel %vm2554_vm3, %v1066_v1, %v1062_v4  ;;  %v1182_v24 = vsel %vm1181_vm14, %v1806_v22, %v1178_v54  ;;  %v951_v62 = vsub.f32 1.0, %v950_v0 }
 0x12b   : > { %v1352_v8 = vmul.f32 %v1067_v42, %v2450_v18  ;;  %v1187_v36 = vsel %vm2562_vm4, %v1186_v47, %v1182_v24  ;;  %v1070_v11 = vmul.f32 %v1814_v20, %v2550_v21  ;;  %v1298_v39 = vadd.f32 %v1808_v40, %v1297_v7  ;;  %v560_v47 = vpop.f32.mrf.mxu3 }
 0x12c   : > { %1409 = vst.msk [vmem:[%s2109_s4 + $0x14] sm:$0xf] %vm1403_vm7, %v1376_v37  ;;  %v1360_v12 = vmul.f32 %v1187_v36, %v2466_v27  ;;  %v952_v18 = vmul.f32 %v1812_v3, %v951_v62  ;;  %vm955_vm0 = vweird.f32 %v1812_v3  ;;  %vm1075_vm3 = vweird.f32 %v1814_v20 }
 0x12d   : > { %v1384_v14 = vpack.c.bf16 %v1352_v8, %v1352_v8  ;;  %v1071_v34 = vsub.f32 1.0, %v1070_v11  ;;  %v1302_v17 = vsel %vm1301_vm15, %v1808_v40, %v1298_v39  ;;  %v1078_v27 = vand.u32 2147483647, %v2550_v21  ;;  %vm956_vm4 = vmor %vm954_vm11, %vm955_vm0 }
 0x12e   : > { %v1392_v16 = vpack.c.bf16 %v1360_v12, %v1360_v12  ;;  %v1307_v19 = vsel %vm2573_vm10, %v1306_v41, %v1302_v17  ;;  %v953_v22 = vadd.f32 %v1812_v3, %v952_v18  ;;  %v823_v5 = vmul.f32 1.442695, %v2530_v44  ;;  %vm1076_vm5 = vmor %vm1074_vm12, %vm1075_vm3 }
 0x12f   : > { %1417 = vst.msk [vmem:[%s2109_s4 + $0x34] sm:$0xf] %vm1403_vm7, %v1384_v14  ;;  %v1072_v6 = vmul.f32 %v1814_v20, %v1071_v34  ;;  %v1368_v30 = vmul.f32 %v1307_v19, %v2476_v13  ;;  %v961_v26 = vor.u32 1.1754944e-38, %v960_v29  ;;  %v1081_v43 = vor.u32 1.1754944e-38, %v1080_v55  ;;  %v1816_v33 = vpop.eup %1815 }
 0x130   : > { %1425 = vst.msk [vmem:[%s2109_s4 + $0x54] sm:$0xf] %vm1403_vm7, %v1392_v16  ;;  %v2623_v63 = vadd.f32 %v2418_v60, %v638_v58  ;;  %v957_v53 = vsel %vm956_vm4, %v1812_v3, %v953_v22  ;;  %1817 = vpow2.f32 %v823_v5  ;;  %v2626_v44 = vadd.f32 %v2418_v60, %v646_v2 }
 0x131   : > { %v1073_v1 = vadd.f32 %v1814_v20, %v1072_v6  ;;  %v1400_v13 = vpack.c.bf16 %v1368_v30, %v1368_v30  ;;  %v962_v15 = vsel %vm2592_vm8, %v961_v26, %v957_v53  ;;  %v2635_v40 = vadd.f32 %v2418_v60, %v654_v23 }
 0x132   : > { %v1628_v32 = vmul.f32 -0.4, %v2623_v63  ;;  %v1345_v35 = vmul.f32 %v962_v15, %v2489_v9  ;;  %vm1079_vm6 = vcmp.eq.f32.partialorder %v1078_v27, 8.507059e+37  ;;  %v1190_v45 = vmul.f32 %v1816_v33, %v2586_v57 }
 0x133   : > { %v1077_v41 = vsel %vm1076_vm5, %v1814_v20, %v1073_v1  ;;  %1433 = vst.msk [vmem:[%s2109_s4 + $0x74] sm:$0xf] %vm1403_vm7, %v1400_v13  ;;  %v1636_v48 = vmul.f32 -0.4, %v2626_v44  ;;  %v594_v21 = vadd.f32 %v560_v47, %v288_v31  ;;  %v1644_v50 = vmul.f32 -0.4, %v2635_v40 }
 0x134   : > { %v1082_v46 = vsel %vm1079_vm6, %v1081_v43, %v1077_v41  ;;  %v777_v38 = vmul.f32 1.442695, %v1628_v32  ;;  %v1377_v49 = vpack.c.bf16 %v1345_v35, %v1345_v35  ;;  %v1191_v61 = vsub.f32 1.0, %v1190_v45 }
 0x135   : > { %v1353_v28 = vmul.f32 %v1082_v46, %v2494_v10  ;;  %v1198_v9 = vand.u32 2147483647, %v2586_v57  ;;  %v1200_v29 = vand.u32 2147483648, %v2586_v57  ;;  %v793_v3 = vmul.f32 1.442695, %v1636_v48  ;;  %627 = vst.msk [vmem:[#allocation2 + $0xf8] sm:$0xff] %vm224_vm1, %v594_v21 }
 0x136   : > { %1819 = vpow2.f32 %v777_v38  ;;  %v1818_v52 = vpop.eup %1817  ;;  %1410 = vst.msk [vmem:[%s2109_s4 + $0x18] sm:$0xf] %vm1403_vm7, %v1377_v49  ;;  %v1192_v56 = vmul.f32 %v1816_v33, %v1191_v61  ;;  %vm1195_vm9 = vweird.f32 %v1816_v33  ;;  %v809_v4 = vmul.f32 1.442695, %v1644_v50 }
 0x137   : > { %v1385_v54 = vpack.c.bf16 %v1353_v28, %v1353_v28  ;;  %v857_v10 = vadd.f32 1.0, %v1818_v52  ;;  %1821 = vpow2.f32 %v793_v3  ;;  %vm1194_vm10 = vweird.f32 %v2586_v57 }
 0x138   : > { %v1193_v0 = vadd.f32 %v1816_v33, %v1192_v56  ;;  %1823 = vpow2.f32 %v809_v4  ;;  %vm1196_vm11 = vmor %vm1194_vm10, %vm1195_vm9  ;;  %v1201_v25 = vor.u32 1.1754944e-38, %v1200_v29  ;;  %vm1199_vm1 = vcmp.eq.f32.partialorder %v1198_v9, 8.507059e+37 }
 0x139   : > { %1418 = vst.msk [vmem:[%s2109_s4 + $0x38] sm:$0xf] %vm1403_vm7, %v1385_v54  ;;  %1825 = vrcp.f32 %v857_v10  ;;  %v1320_v34 = vand.u32 2147483648, %v857_v10  ;;  %vm1314_vm13 = vweird.f32 %v857_v10 }
 0x13a   : > { %v1197_v20 = vsel %vm1196_vm11, %v1816_v33, %v1193_v0 }
 0x13b   : > { %v1202_v42 = vsel %vm1199_vm1, %v1201_v25, %v1197_v20  ;;  %v1321_v5 = vor.u32 1.1754944e-38, %v1320_v34 }
 0x13c   : > { %v1820_v37 = vpop.eup %1819  ;;  %v1361_v24 = vmul.f32 %v1202_v42, %v2501_v59  ;;  %v662_v8 = vld [vmem:[#allocation2 + $0xf8] sm:$0xff] }
 0x13d   : > { %v834_v7 = vadd.f32 1.0, %v1820_v37  ;;  %v1822_v36 = vpop.eup %1821  ;;  %v2654_v62 = vadd.f32 %v2418_v60, %v662_v8  ;;  %v1318_v60 = vand.u32 2147483647, %v857_v10 }
 0x13e   : > { %v1824_v11 = vpop.eup %1823  ;;  %v1393_v12 = vpack.c.bf16 %v1361_v24, %v1361_v24  ;;  %v2656_v39 = vadd.f32 1.0, %v1822_v36 }
 0x13f   : > { %1827 = vrcp.f32 %v834_v7  ;;  %v1826_v57 = vpop.eup %1825  ;;  %v2658_v55 = vadd.f32 1.0, %v1824_v11  ;;  %v1652_v14 = vmul.f32 -0.4, %v2654_v62  ;;  %v973_v27 = vand.u32 2147483647, %v834_v7 }
 0x140   : > { %1426 = vst.msk [vmem:[%s2109_s4 + $0x58] sm:$0xf] %vm1403_vm7, %v1393_v12  ;;  %v1310_v18 = vmul.f32 %v1826_v57, %v857_v10  ;;  %1829 = vrcp.f32 %v2656_v39  ;;  %vm1315_vm12 = vweird.f32 %v1826_v57  ;;  %v975_v22 = vand.u32 2147483648, %v834_v7 }
 0x141   : > { %1831 = vrcp.f32 %v2658_v55  ;;  %v825_v58 = vmul.f32 1.442695, %v1652_v14  ;;  %vm1316_vm14 = vmor %vm1314_vm13, %vm1315_vm12  ;;  %vm1319_vm2 = vcmp.eq.f32.partialorder %v1318_v60, 8.507059e+37  ;;  %vm969_vm8 = vweird.f32 %v834_v7 }
 0x142   : > { %v1311_v59 = vsub.f32 1.0, %v1310_v18  ;;  %vm2665_vm15 = vcmp.eq.f32.partialorder %v973_v27, 8.507059e+37  ;;  %v976_v13 = vor.u32 1.1754944e-38, %v975_v22  ;;  %v1093_v32 = vand.u32 2147483647, %v2656_v39 }
 0x143   : > { %1833 = vpow2.f32 %v825_v58  ;;  %v1095_v41 = vand.u32 2147483648, %v2656_v39  ;;  %v1213_v46 = vand.u32 2147483647, %v2658_v55  ;;  %v1215_v49 = vand.u32 2147483648, %v2658_v55 }
 0x144   : > { %v1312_v17 = vmul.f32 %v1826_v57, %v1311_v59  ;;  %vm1089_vm6 = vweird.f32 %v2656_v39  ;;  %vm1209_vm9 = vweird.f32 %v2658_v55  ;;  %vm1094_vm11 = vcmp.eq.f32.partialorder %v1093_v32, 8.507059e+37 }
 0x145   : > { %v1828_v16 = vpop.eup %1827  ;;  %v1096_v3 = vor.u32 1.1754944e-38, %v1095_v41  ;;  %v1216_v56 = vor.u32 1.1754944e-38, %v1215_v49  ;;  %vm1214_vm12 = vcmp.eq.f32.partialorder %v1213_v46, 8.507059e+37 }
 0x146   : > { %v965_v2 = vmul.f32 %v1828_v16, %v834_v7  ;;  %v1313_v19 = vadd.f32 %v1826_v57, %v1312_v17  ;;  %v1830_v6 = vpop.eup %1829  ;;  %vm970_vm0 = vweird.f32 %v1828_v16 }
 0x147   : > { %v1832_v30 = vpop.eup %1831  ;;  %v1085_v53 = vmul.f32 %v1830_v6, %v2656_v39  ;;  %vm971_vm3 = vmor %vm969_vm8, %vm970_vm0  ;;  %vm1090_vm4 = vweird.f32 %v1830_v6 }
 0x148   : > { %v966_v23 = vsub.f32 1.0, %v965_v2  ;;  %v1317_v26 = vsel %vm1316_vm14, %v1826_v57, %v1313_v19  ;;  %v1205_v47 = vmul.f32 %v1832_v30, %v2658_v55  ;;  %vm1210_vm5 = vweird.f32 %v1832_v30  ;;  %vm1091_vm10 = vmor %vm1089_vm6, %vm1090_vm4 }
 0x149   : > { %v1322_v1 = vsel %vm1319_vm2, %v1321_v5, %v1317_v26  ;;  %v1086_v15 = vsub.f32 1.0, %v1085_v53  ;;  %v1834_v38 = vpop.eup %1833  ;;  %vm1211_vm1 = vmor %vm1209_vm9, %vm1210_vm5 }
 0x14a   : > { %v967_v31 = vmul.f32 %v1828_v16, %v966_v23  ;;  %v1369_v33 = vmul.f32 %v1322_v1, %v2516_v51  ;;  %v1206_v45 = vsub.f32 1.0, %v1205_v47  ;;  %v858_v61 = vadd.f32 1.0, %v1834_v38 }
 0x14b   : > { %v1087_v21 = vmul.f32 %v1830_v6, %v1086_v15 }
 0x14c   : > { %v968_v35 = vadd.f32 %v1828_v16, %v967_v31  ;;  %v1401_v48 = vpack.c.bf16 %v1369_v33, %v1369_v33  ;;  %v1207_v28 = vmul.f32 %v1832_v30, %v1206_v45  ;;  %1835 = vrcp.f32 %v858_v61 }
 0x14d   : > { %v1088_v9 = vadd.f32 %v1830_v6, %v1087_v21  ;;  %v1335_v36 = vand.u32 2147483648, %v858_v61  ;;  %v1333_v12 = vand.u32 2147483647, %v858_v61  ;;  %vm1329_vm14 = vweird.f32 %v858_v61 }
 0x14e   : > { %v972_v51 = vsel %vm971_vm3, %v1828_v16, %v968_v35  ;;  %1434 = vst.msk [vmem:[%s2109_s4 + $0x78] sm:$0xf] %vm1403_vm7, %v1401_v48  ;;  %v1208_v52 = vadd.f32 %v1832_v30, %v1207_v28 }
 0x14f   : > { %v977_v50 = vsel %vm2665_vm15, %v976_v13, %v972_v51  ;;  %v1092_v54 = vsel %vm1091_vm10, %v1830_v6, %v1088_v9  ;;  %v1336_v57 = vor.u32 1.1754944e-38, %v1335_v36  ;;  %vm1334_vm8 = vcmp.eq.f32.partialorder %v1333_v12, 8.507059e+37 }
 0x150   : > { %v1346_v29 = vmul.f32 %v977_v50, %v2623_v63  ;;  %v1097_v10 = vsel %vm1094_vm11, %v1096_v3, %v1092_v54  ;;  %v1212_v0 = vsel %vm1211_vm1, %v1832_v30, %v1208_v52 }
 0x151   : > { %v1354_v25 = vmul.f32 %v1097_v10, %v2626_v44  ;;  %v1217_v20 = vsel %vm1214_vm12, %v1216_v56, %v1212_v0 }
 0x152   : > { %v1378_v4 = vpack.c.bf16 %v1346_v29, %v1346_v29  ;;  %v1362_v63 = vmul.f32 %v1217_v20, %v2635_v40  ;;  %v1836_v42 = vpop.eup %1835 }
 0x153   : > { %v1386_v37 = vpack.c.bf16 %v1354_v25, %v1354_v25  ;;  %v1325_v7 = vmul.f32 %v1836_v42, %v858_v61  ;;  %vm1330_vm13 = vweird.f32 %v1836_v42 }
 0x154   : > { %1411 = vst.msk [vmem:[%s2109_s4 + $0x1c] sm:$0xf] %vm1403_vm7, %v1378_v4  ;;  %v1394_v24 = vpack.c.bf16 %v1362_v63, %v1362_v63  ;;  %vm1331_vm2 = vmor %vm1329_vm14, %vm1330_vm13 }
 0x155   : > { %1419 = vst.msk [vmem:[%s2109_s4 + $0x3c] sm:$0xf] %vm1403_vm7, %v1386_v37  ;;  %v1326_v8 = vsub.f32 1.0, %v1325_v7 }
 0x156   : > { %1427 = vst.msk [vmem:[%s2109_s4 + $0x5c] sm:$0xf] %vm1403_vm7, %v1394_v24 }
 0x157   : > { %v1327_v11 = vmul.f32 %v1836_v42, %v1326_v8 }
 0x159   : > { %v1328_v44 = vadd.f32 %v1836_v42, %v1327_v11 }
 0x15b   : > { %v1332_v39 = vsel %vm1331_vm2, %v1836_v42, %v1328_v44 }
 0x15c   : > { %v1337_v40 = vsel %vm1334_vm8, %v1336_v57, %v1332_v39 }
 0x15d   : > { %v1370_v55 = vmul.f32 %v1337_v40, %v2654_v62 }
 0x15f   : > { %v1402_v14 = vpack.c.bf16 %v1370_v55, %v1370_v55 }
 0x161   : > { %1435 = vst.msk [vmem:[%s2109_s4 + $0x7c] sm:$0xf] %vm1403_vm7, %v1402_v14 }
 0x162 PF: > { %s13_s14 = sadd.s32 1, %s1860_s14   ;;  %s2756_s12 = smov %s1856_s13 }
 0x163   : > { %p10_p5 = scmp.ge.s32.totalorder %s13_s14, 4   ;;  %s2757_s13 = smov %s2759_s15 }
 0x165   :  { %12 = sbr.rel (!%p10_p5) target bundleno = 2 (0x2), region = 73 }

// kernel: discriminator_forward.6
= control target key start
LH: loop header
LB: loop body
LE: loop exit
PB: predicated region body
PF: predicated region fallthrough
CT: control target
= control target key end

     0   :  { %s2187_s12 = smov 0   ;;  %s2189_s13 = smov 0   ;;  %s2708_s0 = inlined_call_operand.vmem [shape: bf16[2,64,1024], index: 0, kind: input, shape index: {}]   ;;  %s2709_s1 = inlined_call_operand.vmem [shape: bf16[1024,128], index: 1, kind: input, shape index: {}]   ;;  %s2710_s2 = inlined_call_operand.vmem [shape: f32[1,128], index: 2, kind: input, shape index: {}]   ;;  %s2711_s3 = inlined_call_operand.vmem [shape: bf16[2,64,128], index: 3, kind: output, shape index: {}]  }
   0x1   :  { %s2191_s14 = smov 0  }
   0x2 LB: > { %s25_s15 = sadd.s32 1, %s2160_s13  ;;  %p1560_p0 = scmp.ge.s32.totalorder %s2164_s14, 1  ;;  %s2164_s14 = sphi %s2191_s14, %s13_s14   ;;  %s2160_s13 = sphi %s2189_s13, %s2729_s13   ;;  %s2156_s12 = sphi %s2187_s12, %s2728_s12  }
   0x3   : > { %p27_p1 = scmp.ge.s32.totalorder %s25_s15, 2  ;;  %p167_p2 = scmp.lt.s32.totalorder %s2164_s14, 3 }
   0x5   : > { %s2731_s15 = smov (%p27_p1, %s25_s15), 0  ;;  %p168_p3 = pnand %p1560_p0, %p167_p2 }
   0x6   : > { %p201_p4 = scmp.lt.s32.totalorder (!%p168_p3), %s2156_s12, 1 }
   0x7   : > { %171 = sbr.rel (%p168_p3) target bundleno = 427 (0x1ab), region = 32 }
   0xc   : > { %v2000_v0 = vld [vmem:[%s2709_s1 + $0x38] sm:$0xff]  ;;  %v1999_v4 = vld [vmem:[%s2709_s1 + $0x30] sm:$0xff]  ;;  %v1998_v8 = vld [vmem:[%s2709_s1 + $0x28] sm:$0xff]  ;;  %s2733_s12 = smov (!%p201_p4, %s2156_s12), 1 }
   0xd   : > { %v2008_v1 = vld [vmem:[%s2709_s1 + $0x78] sm:$0xff]  ;;  %945 = vmatpush.bf16.msra.mxu0 %v2000_v0  ;;  %v2007_v5 = vld [vmem:[%s2709_s1 + $0x70] sm:$0xff]  ;;  %v2006_v9 = vld [vmem:[%s2709_s1 + $0x68] sm:$0xff]  ;;  %s1959_s18 = sshll.u32 %s2733_s12, 8  ;;  %s1960_s10 = sshll.u32 %s2733_s12, 5 }
   0xe   : > { %v2016_v2 = vld [vmem:[%s2709_s1 + $0xb8] sm:$0xff]  ;;  %974 = vmatpush.bf16.msra.mxu1 %v2008_v1  ;;  %v2015_v6 = vld [vmem:[%s2709_s1 + $0xb0] sm:$0xff]  ;;  %v2014_v10 = vld [vmem:[%s2709_s1 + $0xa8] sm:$0xff]  ;;  %s2293_s25 = scalar_lea.vmem %s2708_s0, %s1959_s18  ;;  %s2679_s16 = scalar_lea.vmem %s2711_s3, %s1960_s10 }
   0xf   : > { %v2024_v3 = vld [vmem:[%s2709_s1 + $0xf8] sm:$0xff]  ;;  %1003 = vmatpush.bf16.msra.mxu2 %v2016_v2  ;;  %v2023_v7 = vld [vmem:[%s2709_s1 + $0xf0] sm:$0xff]  ;;  %v2022_v11 = vld [vmem:[%s2709_s1 + $0xe8] sm:$0xff] }
  0x10   : > { %1032 = vmatpush.bf16.msra.mxu3 %v2024_v3  ;;  %v1997_v12 = vld [vmem:[%s2709_s1 + $0x20] sm:$0xff]  ;;  %v1996_v16 = vld [vmem:[%s2709_s1 + $0x18] sm:$0xff]  ;;  %v1995_v20 = vld [vmem:[%s2709_s1 + $0x10] sm:$0xff] }
  0x11   : > { %946 = vmatpush.bf16.msra.mxu0 %v1999_v4  ;;  %v2005_v13 = vld [vmem:[%s2709_s1 + $0x60] sm:$0xff]  ;;  %v2004_v17 = vld [vmem:[%s2709_s1 + $0x58] sm:$0xff]  ;;  %v2003_v21 = vld [vmem:[%s2709_s1 + $0x50] sm:$0xff] }
  0x12   : > { %975 = vmatpush.bf16.msra.mxu1 %v2007_v5  ;;  %v2013_v14 = vld [vmem:[%s2709_s1 + $0xa0] sm:$0xff]  ;;  %v2012_v18 = vld [vmem:[%s2709_s1 + $0x98] sm:$0xff]  ;;  %v2011_v22 = vld [vmem:[%s2709_s1 + $0x90] sm:$0xff] }
  0x13   : > { %1004 = vmatpush.bf16.msra.mxu2 %v2015_v6  ;;  %v2021_v15 = vld [vmem:[%s2709_s1 + $0xe0] sm:$0xff]  ;;  %v2020_v19 = vld [vmem:[%s2709_s1 + $0xd8] sm:$0xff]  ;;  %v2019_v23 = vld [vmem:[%s2709_s1 + $0xd0] sm:$0xff] }
  0x14   : > { %1033 = vmatpush.bf16.msra.mxu3 %v2023_v7  ;;  %v1994_v24 = vld [vmem:[%s2709_s1 + $0x8] sm:$0xff]  ;;  %v1993_v28 = vld [vmem:[%s2709_s1] sm:$0xff]  ;;  %v2048_v40 = vld [vmem:[%s2709_s1 + $0x1b8] sm:$0xff] }
  0x15   : > { %947 = vmatpush.bf16.msra.mxu0 %v1998_v8  ;;  %v2002_v25 = vld [vmem:[%s2709_s1 + $0x48] sm:$0xff]  ;;  %v2001_v29 = vld [vmem:[%s2709_s1 + $0x40] sm:$0xff]  ;;  %v2032_v41 = vld [vmem:[%s2709_s1 + $0x138] sm:$0xff] }
  0x16   : > { %976 = vmatpush.bf16.msra.mxu1 %v2006_v9  ;;  %v2010_v26 = vld [vmem:[%s2709_s1 + $0x88] sm:$0xff]  ;;  %v2009_v30 = vld [vmem:[%s2709_s1 + $0x80] sm:$0xff]  ;;  %v2056_v46 = vld [vmem:[%s2709_s1 + $0x1f8] sm:$0xff] }
  0x17   : > { %1005 = vmatpush.bf16.msra.mxu2 %v2014_v10  ;;  %v2018_v27 = vld [vmem:[%s2709_s1 + $0xc8] sm:$0xff]  ;;  %v2017_v31 = vld [vmem:[%s2709_s1 + $0xc0] sm:$0xff]  ;;  %v2040_v47 = vld [vmem:[%s2709_s1 + $0x178] sm:$0xff] }
  0x18   : > { %1034 = vmatpush.bf16.msra.mxu3 %v2022_v11  ;;  %v1567_v32 = vld [vmem:[%s2293_s25] sm:$0xf]  ;;  %v1961_v34 = vld [vmem:[%s2293_s25 + $0x4] sm:$0xf]  ;;  %v1575_v36 = vld [vmem:[%s2293_s25 + $0x8] sm:$0xf] }
  0x19   : > { %948 = vmatpush.bf16.msra.mxu0 %v1997_v12  ;;  %v1965_v33 = vld [vmem:[%s2293_s25 + $0x1c] sm:$0xf0]  ;;  %v1569_v35 = vld [vmem:[%s2293_s25 + $0x20] sm:$0xf0]  ;;  %v1966_v37 = vld [vmem:[%s2293_s25 + $0x24] sm:$0xf0] }
  0x1a   : > { %977 = vmatpush.bf16.msra.mxu1 %v2005_v13  ;;  %v1962_v38 = vld [vmem:[%s2293_s25 + $0xc] sm:$0xf]  ;;  %v1568_v42 = vor.u32 %v1965_v33, %v1567_v32  ;;  %v1572_v43 = vor.u32 %v1961_v34, %v1569_v35  ;;  %v1576_v44 = vor.u32 %v1966_v37, %v1575_v36  ;;  %v2047_v48 = vld [vmem:[%s2709_s1 + $0x1b0] sm:$0xff]  ;;  %v1599_v56 = vld [vmem:[%s2293_s25 + $0x40] sm:$0xf] }
  0x1b   : > { %1006 = vmatpush.bf16.msra.mxu2 %v2013_v14  ;;  %v1577_v39 = vld [vmem:[%s2293_s25 + $0x28] sm:$0xf0]  ;;  %v2031_v49 = vld [vmem:[%s2709_s1 + $0x130] sm:$0xff]  ;;  %v2045_v57 = vld [vmem:[%s2709_s1 + $0x1a0] sm:$0xff] }
  0x1c   : > { %1035 = vmatpush.bf16.msra.mxu3 %v2021_v15  ;;  %v1580_v45 = vor.u32 %v1962_v38, %v1577_v39  ;;  %v2055_v50 = vld [vmem:[%s2709_s1 + $0x1f0] sm:$0xff]  ;;  %v2046_v52 = vld [vmem:[%s2709_s1 + $0x1a8] sm:$0xff]  ;;  %v2029_v58 = vld [vmem:[%s2709_s1 + $0x120] sm:$0xff] }
  0x1d   : > { %949 = vmatpush.bf16.msra.mxu0 %v1996_v16  ;;  %v2039_v51 = vld [vmem:[%s2709_s1 + $0x170] sm:$0xff]  ;;  %v2030_v53 = vld [vmem:[%s2709_s1 + $0x128] sm:$0xff]  ;;  %v1973_v59 = vld [vmem:[%s2293_s25 + $0x5c] sm:$0xf0] }
  0x1e   : > { %978 = vmatpush.bf16.msra.mxu1 %v2004_v17  ;;  %v2054_v54 = vld [vmem:[%s2709_s1 + $0x1e8] sm:$0xff]  ;;  %v1969_v60 = vld [vmem:[%s2293_s25 + $0x44] sm:$0xf]  ;;  %v2044_v4 = vld [vmem:[%s2709_s1 + $0x198] sm:$0xff]  ;;  %v1600_v6 = vor.u32 %v1973_v59, %v1599_v56 }
  0x1f   : > { %1007 = vmatpush.bf16.msra.mxu2 %v2012_v18  ;;  %v2038_v55 = vld [vmem:[%s2709_s1 + $0x168] sm:$0xff]  ;;  %v1601_v61 = vld [vmem:[%s2293_s25 + $0x60] sm:$0xf0]  ;;  %v2028_v5 = vld [vmem:[%s2709_s1 + $0x118] sm:$0xff] }
  0x20   : > { %1036 = vmatpush.bf16.msra.mxu3 %v2020_v19  ;;  %v1607_v62 = vld [vmem:[%s2293_s25 + $0x48] sm:$0xf]  ;;  %v1970_v0 = vld [vmem:[%s2293_s25 + $0x4c] sm:$0xf]  ;;  %v2053_v2 = vld [vmem:[%s2709_s1 + $0x1e0] sm:$0xff]  ;;  %v1604_v7 = vor.u32 %v1969_v60, %v1601_v61 }
  0x21   : > { %950 = vmatpush.bf16.msra.mxu0 %v1995_v20  ;;  %v1974_v63 = vld [vmem:[%s2293_s25 + $0x64] sm:$0xf0]  ;;  %v1609_v1 = vld [vmem:[%s2293_s25 + $0x68] sm:$0xf0]  ;;  %v2037_v3 = vld [vmem:[%s2709_s1 + $0x160] sm:$0xff] }
  0x22   : > { %979 = vmatpush.bf16.msra.mxu1 %v2003_v21  ;;  %v1608_v8 = vor.u32 %v1974_v63, %v1607_v62  ;;  %v1612_v9 = vor.u32 %v1970_v0, %v1609_v1  ;;  %v2052_v10 = vld [vmem:[%s2709_s1 + $0x1d8] sm:$0xff]  ;;  %v2043_v12 = vld [vmem:[%s2709_s1 + $0x190] sm:$0xff]  ;;  %v2042_v16 = vld [vmem:[%s2709_s1 + $0x188] sm:$0xff] }
  0x23   : > { %1008 = vmatpush.bf16.msra.mxu2 %v2011_v22  ;;  %v2036_v11 = vld [vmem:[%s2709_s1 + $0x158] sm:$0xff]  ;;  %v2027_v13 = vld [vmem:[%s2709_s1 + $0x110] sm:$0xff]  ;;  %v2026_v17 = vld [vmem:[%s2709_s1 + $0x108] sm:$0xff] }
  0x24   : > { %1037 = vmatpush.bf16.msra.mxu3 %v2019_v23  ;;  %v2051_v14 = vld [vmem:[%s2709_s1 + $0x1d0] sm:$0xff]  ;;  %v2050_v18 = vld [vmem:[%s2709_s1 + $0x1c8] sm:$0xff]  ;;  %v1631_v20 = vld [vmem:[%s2293_s25 + $0x80] sm:$0xf] }
  0x25   : > { %951 = vmatpush.bf16.msra.mxu0 %v1994_v24  ;;  %v2035_v15 = vld [vmem:[%s2709_s1 + $0x150] sm:$0xff]  ;;  %v2034_v19 = vld [vmem:[%s2709_s1 + $0x148] sm:$0xff]  ;;  %v2041_v21 = vld [vmem:[%s2709_s1 + $0x180] sm:$0xff] }
  0x26   : > { %980 = vmatpush.bf16.msra.mxu1 %v2002_v25  ;;  %v2025_v22 = vld [vmem:[%s2709_s1 + $0x100] sm:$0xff]  ;;  %v1615_v60 = vld [vmem:[%s2293_s25 + $0x50] sm:$0xf]  ;;  %v1971_v62 = vld [vmem:[%s2293_s25 + $0x54] sm:$0xf] }
  0x27   : > { %1009 = vmatpush.bf16.msra.mxu2 %v2010_v26  ;;  %v1981_v23 = vld [vmem:[%s2293_s25 + $0x9c] sm:$0xf0]  ;;  %v1977_v24 = vld [vmem:[%s2293_s25 + $0x84] sm:$0xf]  ;;  %v1639_v26 = vld [vmem:[%s2293_s25 + $0x88] sm:$0xf] }
  0x28   : > { %1038 = vmatpush.bf16.msra.mxu3 %v2018_v27  ;;  %v1633_v25 = vld [vmem:[%s2293_s25 + $0xa0] sm:$0xf0]  ;;  %v1982_v27 = vld [vmem:[%s2293_s25 + $0xa4] sm:$0xf0]  ;;  %v1632_v32 = vor.u32 %v1981_v23, %v1631_v20  ;;  %v1663_v36 = vld [vmem:[%s2293_s25 + $0xc0] sm:$0xf] }
  0x29   : > { %952 = vmatpush.bf16.msra.mxu0 %v1993_v28  ;;  %v1978_v28 = vld [vmem:[%s2293_s25 + $0x8c] sm:$0xf]  ;;  %v1636_v33 = vor.u32 %v1977_v24, %v1633_v25  ;;  %v1640_v34 = vor.u32 %v1982_v27, %v1639_v26  ;;  %v1989_v37 = vld [vmem:[%s2293_s25 + $0xdc] sm:$0xf0]  ;;  %v1985_v38 = vld [vmem:[%s2293_s25 + $0xc4] sm:$0xf] }
  0x2a   : > { %981 = vmatpush.bf16.msra.mxu1 %v2001_v29  ;;  %v1641_v29 = vld [vmem:[%s2293_s25 + $0xa8] sm:$0xf0]  ;;  %v1665_v39 = vld [vmem:[%s2293_s25 + $0xe0] sm:$0xf0]  ;;  %v1975_v61 = vld [vmem:[%s2293_s25 + $0x6c] sm:$0xf0] }
  0x2b   : > { %1010 = vmatpush.bf16.msra.mxu2 %v2009_v30  ;;  %v2049_v30 = vld [vmem:[%s2709_s1 + $0x1c0] sm:$0xff]  ;;  %v1644_v35 = vor.u32 %v1978_v28, %v1641_v29  ;;  %v1617_v63 = vld [vmem:[%s2293_s25 + $0x70] sm:$0xf0]  ;;  %v1623_v0 = vld [vmem:[%s2293_s25 + $0x58] sm:$0xf] }
  0x2c   : > { %1039 = vmatpush.bf16.msra.mxu3 %v2017_v31  ;;  %953 = vmatmul.bf16.vlgmr.msra.gmra.mxu0 %v1568_v42  ;;  %v2033_v31 = vld [vmem:[%s2709_s1 + $0x140] sm:$0xff]  ;;  %v1986_v42 = vld [vmem:[%s2293_s25 + $0xcc] sm:$0xf]  ;;  %v1976_v1 = vld [vmem:[%s2293_s25 + $0x74] sm:$0xf0] }
  0x2d   : > { %1061 = vmatpush.bf16.msrb.mxu0 %v2032_v41  ;;  %982 = vmatmul.bf16.vlgmr.msra.gmra.mxu1 %v1572_v43  ;;  %v1990_v41 = vld [vmem:[%s2293_s25 + $0xe4] sm:$0xf0]  ;;  %v1673_v43 = vld [vmem:[%s2293_s25 + $0xe8] sm:$0xf0]  ;;  %v1679_v20 = vld [vmem:[%s2293_s25 + $0xd0] sm:$0xf] }
  0x2e   : > { %1011 = vmatmul.bf16.vlgmr.msra.gmra.mxu2 %v1576_v44  ;;  %1090 = vmatpush.bf16.msrb.mxu1 %v2040_v47  ;;  %v1664_v44 = vor.u32 %v1989_v37, %v1663_v36  ;;  %v1676_v47 = vor.u32 %v1986_v42, %v1673_v43  ;;  %v1681_v23 = vld [vmem:[%s2293_s25 + $0xf0] sm:$0xf0]  ;;  %v1687_v24 = vld [vmem:[%s2293_s25 + $0xd8] sm:$0xf]  ;;  %v1988_v26 = vld [vmem:[%s2293_s25 + $0xdc] sm:$0xf] }
  0x2f   : > { %1119 = vmatpush.bf16.msrb.mxu2 %v2048_v40  ;;  %1040 = vmatmul.bf16.vlgmr.msra.gmra.mxu3 %v1580_v45  ;;  %v1671_v40 = vld [vmem:[%s2293_s25 + $0xc8] sm:$0xf]  ;;  %v1668_v45 = vor.u32 %v1985_v38, %v1665_v39  ;;  %v1992_v25 = vld [vmem:[%s2293_s25 + $0xf4] sm:$0xf0]  ;;  %v1689_v27 = vld [vmem:[%s2293_s25 + $0xf8] sm:$0xf0] }
  0x30   : > { %1148 = vmatpush.bf16.msrb.mxu3 %v2056_v46  ;;  %v1672_v46 = vor.u32 %v1990_v41, %v1671_v40 }
  0x31   : > { %1062 = vmatpush.bf16.msrb.mxu0 %v2031_v49  ;;  %v1967_v49 = vld [vmem:[%s2293_s25 + $0x2c] sm:$0xf0] }
  0x32   : > { %1091 = vmatpush.bf16.msrb.mxu1 %v2039_v51  ;;  %v1585_v51 = vld [vmem:[%s2293_s25 + $0x30] sm:$0xf0] }
  0x33   : > { %1120 = vmatpush.bf16.msrb.mxu2 %v2047_v48  ;;  %v1583_v48 = vld [vmem:[%s2293_s25 + $0x10] sm:$0xf] }
  0x34   : > { %1149 = vmatpush.bf16.msrb.mxu3 %v2055_v50  ;;  %v1963_v50 = vld [vmem:[%s2293_s25 + $0x14] sm:$0xf]  ;;  %v1584_v56 = vor.u32 %v1967_v49, %v1583_v48 }
  0x35   : > { %1063 = vmatpush.bf16.msrb.mxu0 %v2030_v53  ;;  %v1968_v53 = vld [vmem:[%s2293_s25 + $0x34] sm:$0xf0] }
  0x36   : > { %1092 = vmatpush.bf16.msrb.mxu1 %v2038_v55  ;;  %v1593_v55 = vld [vmem:[%s2293_s25 + $0x38] sm:$0xf0] }
  0x37   : > { %1121 = vmatpush.bf16.msrb.mxu2 %v2046_v52  ;;  %v1591_v52 = vld [vmem:[%s2293_s25 + $0x18] sm:$0xf] }
  0x38   : > { %1150 = vmatpush.bf16.msrb.mxu3 %v2054_v54  ;;  %v1964_v54 = vld [vmem:[%s2293_s25 + $0x1c] sm:$0xf] }
  0x39   : > { %1064 = vmatpush.bf16.msrb.mxu0 %v2029_v58  ;;  %v1592_v58 = vor.u32 %v1968_v53, %v1591_v52  ;;  %v1596_v59 = vor.u32 %v1964_v54, %v1593_v55 }
  0x3a   : > { %1093 = vmatpush.bf16.msrb.mxu1 %v2037_v3  ;;  %v1625_v3 = vld [vmem:[%s2293_s25 + $0x78] sm:$0xf0] }
  0x3b   : > { %1122 = vmatpush.bf16.msrb.mxu2 %v2045_v57  ;;  %v1588_v57 = vor.u32 %v1963_v50, %v1585_v51 }
  0x3c   : > { %1151 = vmatpush.bf16.msrb.mxu3 %v2053_v2  ;;  %958 = vmatmul.bf16.gmra.mxu0 %v1600_v6  ;;  %v1972_v2 = vld [vmem:[%s2293_s25 + $0x5c] sm:$0xf]  ;;  %v1624_v6 = vor.u32 %v1976_v1, %v1623_v0 }
  0x3d   : > { %1065 = vmatpush.bf16.msrb.mxu0 %v2028_v5  ;;  %987 = vmatmul.bf16.gmra.mxu1 %v1604_v7  ;;  %v1620_v5 = vor.u32 %v1971_v62, %v1617_v63  ;;  %v1628_v7 = vor.u32 %v1972_v2, %v1625_v3 }
  0x3e   : > { %1016 = vmatmul.bf16.gmra.mxu2 %v1608_v8  ;;  %1094 = vmatpush.bf16.msrb.mxu1 %v2036_v11  ;;  %v1647_v8 = vld [vmem:[%s2293_s25 + $0x90] sm:$0xf]  ;;  %v1649_v11 = vld [vmem:[%s2293_s25 + $0xb0] sm:$0xf0] }
  0x3f   : > { %1123 = vmatpush.bf16.msrb.mxu2 %v2044_v4  ;;  %1045 = vmatmul.bf16.gmra.mxu3 %v1612_v9  ;;  %v1616_v4 = vor.u32 %v1975_v61, %v1615_v60  ;;  %v1983_v9 = vld [vmem:[%s2293_s25 + $0xac] sm:$0xf0] }
  0x40   : > { %1152 = vmatpush.bf16.msrb.mxu3 %v2052_v10  ;;  %v1979_v10 = vld [vmem:[%s2293_s25 + $0x94] sm:$0xf] }
  0x41   : > { %1066 = vmatpush.bf16.msrb.mxu0 %v2027_v13  ;;  %v1984_v13 = vld [vmem:[%s2293_s25 + $0xb4] sm:$0xf0] }
  0x42   : > { %1095 = vmatpush.bf16.msrb.mxu1 %v2035_v15  ;;  %v1657_v15 = vld [vmem:[%s2293_s25 + $0xb8] sm:$0xf0] }
  0x43   : > { %1124 = vmatpush.bf16.msrb.mxu2 %v2043_v12  ;;  %v1655_v12 = vld [vmem:[%s2293_s25 + $0x98] sm:$0xf] }
  0x44   : > { %1153 = vmatpush.bf16.msrb.mxu3 %v2051_v14  ;;  %v1980_v14 = vld [vmem:[%s2293_s25 + $0x9c] sm:$0xf] }
  0x45   : > { %1067 = vmatpush.bf16.msrb.mxu0 %v2026_v17  ;;  %v1652_v17 = vor.u32 %v1979_v10, %v1649_v11 }
  0x46   : > { %1096 = vmatpush.bf16.msrb.mxu1 %v2034_v19  ;;  %v1660_v19 = vor.u32 %v1980_v14, %v1657_v15 }
  0x47   : > { %1125 = vmatpush.bf16.msrb.mxu2 %v2042_v16  ;;  %v1648_v16 = vor.u32 %v1983_v9, %v1647_v8 }
  0x48   : > { %1154 = vmatpush.bf16.msrb.mxu3 %v2050_v18  ;;  %v1656_v18 = vor.u32 %v1984_v13, %v1655_v12 }
  0x49   : > { %1068 = vmatpush.bf16.msrb.mxu0 %v2025_v22  ;;  %v1987_v22 = vld [vmem:[%s2293_s25 + $0xd4] sm:$0xf] }
  0x4a   : > { %1097 = vmatpush.bf16.msrb.mxu1 %v2033_v31  ;;  %v1684_v29 = vor.u32 %v1987_v22, %v1681_v23  ;;  %v1692_v31 = vor.u32 %v1988_v26, %v1689_v27 }
  0x4b   : > { %1126 = vmatpush.bf16.msrb.mxu2 %v2041_v21  ;;  %v1991_v21 = vld [vmem:[%s2293_s25 + $0xec] sm:$0xf0] }
  0x4c   : > { %1155 = vmatpush.bf16.msrb.mxu3 %v2049_v30  ;;  %963 = vmatmul.bf16.gmra.mxu0 %v1632_v32  ;;  %v1680_v28 = vor.u32 %v1991_v21, %v1679_v20  ;;  %v1688_v30 = vor.u32 %v1992_v25, %v1687_v24 }
  0x4d   : > { %992 = vmatmul.bf16.gmra.mxu1 %v1636_v33 }
  0x4e   : > { %1021 = vmatmul.bf16.gmra.mxu2 %v1640_v34 }
  0x4f   : > { %1050 = vmatmul.bf16.gmra.mxu3 %v1644_v35 }
  0x5c   : > { %968 = vmatmul.bf16.gmra.mxu0 %v1664_v44 }
  0x5d   : > { %997 = vmatmul.bf16.gmra.mxu1 %v1668_v45 }
  0x5e   : > { %1026 = vmatmul.bf16.gmra.mxu2 %v1672_v46 }
  0x5f   : > { %1055 = vmatmul.bf16.gmra.mxu3 %v1676_v47 }
  0x6c   : > { %1069 = vmatmul.bf16.vlgmr.msrb.gmra.mxu0 %v1584_v56 }
  0x6d   : > { %1098 = vmatmul.bf16.vlgmr.msrb.gmra.mxu1 %v1588_v57 }
  0x6e   : > { %1127 = vmatmul.bf16.vlgmr.msrb.gmra.mxu2 %v1592_v58 }
  0x6f   : > { %1156 = vmatmul.bf16.vlgmr.msrb.gmra.mxu3 %v1596_v59 }
  0x7c   : > { %1074 = vmatmul.bf16.gmra.mxu0 %v1616_v4 }
  0x7d   : > { %1103 = vmatmul.bf16.gmra.mxu1 %v1620_v5 }
  0x7e   : > { %1132 = vmatmul.bf16.gmra.mxu2 %v1624_v6 }
  0x7f   : > { %1161 = vmatmul.bf16.gmra.mxu3 %v1628_v7 }
  0x8c   : > { %1079 = vmatmul.bf16.gmra.mxu0 %v1648_v16 }
  0x8d   : > { %1108 = vmatmul.bf16.gmra.mxu1 %v1652_v17 }
  0x8e   : > { %1137 = vmatmul.bf16.gmra.mxu2 %v1656_v18 }
  0x8f   : > { %1166 = vmatmul.bf16.gmra.mxu3 %v1660_v19 }
  0x9c   : > { %1084 = vmatmul.bf16.gmra.mxu0 %v1680_v28 }
  0x9d   : > { %1113 = vmatmul.bf16.gmra.mxu1 %v1684_v29 }
  0x9e   : > { %1142 = vmatmul.bf16.gmra.mxu2 %v1688_v30 }
  0x9f   : > { %1171 = vmatmul.bf16.gmra.mxu3 %v1692_v31 }
  0xa9   : > { %v954_v32 = vpop.f32.mrf.mxu0 }
  0xaa   : > { %v983_v33 = vpop.f32.mrf.mxu1 }
  0xab   : > { %v984_v34 = vadd.f32 %v983_v33, %v954_v32  ;;  %v2486_v32 = vld [vmem:[%s2710_s2] ss:$0 sm:$0xff] }
  0xb1   : > { %v1012_v35 = vpop.f32.mrf.mxu2  ;;  %v956_v38 = vpop.f32.mrf.mxu0 }
  0xb2   : > { %v1041_v36 = vpop.f32.mrf.mxu3  ;;  %v1013_v37 = vadd.f32 %v1012_v35, %v984_v34  ;;  %v985_v39 = vpop.f32.mrf.mxu1 }
  0xb3   : > { %v986_v40 = vadd.f32 %v985_v39, %v956_v38 }
  0xb4   : > { %v1042_v41 = vadd.f32 %v1041_v36, %v1013_v37 }
  0xb9   : > { %v1014_v42 = vpop.f32.mrf.mxu2  ;;  %v959_v45 = vpop.f32.mrf.mxu0 }
  0xba   : > { %v1043_v43 = vpop.f32.mrf.mxu3  ;;  %v1015_v44 = vadd.f32 %v1014_v42, %v986_v40  ;;  %v988_v46 = vpop.f32.mrf.mxu1 }
  0xbb   : > { %v989_v47 = vadd.f32 %v988_v46, %v959_v45 }
  0xbc   : > { %v1044_v48 = vadd.f32 %v1043_v43, %v1015_v44 }
  0xc1   : > { %v1017_v49 = vpop.f32.mrf.mxu2  ;;  %v961_v52 = vpop.f32.mrf.mxu0 }
  0xc2   : > { %v1046_v50 = vpop.f32.mrf.mxu3  ;;  %v1018_v51 = vadd.f32 %v1017_v49, %v989_v47  ;;  %v990_v53 = vpop.f32.mrf.mxu1 }
  0xc3   : > { %v991_v54 = vadd.f32 %v990_v53, %v961_v52 }
  0xc4   : > { %v1047_v55 = vadd.f32 %v1046_v50, %v1018_v51 }
  0xc9   : > { %v1019_v56 = vpop.f32.mrf.mxu2  ;;  %v964_v59 = vpop.f32.mrf.mxu0 }
  0xca   : > { %v1048_v57 = vpop.f32.mrf.mxu3  ;;  %v1020_v58 = vadd.f32 %v1019_v56, %v991_v54  ;;  %v993_v60 = vpop.f32.mrf.mxu1 }
  0xcb   : > { %v994_v61 = vadd.f32 %v993_v60, %v964_v59 }
  0xcc   : > { %v1049_v62 = vadd.f32 %v1048_v57, %v1020_v58 }
  0xd1   : > { %v1022_v63 = vpop.f32.mrf.mxu2  ;;  %v966_v2 = vpop.f32.mrf.mxu0 }
  0xd2   : > { %v1051_v0 = vpop.f32.mrf.mxu3  ;;  %v1023_v1 = vadd.f32 %v1022_v63, %v994_v61  ;;  %v995_v3 = vpop.f32.mrf.mxu1 }
  0xd3   : > { %v996_v4 = vadd.f32 %v995_v3, %v966_v2 }
  0xd4   : > { %v1052_v5 = vadd.f32 %v1051_v0, %v1023_v1 }
  0xd9   : > { %v1024_v6 = vpop.f32.mrf.mxu2  ;;  %v969_v9 = vpop.f32.mrf.mxu0 }
  0xda   : > { %v1053_v7 = vpop.f32.mrf.mxu3  ;;  %v1025_v8 = vadd.f32 %v1024_v6, %v996_v4  ;;  %v998_v10 = vpop.f32.mrf.mxu1 }
  0xdb   : > { %v999_v3 = vadd.f32 %v998_v10, %v969_v9 }
  0xdc   : > { %v1054_v11 = vadd.f32 %v1053_v7, %v1025_v8 }
  0xe1   : > { %v1027_v12 = vpop.f32.mrf.mxu2  ;;  %v2475_v14 = vpop.f32.mrf.mxu0 }
  0xe2   : > { %v2473_v13 = vpop.f32.mrf.mxu3  ;;  %v2477_v15 = vpop.f32.mrf.mxu1  ;;  %v1028_v7 = vadd.f32 %v1027_v12, %v999_v3 }
  0xe9   : > { %v2479_v16 = vpop.f32.mrf.mxu2  ;;  %v1070_v18 = vpop.f32.mrf.mxu0 }
  0xea   : > { %v2481_v17 = vpop.f32.mrf.mxu3  ;;  %v1099_v19 = vpop.f32.mrf.mxu1  ;;  %v1071_v20 = vadd.f32 %v1070_v18, %v1042_v41 }
  0xec   : > { %v1100_v25 = vadd.f32 %v1099_v19, %v1071_v20 }
  0xf1   : > { %v1128_v21 = vpop.f32.mrf.mxu2  ;;  %v1072_v23 = vpop.f32.mrf.mxu0 }
  0xf2   : > { %v1157_v22 = vpop.f32.mrf.mxu3  ;;  %v1101_v24 = vpop.f32.mrf.mxu1  ;;  %v1073_v26 = vadd.f32 %v1072_v23, %v1044_v48  ;;  %v1129_v27 = vadd.f32 %v1128_v21, %v1100_v25  ;;  %v1057_v21 = vadd.f32 %v2473_v13, %v1028_v7 }
  0xf4   : > { %v1102_v28 = vadd.f32 %v1101_v24, %v1073_v26  ;;  %v1158_v31 = vadd.f32 %v1157_v22, %v1129_v27  ;;  %v1001_v24 = vadd.f32 %v2477_v15, %v2475_v14 }
  0xf6   : > { %v2489_v38 = vadd.f32 %v2486_v32, %v1158_v31  ;;  %v1030_v9 = vadd.f32 %v2479_v16, %v1001_v24 }
  0xf9   : > { %v1130_v29 = vpop.f32.mrf.mxu2  ;;  %v1075_v34 = vpop.f32.mrf.mxu0 }
  0xfa   : > { %v1159_v30 = vpop.f32.mrf.mxu3  ;;  %v1131_v33 = vadd.f32 %v1130_v29, %v1102_v28  ;;  %v1104_v35 = vpop.f32.mrf.mxu1  ;;  %v1076_v37 = vadd.f32 %v1075_v34, %v1047_v55 }
  0xfc   : > { %v1160_v36 = vadd.f32 %v1159_v30, %v1131_v33  ;;  %v1105_v41 = vadd.f32 %v1104_v35, %v1076_v37  ;;  %v1059_v30 = vadd.f32 %v2481_v17, %v1030_v9  ;;  %v2166_v33 = vmov 64.0  }
  0xfd   : > { %2106 = vrcp.f32 %v2166_v33 }
  0xfe   : > { %v2492_v39 = vadd.f32 %v2486_v32, %v1160_v36 }
 0x100   : > { %v1216_v40 = vadd.f32 %v2492_v39, %v2489_v38 }
 0x101   : > { %v1133_v42 = vpop.f32.mrf.mxu2  ;;  %v1077_v45 = vpop.f32.mrf.mxu0 }
 0x102   : > { %v1162_v43 = vpop.f32.mrf.mxu3  ;;  %v1134_v44 = vadd.f32 %v1133_v42, %v1105_v41  ;;  %v1106_v46 = vpop.f32.mrf.mxu1  ;;  %v1078_v48 = vadd.f32 %v1077_v45, %v1049_v62 }
 0x103   : > { %v2107_v36 = vpop.eup %2106 }
 0x104   : > { %v1163_v47 = vadd.f32 %v1162_v43, %v1134_v44  ;;  %v1107_v51 = vadd.f32 %v1106_v46, %v1078_v48  ;;  %v1230_v43 = vmul.f32 64.0, %v2107_v36  ;;  %vm1234_vm0 = vweird.f32 %v2107_v36 }
 0x106   : > { %v2497_v49 = vadd.f32 %v2486_v32, %v1163_v47  ;;  %v1231_v17 = vsub.f32 1.0, %v1230_v43 }
 0x108   : > { %v1217_v50 = vadd.f32 %v1216_v40, %v2497_v49  ;;  %v1232_v48 = vmul.f32 %v2107_v36, %v1231_v17 }
 0x109   : > { %v1135_v52 = vpop.f32.mrf.mxu2  ;;  %v1080_v55 = vpop.f32.mrf.mxu0 }
 0x10a   : > { %v1164_v53 = vpop.f32.mrf.mxu3  ;;  %v1136_v54 = vadd.f32 %v1135_v52, %v1107_v51  ;;  %v1109_v56 = vpop.f32.mrf.mxu1  ;;  %v1081_v58 = vadd.f32 %v1080_v55, %v1052_v5  ;;  %v1233_v52 = vadd.f32 %v2107_v36, %v1232_v48 }
 0x10c   : > { %v1165_v57 = vadd.f32 %v1164_v53, %v1136_v54  ;;  %v1110_v61 = vadd.f32 %v1109_v56, %v1081_v58  ;;  %v1235_v55 = vsel %vm1234_vm0, %v2107_v36, %v1233_v52 }
 0x10e   : > { %v2501_v59 = vadd.f32 %v2486_v32, %v1165_v57 }
 0x110   : > { %v1218_v60 = vadd.f32 %v1217_v50, %v2501_v59 }
 0x111   : > { %v1138_v62 = vpop.f32.mrf.mxu2  ;;  %v1082_v1 = vpop.f32.mrf.mxu0 }
 0x112   : > { %v1167_v63 = vpop.f32.mrf.mxu3  ;;  %v1139_v0 = vadd.f32 %v1138_v62, %v1110_v61  ;;  %v1111_v2 = vpop.f32.mrf.mxu1  ;;  %v1083_v6 = vadd.f32 %v1082_v1, %v1054_v11 }
 0x114   : > { %v1168_v4 = vadd.f32 %v1167_v63, %v1139_v0  ;;  %v1112_v19 = vadd.f32 %v1111_v2, %v1083_v6 }
 0x116   : > { %v1212_v8 = vadd.f32 %v2486_v32, %v1168_v4 }
 0x118   : > { %v1219_v18 = vadd.f32 %v1218_v60, %v1212_v8 }
 0x119   : > { %v1140_v5 = vpop.f32.mrf.mxu2  ;;  %v1085_v23 = vpop.f32.mrf.mxu0 }
 0x11a   : > { %v1169_v20 = vpop.f32.mrf.mxu3  ;;  %v1141_v22 = vadd.f32 %v1140_v5, %v1112_v19  ;;  %v1086_v26 = vadd.f32 %v1085_v23, %v1057_v21  ;;  %v1114_v27 = vpop.f32.mrf.mxu1 }
 0x11c   : > { %v1170_v25 = vadd.f32 %v1169_v20, %v1141_v22  ;;  %v1115_v12 = vadd.f32 %v1114_v27, %v1086_v26 }
 0x11e   : > { %v1213_v10 = vadd.f32 %v2486_v32, %v1170_v25 }
 0x120   : > { %v1220_v11 = vadd.f32 %v1219_v18, %v1213_v10 }
 0x121   : > { %v1143_v28 = vpop.f32.mrf.mxu2  ;;  %v1087_v13 = vpop.f32.mrf.mxu0 }
 0x122   : > { %v1172_v29 = vpop.f32.mrf.mxu3  ;;  %v1144_v31 = vadd.f32 %v1143_v28, %v1115_v12  ;;  %v1088_v35 = vadd.f32 %v1087_v13, %v1059_v30  ;;  %v1116_v15 = vpop.f32.mrf.mxu1 }
 0x124   : > { %v1173_v34 = vadd.f32 %v1172_v29, %v1144_v31  ;;  %v1117_v16 = vadd.f32 %v1116_v15, %v1088_v35 }
 0x126   : > { %v1214_v14 = vadd.f32 %v2486_v32, %v1173_v34 }
 0x128   : > { %v1221_v37 = vadd.f32 %v1220_v11, %v1214_v14 }
 0x129   : > { %v1145_v40 = vpop.f32.mrf.mxu2 }
 0x12a   : > { %v1146_v41 = vadd.f32 %v1145_v40, %v1117_v16  ;;  %v1174_v42 = vpop.f32.mrf.mxu3 }
 0x12c   : > { %v1175_v44 = vadd.f32 %v1174_v42, %v1146_v41 }
 0x12e   : > { %v1215_v45 = vadd.f32 %v2486_v32, %v1175_v44 }
 0x130   : > { %v1222_v46 = vadd.f32 %v1221_v37, %v1215_v45 }
 0x132   : > { %v1223_v47 = vrot.slane %v1222_v46, 4 }
 0x134   : > { %v1224_v50 = vadd.f32 %v1223_v47, %v1222_v46 }
 0x136   : > { %v1225_v51 = vrot.slane %v1224_v50, 2 }
 0x138   : > { %v1226_v53 = vadd.f32 %v1225_v51, %v1224_v50 }
 0x13a   : > { %v1227_v54 = vrot.slane %v1226_v53, 1 }
 0x13c   : > { %v1228_v56 = vadd.f32 %v1227_v54, %v1226_v53 }
 0x13e   : > { %v1236_v57 = vmul.f32 %v1235_v55, %v1228_v56 }
 0x140   : > { %v1237_v58 = vsub.f32 %v2489_v38, %v1236_v57  ;;  %v1238_v60 = vsub.f32 %v2492_v39, %v1236_v57  ;;  %v1239_v61 = vsub.f32 %v2497_v49, %v1236_v57  ;;  %v1240_v32 = vsub.f32 %v2501_v59, %v1236_v57 }
 0x141   : > { %v1241_v62 = vsub.f32 %v1212_v8, %v1236_v57  ;;  %v1242_v63 = vsub.f32 %v1213_v10, %v1236_v57  ;;  %v1243_v0 = vsub.f32 %v1214_v14, %v1236_v57  ;;  %v1244_v5 = vsub.f32 %v1215_v45, %v1236_v57 }
 0x142   : > { %v1245_v1 = vmul.f32 %v1237_v58, %v1237_v58  ;;  %v1246_v2 = vmul.f32 %v1238_v60, %v1238_v60  ;;  %v1247_v3 = vmul.f32 %v1239_v61, %v1239_v61  ;;  %v1248_v6 = vmul.f32 %v1240_v32, %v1240_v32 }
 0x143   : > { %v1249_v18 = vmul.f32 %v1241_v62, %v1241_v62  ;;  %v1250_v20 = vmul.f32 %v1242_v63, %v1242_v63  ;;  %v1251_v21 = vmul.f32 %v1243_v0, %v1243_v0  ;;  %v1252_v22 = vmul.f32 %v1244_v5, %v1244_v5 }
 0x144   : > { %v1253_v4 = vadd.f32 %v1246_v2, %v1245_v1 }
 0x146   : > { %v1254_v7 = vadd.f32 %v1253_v4, %v1247_v3 }
 0x148   : > { %v1255_v19 = vadd.f32 %v1254_v7, %v1248_v6 }
 0x14a   : > { %v1256_v38 = vadd.f32 %v1255_v19, %v1249_v18 }
 0x14c   : > { %v1257_v39 = vadd.f32 %v1256_v38, %v1250_v20 }
 0x14e   : > { %v1258_v49 = vadd.f32 %v1257_v39, %v1251_v21 }
 0x150   : > { %v1259_v23 = vadd.f32 %v1258_v49, %v1252_v22 }
 0x152   : > { %v1260_v59 = vrot.slane %v1259_v23, 4 }
 0x154   : > { %v1261_v8 = vadd.f32 %v1260_v59, %v1259_v23 }
 0x156   : > { %v1262_v24 = vrot.slane %v1261_v8, 2 }
 0x158   : > { %v1263_v25 = vadd.f32 %v1262_v24, %v1261_v8 }
 0x15a   : > { %v1264_v26 = vrot.slane %v1263_v25, 1 }
 0x15c   : > { %v1265_v27 = vadd.f32 %v1264_v26, %v1263_v25 }
 0x15e   : > { %v1266_v9 = vmul.f32 %v1265_v27, %v1235_v55 }
 0x160   : > { %v1267_v10 = vadd.f32 1e-05, %v1266_v9 }
 0x162   : > { %2108 = vrsqrt.f32 %v1267_v10  ;;  %vm1274_vm2 = vweird.f32 %v1267_v10 }
 0x168   : > { %v2109_v11 = vpop.eup %2108 }
 0x169   : > { %v1269_v12 = vmul.f32 %v2109_v11, %v1267_v10  ;;  %vm1275_vm1 = vweird.f32 %v2109_v11 }
 0x16a   : > { %vm1276_vm3 = vmor %vm1274_vm2, %vm1275_vm1 }
 0x16b   : > { %v1270_v28 = vmul.f32 %v2109_v11, %v1269_v12 }
 0x16d   : > { %v1271_v29 = vmul.f32 0.5, %v1270_v28 }
 0x16f   : > { %v1272_v30 = vsub.f32 1.5, %v1271_v29 }
 0x171   : > { %v1273_v31 = vmul.f32 %v2109_v11, %v1272_v30 }
 0x173   : > { %v1277_v13 = vsel %vm1276_vm3, %v2109_v11, %v1273_v31 }
 0x174   : > { %v2517_v33 = vmul.f32 %v1277_v13, %v1237_v58  ;;  %v2519_v34 = vmul.f32 %v1277_v13, %v1238_v60  ;;  %v2521_v35 = vmul.f32 %v1277_v13, %v1239_v61  ;;  %v2523_v14 = vmul.f32 %v1277_v13, %v1240_v32 }
 0x175   : > { %v2525_v15 = vmul.f32 %v1277_v13, %v1241_v62  ;;  %v2527_v36 = vmul.f32 %v1277_v13, %v1242_v63  ;;  %v2529_v37 = vmul.f32 %v1277_v13, %v1243_v0  ;;  %v2531_v16 = vmul.f32 %v1277_v13, %v1244_v5 }
 0x176   : > { %v1949_v40 = vmul.f32 -0.4, %v2517_v33  ;;  %v1950_v41 = vmul.f32 -0.4, %v2519_v34  ;;  %v1951_v42 = vmul.f32 -0.4, %v2521_v35 }
 0x177   : > { %v1952_v43 = vmul.f32 -0.4, %v2523_v14  ;;  %v1953_v44 = vmul.f32 -0.4, %v2525_v15  ;;  %v1954_v45 = vmul.f32 -0.4, %v2527_v36 }
 0x178   : > { %v1955_v17 = vmul.f32 -0.4, %v2529_v37  ;;  %v1302_v46 = vmul.f32 1.442695, %v1949_v40  ;;  %v1304_v47 = vmul.f32 1.442695, %v1950_v41 }
 0x179   : > { %v1306_v48 = vmul.f32 1.442695, %v1951_v42  ;;  %v1308_v50 = vmul.f32 1.442695, %v1952_v43  ;;  %v1956_v51 = vmul.f32 -0.4, %v2531_v16 }
 0x17a   : > { %2110 = vpow2.f32 %v1302_v46  ;;  %v1310_v52 = vmul.f32 1.442695, %v1953_v44  ;;  %v1312_v53 = vmul.f32 1.442695, %v1954_v45  ;;  %v1314_v54 = vmul.f32 1.442695, %v1955_v17 }
 0x17b   : > { %2112 = vpow2.f32 %v1304_v47  ;;  %v1316_v55 = vmul.f32 1.442695, %v1956_v51 }
 0x17c   : > { %2114 = vpow2.f32 %v1306_v48 }
 0x17d   : > { %2116 = vpow2.f32 %v1308_v50 }
 0x17e   : > { %2118 = vpow2.f32 %v1310_v52 }
 0x17f   : > { %2120 = vpow2.f32 %v1312_v53 }
 0x180   : > { %v2111_v56 = vpop.eup %2110  ;;  %2122 = vpow2.f32 %v1314_v54 }
 0x181   : > { %v2113_v57 = vpop.eup %2112  ;;  %v2541_v58 = vadd.f32 1.0, %v2111_v56  ;;  %2124 = vpow2.f32 %v1316_v55 }
 0x182   : > { %v2115_v60 = vpop.eup %2114  ;;  %v2543_v61 = vadd.f32 1.0, %v2113_v57 }
 0x183   : > { %v2117_v32 = vpop.eup %2116  ;;  %v2545_v62 = vadd.f32 1.0, %v2115_v60  ;;  %2126 = vrcp.f32 %v2541_v58  ;;  %v1337_v3 = vand.u32 2147483648, %v2541_v58  ;;  %vm1331_vm4 = vweird.f32 %v2541_v58 }
 0x184   : > { %v2119_v63 = vpop.eup %2118  ;;  %v2548_v0 = vadd.f32 1.0, %v2117_v32  ;;  %2128 = vrcp.f32 %v2543_v61  ;;  %v1352_v6 = vand.u32 2147483648, %v2543_v61  ;;  %v1335_v5 = vand.u32 2147483647, %v2541_v58 }
 0x185   : > { %v2121_v1 = vpop.eup %2120  ;;  %v2551_v2 = vadd.f32 1.0, %v2119_v63  ;;  %2130 = vrcp.f32 %v2545_v62  ;;  %v1338_v21 = vor.u32 1.1754944e-38, %v1337_v3  ;;  %vm1346_vm5 = vweird.f32 %v2543_v61 }
 0x186   : > { %v2123_v4 = vpop.eup %2122  ;;  %v2556_v18 = vadd.f32 1.0, %v2121_v1  ;;  %2132 = vrcp.f32 %v2548_v0  ;;  %v1350_v39 = vand.u32 2147483647, %v2543_v61  ;;  %v1367_v22 = vand.u32 2147483648, %v2545_v62 }
 0x187   : > { %v2125_v7 = vpop.eup %2124  ;;  %2134 = vrcp.f32 %v2551_v2  ;;  %v2571_v49 = vadd.f32 1.0, %v2123_v4  ;;  %v1353_v59 = vor.u32 1.1754944e-38, %v1352_v6  ;;  %vm1361_vm6 = vweird.f32 %v2545_v62 }
 0x188   : > { %v1365_v8 = vand.u32 2147483647, %v2545_v62  ;;  %v2579_v25 = vadd.f32 1.0, %v2125_v7  ;;  %v1380_v27 = vand.u32 2147483647, %v2548_v0  ;;  %2136 = vrcp.f32 %v2556_v18 }
 0x189   : > { %v2559_v19 = vpop.eup %2126  ;;  %vm2584_vm8 = vcmp.eq.f32.partialorder %v1335_v5, 8.507059e+37  ;;  %vm1376_vm9 = vweird.f32 %v2548_v0  ;;  %v1382_v12 = vand.u32 2147483648, %v2548_v0  ;;  %vm2593_vm10 = vcmp.eq.f32.partialorder %v1350_v39, 8.507059e+37 }
 0x18a   : > { %v2564_v20 = vpop.eup %2128  ;;  %v1327_v38 = vmul.f32 %v2559_v19, %v2541_v58  ;;  %vm1332_vm7 = vweird.f32 %v2559_v19  ;;  %v1368_v31 = vor.u32 1.1754944e-38, %v1367_v22  ;;  %vm1391_vm11 = vweird.f32 %v2551_v2 }
 0x18b   : > { %v1342_v23 = vmul.f32 %v2564_v20, %v2543_v61  ;;  %v2577_v24 = vpop.eup %2130  ;;  %v1395_v13 = vand.u32 2147483647, %v2551_v2  ;;  %vm1347_vm12 = vweird.f32 %v2564_v20  ;;  %vm2601_vm13 = vcmp.eq.f32.partialorder %v1365_v8, 8.507059e+37  ;;  %vm2620_vm0 = vmor %vm1331_vm4, %vm1332_vm7 }
 0x18c   : > { %v1328_v26 = vsub.f32 1.0, %v1327_v38  ;;  %v1357_v11 = vmul.f32 %v2577_v24, %v2545_v62  ;;  %v2133_v28 = vpop.eup %2132  ;;  %vm2607_vm14 = vcmp.eq.f32.partialorder %v1380_v27, 8.507059e+37  ;;  %v1397_v47 = vand.u32 2147483648, %v2551_v2  ;;  %vm2636_vm2 = vmor %vm1346_vm5, %vm1347_vm12 }
 0x18d   : > { %v1343_v10 = vsub.f32 1.0, %v1342_v23  ;;  %v2135_v40 = vpop.eup %2134  ;;  %v1372_v44 = vmul.f32 %v2133_v28, %v2548_v0  ;;  %vm1362_vm15 = vweird.f32 %v2577_v24  ;;  %v1383_v54 = vor.u32 1.1754944e-38, %v1382_v12 }
 0x18e   : > { %v1329_v29 = vmul.f32 %v2559_v19, %v1328_v26  ;;  %v1358_v42 = vsub.f32 1.0, %v1357_v11  ;;  %v1387_v46 = vmul.f32 %v2135_v40, %v2551_v2  ;;  %v2137_v52 = vpop.eup %2136  ;;  %vm2624_vm1 = vcmp.eq.f32.partialorder %v1395_v13, 8.507059e+37  ;;  %vm2646_vm4 = vmor %vm1361_vm6, %vm1362_vm15 }
 0x18f   : > { %v1344_v41 = vmul.f32 %v2564_v20, %v1343_v10  ;;  %v1373_v51 = vsub.f32 1.0, %v1372_v44  ;;  %2138 = vrcp.f32 %v2571_v49  ;;  %vm1377_vm3 = vweird.f32 %v2133_v28 }
 0x190   : > { %v1330_v45 = vadd.f32 %v2559_v19, %v1329_v29  ;;  %v1359_v50 = vmul.f32 %v2577_v24, %v1358_v42  ;;  %v1388_v55 = vsub.f32 1.0, %v1387_v46  ;;  %vm1392_vm7 = vweird.f32 %v2135_v40  ;;  %vm1378_vm5 = vmor %vm1376_vm9, %vm1377_vm3 }
 0x191   : > { %v1345_v48 = vadd.f32 %v2564_v20, %v1344_v41  ;;  %v1374_v32 = vmul.f32 %v2133_v28, %v1373_v51  ;;  %v1402_v61 = vmul.f32 %v2137_v52, %v2556_v18  ;;  %v1398_v7 = vor.u32 1.1754944e-38, %v1397_v47  ;;  %vm1393_vm6 = vmor %vm1391_vm11, %vm1392_vm7 }
 0x192   : > { %v1334_v57 = vsel %vm2620_vm0, %v2559_v19, %v1330_v45  ;;  %v1360_v60 = vadd.f32 %v2577_v24, %v1359_v50  ;;  %v1389_v3 = vmul.f32 %v2135_v40, %v1388_v55  ;;  %v1410_v19 = vand.u32 2147483647, %v2556_v18 }
 0x193   : > { %v1349_v63 = vsel %vm2636_vm2, %v2564_v20, %v1345_v48  ;;  %v1375_v6 = vadd.f32 %v2133_v28, %v1374_v32  ;;  %v1339_v62 = vsel %vm2584_vm8, %v1338_v21, %v1334_v57  ;;  %v1403_v20 = vsub.f32 1.0, %v1402_v61 }
 0x194   : > { %v1364_v4 = vsel %vm2646_vm4, %v2577_v24, %v1360_v60  ;;  %v1390_v5 = vadd.f32 %v2135_v40, %v1389_v3  ;;  %v1412_v38 = vand.u32 2147483648, %v2556_v18  ;;  %v1354_v39 = vsel %vm2593_vm10, %v1353_v59, %v1349_v63 }
 0x195   : > { %v1379_v22 = vsel %vm1378_vm5, %v2133_v28, %v1375_v6  ;;  %vm1407_vm12 = vweird.f32 %v2137_v52  ;;  %2140 = vrcp.f32 %v2579_v25  ;;  %v2139_v23 = vpop.eup %2138  ;;  %v1369_v0 = vsel %vm2601_vm13, %v1368_v31, %v1364_v4 }
 0x196   : > { %v1384_v21 = vsel %vm2607_vm14, %v1383_v54, %v1379_v22  ;;  %v1394_v8 = vsel %vm1393_vm6, %v2135_v40, %v1390_v5  ;;  %v1404_v24 = vmul.f32 %v2137_v52, %v1403_v20  ;;  %vm1406_vm8 = vweird.f32 %v2556_v18 }
 0x197   : > { %v1399_v59 = vsel %vm2624_vm1, %v1398_v7, %v1394_v8  ;;  %v1417_v2 = vmul.f32 %v2139_v23, %v2571_v49  ;;  %vm1411_vm9 = vcmp.eq.f32.partialorder %v1410_v19, 8.507059e+37  ;;  %v1446_v27 = vmul.f32 %v1339_v62, %v2517_v33  ;;  %vm1408_vm10 = vmor %vm1406_vm8, %vm1407_vm12 }
 0x198   : > { %v1405_v26 = vadd.f32 %v2137_v52, %v1404_v24  ;;  %v1447_v9 = vmul.f32 %v1354_v39, %v2519_v34  ;;  %v1413_v10 = vor.u32 1.1754944e-38, %v1412_v38  ;;  %v1448_v18 = vmul.f32 %v1369_v0, %v2521_v35 }
 0x199   : > { %v1418_v11 = vsub.f32 1.0, %v1417_v2  ;;  %v1449_v12 = vmul.f32 %v1384_v21, %v2523_v14  ;;  %v1427_v33 = vand.u32 2147483648, %v2571_v49  ;;  %v1450_v34 = vmul.f32 %v1399_v59, %v2525_v15 }
 0x19a   : > { %v1409_v28 = vsel %vm1408_vm10, %v2137_v52, %v1405_v26  ;;  %v2060_v29 = vpack.c.bf16 %v1447_v9, %v1446_v27  ;;  %vm1422_vm11 = vweird.f32 %v2139_v23  ;;  %v1425_v41 = vand.u32 2147483647, %v2571_v49 }
 0x19b   : > { %v2141_v30 = vpop.eup %2140  ;;  %v1414_v31 = vsel %vm1411_vm9, %v1413_v10, %v1409_v28  ;;  %v1419_v13 = vmul.f32 %v2139_v23, %v1418_v11  ;;  %v2065_v40 = vpack.c.bf16 %v1449_v12, %v1448_v18  ;;  %vm1421_vm13 = vweird.f32 %v2571_v49 }
 0x19c   : > { %v1432_v42 = vmul.f32 %v2141_v30, %v2579_v25  ;;  %v1451_v35 = vmul.f32 %v1414_v31, %v2527_v36  ;;  %2061 = vst [vmem:[%s2679_s16] sm:$0xff] %v2060_v29   ;;  %vm1423_vm14 = vmor %vm1421_vm13, %vm1422_vm11  ;;  %v1428_v45 = vor.u32 1.1754944e-38, %v1427_v33  ;;  %v1442_v17 = vand.u32 2147483648, %v2579_v25 }
 0x19d   : > { %v1420_v14 = vadd.f32 %v2139_v23, %v1419_v13  ;;  %2077 = vst [vmem:[%s2679_s16 + $0x8] sm:$0xff] %v2065_v40   ;;  %vm1426_vm15 = vcmp.eq.f32.partialorder %v1425_v41, 8.507059e+37  ;;  %vm1437_vm0 = vweird.f32 %v2141_v30  ;;  %v1440_v47 = vand.u32 2147483647, %v2579_v25 }
 0x19e   : > { %v1433_v15 = vsub.f32 1.0, %v1432_v42  ;;  %v2070_v43 = vpack.c.bf16 %v1451_v35, %v1450_v34  ;;  %vm1436_vm1 = vweird.f32 %v2579_v25  ;;  %v1443_v49 = vor.u32 1.1754944e-38, %v1442_v17 }
 0x19f   : > { %v1424_v44 = vsel %vm1423_vm14, %v2139_v23, %v1420_v14  ;;  %vm1438_vm2 = vmor %vm1436_vm1, %vm1437_vm0  ;;  %vm1441_vm3 = vcmp.eq.f32.partialorder %v1440_v47, 8.507059e+37 }
 0x1a0   : > { %v1434_v46 = vmul.f32 %v2141_v30, %v1433_v15  ;;  %2078 = vst [vmem:[%s2679_s16 + $0x10] sm:$0xff] %v2070_v43   ;;  %v1429_v36 = vsel %vm1426_vm15, %v1428_v45, %v1424_v44 }
 0x1a1   : > { %v1452_v51 = vmul.f32 %v1429_v36, %v2529_v37 }
 0x1a2   : > { %v1435_v48 = vadd.f32 %v2141_v30, %v1434_v46 }
 0x1a4   : > { %v1439_v50 = vsel %vm1438_vm2, %v2141_v30, %v1435_v48 }
 0x1a5   : > { %v1444_v52 = vsel %vm1441_vm3, %v1443_v49, %v1439_v50 }
 0x1a6   : > { %v1453_v53 = vmul.f32 %v1444_v52, %v2531_v16 }
 0x1a8   : > { %v2075_v54 = vpack.c.bf16 %v1453_v53, %v1452_v51 }
 0x1aa   : > { %2079 = vst [vmem:[%s2679_s16 + $0x18] sm:$0xff] %v2075_v54  }
 0x1ab PF: > { %s13_s14 = sadd.s32 1, %s2164_s14   ;;  %s2728_s12 = smov %s2160_s13 }
 0x1ac   : > { %p10_p5 = scmp.ge.s32.totalorder %s13_s14, 4   ;;  %s2729_s13 = smov %s2731_s15 }
 0x1ae   :  { %12 = sbr.rel (!%p10_p5) target bundleno = 2 (0x2), region = 73 }

// kernel: discriminator_forward.7
= control target key start
LH: loop header
LB: loop body
LE: loop exit
PB: predicated region body
PF: predicated region fallthrough
CT: control target
= control target key end

     0   :  { %s4057_s12 = smov 0   ;;  %s4059_s13 = smov 0   ;;  %s5786_s0 = inlined_call_operand.vmem [shape: bf16[2,16,2048], index: 0, kind: input, shape index: {}]   ;;  %s5787_s1 = inlined_call_operand.vmem [shape: bf16[2048,256], index: 1, kind: input, shape index: {}]   ;;  %s5788_s2 = inlined_call_operand.vmem [shape: f32[1,256], index: 2, kind: input, shape index: {}]   ;;  %s5789_s3 = inlined_call_operand.vmem [shape: bf16[2,16,256], index: 3, kind: output, shape index: {}]  }
   0x1   :  { %s4061_s14 = smov 0  }
   0x2 LB: > { %s25_s15 = sadd.s32 1, %s4030_s13  ;;  %p2592_p0 = scmp.ge.s32.totalorder %s4034_s14, 1  ;;  %s4034_s14 = sphi %s4061_s14, %s13_s14   ;;  %s4030_s13 = sphi %s4059_s13, %s5797_s13   ;;  %s4026_s12 = sphi %s4057_s12, %s5796_s12  }
   0x3   : > { %p27_p1 = scmp.ge.s32.totalorder %s25_s15, 2  ;;  %p168_p2 = scmp.lt.s32.totalorder %s4034_s14, 3 }
   0x5   : > { %s5799_s15 = smov (%p27_p1, %s25_s15), 0  ;;  %p169_p3 = pnand %p2592_p0, %p168_p2 }
   0x6   : > { %p203_p4 = scmp.lt.s32.totalorder (!%p169_p3), %s4026_s12, 1 }
   0x7   : > { %172 = sbr.rel (%p169_p3) target bundleno = 512 (0x200), region = 32 }
   0xc   : > { %v2719_v0 = vld [vmem:[%s5787_s1 + $0x70] sm:$0xf]  ;;  %v3724_v1 = vld [vmem:[%s5787_s1 + $0x74] sm:$0xf0]  ;;  %v2711_v11 = vld [vmem:[%s5787_s1 + $0x60] sm:$0xf] }
   0xd   : > { %v2783_v2 = vld [vmem:[%s5787_s1 + $0xf0] sm:$0xf]  ;;  %v2720_v3 = vor.u32 %v3724_v1, %v2719_v0  ;;  %v3740_v4 = vld [vmem:[%s5787_s1 + $0xf4] sm:$0xf0]  ;;  %v3722_v13 = vld [vmem:[%s5787_s1 + $0x64] sm:$0xf0] }
   0xe   : > { %v2847_v5 = vld [vmem:[%s5787_s1 + $0x170] sm:$0xf]  ;;  %v3756_v6 = vld [vmem:[%s5787_s1 + $0x174] sm:$0xf0]  ;;  %v2784_v7 = vor.u32 %v3740_v4, %v2783_v2  ;;  %v2775_v14 = vld [vmem:[%s5787_s1 + $0xe0] sm:$0xf]  ;;  %v2712_v16 = vor.u32 %v3722_v13, %v2711_v11 }
   0xf   : > { %v2848_v8 = vor.u32 %v3756_v6, %v2847_v5  ;;  %v2911_v9 = vld [vmem:[%s5787_s1 + $0x1f0] sm:$0xf]  ;;  %v3772_v10 = vld [vmem:[%s5787_s1 + $0x1f4] sm:$0xf0]  ;;  %1868 = vmatpush.bf16.msra.mxu0 %v2720_v3  ;;  %v3738_v15 = vld [vmem:[%s5787_s1 + $0xe4] sm:$0xf0] }
  0x10   : > { %v2912_v12 = vor.u32 %v3772_v10, %v2911_v9  ;;  %1882 = vmatpush.bf16.msra.mxu1 %v2784_v7  ;;  %v2776_v17 = vor.u32 %v3738_v15, %v2775_v14  ;;  %v2839_v18 = vld [vmem:[%s5787_s1 + $0x160] sm:$0xf]  ;;  %v3754_v19 = vld [vmem:[%s5787_s1 + $0x164] sm:$0xf0]  ;;  %v2703_v23 = vld [vmem:[%s5787_s1 + $0x50] sm:$0xf] }
  0x11   : > { %1896 = vmatpush.bf16.msra.mxu2 %v2848_v8  ;;  %v2903_v20 = vld [vmem:[%s5787_s1 + $0x1e0] sm:$0xf]  ;;  %v2840_v21 = vor.u32 %v3754_v19, %v2839_v18  ;;  %v3770_v22 = vld [vmem:[%s5787_s1 + $0x1e4] sm:$0xf0]  ;;  %v3720_v24 = vld [vmem:[%s5787_s1 + $0x54] sm:$0xf0] }
  0x12   : > { %1910 = vmatpush.bf16.msra.mxu3 %v2912_v12  ;;  %v2904_v25 = vor.u32 %v3770_v22, %v2903_v20  ;;  %v2767_v26 = vld [vmem:[%s5787_s1 + $0xd0] sm:$0xf]  ;;  %v3736_v27 = vld [vmem:[%s5787_s1 + $0xd4] sm:$0xf0]  ;;  %v2704_v29 = vor.u32 %v3720_v24, %v2703_v23  ;;  %v2695_v35 = vld [vmem:[%s5787_s1 + $0x40] sm:$0xf] }
  0x13   : > { %v2831_v28 = vld [vmem:[%s5787_s1 + $0x150] sm:$0xf]  ;;  %1869 = vmatpush.bf16.msra.mxu0 %v2712_v16  ;;  %v3752_v30 = vld [vmem:[%s5787_s1 + $0x154] sm:$0xf0]  ;;  %v2768_v33 = vor.u32 %v3736_v27, %v2767_v26  ;;  %v3718_v36 = vld [vmem:[%s5787_s1 + $0x44] sm:$0xf0] }
  0x14   : > { %v2895_v31 = vld [vmem:[%s5787_s1 + $0x1d0] sm:$0xf]  ;;  %v3768_v32 = vld [vmem:[%s5787_s1 + $0x1d4] sm:$0xf0]  ;;  %1883 = vmatpush.bf16.msra.mxu1 %v2776_v17  ;;  %v2832_v34 = vor.u32 %v3752_v30, %v2831_v28  ;;  %v2759_v37 = vld [vmem:[%s5787_s1 + $0xc0] sm:$0xf]  ;;  %v2696_v44 = vor.u32 %v3718_v36, %v2695_v35 }
  0x15   : > { %1897 = vmatpush.bf16.msra.mxu2 %v2840_v21  ;;  %v2896_v38 = vor.u32 %v3768_v32, %v2895_v31  ;;  %v3734_v39 = vld [vmem:[%s5787_s1 + $0xc4] sm:$0xf0]  ;;  %v2823_v40 = vld [vmem:[%s5787_s1 + $0x140] sm:$0xf]  ;;  %v2687_v47 = vld [vmem:[%s5787_s1 + $0x30] sm:$0xf] }
  0x16   : > { %1911 = vmatpush.bf16.msra.mxu3 %v2904_v25  ;;  %v3750_v41 = vld [vmem:[%s5787_s1 + $0x144] sm:$0xf0]  ;;  %v2887_v42 = vld [vmem:[%s5787_s1 + $0x1c0] sm:$0xf]  ;;  %v2760_v45 = vor.u32 %v3734_v39, %v2759_v37  ;;  %v3716_v48 = vld [vmem:[%s5787_s1 + $0x34] sm:$0xf0] }
  0x17   : > { %v3766_v43 = vld [vmem:[%s5787_s1 + $0x1c4] sm:$0xf0]  ;;  %1870 = vmatpush.bf16.msra.mxu0 %v2704_v29  ;;  %v2824_v46 = vor.u32 %v3750_v41, %v2823_v40  ;;  %v2751_v49 = vld [vmem:[%s5787_s1 + $0xb0] sm:$0xf]  ;;  %v3732_v51 = vld [vmem:[%s5787_s1 + $0xb4] sm:$0xf0]  ;;  %v2688_v56 = vor.u32 %v3716_v48, %v2687_v47 }
  0x18   : > { %1884 = vmatpush.bf16.msra.mxu1 %v2768_v33  ;;  %v2888_v50 = vor.u32 %v3766_v43, %v2887_v42  ;;  %v2815_v52 = vld [vmem:[%s5787_s1 + $0x130] sm:$0xf]  ;;  %v3748_v53 = vld [vmem:[%s5787_s1 + $0x134] sm:$0xf0]  ;;  %v2752_v57 = vor.u32 %v3732_v51, %v2751_v49  ;;  %v2679_v59 = vld [vmem:[%s5787_s1 + $0x20] sm:$0xf] }
  0x19   : > { %1898 = vmatpush.bf16.msra.mxu2 %v2832_v34  ;;  %v2879_v54 = vld [vmem:[%s5787_s1 + $0x1b0] sm:$0xf]  ;;  %v3764_v55 = vld [vmem:[%s5787_s1 + $0x1b4] sm:$0xf0]  ;;  %v2816_v58 = vor.u32 %v3748_v53, %v2815_v52  ;;  %v3714_v60 = vld [vmem:[%s5787_s1 + $0x24] sm:$0xf0] }
  0x1a   : > { %1912 = vmatpush.bf16.msra.mxu3 %v2896_v38  ;;  %v2743_v61 = vld [vmem:[%s5787_s1 + $0xa0] sm:$0xf]  ;;  %v2880_v62 = vor.u32 %v3764_v55, %v2879_v54  ;;  %v3730_v63 = vld [vmem:[%s5787_s1 + $0xa4] sm:$0xf0]  ;;  %v2680_v4 = vor.u32 %v3714_v60, %v2679_v59  ;;  %v2671_v7 = vld [vmem:[%s5787_s1 + $0x10] sm:$0xf] }
  0x1b   : > { %1871 = vmatpush.bf16.msra.mxu0 %v2696_v44  ;;  %v2807_v0 = vld [vmem:[%s5787_s1 + $0x120] sm:$0xf]  ;;  %v3746_v1 = vld [vmem:[%s5787_s1 + $0x124] sm:$0xf0]  ;;  %v2744_v5 = vor.u32 %v3730_v63, %v2743_v61  ;;  %v3712_v8 = vld [vmem:[%s5787_s1 + $0x14] sm:$0xf0] }
  0x1c   : > { %1885 = vmatpush.bf16.msra.mxu1 %v2760_v45  ;;  %v2871_v2 = vld [vmem:[%s5787_s1 + $0x1a0] sm:$0xf]  ;;  %v3762_v3 = vld [vmem:[%s5787_s1 + $0x1a4] sm:$0xf0]  ;;  %v2808_v6 = vor.u32 %v3746_v1, %v2807_v0  ;;  %v2735_v9 = vld [vmem:[%s5787_s1 + $0x90] sm:$0xf]  ;;  %v2672_v16 = vor.u32 %v3712_v8, %v2671_v7 }
  0x1d   : > { %1899 = vmatpush.bf16.msra.mxu2 %v2824_v46  ;;  %v2872_v10 = vor.u32 %v3762_v3, %v2871_v2  ;;  %v3728_v11 = vld [vmem:[%s5787_s1 + $0x94] sm:$0xf0]  ;;  %v2799_v12 = vld [vmem:[%s5787_s1 + $0x110] sm:$0xf]  ;;  %v2663_v17 = vld [vmem:[%s5787_s1] sm:$0xf] }
  0x1e   : > { %1913 = vmatpush.bf16.msra.mxu3 %v2888_v50  ;;  %v3744_v13 = vld [vmem:[%s5787_s1 + $0x114] sm:$0xf0]  ;;  %v2863_v14 = vld [vmem:[%s5787_s1 + $0x190] sm:$0xf]  ;;  %v3710_v18 = vld [vmem:[%s5787_s1 + $0x4] sm:$0xf0]  ;;  %v2736_v19 = vor.u32 %v3728_v11, %v2735_v9 }
  0x1f   : > { %1872 = vmatpush.bf16.msra.mxu0 %v2688_v56  ;;  %v3760_v15 = vld [vmem:[%s5787_s1 + $0x194] sm:$0xf0]  ;;  %v2800_v20 = vor.u32 %v3744_v13, %v2799_v12  ;;  %v2727_v21 = vld [vmem:[%s5787_s1 + $0x80] sm:$0xf]  ;;  %v3726_v22 = vld [vmem:[%s5787_s1 + $0x84] sm:$0xf0]  ;;  %v2664_v31 = vor.u32 %v3710_v18, %v2663_v17 }
  0x20   : > { %1886 = vmatpush.bf16.msra.mxu1 %v2752_v57  ;;  %v2791_v23 = vld [vmem:[%s5787_s1 + $0x100] sm:$0xf]  ;;  %v2864_v24 = vor.u32 %v3760_v15, %v2863_v14  ;;  %v3742_v25 = vld [vmem:[%s5787_s1 + $0x104] sm:$0xf0]  ;;  %v2975_v28 = vld [vmem:[%s5787_s1 + $0x270] sm:$0xf]  ;;  %v2728_v35 = vor.u32 %v3726_v22, %v2727_v21 }
  0x21   : > { %1900 = vmatpush.bf16.msra.mxu2 %v2816_v58  ;;  %v2855_v26 = vld [vmem:[%s5787_s1 + $0x180] sm:$0xf]  ;;  %v3758_v27 = vld [vmem:[%s5787_s1 + $0x184] sm:$0xf0]  ;;  %v3788_v29 = vld [vmem:[%s5787_s1 + $0x274] sm:$0xf0]  ;;  %v2792_v36 = vor.u32 %v3742_v25, %v2791_v23 }
  0x22   : > { %1914 = vmatpush.bf16.msra.mxu3 %v2880_v62  ;;  %v3039_v30 = vld [vmem:[%s5787_s1 + $0x2f0] sm:$0xf]  ;;  %v3804_v32 = vld [vmem:[%s5787_s1 + $0x2f4] sm:$0xf0]  ;;  %v2856_v39 = vor.u32 %v3758_v27, %v2855_v26  ;;  %v2976_v40 = vor.u32 %v3788_v29, %v2975_v28  ;;  %v2967_v43 = vld [vmem:[%s5787_s1 + $0x260] sm:$0xf] }
  0x23   : > { %1873 = vmatpush.bf16.msra.mxu0 %v2680_v4  ;;  %v3103_v33 = vld [vmem:[%s5787_s1 + $0x370] sm:$0xf]  ;;  %v3820_v34 = vld [vmem:[%s5787_s1 + $0x374] sm:$0xf0]  ;;  %v3040_v41 = vor.u32 %v3804_v32, %v3039_v30  ;;  %v3786_v44 = vld [vmem:[%s5787_s1 + $0x264] sm:$0xf0] }
  0x24   : > { %1887 = vmatpush.bf16.msra.mxu1 %v2744_v5  ;;  %v3167_v37 = vld [vmem:[%s5787_s1 + $0x3f0] sm:$0xf]  ;;  %v3836_v38 = vld [vmem:[%s5787_s1 + $0x3f4] sm:$0xf0]  ;;  %v3104_v42 = vor.u32 %v3820_v34, %v3103_v33  ;;  %v3031_v45 = vld [vmem:[%s5787_s1 + $0x2e0] sm:$0xf]  ;;  %v2968_v52 = vor.u32 %v3786_v44, %v2967_v43 }
  0x25   : > { %1901 = vmatpush.bf16.msra.mxu2 %v2808_v6  ;;  %v3168_v46 = vor.u32 %v3836_v38, %v3167_v37  ;;  %v3802_v47 = vld [vmem:[%s5787_s1 + $0x2e4] sm:$0xf0]  ;;  %v3095_v48 = vld [vmem:[%s5787_s1 + $0x360] sm:$0xf]  ;;  %v2959_v53 = vld [vmem:[%s5787_s1 + $0x250] sm:$0xf] }
  0x26   : > { %1915 = vmatpush.bf16.msra.mxu3 %v2872_v10  ;;  %v3818_v49 = vld [vmem:[%s5787_s1 + $0x364] sm:$0xf0]  ;;  %v3159_v50 = vld [vmem:[%s5787_s1 + $0x3e0] sm:$0xf]  ;;  %v3784_v54 = vld [vmem:[%s5787_s1 + $0x254] sm:$0xf0]  ;;  %v3032_v56 = vor.u32 %v3802_v47, %v3031_v45 }
  0x27   : > { %1874 = vmatpush.bf16.msra.mxu0 %v2672_v16  ;;  %v3834_v51 = vld [vmem:[%s5787_s1 + $0x3e4] sm:$0xf0]  ;;  %v3023_v55 = vld [vmem:[%s5787_s1 + $0x2d0] sm:$0xf]  ;;  %v3096_v57 = vor.u32 %v3818_v49, %v3095_v48  ;;  %v3800_v58 = vld [vmem:[%s5787_s1 + $0x2d4] sm:$0xf0]  ;;  %v2960_v2 = vor.u32 %v3784_v54, %v2959_v53 }
  0x28   : > { %1888 = vmatpush.bf16.msra.mxu1 %v2736_v19  ;;  %v3087_v59 = vld [vmem:[%s5787_s1 + $0x350] sm:$0xf]  ;;  %s5801_s12 = smov (!%p203_p4, %s4026_s12), 1  ;;  %v3160_v60 = vor.u32 %v3834_v51, %v3159_v50  ;;  %v3816_v61 = vld [vmem:[%s5787_s1 + $0x354] sm:$0xf0]  ;;  %v3024_v7 = vor.u32 %v3800_v58, %v3023_v55 }
  0x29   : > { %1902 = vmatpush.bf16.msra.mxu2 %v2800_v20  ;;  %v3151_v62 = vld [vmem:[%s5787_s1 + $0x3d0] sm:$0xf]  ;;  %v3832_v63 = vld [vmem:[%s5787_s1 + $0x3d4] sm:$0xf0]  ;;  %v2951_v0 = vld [vmem:[%s5787_s1 + $0x240] sm:$0xf]  ;;  %v3088_v8 = vor.u32 %v3816_v61, %v3087_v59 }
  0x2a   : > { %1916 = vmatpush.bf16.msra.mxu3 %v2864_v24  ;;  %v3782_v1 = vld [vmem:[%s5787_s1 + $0x244] sm:$0xf0]  ;;  %s3691_s8 = sshll.u32 %s5801_s12, 7  ;;  %v3015_v3 = vld [vmem:[%s5787_s1 + $0x2c0] sm:$0xf]  ;;  %v3152_v13 = vor.u32 %v3832_v63, %v3151_v62  ;;  %s3692_s26 = sshll.u32 %s5801_s12, 4 }
  0x2b   : > { %1875 = vmatpush.bf16.msra.mxu0 %v2664_v31  ;;  %v3798_v4 = vld [vmem:[%s5787_s1 + $0x2c4] sm:$0xf0]  ;;  %v3079_v5 = vld [vmem:[%s5787_s1 + $0x340] sm:$0xf]  ;;  %s4367_s23 = scalar_lea.vmem %s5786_s0, %s3691_s8  ;;  %v2952_v23 = vor.u32 %v3782_v1, %v2951_v0  ;;  %v2943_v27 = vld [vmem:[%s5787_s1 + $0x230] sm:$0xf]  ;;  %s223_s29 = scalar_lea.vmem %s5789_s3, %s3692_s26 }
  0x2c   : > { %1889 = vmatpush.bf16.msra.mxu1 %v2728_v35  ;;  %v3814_v6 = vld [vmem:[%s5787_s1 + $0x344] sm:$0xf0]  ;;  %v3143_v9 = vld [vmem:[%s5787_s1 + $0x3c0] sm:$0xf]  ;;  %v3693_v16 = vld [vmem:[%s4367_s23 + $0x4] sm:$0xf]  ;;  %v3016_v25 = vor.u32 %v3798_v4, %v3015_v3 }
  0x2d   : > { %1903 = vmatpush.bf16.msra.mxu2 %v2792_v36  ;;  %v2599_v10 = vld [vmem:[%s4367_s23] sm:$0xf]  ;;  %v2607_v12 = vld [vmem:[%s4367_s23 + $0x8] sm:$0xf]  ;;  %v2601_v17 = vld [vmem:[%s4367_s23 + $0x40] sm:$0xf0]  ;;  %v3080_v26 = vor.u32 %v3814_v6, %v3079_v5 }
  0x2e   : > { %1917 = vmatpush.bf16.msra.mxu3 %v2856_v39  ;;  %v3701_v11 = vld [vmem:[%s4367_s23 + $0x3c] sm:$0xf0]  ;;  %v3702_v15 = vld [vmem:[%s4367_s23 + $0x44] sm:$0xf0]  ;;  %v4385_v20 = vor.u32 %v3693_v16, %v2601_v17  ;;  %v3694_v21 = vld [vmem:[%s4367_s23 + $0xc] sm:$0xf] }
  0x2f   : > { %1924 = vmatpush.bf16.msrb.mxu0 %v2976_v40  ;;  %v4375_v14 = vor.u32 %v3701_v11, %v2599_v10  ;;  %v3830_v18 = vld [vmem:[%s5787_s1 + $0x3c4] sm:$0xf0]  ;;  %v4383_v19 = vor.u32 %v3702_v15, %v2607_v12  ;;  %v2609_v22 = vld [vmem:[%s4367_s23 + $0x48] sm:$0xf0]  ;;  %v3780_v28 = vld [vmem:[%s5787_s1 + $0x234] sm:$0xf0] }
  0x30   : > { %1938 = vmatpush.bf16.msrb.mxu1 %v3040_v41  ;;  %v4389_v24 = vor.u32 %v3694_v21, %v2609_v22  ;;  %v3007_v29 = vld [vmem:[%s5787_s1 + $0x2b0] sm:$0xf]  ;;  %v3144_v30 = vor.u32 %v3830_v18, %v3143_v9  ;;  %v3796_v31 = vld [vmem:[%s5787_s1 + $0x2b4] sm:$0xf0]  ;;  %v2944_v36 = vor.u32 %v3780_v28, %v2943_v27  ;;  %v2935_v39 = vld [vmem:[%s5787_s1 + $0x220] sm:$0xf] }
  0x31   : > { %1952 = vmatpush.bf16.msrb.mxu2 %v3104_v42  ;;  %1876 = vmatmul.bf16.vlgmr.msra.gmra.mxu0 %v4375_v14  ;;  %v3071_v32 = vld [vmem:[%s5787_s1 + $0x330] sm:$0xf]  ;;  %v3812_v33 = vld [vmem:[%s5787_s1 + $0x334] sm:$0xf0]  ;;  %v3008_v37 = vor.u32 %v3796_v31, %v3007_v29  ;;  %v3778_v40 = vld [vmem:[%s5787_s1 + $0x224] sm:$0xf0] }
  0x32   : > { %1966 = vmatpush.bf16.msrb.mxu3 %v3168_v46  ;;  %1904 = vmatmul.bf16.vlgmr.msra.gmra.mxu2 %v4383_v19  ;;  %v3135_v34 = vld [vmem:[%s5787_s1 + $0x3b0] sm:$0xf]  ;;  %v3828_v35 = vld [vmem:[%s5787_s1 + $0x3b4] sm:$0xf0]  ;;  %v3072_v38 = vor.u32 %v3812_v33, %v3071_v32  ;;  %v2999_v41 = vld [vmem:[%s5787_s1 + $0x2a0] sm:$0xf]  ;;  %v2936_v48 = vor.u32 %v3778_v40, %v2935_v39 }
  0x33   : > { %1925 = vmatpush.bf16.msrb.mxu0 %v2968_v52  ;;  %1890 = vmatmul.bf16.vlgmr.msra.gmra.mxu1 %v4385_v20  ;;  %v3136_v42 = vor.u32 %v3828_v35, %v3135_v34  ;;  %v3794_v43 = vld [vmem:[%s5787_s1 + $0x2a4] sm:$0xf0]  ;;  %v3063_v44 = vld [vmem:[%s5787_s1 + $0x320] sm:$0xf]  ;;  %v2927_v49 = vld [vmem:[%s5787_s1 + $0x210] sm:$0xf] }
  0x34   : > { %1939 = vmatpush.bf16.msrb.mxu1 %v3032_v56  ;;  %1918 = vmatmul.bf16.vlgmr.msra.gmra.mxu3 %v4389_v24  ;;  %v3810_v45 = vld [vmem:[%s5787_s1 + $0x324] sm:$0xf0]  ;;  %v3127_v46 = vld [vmem:[%s5787_s1 + $0x3a0] sm:$0xf]  ;;  %v3000_v50 = vor.u32 %v3794_v43, %v2999_v41  ;;  %v3776_v52 = vld [vmem:[%s5787_s1 + $0x214] sm:$0xf0] }
  0x35   : > { %1953 = vmatpush.bf16.msrb.mxu2 %v3096_v57  ;;  %v3826_v47 = vld [vmem:[%s5787_s1 + $0x3a4] sm:$0xf0]  ;;  %v3064_v51 = vor.u32 %v3810_v45, %v3063_v44  ;;  %v2991_v53 = vld [vmem:[%s5787_s1 + $0x290] sm:$0xf]  ;;  %v3792_v54 = vld [vmem:[%s5787_s1 + $0x294] sm:$0xf0]  ;;  %v2928_v62 = vor.u32 %v3776_v52, %v2927_v49 }
  0x36   : > { %1967 = vmatpush.bf16.msrb.mxu3 %v3160_v60  ;;  %v3128_v55 = vor.u32 %v3826_v47, %v3127_v46  ;;  %v3055_v56 = vld [vmem:[%s5787_s1 + $0x310] sm:$0xf]  ;;  %v3808_v57 = vld [vmem:[%s5787_s1 + $0x314] sm:$0xf0]  ;;  %v2919_v60 = vld [vmem:[%s5787_s1 + $0x200] sm:$0xf]  ;;  %v2992_v3 = vor.u32 %v3792_v54, %v2991_v53 }
  0x37   : > { %1926 = vmatpush.bf16.msrb.mxu0 %v2960_v2  ;;  %v3119_v58 = vld [vmem:[%s5787_s1 + $0x390] sm:$0xf]  ;;  %v3824_v59 = vld [vmem:[%s5787_s1 + $0x394] sm:$0xf0]  ;;  %v3774_v61 = vld [vmem:[%s5787_s1 + $0x204] sm:$0xf0]  ;;  %v3056_v4 = vor.u32 %v3808_v57, %v3055_v56 }
  0x38   : > { %1940 = vmatpush.bf16.msrb.mxu1 %v3024_v7  ;;  %v2983_v63 = vld [vmem:[%s5787_s1 + $0x280] sm:$0xf]  ;;  %v3790_v0 = vld [vmem:[%s5787_s1 + $0x284] sm:$0xf0]  ;;  %v3231_v7 = vld [vmem:[%s5787_s1 + $0x470] sm:$0xf]  ;;  %v2920_v16 = vor.u32 %v3774_v61, %v2919_v60 }
  0x39   : > { %1954 = vmatpush.bf16.msrb.mxu2 %v3088_v8  ;;  %v3047_v1 = vld [vmem:[%s5787_s1 + $0x300] sm:$0xf]  ;;  %v3806_v2 = vld [vmem:[%s5787_s1 + $0x304] sm:$0xf0]  ;;  %v3120_v8 = vor.u32 %v3824_v59, %v3119_v58  ;;  %v3852_v9 = vld [vmem:[%s5787_s1 + $0x474] sm:$0xf0]  ;;  %v2984_v22 = vor.u32 %v3790_v0, %v2983_v63 }
  0x3a   : > { %1968 = vmatpush.bf16.msrb.mxu3 %v3152_v13  ;;  %v3111_v5 = vld [vmem:[%s5787_s1 + $0x380] sm:$0xf]  ;;  %v3822_v6 = vld [vmem:[%s5787_s1 + $0x384] sm:$0xf0]  ;;  %v3295_v10 = vld [vmem:[%s5787_s1 + $0x4f0] sm:$0xf]  ;;  %v3232_v29 = vor.u32 %v3852_v9, %v3231_v7 }
  0x3b   : > { %1927 = vmatpush.bf16.msrb.mxu0 %v2952_v23  ;;  %v3868_v11 = vld [vmem:[%s5787_s1 + $0x4f4] sm:$0xf0]  ;;  %v3359_v12 = vld [vmem:[%s5787_s1 + $0x570] sm:$0xf]  ;;  %v3048_v23 = vor.u32 %v3806_v2, %v3047_v1  ;;  %v3695_v27 = vld [vmem:[%s4367_s23 + $0x14] sm:$0xf]  ;;  %v3112_v28 = vor.u32 %v3822_v6, %v3111_v5 }
  0x3c   : > { %1941 = vmatpush.bf16.msrb.mxu1 %v3016_v25  ;;  %v3884_v13 = vld [vmem:[%s5787_s1 + $0x574] sm:$0xf0]  ;;  %v3423_v15 = vld [vmem:[%s5787_s1 + $0x5f0] sm:$0xf]  ;;  %v3696_v31 = vld [vmem:[%s4367_s23 + $0x1c] sm:$0xf]  ;;  %v3296_v33 = vor.u32 %v3868_v11, %v3295_v10 }
  0x3d   : > { %1955 = vmatpush.bf16.msrb.mxu2 %v3080_v26  ;;  %v3900_v17 = vld [vmem:[%s5787_s1 + $0x5f4] sm:$0xf0]  ;;  %v2615_v18 = vld [vmem:[%s4367_s23 + $0x10] sm:$0xf]  ;;  %v2625_v32 = vld [vmem:[%s4367_s23 + $0x58] sm:$0xf0]  ;;  %v3360_v34 = vor.u32 %v3884_v13, %v3359_v12 }
  0x3e   : > { %1969 = vmatpush.bf16.msrb.mxu3 %v3144_v30  ;;  %v3703_v21 = vld [vmem:[%s4367_s23 + $0x4c] sm:$0xf0]  ;;  %v2623_v25 = vld [vmem:[%s4367_s23 + $0x18] sm:$0xf]  ;;  %v2617_v30 = vld [vmem:[%s4367_s23 + $0x50] sm:$0xf0]  ;;  %v4553_v47 = vor.u32 %v3696_v31, %v2625_v32 }
  0x3f   : > { %1928 = vmatpush.bf16.msrb.mxu0 %v2944_v36  ;;  %v3704_v26 = vld [vmem:[%s4367_s23 + $0x54] sm:$0xf0]  ;;  %v3223_v35 = vld [vmem:[%s5787_s1 + $0x460] sm:$0xf]  ;;  %v3850_v36 = vld [vmem:[%s5787_s1 + $0x464] sm:$0xf0]  ;;  %v4532_v39 = vor.u32 %v3703_v21, %v2615_v18  ;;  %v4545_v44 = vor.u32 %v3695_v27, %v2617_v30 }
  0x40   : > { %1942 = vmatpush.bf16.msrb.mxu1 %v3008_v37  ;;  %v3287_v37 = vld [vmem:[%s5787_s1 + $0x4e0] sm:$0xf]  ;;  %v3866_v40 = vld [vmem:[%s5787_s1 + $0x4e4] sm:$0xf0]  ;;  %v4543_v43 = vor.u32 %v3704_v26, %v2623_v25  ;;  %v3848_v52 = vld [vmem:[%s5787_s1 + $0x454] sm:$0xf0] }
  0x41   : > { %1956 = vmatpush.bf16.msrb.mxu2 %v3072_v38  ;;  %v3424_v38 = vor.u32 %v3900_v17, %v3423_v15  ;;  %v3351_v41 = vld [vmem:[%s5787_s1 + $0x560] sm:$0xf]  ;;  %v3898_v46 = vld [vmem:[%s5787_s1 + $0x5e4] sm:$0xf0]  ;;  %v3288_v49 = vor.u32 %v3866_v40, %v3287_v37  ;;  %v3279_v53 = vld [vmem:[%s5787_s1 + $0x4d0] sm:$0xf] }
  0x42   : > { %1970 = vmatpush.bf16.msrb.mxu3 %v3136_v42  ;;  %v3882_v42 = vld [vmem:[%s5787_s1 + $0x564] sm:$0xf0]  ;;  %v3415_v45 = vld [vmem:[%s5787_s1 + $0x5e0] sm:$0xf]  ;;  %v3343_v56 = vld [vmem:[%s5787_s1 + $0x550] sm:$0xf] }
  0x43   : > { %1929 = vmatpush.bf16.msrb.mxu0 %v2936_v48  ;;  %v3224_v48 = vor.u32 %v3850_v36, %v3223_v35  ;;  %v3416_v54 = vor.u32 %v3898_v46, %v3415_v45  ;;  %v3880_v57 = vld [vmem:[%s5787_s1 + $0x554] sm:$0xf0]  ;;  %v3407_v58 = vld [vmem:[%s5787_s1 + $0x5d0] sm:$0xf]  ;;  %v3207_v63 = vld [vmem:[%s5787_s1 + $0x440] sm:$0xf] }
  0x44   : > { %1943 = vmatpush.bf16.msrb.mxu1 %v3000_v50  ;;  %v3352_v50 = vor.u32 %v3882_v42, %v3351_v41  ;;  %v3896_v59 = vld [vmem:[%s5787_s1 + $0x5d4] sm:$0xf0]  ;;  %v3846_v0 = vld [vmem:[%s5787_s1 + $0x444] sm:$0xf0]  ;;  %v3271_v1 = vld [vmem:[%s5787_s1 + $0x4c0] sm:$0xf] }
  0x45   : > { %1957 = vmatpush.bf16.msrb.mxu2 %v3064_v51  ;;  %v3215_v51 = vld [vmem:[%s5787_s1 + $0x450] sm:$0xf]  ;;  %v3408_v2 = vor.u32 %v3896_v59, %v3407_v58  ;;  %v3878_v5 = vld [vmem:[%s5787_s1 + $0x544] sm:$0xf0]  ;;  %v3399_v6 = vld [vmem:[%s5787_s1 + $0x5c0] sm:$0xf] }
  0x46   : > { %1971 = vmatpush.bf16.msrb.mxu3 %v3128_v55  ;;  %v3864_v55 = vld [vmem:[%s5787_s1 + $0x4d4] sm:$0xf0]  ;;  %v3216_v60 = vor.u32 %v3848_v52, %v3215_v51  ;;  %v3894_v7 = vld [vmem:[%s5787_s1 + $0x5c4] sm:$0xf0]  ;;  %v3199_v11 = vld [vmem:[%s5787_s1 + $0x430] sm:$0xf] }
  0x47   : > { %1930 = vmatpush.bf16.msrb.mxu0 %v2928_v62  ;;  %v3280_v61 = vor.u32 %v3864_v55, %v3279_v53  ;;  %v3344_v62 = vor.u32 %v3880_v57, %v3343_v56  ;;  %v3844_v12 = vld [vmem:[%s5787_s1 + $0x434] sm:$0xf0]  ;;  %v3263_v13 = vld [vmem:[%s5787_s1 + $0x4b0] sm:$0xf]  ;;  %v3400_v15 = vor.u32 %v3894_v7, %v3399_v6  ;;  %v3191_v27 = vld [vmem:[%s5787_s1 + $0x420] sm:$0xf] }
  0x48   : > { %1944 = vmatpush.bf16.msrb.mxu1 %v2992_v3  ;;  %v3862_v3 = vld [vmem:[%s5787_s1 + $0x4c4] sm:$0xf0]  ;;  %v3327_v17 = vld [vmem:[%s5787_s1 + $0x530] sm:$0xf]  ;;  %v3876_v18 = vld [vmem:[%s5787_s1 + $0x534] sm:$0xf0] }
  0x49   : > { %1958 = vmatpush.bf16.msrb.mxu2 %v3056_v4  ;;  %v3335_v4 = vld [vmem:[%s5787_s1 + $0x540] sm:$0xf]  ;;  %v3272_v9 = vor.u32 %v3862_v3, %v3271_v1  ;;  %v3391_v21 = vld [vmem:[%s5787_s1 + $0x5b0] sm:$0xf]  ;;  %v3328_v26 = vor.u32 %v3876_v18, %v3327_v17  ;;  %v3858_v31 = vld [vmem:[%s5787_s1 + $0x4a4] sm:$0xf0] }
  0x4a   : > { %1972 = vmatpush.bf16.msrb.mxu3 %v3120_v8  ;;  %v3208_v8 = vor.u32 %v3846_v0, %v3207_v63  ;;  %v3336_v10 = vor.u32 %v3878_v5, %v3335_v4  ;;  %v3319_v32 = vld [vmem:[%s5787_s1 + $0x520] sm:$0xf]  ;;  %v3890_v35 = vld [vmem:[%s5787_s1 + $0x5a4] sm:$0xf0]  ;;  %v3183_v37 = vld [vmem:[%s5787_s1 + $0x410] sm:$0xf] }
  0x4b   : > { %1931 = vmatpush.bf16.msrb.mxu0 %v2920_v16  ;;  %v3860_v16 = vld [vmem:[%s5787_s1 + $0x4b4] sm:$0xf0]  ;;  %v3247_v42 = vld [vmem:[%s5787_s1 + $0x490] sm:$0xf]  ;;  %v3175_v52 = vld [vmem:[%s5787_s1 + $0x400] sm:$0xf] }
  0x4c   : > { %1945 = vmatpush.bf16.msrb.mxu1 %v2984_v22  ;;  %v3892_v22 = vld [vmem:[%s5787_s1 + $0x5b4] sm:$0xf0]  ;;  %v3264_v25 = vor.u32 %v3860_v16, %v3263_v13  ;;  %v3838_v53 = vld [vmem:[%s5787_s1 + $0x404] sm:$0xf0]  ;;  %v3239_v55 = vld [vmem:[%s5787_s1 + $0x480] sm:$0xf] }
  0x4d   : > { %1959 = vmatpush.bf16.msrb.mxu2 %v3048_v23  ;;  %v3200_v23 = vor.u32 %v3844_v12, %v3199_v11  ;;  %v3392_v30 = vor.u32 %v3892_v22, %v3391_v21  ;;  %v3840_v41 = vld [vmem:[%s5787_s1 + $0x414] sm:$0xf0]  ;;  %v3854_v56 = vld [vmem:[%s5787_s1 + $0x484] sm:$0xf0]  ;;  %v3303_v57 = vld [vmem:[%s5787_s1 + $0x500] sm:$0xf]  ;;  %v3176_v7 = vor.u32 %v3838_v53, %v3175_v52 }
  0x4e   : > { %1973 = vmatpush.bf16.msrb.mxu3 %v3112_v28  ;;  %1932 = vmatmul.bf16.vlgmr.msrb.gmra.mxu0 %v4532_v39  ;;  %v3842_v28 = vld [vmem:[%s5787_s1 + $0x424] sm:$0xf0]  ;;  %v3856_v45 = vld [vmem:[%s5787_s1 + $0x494] sm:$0xf0]  ;;  %v3487_v63 = vld [vmem:[%s5787_s1 + $0x670] sm:$0xf]  ;;  %v3240_v11 = vor.u32 %v3854_v56, %v3239_v55 }
  0x4f   : > { %1980 = vmatpush.bf16.msra.mxu0 %v3232_v29  ;;  %1946 = vmatmul.bf16.vlgmr.msrb.gmra.mxu1 %v4545_v44  ;;  %v3255_v29 = vld [vmem:[%s5787_s1 + $0x4a0] sm:$0xf]  ;;  %v3192_v36 = vor.u32 %v3842_v28, %v3191_v27  ;;  %v3888_v51 = vld [vmem:[%s5787_s1 + $0x594] sm:$0xf0]  ;;  %v3870_v58 = vld [vmem:[%s5787_s1 + $0x504] sm:$0xf0]  ;;  %v3248_v59 = vor.u32 %v3856_v45, %v3247_v42 }
  0x50   : > { %1994 = vmatpush.bf16.msra.mxu1 %v3296_v33  ;;  %1960 = vmatmul.bf16.vlgmr.msrb.gmra.mxu2 %v4543_v43  ;;  %v3874_v33 = vld [vmem:[%s5787_s1 + $0x524] sm:$0xf0]  ;;  %v3916_v1 = vld [vmem:[%s5787_s1 + $0x674] sm:$0xf0]  ;;  %v3615_v4 = vld [vmem:[%s5787_s1 + $0x770] sm:$0xf]  ;;  %v3304_v12 = vor.u32 %v3870_v58, %v3303_v57 }
  0x51   : > { %2008 = vmatpush.bf16.msra.mxu2 %v3360_v34  ;;  %1974 = vmatmul.bf16.vlgmr.msrb.gmra.mxu3 %v4553_v47  ;;  %v3383_v34 = vld [vmem:[%s5787_s1 + $0x5a0] sm:$0xf]  ;;  %v3320_v40 = vor.u32 %v3874_v33, %v3319_v32  ;;  %v3932_v3 = vld [vmem:[%s5787_s1 + $0x6f4] sm:$0xf0]  ;;  %v3679_v6 = vld [vmem:[%s5787_s1 + $0x7f0] sm:$0xf]  ;;  %v3488_v18 = vor.u32 %v3916_v1, %v3487_v63 }
  0x52   : > { %2022 = vmatpush.bf16.msra.mxu3 %v3424_v38  ;;  %v3256_v38 = vor.u32 %v3858_v31, %v3255_v29  ;;  %v3384_v46 = vor.u32 %v3890_v35, %v3383_v34  ;;  %v3948_v5 = vld [vmem:[%s5787_s1 + $0x774] sm:$0xf0]  ;;  %v2639_v13 = vld [vmem:[%s4367_s23 + $0x28] sm:$0xf]  ;;  %v3697_v16 = vld [vmem:[%s4367_s23 + $0x24] sm:$0xf] }
  0x53   : > { %1981 = vmatpush.bf16.msra.mxu0 %v3224_v48  ;;  %v3311_v48 = vld [vmem:[%s5787_s1 + $0x510] sm:$0xf]  ;;  %v2633_v21 = vld [vmem:[%s4367_s23 + $0x60] sm:$0xf0]  ;;  %v3698_v22 = vld [vmem:[%s4367_s23 + $0x2c] sm:$0xf] }
  0x54   : > { %1995 = vmatpush.bf16.msra.mxu1 %v3288_v49  ;;  %v3872_v49 = vld [vmem:[%s5787_s1 + $0x514] sm:$0xf0]  ;;  %v3479_v27 = vld [vmem:[%s5787_s1 + $0x660] sm:$0xf]  ;;  %v3914_v28 = vld [vmem:[%s5787_s1 + $0x664] sm:$0xf0] }
  0x55   : > { %2009 = vmatpush.bf16.msra.mxu2 %v3352_v50  ;;  %v3375_v50 = vld [vmem:[%s5787_s1 + $0x590] sm:$0xf]  ;;  %v3543_v29 = vld [vmem:[%s5787_s1 + $0x6e0] sm:$0xf]  ;;  %v3930_v32 = vld [vmem:[%s5787_s1 + $0x6e4] sm:$0xf0] }
  0x56   : > { %2023 = vmatpush.bf16.msra.mxu3 %v3416_v54  ;;  %v3184_v54 = vor.u32 %v3840_v41, %v3183_v37  ;;  %v3376_v0 = vor.u32 %v3888_v51, %v3375_v50  ;;  %v3607_v33 = vld [vmem:[%s5787_s1 + $0x760] sm:$0xf]  ;;  %v3946_v34 = vld [vmem:[%s5787_s1 + $0x764] sm:$0xf0]  ;;  %v3480_v41 = vor.u32 %v3914_v28, %v3479_v27  ;;  %v3544_v42 = vor.u32 %v3930_v32, %v3543_v29  ;;  %v3928_v51 = vld [vmem:[%s5787_s1 + $0x6d4] sm:$0xf0] }
  0x57   : > { %1982 = vmatpush.bf16.msra.mxu0 %v3216_v60  ;;  %v3312_v60 = vor.u32 %v3872_v49, %v3311_v48  ;;  %v3671_v37 = vld [vmem:[%s5787_s1 + $0x7e0] sm:$0xf]  ;;  %v3608_v45 = vor.u32 %v3946_v34, %v3607_v33  ;;  %v3912_v48 = vld [vmem:[%s5787_s1 + $0x654] sm:$0xf0]  ;;  %v3535_v49 = vld [vmem:[%s5787_s1 + $0x6d0] sm:$0xf] }
  0x58   : > { %1996 = vmatpush.bf16.msra.mxu1 %v3280_v61  ;;  %v3367_v61 = vld [vmem:[%s5787_s1 + $0x580] sm:$0xf]  ;;  %v3599_v52 = vld [vmem:[%s5787_s1 + $0x750] sm:$0xf]  ;;  %v3944_v53 = vld [vmem:[%s5787_s1 + $0x754] sm:$0xf0]  ;;  %v3536_v57 = vor.u32 %v3928_v51, %v3535_v49 }
  0x59   : > { %2010 = vmatpush.bf16.msra.mxu2 %v3344_v62  ;;  %v3886_v62 = vld [vmem:[%s5787_s1 + $0x584] sm:$0xf0]  ;;  %v3960_v55 = vld [vmem:[%s5787_s1 + $0x7d4] sm:$0xf0]  ;;  %v3600_v58 = vor.u32 %v3944_v53, %v3599_v52  ;;  %v3575_v28 = vld [vmem:[%s5787_s1 + $0x720] sm:$0xf] }
  0x5a   : > { %2024 = vmatpush.bf16.msra.mxu3 %v3408_v2  ;;  %v3551_v2 = vld [vmem:[%s5787_s1 + $0x6f0] sm:$0xf]  ;;  %v3368_v17 = vor.u32 %v3886_v62, %v3367_v61  ;;  %v3527_v61 = vld [vmem:[%s5787_s1 + $0x6c0] sm:$0xf]  ;;  %v3926_v63 = vld [vmem:[%s5787_s1 + $0x6c4] sm:$0xf0] }
  0x5b   : > { %1983 = vmatpush.bf16.msra.mxu0 %v3208_v8  ;;  %v3964_v8 = vld [vmem:[%s5787_s1 + $0x7f4] sm:$0xf0]  ;;  %v3942_v1 = vld [vmem:[%s5787_s1 + $0x744] sm:$0xf0]  ;;  %v3439_v34 = vld [vmem:[%s5787_s1 + $0x610] sm:$0xf] }
  0x5c   : > { %1997 = vmatpush.bf16.msra.mxu1 %v3272_v9  ;;  %v2631_v9 = vld [vmem:[%s4367_s23 + $0x20] sm:$0xf]  ;;  %v3922_v27 = vld [vmem:[%s5787_s1 + $0x6a4] sm:$0xf0]  ;;  %v3936_v49 = vld [vmem:[%s5787_s1 + $0x714] sm:$0xf0] }
  0x5d   : > { %2011 = vmatpush.bf16.msra.mxu2 %v3336_v10  ;;  %v3705_v10 = vld [vmem:[%s4367_s23 + $0x5c] sm:$0xf0]  ;;  %v3938_v29 = vld [vmem:[%s5787_s1 + $0x724] sm:$0xf0]  ;;  %v3952_v51 = vld [vmem:[%s5787_s1 + $0x794] sm:$0xf0] }
  0x5e   : > { %2025 = vmatpush.bf16.msra.mxu3 %v3400_v15  ;;  %v3706_v15 = vld [vmem:[%s4367_s23 + $0x64] sm:$0xf0]  ;;  %v4744_v31 = vor.u32 %v3705_v10, %v2631_v9  ;;  %v3519_v9 = vld [vmem:[%s5787_s1 + $0x6b0] sm:$0xf]  ;;  %v3431_v52 = vld [vmem:[%s5787_s1 + $0x600] sm:$0xf] }
  0x5f   : > { %1984 = vmatpush.bf16.msra.mxu0 %v3200_v23  ;;  %v2641_v23 = vld [vmem:[%s4367_s23 + $0x68] sm:$0xf0]  ;;  %v4755_v35 = vor.u32 %v3706_v15, %v2639_v13  ;;  %v3940_v13 = vld [vmem:[%s5787_s1 + $0x734] sm:$0xf0]  ;;  %v3647_v15 = vld [vmem:[%s5787_s1 + $0x7b0] sm:$0xf] }
  0x60   : > { %1998 = vmatpush.bf16.msra.mxu1 %v3264_v25  ;;  %v3552_v25 = vor.u32 %v3932_v3, %v3551_v2  ;;  %v3655_v2 = vld [vmem:[%s5787_s1 + $0x7c0] sm:$0xf]  ;;  %v3958_v3 = vld [vmem:[%s5787_s1 + $0x7c4] sm:$0xf0] }
  0x61   : > { %2012 = vmatpush.bf16.msra.mxu2 %v3328_v26  ;;  %v3616_v26 = vor.u32 %v3948_v5, %v3615_v4  ;;  %v3528_v5 = vor.u32 %v3926_v63, %v3527_v61  ;;  %v3656_v10 = vor.u32 %v3958_v3, %v3655_v2  ;;  %v3954_v32 = vld [vmem:[%s5787_s1 + $0x7a4] sm:$0xf0]  ;;  %v3623_v61 = vld [vmem:[%s5787_s1 + $0x780] sm:$0xf]  ;;  %v3723_v63 = vld [vmem:[%s5787_s1 + $0x74] sm:$0xf] }
  0x62   : > { %2026 = vmatpush.bf16.msra.mxu3 %v3392_v30  ;;  %v3680_v30 = vor.u32 %v3964_v8, %v3679_v6  ;;  %v3908_v8 = vld [vmem:[%s5787_s1 + $0x634] sm:$0xf0]  ;;  %v3902_v53 = vld [vmem:[%s5787_s1 + $0x604] sm:$0xf0]  ;;  %v3739_v2 = vld [vmem:[%s5787_s1 + $0xf4] sm:$0xf] }
  0x63   : > { %1985 = vmatpush.bf16.msra.mxu0 %v3192_v36  ;;  %v4757_v36 = vor.u32 %v3697_v16, %v2633_v21  ;;  %v3956_v16 = vld [vmem:[%s5787_s1 + $0x7b4] sm:$0xf0]  ;;  %v2785_v3 = vld [vmem:[%s5787_s1 + $0xf8] sm:$0xf0] }
  0x64   : > { %1999 = vmatpush.bf16.msra.mxu1 %v3256_v38  ;;  %v3962_v38 = vld [vmem:[%s5787_s1 + $0x7e4] sm:$0xf0] }
  0x65   : > { %2013 = vmatpush.bf16.msra.mxu2 %v3320_v40  ;;  %v4765_v40 = vor.u32 %v3698_v22, %v2641_v23  ;;  %v3672_v50 = vor.u32 %v3962_v38, %v3671_v37  ;;  %v3447_v22 = vld [vmem:[%s5787_s1 + $0x620] sm:$0xf]  ;;  %v3906_v23 = vld [vmem:[%s5787_s1 + $0x624] sm:$0xf0]  ;;  %v3576_v38 = vor.u32 %v3938_v29, %v3575_v28  ;;  %v2713_v28 = vld [vmem:[%s5787_s1 + $0x68] sm:$0xf0] }
  0x66   : > { %2027 = vmatpush.bf16.msra.mxu3 %v3384_v46  ;;  %v3471_v46 = vld [vmem:[%s5787_s1 + $0x650] sm:$0xf]  ;;  %v3448_v33 = vor.u32 %v3906_v23, %v3447_v22  ;;  %v3700_v22 = vld [vmem:[%s4367_s23 + $0x3c] sm:$0xf]  ;;  %v3737_v29 = vld [vmem:[%s5787_s1 + $0xe4] sm:$0xf] }
  0x67   : > { %1986 = vmatpush.bf16.msra.mxu0 %v3184_v54  ;;  %v3663_v54 = vld [vmem:[%s5787_s1 + $0x7d0] sm:$0xf]  ;;  %v3472_v56 = vor.u32 %v3912_v48, %v3471_v46  ;;  %v2657_v23 = vld [vmem:[%s4367_s23 + $0x78] sm:$0xf0] }
  0x68   : > { %2000 = vmatpush.bf16.msra.mxu1 %v3248_v59  ;;  %v3463_v59 = vld [vmem:[%s5787_s1 + $0x640] sm:$0xf]  ;;  %v3664_v62 = vor.u32 %v3960_v55, %v3663_v54  ;;  %v3567_v48 = vld [vmem:[%s5787_s1 + $0x710] sm:$0xf] }
  0x69   : > { %2014 = vmatpush.bf16.msra.mxu2 %v3312_v60  ;;  %v3910_v60 = vld [vmem:[%s5787_s1 + $0x644] sm:$0xf0]  ;;  %v3495_v55 = vld [vmem:[%s5787_s1 + $0x680] sm:$0xf] }
  0x6a   : > { %2028 = vmatpush.bf16.msra.mxu3 %v3376_v0  ;;  %v3591_v0 = vld [vmem:[%s5787_s1 + $0x740] sm:$0xf]  ;;  %v3464_v4 = vor.u32 %v3910_v60, %v3463_v59  ;;  %v3568_v60 = vor.u32 %v3936_v49, %v3567_v48 }
  0x6b   : > { %1987 = vmatpush.bf16.msra.mxu0 %v3176_v7  ;;  %v3592_v6 = vor.u32 %v3942_v1, %v3591_v0  ;;  %v3455_v7 = vld [vmem:[%s5787_s1 + $0x630] sm:$0xf]  ;;  %v2721_v1 = vld [vmem:[%s5787_s1 + $0x78] sm:$0xf0] }
  0x6c   : > { %2001 = vmatpush.bf16.msra.mxu1 %v3240_v11  ;;  %v3924_v11 = vld [vmem:[%s5787_s1 + $0x6b4] sm:$0xf0] }
  0x6d   : > { %2015 = vmatpush.bf16.msra.mxu2 %v3304_v12  ;;  %v3583_v12 = vld [vmem:[%s5787_s1 + $0x730] sm:$0xf] }
  0x6e   : > { %2029 = vmatpush.bf16.msra.mxu3 %v3368_v17  ;;  %1988 = vmatmul.bf16.vlgmr.msra.gmra.mxu0 %v4744_v31  ;;  %v3456_v17 = vor.u32 %v3908_v8, %v3455_v7  ;;  %v3584_v21 = vor.u32 %v3940_v13, %v3583_v12  ;;  %v3432_v7 = vor.u32 %v3902_v53, %v3431_v52  ;;  %v2913_v8 = vld [vmem:[%s5787_s1 + $0x1f8] sm:$0xf0]  ;;  %v2655_v13 = vld [vmem:[%s4367_s23 + $0x38] sm:$0xf]  ;;  %v3735_v53 = vld [vmem:[%s5787_s1 + $0xd4] sm:$0xf] }
  0x6f   : > { %2036 = vmatpush.bf16.msrb.mxu0 %v3488_v18  ;;  %2002 = vmatmul.bf16.vlgmr.msra.gmra.mxu1 %v4757_v36  ;;  %v3520_v18 = vor.u32 %v3924_v11, %v3519_v9  ;;  %v2647_v9 = vld [vmem:[%s4367_s23 + $0x30] sm:$0xf]  ;;  %v2705_v52 = vld [vmem:[%s5787_s1 + $0x58] sm:$0xf0] }
  0x70   : > { %2050 = vmatpush.bf16.msrb.mxu1 %v3552_v25  ;;  %2016 = vmatmul.bf16.vlgmr.msra.gmra.mxu2 %v4755_v35  ;;  %v3511_v25 = vld [vmem:[%s5787_s1 + $0x6a0] sm:$0xf] }
  0x71   : > { %2064 = vmatpush.bf16.msrb.mxu2 %v3616_v26  ;;  %2030 = vmatmul.bf16.vlgmr.msra.gmra.mxu3 %v4765_v40  ;;  %v3648_v26 = vor.u32 %v3956_v16, %v3647_v15  ;;  %v3512_v37 = vor.u32 %v3922_v27, %v3511_v25  ;;  %v3708_v15 = vld [vmem:[%s4367_s23 + $0x74] sm:$0xf0]  ;;  %v3699_v16 = vld [vmem:[%s4367_s23 + $0x34] sm:$0xf]  ;;  %v2788_v25 = vor.u32 %v3739_v2, %v2785_v3  ;;  %v3721_v27 = vld [vmem:[%s5787_s1 + $0x64] sm:$0xf] }
  0x72   : > { %2078 = vmatpush.bf16.msrb.mxu3 %v3680_v30  ;;  %v3639_v30 = vld [vmem:[%s5787_s1 + $0x7a0] sm:$0xf]  ;;  %v2716_v48 = vor.u32 %v3721_v27, %v2713_v28  ;;  %v2761_v3 = vld [vmem:[%s5787_s1 + $0xc8] sm:$0xf0]  ;;  %v3713_v27 = vld [vmem:[%s5787_s1 + $0x24] sm:$0xf] }
  0x73   : > { %2037 = vmatpush.bf16.msrb.mxu0 %v3480_v41  ;;  %v3904_v41 = vld [vmem:[%s5787_s1 + $0x614] sm:$0xf0]  ;;  %v3640_v46 = vor.u32 %v3954_v32, %v3639_v30  ;;  %v2681_v28 = vld [vmem:[%s5787_s1 + $0x28] sm:$0xf0] }
  0x74   : > { %2051 = vmatpush.bf16.msrb.mxu1 %v3544_v42  ;;  %v3503_v42 = vld [vmem:[%s5787_s1 + $0x690] sm:$0xf]  ;;  %v3440_v54 = vor.u32 %v3904_v41, %v3439_v34  ;;  %v3753_v34 = vld [vmem:[%s5787_s1 + $0x164] sm:$0xf] }
  0x75   : > { %2065 = vmatpush.bf16.msrb.mxu2 %v3608_v45  ;;  %v3920_v45 = vld [vmem:[%s5787_s1 + $0x694] sm:$0xf0] }
  0x76   : > { %2079 = vmatpush.bf16.msrb.mxu3 %v3672_v50  ;;  %v3631_v50 = vld [vmem:[%s5787_s1 + $0x790] sm:$0xf]  ;;  %v3504_v59 = vor.u32 %v3920_v45, %v3503_v42  ;;  %v3769_v42 = vld [vmem:[%s5787_s1 + $0x1e4] sm:$0xf]  ;;  %v2905_v45 = vld [vmem:[%s5787_s1 + $0x1e8] sm:$0xf0] }
  0x77   : > { %2038 = vmatpush.bf16.msrb.mxu0 %v3472_v56  ;;  %v3918_v56 = vld [vmem:[%s5787_s1 + $0x684] sm:$0xf0]  ;;  %v3632_v0 = vor.u32 %v3952_v51, %v3631_v50  ;;  %v3719_v51 = vld [vmem:[%s5787_s1 + $0x54] sm:$0xf] }
  0x78   : > { %2052 = vmatpush.bf16.msrb.mxu1 %v3536_v57  ;;  %v3559_v57 = vld [vmem:[%s5787_s1 + $0x700] sm:$0xf]  ;;  %v3496_v11 = vor.u32 %v3918_v56, %v3495_v55  ;;  %v2769_v55 = vld [vmem:[%s5787_s1 + $0xd8] sm:$0xf0]  ;;  %v3751_v56 = vld [vmem:[%s5787_s1 + $0x154] sm:$0xf] }
  0x79   : > { %2066 = vmatpush.bf16.msrb.mxu2 %v3600_v58  ;;  %v3934_v58 = vld [vmem:[%s5787_s1 + $0x704] sm:$0xf0] }
  0x7a   : > { %2080 = vmatpush.bf16.msrb.mxu3 %v3664_v62  ;;  %v3950_v62 = vld [vmem:[%s5787_s1 + $0x784] sm:$0xf0]  ;;  %v3560_v12 = vor.u32 %v3934_v58, %v3559_v57  ;;  %v2833_v57 = vld [vmem:[%s5787_s1 + $0x158] sm:$0xf0]  ;;  %v3767_v58 = vld [vmem:[%s5787_s1 + $0x1d4] sm:$0xf] }
  0x7b   : > { %2039 = vmatpush.bf16.msrb.mxu0 %v3464_v4  ;;  %v3755_v4 = vld [vmem:[%s5787_s1 + $0x174] sm:$0xf] }
  0x7c   : > { %2053 = vmatpush.bf16.msrb.mxu1 %v3528_v5  ;;  %v2849_v5 = vld [vmem:[%s5787_s1 + $0x178] sm:$0xf0] }
  0x7d   : > { %2067 = vmatpush.bf16.msrb.mxu2 %v3592_v6  ;;  %v3771_v6 = vld [vmem:[%s5787_s1 + $0x1f4] sm:$0xf] }
  0x7e   : > { %2081 = vmatpush.bf16.msrb.mxu3 %v3656_v10  ;;  %v3707_v10 = vld [vmem:[%s4367_s23 + $0x6c] sm:$0xf0]  ;;  %v2916_v30 = vor.u32 %v3771_v6, %v2913_v8  ;;  %v3765_v6 = vld [vmem:[%s5787_s1 + $0x1c4] sm:$0xf] }
  0x7f   : > { %2040 = vmatpush.bf16.msrb.mxu0 %v3456_v17  ;;  %v3624_v17 = vor.u32 %v3950_v62, %v3623_v61  ;;  %v4956_v32 = vor.u32 %v3707_v10, %v2647_v9  ;;  %v2772_v61 = vor.u32 %v3735_v53, %v2769_v55  ;;  %v2836_v62 = vor.u32 %v3751_v56, %v2833_v57  ;;  %v3727_v53 = vld [vmem:[%s5787_s1 + $0x94] sm:$0xf]  ;;  %v2737_v55 = vld [vmem:[%s5787_s1 + $0x98] sm:$0xf0] }
  0x80   : > { %2054 = vmatpush.bf16.msrb.mxu1 %v3520_v18  ;;  %v2724_v18 = vor.u32 %v3723_v63, %v2721_v1  ;;  %v3717_v63 = vld [vmem:[%s5787_s1 + $0x44] sm:$0xf]  ;;  %v3743_v56 = vld [vmem:[%s5787_s1 + $0x114] sm:$0xf]  ;;  %v2801_v57 = vld [vmem:[%s5787_s1 + $0x118] sm:$0xf0] }
  0x81   : > { %2068 = vmatpush.bf16.msrb.mxu2 %v3584_v21  ;;  %v2649_v21 = vld [vmem:[%s4367_s23 + $0x70] sm:$0xf0]  ;;  %v3733_v1 = vld [vmem:[%s5787_s1 + $0xc4] sm:$0xf] }
  0x82   : > { %2082 = vmatpush.bf16.msrb.mxu3 %v3648_v26  ;;  %v2852_v26 = vor.u32 %v3755_v4, %v2849_v5  ;;  %v4969_v41 = vor.u32 %v3699_v16, %v2649_v21  ;;  %v3749_v4 = vld [vmem:[%s5787_s1 + $0x144] sm:$0xf]  ;;  %v2825_v5 = vld [vmem:[%s5787_s1 + $0x148] sm:$0xf0]  ;;  %v2764_v9 = vor.u32 %v3733_v1, %v2761_v3  ;;  %v2753_v16 = vld [vmem:[%s5787_s1 + $0xb8] sm:$0xf0] }
  0x83   : > { %2041 = vmatpush.bf16.msrb.mxu0 %v3448_v33  ;;  %v2777_v33 = vld [vmem:[%s5787_s1 + $0xe8] sm:$0xf0]  ;;  %v2828_v10 = vor.u32 %v3749_v4, %v2825_v5  ;;  %v3763_v21 = vld [vmem:[%s5787_s1 + $0x1b4] sm:$0xf]  ;;  %v3725_v1 = vld [vmem:[%s5787_s1 + $0x84] sm:$0xf] }
  0x84   : > { %2055 = vmatpush.bf16.msrb.mxu1 %v3512_v37  ;;  %v2841_v37 = vld [vmem:[%s5787_s1 + $0x168] sm:$0xf0]  ;;  %v2780_v49 = vor.u32 %v3737_v29, %v2777_v33  ;;  %v3729_v29 = vld [vmem:[%s5787_s1 + $0xa4] sm:$0xf] }
  0x85   : > { %2069 = vmatpush.bf16.msrb.mxu2 %v3576_v38  ;;  %v4967_v38 = vor.u32 %v3708_v15, %v2655_v13  ;;  %v2844_v50 = vor.u32 %v3753_v34, %v2841_v37  ;;  %v3731_v13 = vld [vmem:[%s5787_s1 + $0xb4] sm:$0xf]  ;;  %v2745_v33 = vld [vmem:[%s5787_s1 + $0xa8] sm:$0xf0]  ;;  %v3745_v34 = vld [vmem:[%s5787_s1 + $0x124] sm:$0xf] }
  0x86   : > { %2083 = vmatpush.bf16.msrb.mxu3 %v3640_v46  ;;  %v4977_v46 = vor.u32 %v3700_v22, %v2657_v23  ;;  %v2881_v22 = vld [vmem:[%s5787_s1 + $0x1b8] sm:$0xf0]  ;;  %v2809_v37 = vld [vmem:[%s5787_s1 + $0x128] sm:$0xf0]  ;;  %v3741_v3 = vld [vmem:[%s5787_s1 + $0x104] sm:$0xf] }
  0x87   : > { %2042 = vmatpush.bf16.msrb.mxu0 %v3440_v54  ;;  %v2908_v54 = vor.u32 %v3769_v42, %v2905_v45  ;;  %v3761_v42 = vld [vmem:[%s5787_s1 + $0x1a4] sm:$0xf]  ;;  %v2873_v45 = vld [vmem:[%s5787_s1 + $0x1a8] sm:$0xf0] }
  0x88   : > { %2056 = vmatpush.bf16.msrb.mxu1 %v3504_v59  ;;  %v2897_v59 = vld [vmem:[%s5787_s1 + $0x1d8] sm:$0xf0]  ;;  %v2793_v5 = vld [vmem:[%s5787_s1 + $0x108] sm:$0xf0] }
  0x89   : > { %2070 = vmatpush.bf16.msrb.mxu2 %v3568_v60  ;;  %v2708_v60 = vor.u32 %v3719_v51, %v2705_v52  ;;  %v2900_v2 = vor.u32 %v3767_v58, %v2897_v59  ;;  %v3711_v51 = vld [vmem:[%s5787_s1 + $0x14] sm:$0xf]  ;;  %v2673_v52 = vld [vmem:[%s5787_s1 + $0x18] sm:$0xf0] }
  0x8a   : > { %2084 = vmatpush.bf16.msrb.mxu3 %v3632_v0  ;;  %v2697_v0 = vld [vmem:[%s5787_s1 + $0x48] sm:$0xf0]  ;;  %v3759_v58 = vld [vmem:[%s5787_s1 + $0x194] sm:$0xf]  ;;  %v2865_v59 = vld [vmem:[%s5787_s1 + $0x198] sm:$0xf0] }
  0x8b   : > { %2043 = vmatpush.bf16.msrb.mxu0 %v3432_v7  ;;  %v2889_v7 = vld [vmem:[%s5787_s1 + $0x1c8] sm:$0xf0]  ;;  %v2700_v8 = vor.u32 %v3717_v63, %v2697_v0  ;;  %v2740_v63 = vor.u32 %v3727_v53, %v2737_v55  ;;  %v2804_v0 = vor.u32 %v3743_v56, %v2801_v57  ;;  %v2868_v4 = vor.u32 %v3759_v58, %v2865_v59  ;;  %v3799_v53 = vld [vmem:[%s5787_s1 + $0x2d4] sm:$0xf]  ;;  %v3025_v55 = vld [vmem:[%s5787_s1 + $0x2d8] sm:$0xf0] }
  0x8c   : > { %2057 = vmatpush.bf16.msrb.mxu1 %v3496_v11  ;;  %v3715_v11 = vld [vmem:[%s5787_s1 + $0x34] sm:$0xf]  ;;  %v2892_v15 = vor.u32 %v3765_v6, %v2889_v7  ;;  %v3757_v6 = vld [vmem:[%s5787_s1 + $0x184] sm:$0xf]  ;;  %v2857_v7 = vld [vmem:[%s5787_s1 + $0x188] sm:$0xf0] }
  0x8d   : > { %2071 = vmatpush.bf16.msrb.mxu2 %v3560_v12  ;;  %v2689_v12 = vld [vmem:[%s5787_s1 + $0x38] sm:$0xf0]  ;;  %v3815_v56 = vld [vmem:[%s5787_s1 + $0x354] sm:$0xf] }
  0x8e   : > { %2085 = vmatpush.bf16.msrb.mxu3 %v3624_v17  ;;  %2044 = vmatmul.bf16.vlgmr.msrb.gmra.mxu0 %v4956_v32  ;;  %v3747_v17 = vld [vmem:[%s5787_s1 + $0x134] sm:$0xf]  ;;  %v2692_v23 = vor.u32 %v3715_v11, %v2689_v12  ;;  %v3041_v12 = vld [vmem:[%s5787_s1 + $0x2f8] sm:$0xf0] }
  0x8f   : > { %2092 = vmatpush.bf16.msra.mxu0 %v2724_v18  ;;  %2058 = vmatmul.bf16.vlgmr.msrb.gmra.mxu1 %v4969_v41  ;;  %v2817_v18 = vld [vmem:[%s5787_s1 + $0x138] sm:$0xf0]  ;;  %v3831_v58 = vld [vmem:[%s5787_s1 + $0x3d4] sm:$0xf] }
  0x90   : > { %2106 = vmatpush.bf16.msra.mxu1 %v2788_v25  ;;  %2072 = vmatmul.bf16.vlgmr.msrb.gmra.mxu2 %v4967_v38  ;;  %v2756_v25 = vor.u32 %v3731_v13, %v2753_v16  ;;  %v3819_v13 = vld [vmem:[%s5787_s1 + $0x374] sm:$0xf]  ;;  %v3089_v57 = vld [vmem:[%s5787_s1 + $0x358] sm:$0xf0] }
  0x91   : > { %2120 = vmatpush.bf16.msra.mxu2 %v2852_v26  ;;  %2086 = vmatmul.bf16.vlgmr.msrb.gmra.mxu3 %v4977_v46  ;;  %v2820_v26 = vor.u32 %v3747_v17, %v2817_v18  ;;  %v2796_v17 = vor.u32 %v3741_v3, %v2793_v5  ;;  %v3835_v18 = vld [vmem:[%s5787_s1 + $0x3f4] sm:$0xf]  ;;  %v3153_v59 = vld [vmem:[%s5787_s1 + $0x3d8] sm:$0xf0]  ;;  %v3145_v3 = vld [vmem:[%s5787_s1 + $0x3c8] sm:$0xf0] }
  0x92   : > { %2134 = vmatpush.bf16.msra.mxu3 %v2916_v30  ;;  %v2884_v30 = vor.u32 %v3763_v21, %v2881_v22  ;;  %v3169_v21 = vld [vmem:[%s5787_s1 + $0x3f8] sm:$0xf0]  ;;  %v2860_v22 = vor.u32 %v3757_v6, %v2857_v7  ;;  %v3779_v7 = vld [vmem:[%s5787_s1 + $0x234] sm:$0xf] }
  0x93   : > { %2093 = vmatpush.bf16.msra.mxu0 %v2716_v48  ;;  %v2684_v48 = vor.u32 %v3713_v27, %v2681_v28  ;;  %v3785_v27 = vld [vmem:[%s5787_s1 + $0x264] sm:$0xf]  ;;  %v2969_v28 = vld [vmem:[%s5787_s1 + $0x268] sm:$0xf0] }
  0x94   : > { %2107 = vmatpush.bf16.msra.mxu1 %v2780_v49  ;;  %v2748_v49 = vor.u32 %v3729_v29, %v2745_v33  ;;  %v3801_v29 = vld [vmem:[%s5787_s1 + $0x2e4] sm:$0xf]  ;;  %v3033_v33 = vld [vmem:[%s5787_s1 + $0x2e8] sm:$0xf0] }
  0x95   : > { %2121 = vmatpush.bf16.msra.mxu2 %v2844_v50  ;;  %v2812_v50 = vor.u32 %v3745_v34, %v2809_v37  ;;  %v3817_v34 = vld [vmem:[%s5787_s1 + $0x364] sm:$0xf]  ;;  %v3097_v37 = vld [vmem:[%s5787_s1 + $0x368] sm:$0xf0] }
  0x96   : > { %2135 = vmatpush.bf16.msra.mxu3 %v2908_v54  ;;  %v2876_v54 = vor.u32 %v3761_v42, %v2873_v45  ;;  %v3833_v42 = vld [vmem:[%s5787_s1 + $0x3e4] sm:$0xf]  ;;  %v3161_v45 = vld [vmem:[%s5787_s1 + $0x3e8] sm:$0xf0] }
  0x97   : > { %2094 = vmatpush.bf16.msra.mxu0 %v2708_v60  ;;  %v2676_v60 = vor.u32 %v3711_v51, %v2673_v52  ;;  %v3783_v51 = vld [vmem:[%s5787_s1 + $0x254] sm:$0xf]  ;;  %v2961_v52 = vld [vmem:[%s5787_s1 + $0x258] sm:$0xf0] }
  0x98   : > { %2108 = vmatpush.bf16.msra.mxu1 %v2772_v61  ;;  %v3709_v61 = vld [vmem:[%s5787_s1 + $0x4] sm:$0xf] }
  0x99   : > { %2122 = vmatpush.bf16.msra.mxu2 %v2836_v62  ;;  %v2665_v62 = vld [vmem:[%s5787_s1 + $0x8] sm:$0xf0] }
  0x9a   : > { %2136 = vmatpush.bf16.msra.mxu3 %v2900_v2  ;;  %v2729_v2 = vld [vmem:[%s5787_s1 + $0x88] sm:$0xf0]  ;;  %v2668_v11 = vor.u32 %v3709_v61, %v2665_v62  ;;  %v3028_v61 = vor.u32 %v3799_v53, %v3025_v55  ;;  %v3781_v62 = vld [vmem:[%s5787_s1 + $0x244] sm:$0xf]  ;;  %v3807_v55 = vld [vmem:[%s5787_s1 + $0x314] sm:$0xf] }
  0x9b   : > { %2095 = vmatpush.bf16.msra.mxu0 %v2700_v8  ;;  %v3787_v8 = vld [vmem:[%s5787_s1 + $0x274] sm:$0xf]  ;;  %v2732_v16 = vor.u32 %v3725_v1, %v2729_v2  ;;  %v3081_v1 = vld [vmem:[%s5787_s1 + $0x348] sm:$0xf0]  ;;  %v3829_v2 = vld [vmem:[%s5787_s1 + $0x3c4] sm:$0xf] }
  0x9c   : > { %2109 = vmatpush.bf16.msra.mxu1 %v2764_v9  ;;  %v2977_v9 = vld [vmem:[%s5787_s1 + $0x278] sm:$0xf0] }
  0x9d   : > { %2123 = vmatpush.bf16.msra.mxu2 %v2828_v10  ;;  %v3803_v10 = vld [vmem:[%s5787_s1 + $0x2f4] sm:$0xf] }
  0x9e   : > { %2137 = vmatpush.bf16.msra.mxu3 %v2892_v15  ;;  %v3105_v15 = vld [vmem:[%s5787_s1 + $0x378] sm:$0xf0] }
  0x9f   : > { %2096 = vmatpush.bf16.msra.mxu0 %v2692_v23  ;;  %v2980_v23 = vor.u32 %v3787_v8, %v2977_v9  ;;  %v2945_v8 = vld [vmem:[%s5787_s1 + $0x238] sm:$0xf0]  ;;  %v3795_v9 = vld [vmem:[%s5787_s1 + $0x2b4] sm:$0xf] }
  0xa0   : > { %2110 = vmatpush.bf16.msra.mxu1 %v2756_v25  ;;  %v3044_v25 = vor.u32 %v3803_v10, %v3041_v12  ;;  %v3148_v10 = vor.u32 %v3829_v2, %v3145_v3  ;;  %v3811_v12 = vld [vmem:[%s5787_s1 + $0x334] sm:$0xf]  ;;  %v3113_v2 = vld [vmem:[%s5787_s1 + $0x388] sm:$0xf0] }
  0xa1   : > { %2124 = vmatpush.bf16.msra.mxu2 %v2820_v26  ;;  %v3108_v26 = vor.u32 %v3819_v13, %v3105_v15  ;;  %v3073_v13 = vld [vmem:[%s5787_s1 + $0x338] sm:$0xf0]  ;;  %v3827_v15 = vld [vmem:[%s5787_s1 + $0x3b4] sm:$0xf] }
  0xa2   : > { %2138 = vmatpush.bf16.msra.mxu3 %v2884_v30  ;;  %v3172_v30 = vor.u32 %v3835_v18, %v3169_v21  ;;  %v3076_v21 = vor.u32 %v3811_v12, %v3073_v13  ;;  %v3883_v12 = vld [vmem:[%s5787_s1 + $0x574] sm:$0xf]  ;;  %v3361_v13 = vld [vmem:[%s5787_s1 + $0x578] sm:$0xf0] }
  0xa3   : > { %2097 = vmatpush.bf16.msra.mxu0 %v2684_v48  ;;  %v2972_v48 = vor.u32 %v3785_v27, %v2969_v28  ;;  %v3001_v27 = vld [vmem:[%s5787_s1 + $0x2a8] sm:$0xf0]  ;;  %v3809_v28 = vld [vmem:[%s5787_s1 + $0x324] sm:$0xf] }
  0xa4   : > { %2111 = vmatpush.bf16.msra.mxu1 %v2748_v49  ;;  %v3036_v49 = vor.u32 %v3801_v29, %v3033_v33  ;;  %v3065_v29 = vld [vmem:[%s5787_s1 + $0x328] sm:$0xf0] }
  0xa5   : > { %2125 = vmatpush.bf16.msra.mxu2 %v2812_v50  ;;  %v3100_v50 = vor.u32 %v3817_v34, %v3097_v37  ;;  %v3129_v33 = vld [vmem:[%s5787_s1 + $0x3a8] sm:$0xf0] }
  0xa6   : > { %2139 = vmatpush.bf16.msra.mxu3 %v2876_v54  ;;  %v3164_v54 = vor.u32 %v3833_v42, %v3161_v45 }
  0xa7   : > { %2098 = vmatpush.bf16.msra.mxu0 %v2676_v60  ;;  %v2964_v60 = vor.u32 %v3783_v51, %v2961_v52  ;;  %v3791_v51 = vld [vmem:[%s5787_s1 + $0x294] sm:$0xf] }
  0xa8   : > { %2112 = vmatpush.bf16.msra.mxu1 %v2740_v63  ;;  %v2953_v63 = vld [vmem:[%s5787_s1 + $0x248] sm:$0xf0] }
  0xa9   : > { %2126 = vmatpush.bf16.msra.mxu2 %v2804_v0  ;;  %v3813_v0 = vld [vmem:[%s5787_s1 + $0x344] sm:$0xf] }
  0xaa   : > { %2140 = vmatpush.bf16.msra.mxu3 %v2868_v4  ;;  %v2956_v4 = vor.u32 %v3781_v62, %v2953_v63  ;;  %v3084_v6 = vor.u32 %v3813_v0, %v3081_v1  ;;  %v3789_v63 = vld [vmem:[%s5787_s1 + $0x284] sm:$0xf]  ;;  %v3049_v0 = vld [vmem:[%s5787_s1 + $0x308] sm:$0xf0] }
  0xab   : > { %2099 = vmatpush.bf16.msra.mxu0 %v2668_v11  ;;  %v3009_v11 = vld [vmem:[%s5787_s1 + $0x2b8] sm:$0xf0]  ;;  %v3821_v1 = vld [vmem:[%s5787_s1 + $0x384] sm:$0xf] }
  0xac   : > { %2113 = vmatpush.bf16.msra.mxu1 %v2732_v16  ;;  %v3137_v16 = vld [vmem:[%s5787_s1 + $0x3b8] sm:$0xf0]  ;;  %v3012_v18 = vor.u32 %v3795_v9, %v3009_v11 }
  0xad   : > { %2127 = vmatpush.bf16.msra.mxu2 %v2796_v17  ;;  %v2948_v17 = vor.u32 %v3779_v7, %v2945_v8  ;;  %v3297_v11 = vld [vmem:[%s5787_s1 + $0x4f8] sm:$0xf0] }
  0xae   : > { %2141 = vmatpush.bf16.msra.mxu3 %v2860_v22  ;;  %2100 = vmatmul.bf16.vlgmr.msra.gmra.mxu0 %v4375_v14  ;;  %v3092_v14 = vor.u32 %v3815_v56, %v3089_v57  ;;  %v3777_v22 = vld [vmem:[%s5787_s1 + $0x224] sm:$0xf]  ;;  %v1877_v34 = vpop.f32.mrf.mxu0  ;;  %v3057_v56 = vld [vmem:[%s5787_s1 + $0x318] sm:$0xf0]  ;;  %v3823_v57 = vld [vmem:[%s5787_s1 + $0x394] sm:$0xf] }
  0xaf   : > { %2148 = vmatpush.bf16.msrb.mxu0 %v2980_v23  ;;  %2114 = vmatmul.bf16.vlgmr.msra.gmra.mxu1 %v4385_v20  ;;  %v3156_v20 = vor.u32 %v3831_v58, %v3153_v59  ;;  %v2937_v23 = vld [vmem:[%s5787_s1 + $0x228] sm:$0xf0]  ;;  %v3121_v58 = vld [vmem:[%s5787_s1 + $0x398] sm:$0xf0]  ;;  %v3060_v62 = vor.u32 %v3807_v55, %v3057_v56  ;;  %v3863_v56 = vld [vmem:[%s5787_s1 + $0x4d4] sm:$0xf] }
  0xb0   : > { %2162 = vmatpush.bf16.msrb.mxu1 %v3044_v25  ;;  %2128 = vmatmul.bf16.vlgmr.msra.gmra.mxu2 %v4383_v19  ;;  %v3797_v19 = vld [vmem:[%s5787_s1 + $0x2c4] sm:$0xf]  ;;  %v2940_v37 = vor.u32 %v3777_v22, %v2937_v23  ;;  %v1891_v42 = vpop.f32.mrf.mxu1  ;;  %v3217_v55 = vld [vmem:[%s5787_s1 + $0x458] sm:$0xf0] }
  0xb1   : > { %2176 = vmatpush.bf16.msrb.mxu2 %v3108_v26  ;;  %2142 = vmatmul.bf16.vlgmr.msra.gmra.mxu3 %v4389_v24  ;;  %v3017_v24 = vld [vmem:[%s5787_s1 + $0x2c8] sm:$0xf0]  ;;  %v3793_v25 = vld [vmem:[%s5787_s1 + $0x2a4] sm:$0xf]  ;;  %v3140_v26 = vor.u32 %v3827_v15, %v3137_v16  ;;  %v1892_v52 = vadd.f32 %v1891_v42, %v1877_v34 }
  0xb2   : > { %2190 = vmatpush.bf16.msrb.mxu3 %v3172_v30  ;;  %v3020_v5 = vor.u32 %v3797_v19, %v3017_v24  ;;  %v3825_v30 = vld [vmem:[%s5787_s1 + $0x3a4] sm:$0xf]  ;;  %v3004_v45 = vor.u32 %v3793_v25, %v3001_v27  ;;  %v2985_v19 = vld [vmem:[%s5787_s1 + $0x288] sm:$0xf0]  ;;  %v3124_v24 = vor.u32 %v3823_v57, %v3121_v58  ;;  %v3116_v25 = vor.u32 %v3821_v1, %v3113_v2 }
  0xb3   : > { %2149 = vmatpush.bf16.msrb.mxu0 %v2972_v48  ;;  %v3068_v48 = vor.u32 %v3809_v28, %v3065_v29  ;;  %v3132_v53 = vor.u32 %v3825_v30, %v3129_v33  ;;  %v3364_v28 = vor.u32 %v3883_v12, %v3361_v13  ;;  %v3849_v29 = vld [vmem:[%s5787_s1 + $0x464] sm:$0xf]  ;;  %v3225_v30 = vld [vmem:[%s5787_s1 + $0x468] sm:$0xf0]  ;;  %v3843_v12 = vld [vmem:[%s5787_s1 + $0x434] sm:$0xf] }
  0xb4   : > { %2163 = vmatpush.bf16.msrb.mxu1 %v3036_v49  ;;  %v3775_v49 = vld [vmem:[%s5787_s1 + $0x214] sm:$0xf]  ;;  %v3865_v33 = vld [vmem:[%s5787_s1 + $0x4e4] sm:$0xf]  ;;  %v3273_v1 = vld [vmem:[%s5787_s1 + $0x4c8] sm:$0xf0] }
  0xb5   : > { %2177 = vmatpush.bf16.msrb.mxu2 %v3100_v50  ;;  %v2929_v50 = vld [vmem:[%s5787_s1 + $0x218] sm:$0xf0]  ;;  %v1905_v3 = vpop.f32.mrf.mxu2  ;;  %v3881_v42 = vld [vmem:[%s5787_s1 + $0x564] sm:$0xf] }
  0xb6   : > { %2191 = vmatpush.bf16.msrb.mxu3 %v3164_v54  ;;  %v2993_v54 = vld [vmem:[%s5787_s1 + $0x298] sm:$0xf0]  ;;  %v2932_v59 = vor.u32 %v3775_v49, %v2929_v50  ;;  %v1906_v7 = vadd.f32 %v1905_v3, %v1892_v52  ;;  %v1879_v15 = vpop.f32.mrf.mxu0  ;;  %v3417_v49 = vld [vmem:[%s5787_s1 + $0x5e8] sm:$0xf0]  ;;  %v3228_v50 = vor.u32 %v3849_v29, %v3225_v30  ;;  %v3877_v2 = vld [vmem:[%s5787_s1 + $0x544] sm:$0xf] }
  0xb7   : > { %2150 = vmatpush.bf16.msrb.mxu0 %v2964_v60  ;;  %v3773_v60 = vld [vmem:[%s5787_s1 + $0x204] sm:$0xf]  ;;  %v1919_v8 = vpop.f32.mrf.mxu3  ;;  %v3337_v3 = vld [vmem:[%s5787_s1 + $0x548] sm:$0xf0]  ;;  %v3201_v13 = vld [vmem:[%s5787_s1 + $0x438] sm:$0xf0] }
  0xb8   : > { %2164 = vmatpush.bf16.msrb.mxu1 %v3028_v61  ;;  %v2921_v61 = vld [vmem:[%s5787_s1 + $0x208] sm:$0xf0]  ;;  %v1893_v16 = vpop.f32.mrf.mxu1  ;;  %v1920_v22 = vadd.f32 %v1919_v8, %v1906_v7  ;;  %v3841_v29 = vld [vmem:[%s5787_s1 + $0x424] sm:$0xf] }
  0xb9   : > { %2178 = vmatpush.bf16.msrb.mxu2 %v3092_v14  ;;  %v2996_v14 = vor.u32 %v3791_v51, %v2993_v54  ;;  %v2924_v9 = vor.u32 %v3773_v60, %v2921_v61  ;;  %v1894_v23 = vadd.f32 %v1893_v16, %v1879_v15  ;;  %v3847_v54 = vld [vmem:[%s5787_s1 + $0x454] sm:$0xf]  ;;  %v3345_v61 = vld [vmem:[%s5787_s1 + $0x558] sm:$0xf0]  ;;  %v3193_v30 = vld [vmem:[%s5787_s1 + $0x428] sm:$0xf0] }
  0xba   : > { %2192 = vmatpush.bf16.msrb.mxu3 %v3156_v20  ;;  %v3805_v20 = vld [vmem:[%s5787_s1 + $0x304] sm:$0xf]  ;;  %v3879_v60 = vld [vmem:[%s5787_s1 + $0x554] sm:$0xf] }
  0xbb   : > { %2151 = vmatpush.bf16.msrb.mxu0 %v2956_v4  ;;  %v3851_v4 = vld [vmem:[%s5787_s1 + $0x474] sm:$0xf] }
  0xbc   : > { %2165 = vmatpush.bf16.msrb.mxu1 %v3020_v5  ;;  %v3233_v5 = vld [vmem:[%s5787_s1 + $0x478] sm:$0xf0]  ;;  %v3859_v15 = vld [vmem:[%s5787_s1 + $0x4b4] sm:$0xf] }
  0xbd   : > { %2179 = vmatpush.bf16.msrb.mxu2 %v3084_v6  ;;  %v3867_v6 = vld [vmem:[%s5787_s1 + $0x4f4] sm:$0xf]  ;;  %v1907_v51 = vpop.f32.mrf.mxu2 }
  0xbe   : > { %2193 = vmatpush.bf16.msrb.mxu3 %v3148_v10  ;;  %v2988_v10 = vor.u32 %v3789_v63, %v2985_v19  ;;  %v3300_v27 = vor.u32 %v3867_v6, %v3297_v11  ;;  %v1908_v57 = vadd.f32 %v1907_v51, %v1894_v23  ;;  %v3220_v19 = vor.u32 %v3847_v54, %v3217_v55  ;;  %v3401_v6 = vld [vmem:[%s5787_s1 + $0x5c8] sm:$0xf0]  ;;  %v3891_v23 = vld [vmem:[%s5787_s1 + $0x5b4] sm:$0xf] }
  0xbf   : > { %2152 = vmatpush.bf16.msrb.mxu0 %v2948_v17  ;;  %v3052_v17 = vor.u32 %v3805_v20, %v3049_v0  ;;  %v3861_v0 = vld [vmem:[%s5787_s1 + $0x4c4] sm:$0xf]  ;;  %v3340_v11 = vor.u32 %v3877_v2, %v3337_v3  ;;  %v3196_v55 = vor.u32 %v3841_v29, %v3193_v30 }
  0xc0   : > { %2166 = vmatpush.bf16.msrb.mxu1 %v3012_v18  ;;  %v3899_v18 = vld [vmem:[%s5787_s1 + $0x5f4] sm:$0xf]  ;;  %v3853_v3 = vld [vmem:[%s5787_s1 + $0x484] sm:$0xf] }
  0xc1   : > { %2180 = vmatpush.bf16.msrb.mxu2 %v3076_v21  ;;  %v3425_v21 = vld [vmem:[%s5787_s1 + $0x5f8] sm:$0xf0] }
  0xc2   : > { %2194 = vmatpush.bf16.msrb.mxu3 %v3140_v26  ;;  %v3236_v26 = vor.u32 %v3851_v4, %v3233_v5  ;;  %v3428_v34 = vor.u32 %v3899_v18, %v3425_v21  ;;  %v3893_v5 = vld [vmem:[%s5787_s1 + $0x5c4] sm:$0xf]  ;;  %v3265_v18 = vld [vmem:[%s5787_s1 + $0x4b8] sm:$0xf0]  ;;  %v3875_v21 = vld [vmem:[%s5787_s1 + $0x534] sm:$0xf] }
  0xc3   : > { %2153 = vmatpush.bf16.msrb.mxu0 %v2940_v37  ;;  %v3289_v37 = vld [vmem:[%s5787_s1 + $0x4e8] sm:$0xf0]  ;;  %v3404_v16 = vor.u32 %v3893_v5, %v3401_v6  ;;  %v3869_v5 = vld [vmem:[%s5787_s1 + $0x504] sm:$0xf] }
  0xc4   : > { %2167 = vmatpush.bf16.msrb.mxu1 %v3004_v45  ;;  %v3353_v45 = vld [vmem:[%s5787_s1 + $0x568] sm:$0xf0]  ;;  %v3292_v52 = vor.u32 %v3865_v33, %v3289_v37  ;;  %v3857_v33 = vld [vmem:[%s5787_s1 + $0x4a4] sm:$0xf] }
  0xc5   : > { %2181 = vmatpush.bf16.msrb.mxu2 %v3068_v48  ;;  %v3897_v48 = vld [vmem:[%s5787_s1 + $0x5e4] sm:$0xf] }
  0xc6   : > { %2195 = vmatpush.bf16.msrb.mxu3 %v3132_v53  ;;  %v3356_v53 = vor.u32 %v3881_v42, %v3353_v45  ;;  %v3420_v58 = vor.u32 %v3897_v48, %v3417_v49  ;;  %v3257_v42 = vld [vmem:[%s5787_s1 + $0x4a8] sm:$0xf0]  ;;  %v3873_v45 = vld [vmem:[%s5787_s1 + $0x524] sm:$0xf] }
  0xc7   : > { %2154 = vmatpush.bf16.msrb.mxu0 %v2932_v59  ;;  %v3281_v59 = vld [vmem:[%s5787_s1 + $0x4d8] sm:$0xf0]  ;;  %v3321_v48 = vld [vmem:[%s5787_s1 + $0x528] sm:$0xf0] }
  0xc8   : > { %2168 = vmatpush.bf16.msrb.mxu1 %v2996_v14  ;;  %v1921_v14 = vpop.f32.mrf.mxu3  ;;  %v3284_v20 = vor.u32 %v3863_v56, %v3281_v59  ;;  %v3324_v59 = vor.u32 %v3873_v45, %v3321_v48  ;;  %v3929_v45 = vld [vmem:[%s5787_s1 + $0x6e4] sm:$0xf] }
  0xc9   : > { %2182 = vmatpush.bf16.msrb.mxu2 %v3060_v62  ;;  %v3409_v62 = vld [vmem:[%s5787_s1 + $0x5d8] sm:$0xf0]  ;;  %v1922_v63 = vadd.f32 %v1921_v14, %v1908_v57  ;;  %v3855_v14 = vld [vmem:[%s5787_s1 + $0x494] sm:$0xf] }
  0xca   : > { %2196 = vmatpush.bf16.msrb.mxu3 %v3124_v24  ;;  %v3348_v24 = vor.u32 %v3879_v60, %v3345_v61  ;;  %v3839_v60 = vld [vmem:[%s5787_s1 + $0x414] sm:$0xf]  ;;  %v3185_v61 = vld [vmem:[%s5787_s1 + $0x418] sm:$0xf0] }
  0xcb   : > { %2155 = vmatpush.bf16.msrb.mxu0 %v2924_v9  ;;  %v1933_v4 = vpop.f32.mrf.mxu0 }
  0xcc   : > { %2169 = vmatpush.bf16.msrb.mxu1 %v2988_v10  ;;  %v1934_v7 = vadd.f32 %v1933_v4, %v1920_v22  ;;  %v1947_v9 = vpop.f32.mrf.mxu1  ;;  %v3276_v10 = vor.u32 %v3861_v0, %v3273_v1  ;;  %v3329_v22 = vld [vmem:[%s5787_s1 + $0x538] sm:$0xf0]  ;;  %v3837_v0 = vld [vmem:[%s5787_s1 + $0x404] sm:$0xf]  ;;  %v3241_v4 = vld [vmem:[%s5787_s1 + $0x488] sm:$0xf0] }
  0xcd   : > { %2183 = vmatpush.bf16.msrb.mxu2 %v3052_v17 }
  0xce   : > { %2197 = vmatpush.bf16.msrb.mxu3 %v3116_v25  ;;  %2156 = vmatmul.bf16.vlgmr.msrb.gmra.mxu0 %v4532_v39  ;;  %v3895_v39 = vld [vmem:[%s5787_s1 + $0x5d4] sm:$0xf]  ;;  %v1948_v17 = vadd.f32 %v1947_v9, %v1934_v7  ;;  %v3393_v25 = vld [vmem:[%s5787_s1 + $0x5b8] sm:$0xf0]  ;;  %v3885_v9 = vld [vmem:[%s5787_s1 + $0x584] sm:$0xf] }
  0xcf   : > { %2204 = vmatpush.bf16.msra.mxu0 %v3236_v26  ;;  %2170 = vmatmul.bf16.vlgmr.msrb.gmra.mxu1 %v4545_v44  ;;  %v3209_v44 = vld [vmem:[%s5787_s1 + $0x448] sm:$0xf0]  ;;  %v3204_v26 = vor.u32 %v3843_v12, %v3201_v13  ;;  %v3915_v13 = vld [vmem:[%s5787_s1 + $0x674] sm:$0xf] }
  0xd0   : > { %2218 = vmatpush.bf16.msra.mxu1 %v3300_v27  ;;  %2184 = vmatmul.bf16.vlgmr.msrb.gmra.mxu2 %v4543_v43  ;;  %v3845_v43 = vld [vmem:[%s5787_s1 + $0x444] sm:$0xf]  ;;  %v3268_v27 = vor.u32 %v3859_v15, %v3265_v18  ;;  %v3489_v15 = vld [vmem:[%s5787_s1 + $0x678] sm:$0xf0] }
  0xd1   : > { %2232 = vmatpush.bf16.msra.mxu2 %v3364_v28  ;;  %2198 = vmatmul.bf16.vlgmr.msrb.gmra.mxu3 %v4553_v47  ;;  %v3412_v47 = vor.u32 %v3895_v39, %v3409_v62  ;;  %v3212_v8 = vor.u32 %v3845_v43, %v3209_v44  ;;  %v3332_v28 = vor.u32 %v3875_v21, %v3329_v22  ;;  %v3377_v43 = vld [vmem:[%s5787_s1 + $0x598] sm:$0xf0]  ;;  %v3947_v21 = vld [vmem:[%s5787_s1 + $0x774] sm:$0xf] }
  0xd2   : > { %2246 = vmatpush.bf16.msra.mxu3 %v3428_v34  ;;  %v3396_v34 = vor.u32 %v3891_v23, %v3393_v25  ;;  %v3188_v44 = vor.u32 %v3839_v60, %v3185_v61  ;;  %v3553_v18 = vld [vmem:[%s5787_s1 + $0x6f8] sm:$0xf0]  ;;  %v3244_v25 = vor.u32 %v3853_v3, %v3241_v4  ;;  %v3492_v30 = vor.u32 %v3915_v13, %v3489_v15  ;;  %v3927_v60 = vld [vmem:[%s5787_s1 + $0x6d4] sm:$0xf]  ;;  %v3657_v3 = vld [vmem:[%s5787_s1 + $0x7c8] sm:$0xf0] }
  0xd3   : > { %2205 = vmatpush.bf16.msra.mxu0 %v3228_v50  ;;  %v1961_v37 = vpop.f32.mrf.mxu2  ;;  %v1935_v50 = vpop.f32.mrf.mxu0  ;;  %v3617_v22 = vld [vmem:[%s5787_s1 + $0x778] sm:$0xf0]  ;;  %v3939_v15 = vld [vmem:[%s5787_s1 + $0x734] sm:$0xf] }
  0xd4   : > { %2219 = vmatpush.bf16.msra.mxu1 %v3292_v52  ;;  %v1962_v49 = vadd.f32 %v1961_v37, %v1948_v17  ;;  %v1975_v51 = vpop.f32.mrf.mxu3  ;;  %v3889_v52 = vld [vmem:[%s5787_s1 + $0x5a4] sm:$0xf]  ;;  %v1936_v54 = vadd.f32 %v1935_v50, %v1922_v63  ;;  %v1949_v56 = vpop.f32.mrf.mxu1  ;;  %v3249_v63 = vld [vmem:[%s5787_s1 + $0x498] sm:$0xf0] }
  0xd5   : > { %2233 = vmatpush.bf16.msra.mxu2 %v3356_v53  ;;  %v3385_v53 = vld [vmem:[%s5787_s1 + $0x5a8] sm:$0xf0]  ;;  %v3252_v1 = vor.u32 %v3855_v14, %v3249_v63  ;;  %v3913_v37 = vld [vmem:[%s5787_s1 + $0x664] sm:$0xf]  ;;  %v3537_v14 = vld [vmem:[%s5787_s1 + $0x6d8] sm:$0xf0] }
  0xd6   : > { %2247 = vmatpush.bf16.msra.mxu3 %v3420_v58  ;;  %v5471_v57 = vadd.f32 %v1975_v51, %v1962_v49  ;;  %v3260_v58 = vor.u32 %v3857_v33, %v3257_v42  ;;  %v3388_v39 = vor.u32 %v3889_v52, %v3385_v53  ;;  %v1950_v62 = vadd.f32 %v1949_v56, %v1936_v54  ;;  %v3481_v42 = vld [vmem:[%s5787_s1 + $0x668] sm:$0xf0]  ;;  %v3945_v50 = vld [vmem:[%s5787_s1 + $0x764] sm:$0xf]  ;;  %v3665_v63 = vld [vmem:[%s5787_s1 + $0x7d8] sm:$0xf0] }
  0xd7   : > { %2206 = vmatpush.bf16.msra.mxu0 %v3220_v19  ;;  %v3871_v19 = vld [vmem:[%s5787_s1 + $0x514] sm:$0xf]  ;;  %v3545_v49 = vld [vmem:[%s5787_s1 + $0x6e8] sm:$0xf0]  ;;  %v3961_v52 = vld [vmem:[%s5787_s1 + $0x7e4] sm:$0xf]  ;;  %v3484_v54 = vor.u32 %v3913_v37, %v3481_v42 }
  0xd8   : > { %2220 = vmatpush.bf16.msra.mxu1 %v3284_v20  ;;  %v3313_v20 = vld [vmem:[%s5787_s1 + $0x518] sm:$0xf0]  ;;  %v3609_v51 = vld [vmem:[%s5787_s1 + $0x768] sm:$0xf0] }
  0xd9   : > { %2234 = vmatpush.bf16.msra.mxu2 %v3348_v24  ;;  %v3887_v24 = vld [vmem:[%s5787_s1 + $0x594] sm:$0xf]  ;;  %v3316_v2 = vor.u32 %v3871_v19, %v3313_v20  ;;  %v3673_v53 = vld [vmem:[%s5787_s1 + $0x7e8] sm:$0xf0]  ;;  %v3612_v56 = vor.u32 %v3945_v50, %v3609_v51  ;;  %v3540_v20 = vor.u32 %v3927_v60, %v3537_v14  ;;  %v3521_v13 = vld [vmem:[%s5787_s1 + $0x6b8] sm:$0xf0] }
  0xda   : > { %2248 = vmatpush.bf16.msra.mxu3 %v3412_v47  ;;  %v3177_v47 = vld [vmem:[%s5787_s1 + $0x408] sm:$0xf0]  ;;  %v3380_v6 = vor.u32 %v3887_v24, %v3377_v43  ;;  %v3676_v61 = vor.u32 %v3961_v52, %v3673_v53  ;;  %v3925_v43 = vld [vmem:[%s5787_s1 + $0x6c4] sm:$0xf]  ;;  %v3919_v60 = vld [vmem:[%s5787_s1 + $0x694] sm:$0xf] }
  0xdb   : > { %2207 = vmatpush.bf16.msra.mxu0 %v3212_v8  ;;  %v1963_v7 = vpop.f32.mrf.mxu2  ;;  %v3305_v8 = vld [vmem:[%s5787_s1 + $0x508] sm:$0xf0]  ;;  %v3180_v17 = vor.u32 %v3837_v0, %v3177_v47  ;;  %v3941_v0 = vld [vmem:[%s5787_s1 + $0x744] sm:$0xf]  ;;  %v3505_v14 = vld [vmem:[%s5787_s1 + $0x698] sm:$0xf0] }
  0xdc   : > { %2221 = vmatpush.bf16.msra.mxu1 %v3276_v10  ;;  %v3369_v10 = vld [vmem:[%s5787_s1 + $0x588] sm:$0xf0]  ;;  %v1977_v12 = vpop.f32.mrf.mxu3 }
  0xdd   : > { %2235 = vmatpush.bf16.msra.mxu2 %v3340_v11  ;;  %v1964_v11 = vadd.f32 %v1963_v7, %v1950_v62  ;;  %v3372_v29 = vor.u32 %v3885_v9, %v3369_v10  ;;  %v3601_v62 = vld [vmem:[%s5787_s1 + $0x758] sm:$0xf0]  ;;  %v3593_v47 = vld [vmem:[%s5787_s1 + $0x748] sm:$0xf0]  ;;  %v3907_v9 = vld [vmem:[%s5787_s1 + $0x634] sm:$0xf] }
  0xde   : > { %2249 = vmatpush.bf16.msra.mxu3 %v3404_v16  ;;  %v3931_v16 = vld [vmem:[%s5787_s1 + $0x6f4] sm:$0xf]  ;;  %v3457_v10 = vld [vmem:[%s5787_s1 + $0x638] sm:$0xf0]  ;;  %v3577_v37 = vld [vmem:[%s5787_s1 + $0x728] sm:$0xf0] }
  0xdf   : > { %2208 = vmatpush.bf16.msra.mxu0 %v3204_v26  ;;  %v5539_v23 = vadd.f32 %v1977_v12, %v1964_v11  ;;  %v3308_v26 = vor.u32 %v3869_v5, %v3305_v8  ;;  %v3556_v33 = vor.u32 %v3931_v16, %v3553_v18  ;;  %v3596_v8 = vor.u32 %v3941_v0, %v3593_v47  ;;  %v3923_v11 = vld [vmem:[%s5787_s1 + $0x6b4] sm:$0xf]  ;;  %v3585_v16 = vld [vmem:[%s5787_s1 + $0x738] sm:$0xf0]  ;;  %v3641_v50 = vld [vmem:[%s5787_s1 + $0x7a8] sm:$0xf0] }
  0xe0   : > { %2222 = vmatpush.bf16.msra.mxu1 %v3268_v27  ;;  %v3963_v27 = vld [vmem:[%s5787_s1 + $0x7f4] sm:$0xf]  ;;  %v3649_v18 = vld [vmem:[%s5787_s1 + $0x7b8] sm:$0xf0]  ;;  %v3497_v0 = vld [vmem:[%s5787_s1 + $0x688] sm:$0xf0] }
  0xe1   : > { %2236 = vmatpush.bf16.msra.mxu2 %v3332_v28  ;;  %v3681_v28 = vld [vmem:[%s5787_s1 + $0x7f8] sm:$0xf0]  ;;  %v3933_v47 = vld [vmem:[%s5787_s1 + $0x704] sm:$0xf] }
  0xe2   : > { %2250 = vmatpush.bf16.msra.mxu3 %v3396_v34  ;;  %v3620_v34 = vor.u32 %v3947_v21, %v3617_v22  ;;  %v3684_v48 = vor.u32 %v3963_v27, %v3681_v28  ;;  %v3460_v21 = vor.u32 %v3907_v9, %v3457_v10  ;;  %v3524_v22 = vor.u32 %v3923_v11, %v3521_v13  ;;  %v3449_v27 = vld [vmem:[%s5787_s1 + $0x628] sm:$0xf0]  ;;  %v3921_v28 = vld [vmem:[%s5787_s1 + $0x6a4] sm:$0xf] }
  0xe3   : > { %2209 = vmatpush.bf16.msra.mxu0 %v3196_v55  ;;  %v3548_v55 = vor.u32 %v3929_v45, %v3545_v49  ;;  %v3953_v49 = vld [vmem:[%s5787_s1 + $0x7a4] sm:$0xf] }
  0xe4   : > { %2223 = vmatpush.bf16.msra.mxu1 %v3260_v58  ;;  %v3911_v58 = vld [vmem:[%s5787_s1 + $0x654] sm:$0xf] }
  0xe5   : > { %2237 = vmatpush.bf16.msra.mxu2 %v3324_v59  ;;  %v3473_v59 = vld [vmem:[%s5787_s1 + $0x658] sm:$0xf0] }
  0xe6   : > { %2251 = vmatpush.bf16.msra.mxu3 %v3388_v39  ;;  %v3943_v39 = vld [vmem:[%s5787_s1 + $0x754] sm:$0xf]  ;;  %v3476_v19 = vor.u32 %v3911_v58, %v3473_v59  ;;  %v3441_v59 = vld [vmem:[%s5787_s1 + $0x618] sm:$0xf0] }
  0xe7   : > { %2210 = vmatpush.bf16.msra.mxu0 %v3188_v44  ;;  %v3604_v24 = vor.u32 %v3943_v39, %v3601_v62  ;;  %v3529_v44 = vld [vmem:[%s5787_s1 + $0x6c8] sm:$0xf0]  ;;  %v3903_v58 = vld [vmem:[%s5787_s1 + $0x614] sm:$0xf]  ;;  %v3569_v62 = vld [vmem:[%s5787_s1 + $0x718] sm:$0xf0] }
  0xe8   : > { %2224 = vmatpush.bf16.msra.mxu1 %v3252_v1  ;;  %v3532_v7 = vor.u32 %v3925_v43, %v3529_v44  ;;  %v3935_v39 = vld [vmem:[%s5787_s1 + $0x714] sm:$0xf]  ;;  %v3917_v43 = vld [vmem:[%s5787_s1 + $0x684] sm:$0xf] }
  0xe9   : > { %2238 = vmatpush.bf16.msra.mxu2 %v3316_v2  ;;  %v3957_v2 = vld [vmem:[%s5787_s1 + $0x7c4] sm:$0xf] }
  0xea   : > { %2252 = vmatpush.bf16.msra.mxu3 %v3380_v6 }
  0xeb   : > { %2211 = vmatpush.bf16.msra.mxu0 %v3180_v17  ;;  %v1989_v1 = vpop.f32.mrf.mxu0  ;;  %v3955_v17 = vld [vmem:[%s5787_s1 + $0x7b4] sm:$0xf] }
  0xec   : > { %2225 = vmatpush.bf16.msra.mxu1 %v3244_v25  ;;  %v1990_v4 = vadd.f32 %v1989_v1, %v5471_v57  ;;  %v2003_v6 = vpop.f32.mrf.mxu1  ;;  %v3660_v57 = vor.u32 %v3957_v2, %v3657_v3  ;;  %v3588_v25 = vor.u32 %v3939_v15, %v3585_v16  ;;  %v3561_v1 = vld [vmem:[%s5787_s1 + $0x708] sm:$0xf0] }
  0xed   : > { %2239 = vmatpush.bf16.msra.mxu2 %v3308_v26  ;;  %v3905_v26 = vld [vmem:[%s5787_s1 + $0x624] sm:$0xf]  ;;  %v3564_v9 = vor.u32 %v3933_v47, %v3561_v1 }
  0xee   : > { %2253 = vmatpush.bf16.msra.mxu3 %v3372_v29  ;;  %2212 = vmatmul.bf16.vlgmr.msra.gmra.mxu0 %v4744_v31  ;;  %v3959_v31 = vld [vmem:[%s5787_s1 + $0x7d4] sm:$0xf]  ;;  %v2004_v12 = vadd.f32 %v2003_v6, %v1990_v4  ;;  %v3652_v29 = vor.u32 %v3955_v17, %v3649_v18  ;;  %v3452_v52 = vor.u32 %v3905_v26, %v3449_v27  ;;  %v3949_v4 = vld [vmem:[%s5787_s1 + $0x784] sm:$0xf] }
  0xef   : > { %2260 = vmatpush.bf16.msrb.mxu0 %v3492_v30  ;;  %2226 = vmatmul.bf16.vlgmr.msra.gmra.mxu1 %v4757_v36  ;;  %v3465_v36 = vld [vmem:[%s5787_s1 + $0x648] sm:$0xf0] }
  0xf0   : > { %2274 = vmatpush.bf16.msrb.mxu1 %v3556_v33  ;;  %2240 = vmatmul.bf16.vlgmr.msra.gmra.mxu2 %v4755_v35  ;;  %v3909_v35 = vld [vmem:[%s5787_s1 + $0x644] sm:$0xf]  ;;  %v3513_v33 = vld [vmem:[%s5787_s1 + $0x6a8] sm:$0xf0] }
  0xf1   : > { %2288 = vmatpush.bf16.msrb.mxu2 %v3620_v34  ;;  %2254 = vmatmul.bf16.vlgmr.msra.gmra.mxu3 %v4765_v40  ;;  %v3668_v40 = vor.u32 %v3959_v31, %v3665_v63  ;;  %v3468_v5 = vor.u32 %v3909_v35, %v3465_v36  ;;  %v3937_v34 = vld [vmem:[%s5787_s1 + $0x724] sm:$0xf]  ;;  %v3951_v31 = vld [vmem:[%s5787_s1 + $0x794] sm:$0xf]  ;;  %v3633_v63 = vld [vmem:[%s5787_s1 + $0x798] sm:$0xf0] }
  0xf2   : > { %2302 = vmatpush.bf16.msrb.mxu3 %v3684_v48  ;;  %v3901_v35 = vld [vmem:[%s5787_s1 + $0x604] sm:$0xf]  ;;  %v3433_v36 = vld [vmem:[%s5787_s1 + $0x608] sm:$0xf0] }
  0xf3   : > { %2261 = vmatpush.bf16.msrb.mxu0 %v3484_v54  ;;  %v2017_v30 = vpop.f32.mrf.mxu2  ;;  %v1991_v45 = vpop.f32.mrf.mxu0  ;;  %v3436_v6 = vor.u32 %v3901_v35, %v3433_v36 }
  0xf4   : > { %2275 = vmatpush.bf16.msrb.mxu1 %v3548_v55  ;;  %v2018_v42 = vadd.f32 %v2017_v30, %v2004_v12  ;;  %v2031_v48 = vpop.f32.mrf.mxu3  ;;  %v1992_v51 = vadd.f32 %v1991_v45, %v5539_v23  ;;  %v2005_v53 = vpop.f32.mrf.mxu1  ;;  %v3516_v55 = vor.u32 %v3921_v28, %v3513_v33  ;;  %v3644_v23 = vor.u32 %v3953_v49, %v3641_v50 }
  0xf5   : > { %2289 = vmatpush.bf16.msrb.mxu2 %v3612_v56  ;;  %v3580_v56 = vor.u32 %v3937_v34, %v3577_v37 }
  0xf6   : > { %2303 = vmatpush.bf16.msrb.mxu3 %v3676_v61  ;;  %v2032_v54 = vadd.f32 %v2031_v48, %v2018_v42  ;;  %v2006_v61 = vadd.f32 %v2005_v53, %v1992_v51 }
  0xf7   : > { %2262 = vmatpush.bf16.msrb.mxu0 %v3476_v19  ;;  %v3444_v19 = vor.u32 %v3903_v58, %v3441_v59 }
  0xf8   : > { %2276 = vmatpush.bf16.msrb.mxu1 %v3540_v20  ;;  %v3508_v20 = vor.u32 %v3919_v60, %v3505_v14 }
  0xf9   : > { %2290 = vmatpush.bf16.msrb.mxu2 %v3604_v24  ;;  %v3572_v24 = vor.u32 %v3935_v39, %v3569_v62 }
  0xfa   : > { %2304 = vmatpush.bf16.msrb.mxu3 %v3668_v40  ;;  %v3636_v40 = vor.u32 %v3951_v31, %v3633_v63 }
  0xfb   : > { %2263 = vmatpush.bf16.msrb.mxu0 %v3468_v5  ;;  %v2019_v44 = vpop.f32.mrf.mxu2  ;;  %v3625_v5 = vld [vmem:[%s5787_s1 + $0x788] sm:$0xf0] }
  0xfc   : > { %2277 = vmatpush.bf16.msrb.mxu1 %v3532_v7  ;;  %v2020_v2 = vadd.f32 %v2019_v44, %v2006_v61  ;;  %v2033_v3 = vpop.f32.mrf.mxu3  ;;  %v3628_v10 = vor.u32 %v3949_v4, %v3625_v5 }
  0xfd   : > { %2291 = vmatpush.bf16.msrb.mxu2 %v3596_v8  ;;  %v3500_v8 = vor.u32 %v3917_v43, %v3497_v0 }
  0xfe   : > { %2305 = vmatpush.bf16.msrb.mxu3 %v3660_v57  ;;  %v2034_v7 = vadd.f32 %v2033_v3, %v2020_v2 }
  0xff   : > { %2264 = vmatpush.bf16.msrb.mxu0 %v3460_v21  ;;  %v4036_v21 = vmov 16.0  }
 0x100   : > { %2278 = vmatpush.bf16.msrb.mxu1 %v3524_v22  ;;  %3990 = vrcp.f32 %v4036_v21 }
 0x101   : > { %2292 = vmatpush.bf16.msrb.mxu2 %v3588_v25 }
 0x102   : > { %2306 = vmatpush.bf16.msrb.mxu3 %v3652_v29 }
 0x103   : > { %2265 = vmatpush.bf16.msrb.mxu0 %v3452_v52 }
 0x104   : > { %2279 = vmatpush.bf16.msrb.mxu1 %v3516_v55 }
 0x105   : > { %2293 = vmatpush.bf16.msrb.mxu2 %v3580_v56 }
 0x106   : > { %2307 = vmatpush.bf16.msrb.mxu3 %v3644_v23 }
 0x107   : > { %2266 = vmatpush.bf16.msrb.mxu0 %v3444_v19 }
 0x108   : > { %2280 = vmatpush.bf16.msrb.mxu1 %v3508_v20 }
 0x109   : > { %2294 = vmatpush.bf16.msrb.mxu2 %v3572_v24 }
 0x10a   : > { %2308 = vmatpush.bf16.msrb.mxu3 %v3636_v40 }
 0x10b   : > { %2267 = vmatpush.bf16.msrb.mxu0 %v3436_v6  ;;  %v2045_v11 = vpop.f32.mrf.mxu0 }
 0x10c   : > { %2281 = vmatpush.bf16.msrb.mxu1 %v3500_v8  ;;  %v2046_v57 = vadd.f32 %v2045_v11, %v2032_v54  ;;  %v2059_v12 = vpop.f32.mrf.mxu1 }
 0x10d   : > { %2295 = vmatpush.bf16.msrb.mxu2 %v3564_v9 }
 0x10e   : > { %2309 = vmatpush.bf16.msrb.mxu3 %v3628_v10  ;;  %2268 = vmatmul.bf16.vlgmr.msrb.gmra.mxu0 %v4956_v32  ;;  %v2060_v13 = vadd.f32 %v2059_v12, %v2046_v57 }
 0x10f   : > { %2282 = vmatmul.bf16.vlgmr.msrb.gmra.mxu1 %v4969_v41  ;;  %v3991_v41 = vpop.eup %3990 }
 0x110   : > { %2296 = vmatmul.bf16.vlgmr.msrb.gmra.mxu2 %v4967_v38  ;;  %v5728_v38 = vld [vmem:[%s5788_s2] sm:$0x3]  ;;  %v2356_v30 = vmul.f32 16.0, %v3991_v41  ;;  %vm2360_vm0 = vweird.f32 %v3991_v41 }
 0x111   : > { %2310 = vmatmul.bf16.vlgmr.msrb.gmra.mxu3 %v4977_v46  ;;  %v2333_v27 = vperm.slane %v5728_v38, 0 }
 0x112   : > { %v2357_v42 = vsub.f32 1.0, %v2356_v30 }
 0x113   : > { %v2073_v15 = vpop.f32.mrf.mxu2  ;;  %v2047_v17 = vpop.f32.mrf.mxu0 }
 0x114   : > { %v2074_v16 = vadd.f32 %v2073_v15, %v2060_v13  ;;  %v2087_v18 = vpop.f32.mrf.mxu3  ;;  %v2048_v22 = vadd.f32 %v2047_v17, %v2034_v7  ;;  %v2061_v25 = vpop.f32.mrf.mxu1  ;;  %v2358_v49 = vmul.f32 %v3991_v41, %v2357_v42 }
 0x116   : > { %v2088_v26 = vadd.f32 %v2087_v18, %v2074_v16  ;;  %v2062_v32 = vadd.f32 %v2061_v25, %v2048_v22  ;;  %v2359_v52 = vadd.f32 %v3991_v41, %v2358_v49 }
 0x118   : > { %v2337_v34 = vadd.f32 %v2333_v27, %v2088_v26  ;;  %v5731_v55 = vsel %vm2360_vm0, %v3991_v41, %v2359_v52 }
 0x11b   : > { %v2075_v46 = vpop.f32.mrf.mxu2 }
 0x11c   : > { %v2076_v28 = vadd.f32 %v2075_v46, %v2062_v32  ;;  %v2089_v29 = vpop.f32.mrf.mxu3 }
 0x11e   : > { %v2090_v33 = vadd.f32 %v2089_v29, %v2076_v28 }
 0x120   : > { %v2339_v37 = vadd.f32 %v2333_v27, %v2090_v33 }
 0x122   : > { %v2341_v45 = vadd.f32 %v2339_v37, %v2337_v34 }
 0x124   : > { %v2342_v48 = vrot.slane %v2341_v45, 4 }
 0x126   : > { %v2343_v50 = vadd.f32 %v2342_v48, %v2341_v45 }
 0x128   : > { %v2344_v51 = vrot.slane %v2343_v50, 2 }
 0x12a   : > { %v2345_v53 = vadd.f32 %v2344_v51, %v2343_v50 }
 0x12b   : > { %v2101_v36 = vpop.f32.mrf.mxu0 }
 0x12c   : > { %v2346_v54 = vrot.slane %v2345_v53, 1  ;;  %v2115_v40 = vpop.f32.mrf.mxu1 }
 0x12d   : > { %v2116_v13 = vadd.f32 %v2115_v40, %v2101_v36 }
 0x12e   : > { %v2347_v56 = vadd.f32 %v2346_v54, %v2345_v53 }
 0x130   : > { %v2362_v58 = vmul.f32 %v5731_v55, %v2347_v56 }
 0x132   : > { %v2364_v59 = vsub.f32 %v2337_v34, %v2362_v58  ;;  %v2366_v60 = vsub.f32 %v2339_v37, %v2362_v58 }
 0x133   : > { %v2129_v47 = vpop.f32.mrf.mxu2  ;;  %v2103_v4 = vpop.f32.mrf.mxu0 }
 0x134   : > { %v2368_v23 = vmul.f32 %v2364_v59, %v2364_v59  ;;  %v2370_v61 = vmul.f32 %v2366_v60, %v2366_v60  ;;  %v2143_v2 = vpop.f32.mrf.mxu3  ;;  %v2117_v6 = vpop.f32.mrf.mxu1  ;;  %v2130_v16 = vadd.f32 %v2129_v47, %v2116_v13 }
 0x135   : > { %v2118_v22 = vadd.f32 %v2117_v6, %v2103_v4 }
 0x136   : > { %v2372_v14 = vadd.f32 %v2370_v61, %v2368_v23  ;;  %v2144_v21 = vadd.f32 %v2143_v2, %v2130_v16 }
 0x138   : > { %v2373_v39 = vrot.slane %v2372_v14, 4 }
 0x13a   : > { %v2374_v62 = vadd.f32 %v2373_v39, %v2372_v14 }
 0x13b   : > { %v2131_v10 = vpop.f32.mrf.mxu2 }
 0x13c   : > { %v2375_v31 = vrot.slane %v2374_v62, 2  ;;  %v2145_v11 = vpop.f32.mrf.mxu3  ;;  %v2132_v26 = vadd.f32 %v2131_v10, %v2118_v22 }
 0x13e   : > { %v2376_v63 = vadd.f32 %v2375_v31, %v2374_v62  ;;  %v2146_v28 = vadd.f32 %v2145_v11, %v2132_v26 }
 0x140   : > { %v2377_v19 = vrot.slane %v2376_v63, 1 }
 0x142   : > { %v2378_v20 = vadd.f32 %v2377_v19, %v2376_v63 }
 0x144   : > { %v2386_v24 = vmul.f32 %v2378_v20, %v5731_v55 }
 0x146   : > { %v2388_v35 = vadd.f32 1e-05, %v2386_v24 }
 0x148   : > { %3992 = vrsqrt.f32 %v2388_v35  ;;  %vm2396_vm2 = vweird.f32 %v2388_v35 }
 0x14b   : > { %v2157_v57 = vpop.f32.mrf.mxu0 }
 0x14c   : > { %v2171_v12 = vpop.f32.mrf.mxu1  ;;  %v2158_v32 = vadd.f32 %v2157_v57, %v2144_v21 }
 0x14e   : > { %v3993_v43 = vpop.eup %3992  ;;  %v2172_v29 = vadd.f32 %v2171_v12, %v2158_v32 }
 0x14f   : > { %v2391_v44 = vmul.f32 %v3993_v43, %v2388_v35  ;;  %vm2397_vm1 = vweird.f32 %v3993_v43 }
 0x150   : > { %vm2398_vm3 = vmor %vm2396_vm2, %vm2397_vm1 }
 0x151   : > { %v2392_v0 = vmul.f32 %v3993_v43, %v2391_v44 }
 0x153   : > { %v2393_v1 = vmul.f32 0.5, %v2392_v0  ;;  %v2185_v15 = vpop.f32.mrf.mxu2  ;;  %v2159_v18 = vpop.f32.mrf.mxu0 }
 0x154   : > { %v2199_v17 = vpop.f32.mrf.mxu3  ;;  %v2173_v25 = vpop.f32.mrf.mxu1  ;;  %v2160_v33 = vadd.f32 %v2159_v18, %v2146_v28  ;;  %v2186_v34 = vadd.f32 %v2185_v15, %v2172_v29 }
 0x155   : > { %v2394_v3 = vsub.f32 1.5, %v2393_v1  ;;  %v2334_v1 = vperm.slane %v5728_v38, 1 }
 0x156   : > { %v2174_v42 = vadd.f32 %v2173_v25, %v2160_v33  ;;  %v2200_v48 = vadd.f32 %v2199_v17, %v2186_v34 }
 0x157   : > { %v2395_v5 = vmul.f32 %v3993_v43, %v2394_v3 }
 0x159   : > { %v2399_v7 = vsel %vm2398_vm3, %v3993_v43, %v2395_v5 }
 0x15a   : > { %v5735_v8 = vmul.f32 %v2399_v7, %v2364_v59  ;;  %v5737_v9 = vmul.f32 %v2399_v7, %v2366_v60 }
 0x15b   : > { %v2187_v41 = vpop.f32.mrf.mxu2 }
 0x15c   : > { %v2201_v46 = vpop.f32.mrf.mxu3  ;;  %v2188_v49 = vadd.f32 %v2187_v41, %v2174_v42  ;;  %v3685_v29 = vmul.f32 -0.4, %v5735_v8  ;;  %v3687_v33 = vmul.f32 -0.4, %v5737_v9 }
 0x15e   : > { %v2202_v53 = vadd.f32 %v2201_v46, %v2188_v49  ;;  %v2422_v34 = vmul.f32 1.442695, %v3685_v29 }
 0x16b   : > { %v2213_v27 = vpop.f32.mrf.mxu0 }
 0x16c   : > { %v2227_v30 = vpop.f32.mrf.mxu1  ;;  %v2214_v51 = vadd.f32 %v2213_v27, %v2200_v48 }
 0x16e   : > { %v2228_v54 = vadd.f32 %v2227_v30, %v2214_v51 }
 0x173   : > { %v2241_v37 = vpop.f32.mrf.mxu2  ;;  %v2215_v50 = vpop.f32.mrf.mxu0 }
 0x174   : > { %v2255_v45 = vpop.f32.mrf.mxu3  ;;  %v2229_v52 = vpop.f32.mrf.mxu1  ;;  %v2216_v56 = vadd.f32 %v2215_v50, %v2202_v53  ;;  %v2242_v59 = vadd.f32 %v2241_v37, %v2228_v54  ;;  %v2426_v37 = vmul.f32 1.442695, %v3687_v33 }
 0x176   : > { %v2230_v61 = vadd.f32 %v2229_v52, %v2216_v56  ;;  %v2256_v39 = vadd.f32 %v2255_v45, %v2242_v59 }
 0x17b   : > { %v2243_v58 = vpop.f32.mrf.mxu2 }
 0x17c   : > { %v2257_v60 = vpop.f32.mrf.mxu3  ;;  %v2244_v62 = vadd.f32 %v2243_v58, %v2230_v61 }
 0x17e   : > { %v2258_v19 = vadd.f32 %v2257_v60, %v2244_v62 }
 0x18b   : > { %v2269_v23 = vpop.f32.mrf.mxu0 }
 0x18c   : > { %v2283_v14 = vpop.f32.mrf.mxu1  ;;  %v2270_v31 = vadd.f32 %v2269_v23, %v2256_v39 }
 0x18e   : > { %v2284_v35 = vadd.f32 %v2283_v14, %v2270_v31 }
 0x193   : > { %v2297_v63 = vpop.f32.mrf.mxu2  ;;  %v2271_v24 = vpop.f32.mrf.mxu0 }
 0x194   : > { %v2311_v20 = vpop.f32.mrf.mxu3  ;;  %v2272_v36 = vadd.f32 %v2271_v24, %v2258_v19  ;;  %v2298_v43 = vadd.f32 %v2297_v63, %v2284_v35  ;;  %v2285_v40 = vpop.f32.mrf.mxu1 }
 0x196   : > { %v2286_v44 = vadd.f32 %v2285_v40, %v2272_v36  ;;  %v2312_v47 = vadd.f32 %v2311_v20, %v2298_v43 }
 0x198   : > { %v2338_v5 = vadd.f32 %v2334_v1, %v2312_v47 }
 0x19b   : > { %v2299_v0 = vpop.f32.mrf.mxu2 }
 0x19c   : > { %v2300_v2 = vadd.f32 %v2299_v0, %v2286_v44  ;;  %v2313_v3 = vpop.f32.mrf.mxu3 }
 0x19e   : > { %v2314_v4 = vadd.f32 %v2313_v3, %v2300_v2 }
 0x1a0   : > { %v2340_v6 = vadd.f32 %v2334_v1, %v2314_v4 }
 0x1a2   : > { %v2348_v7 = vadd.f32 %v2340_v6, %v2338_v5 }
 0x1a4   : > { %v2349_v10 = vrot.slane %v2348_v7, 4 }
 0x1a6   : > { %v2350_v11 = vadd.f32 %v2349_v10, %v2348_v7 }
 0x1a8   : > { %v2351_v57 = vrot.slane %v2350_v11, 2 }
 0x1aa   : > { %v2352_v12 = vadd.f32 %v2351_v57, %v2350_v11 }
 0x1ac   : > { %v2353_v13 = vrot.slane %v2352_v12, 1 }
 0x1ae   : > { %v2354_v15 = vadd.f32 %v2353_v13, %v2352_v12 }
 0x1b0   : > { %v2363_v16 = vmul.f32 %v5731_v55, %v2354_v15 }
 0x1b2   : > { %v2365_v17 = vsub.f32 %v2338_v5, %v2363_v16  ;;  %v2367_v18 = vsub.f32 %v2340_v6, %v2363_v16 }
 0x1b4   : > { %v2369_v21 = vmul.f32 %v2365_v17, %v2365_v17  ;;  %v2371_v22 = vmul.f32 %v2367_v18, %v2367_v18 }
 0x1b6   : > { %v2379_v25 = vadd.f32 %v2371_v22, %v2369_v21 }
 0x1b8   : > { %v2380_v38 = vrot.slane %v2379_v25, 4 }
 0x1ba   : > { %v2381_v26 = vadd.f32 %v2380_v38, %v2379_v25 }
 0x1bc   : > { %v2382_v32 = vrot.slane %v2381_v26, 2 }
 0x1be   : > { %v2383_v41 = vadd.f32 %v2382_v32, %v2381_v26 }
 0x1c0   : > { %v2384_v46 = vrot.slane %v2383_v41, 1 }
 0x1c2   : > { %v2385_v27 = vadd.f32 %v2384_v46, %v2383_v41 }
 0x1c4   : > { %v2387_v28 = vmul.f32 %v2385_v27, %v5731_v55 }
 0x1c6   : > { %v2389_v30 = vadd.f32 1e-05, %v2387_v28 }
 0x1c8   : > { %3994 = vrsqrt.f32 %v2389_v30  ;;  %vm2406_vm5 = vweird.f32 %v2389_v30 }
 0x1c9   : > { %3996 = vpow2.f32 %v2422_v34 }
 0x1ca   : > { %3998 = vpow2.f32 %v2426_v37 }
 0x1ce   : > { %v3995_v42 = vpop.eup %3994 }
 0x1cf   : > { %v2401_v45 = vmul.f32 %v3995_v42, %v2389_v30  ;;  %v3997_v49 = vpop.eup %3996  ;;  %vm2407_vm4 = vweird.f32 %v3995_v42 }
 0x1d0   : > { %v3999_v51 = vpop.eup %3998  ;;  %v2430_v53 = vadd.f32 1.0, %v3997_v49  ;;  %vm2408_vm6 = vmor %vm2406_vm5, %vm2407_vm4 }
 0x1d1   : > { %v2402_v48 = vmul.f32 %v3995_v42, %v2401_v45  ;;  %v2432_v54 = vadd.f32 1.0, %v3999_v51 }
 0x1d2   : > { %4000 = vrcp.f32 %v2430_v53  ;;  %v2443_v0 = vand.u32 2147483647, %v2430_v53  ;;  %v2445_v2 = vand.u32 2147483648, %v2430_v53  ;;  %vm2439_vm8 = vweird.f32 %v2430_v53 }
 0x1d3   : > { %v2403_v50 = vmul.f32 0.5, %v2402_v48  ;;  %4002 = vrcp.f32 %v2432_v54  ;;  %vm2469_vm9 = vweird.f32 %v2432_v54  ;;  %v2473_v11 = vand.u32 2147483647, %v2432_v54 }
 0x1d4   : > { %vm5754_vm12 = vcmp.eq.f32.partialorder %v2443_v0, 8.507059e+37  ;;  %v2475_v57 = vand.u32 2147483648, %v2432_v54  ;;  %v2446_v15 = vor.u32 1.1754944e-38, %v2445_v2 }
 0x1d5   : > { %v2404_v52 = vsub.f32 1.5, %v2403_v50  ;;  %vm2474_vm0 = vcmp.eq.f32.partialorder %v2473_v11, 8.507059e+37 }
 0x1d6   : > { %v2476_v41 = vor.u32 1.1754944e-38, %v2475_v57 }
 0x1d7   : > { %v2405_v55 = vmul.f32 %v3995_v42, %v2404_v52 }
 0x1d8   : > { %v4001_v39 = vpop.eup %4000 }
 0x1d9   : > { %v2409_v56 = vsel %vm2408_vm6, %v3995_v42, %v2405_v55  ;;  %v4003_v62 = vpop.eup %4002  ;;  %v2435_v31 = vmul.f32 %v4001_v39, %v2430_v53  ;;  %vm2440_vm7 = vweird.f32 %v4001_v39 }
 0x1da   : > { %v5744_v58 = vmul.f32 %v2409_v56, %v2365_v17  ;;  %v5746_v59 = vmul.f32 %v2409_v56, %v2367_v18  ;;  %v2465_v63 = vmul.f32 %v4003_v62, %v2432_v54  ;;  %vm2470_vm10 = vweird.f32 %v4003_v62  ;;  %vm5750_vm11 = vmor %vm2439_vm8, %vm2440_vm7 }
 0x1db   : > { %v2436_v24 = vsub.f32 1.0, %v2435_v31  ;;  %vm5760_vm13 = vmor %vm2469_vm9, %vm2470_vm10 }
 0x1dc   : > { %v3686_v60 = vmul.f32 -0.4, %v5744_v58  ;;  %v3688_v23 = vmul.f32 -0.4, %v5746_v59  ;;  %v2466_v43 = vsub.f32 1.0, %v2465_v63 }
 0x1dd   : > { %v2437_v40 = vmul.f32 %v4001_v39, %v2436_v24 }
 0x1de   : > { %v2424_v61 = vmul.f32 1.442695, %v3686_v60  ;;  %v2428_v14 = vmul.f32 1.442695, %v3688_v23  ;;  %v2467_v44 = vmul.f32 %v4003_v62, %v2466_v43 }
 0x1df   : > { %v2438_v1 = vadd.f32 %v4001_v39, %v2437_v40 }
 0x1e0   : > { %4004 = vpow2.f32 %v2424_v61  ;;  %v2468_v5 = vadd.f32 %v4003_v62, %v2467_v44 }
 0x1e1   : > { %4006 = vpow2.f32 %v2428_v14  ;;  %v2442_v13 = vsel %vm5750_vm11, %v4001_v39, %v2438_v1 }
 0x1e2   : > { %v2472_v38 = vsel %vm5760_vm13, %v4003_v62, %v2468_v5  ;;  %v2447_v27 = vsel %vm5754_vm12, %v2446_v15, %v2442_v13 }
 0x1e3   : > { %v2477_v30 = vsel %vm2474_vm0, %v2476_v41, %v2472_v38  ;;  %v2494_v45 = vmul.f32 %v2447_v27, %v5735_v8 }
 0x1e4   : > { %v2496_v50 = vmul.f32 %v2477_v30, %v5737_v9 }
 0x1e6   : > { %v4005_v19 = vpop.eup %4004 }
 0x1e7   : > { %v4007_v20 = vpop.eup %4006  ;;  %v2431_v35 = vadd.f32 1.0, %v4005_v19 }
 0x1e8   : > { %v2433_v36 = vadd.f32 1.0, %v4007_v20 }
 0x1e9   : > { %4008 = vrcp.f32 %v2431_v35  ;;  %v2460_v16 = vand.u32 2147483648, %v2431_v35  ;;  %v2458_v22 = vand.u32 2147483647, %v2431_v35  ;;  %vm2454_vm1 = vweird.f32 %v2431_v35 }
 0x1ea   : > { %4010 = vrcp.f32 %v2433_v36  ;;  %v2490_v25 = vand.u32 2147483648, %v2433_v36  ;;  %v2488_v32 = vand.u32 2147483647, %v2433_v36  ;;  %vm2484_vm3 = vweird.f32 %v2433_v36 }
 0x1eb   : > { %v2461_v28 = vor.u32 1.1754944e-38, %v2460_v16  ;;  %vm2459_vm4 = vcmp.eq.f32.partialorder %v2458_v22, 8.507059e+37 }
 0x1ec   : > { %v2491_v34 = vor.u32 1.1754944e-38, %v2490_v25  ;;  %vm2489_vm6 = vcmp.eq.f32.partialorder %v2488_v32, 8.507059e+37 }
 0x1ef   : > { %v4009_v47 = vpop.eup %4008 }
 0x1f0   : > { %v4011_v3 = vpop.eup %4010  ;;  %v2450_v4 = vmul.f32 %v4009_v47, %v2431_v35  ;;  %vm2455_vm14 = vweird.f32 %v4009_v47 }
 0x1f1   : > { %v2480_v6 = vmul.f32 %v4011_v3, %v2433_v36  ;;  %vm2485_vm15 = vweird.f32 %v4011_v3  ;;  %vm2456_vm2 = vmor %vm2454_vm1, %vm2455_vm14 }
 0x1f2   : > { %v2451_v12 = vsub.f32 1.0, %v2450_v4  ;;  %vm2486_vm5 = vmor %vm2484_vm3, %vm2485_vm15 }
 0x1f3   : > { %v2481_v17 = vsub.f32 1.0, %v2480_v6 }
 0x1f4   : > { %v2452_v21 = vmul.f32 %v4009_v47, %v2451_v12 }
 0x1f5   : > { %v2482_v26 = vmul.f32 %v4011_v3, %v2481_v17 }
 0x1f6   : > { %v2453_v46 = vadd.f32 %v4009_v47, %v2452_v21 }
 0x1f7   : > { %v2483_v29 = vadd.f32 %v4011_v3, %v2482_v26 }
 0x1f8   : > { %v2457_v33 = vsel %vm2456_vm2, %v4009_v47, %v2453_v46 }
 0x1f9   : > { %v2462_v37 = vsel %vm2459_vm4, %v2461_v28, %v2457_v33  ;;  %v2487_v42 = vsel %vm2486_vm5, %v4011_v3, %v2483_v29 }
 0x1fa   : > { %v2492_v48 = vsel %vm2489_vm6, %v2491_v34, %v2487_v42  ;;  %v2495_v49 = vmul.f32 %v2462_v37, %v5744_v58 }
 0x1fb   : > { %v2497_v51 = vmul.f32 %v2492_v48, %v5746_v59 }
 0x1fc   : > { %v2498_v52 = vpack.c.bf16 %v2495_v49, %v2494_v45 }
 0x1fd   : > { %v2499_v53 = vpack.c.bf16 %v2497_v51, %v2496_v50 }
 0x1fe   : > { %2500 = vst [vmem:[%s223_s29] sm:$0xff] %v2498_v52 }
 0x1ff   : > { %2501 = vst [vmem:[%s223_s29 + $0x8] sm:$0xff] %v2499_v53 }
 0x200 PF: > { %s13_s14 = sadd.s32 1, %s4034_s14   ;;  %s5796_s12 = smov %s4030_s13 }
 0x201   : > { %p10_p5 = scmp.ge.s32.totalorder %s13_s14, 4   ;;  %s5797_s13 = smov %s5799_s15 }
 0x203   :  { %12 = sbr.rel (!%p10_p5) target bundleno = 2 (0x2), region = 73 }

// kernel: discriminator_forward.9
= control target key start
LH: loop header
LB: loop body
LE: loop exit
PB: predicated region body
PF: predicated region fallthrough
CT: control target
= control target key end

     0   :  { %s2778_s12 = smov 0   ;;  %s2780_s13 = smov 0   ;;  %s3018_s0 = inlined_call_operand.vmem [shape: bf16[8,8192], index: 0, kind: input, shape index: {}]   ;;  %s3019_s1 = inlined_call_operand.vmem [shape: bf16[8192,128], index: 1, kind: input, shape index: {}]   ;;  %s3020_s2 = inlined_call_operand.vmem [shape: f32[1,128], index: 2, kind: input, shape index: {}]   ;;  %s3021_s3 = inlined_call_operand.vmem [shape: f32[8,128], index: 3, kind: output, shape index: {}]  }
   0x1   :  { %s2782_s14 = smov 0   ;;  %s2784_s15 = smov 0  }
   0x2   :  { %s2786_s16 = smov 0  }
   0x3 LB: > { %s1821_s17 = sadd.s32 4294967295, %s2747_s16   ;;  %s22_s18 = sadd.s32 1, %s2743_s15  ;;  %s2747_s16 = sphi %s2786_s16, %s13_s16   ;;  %s2743_s15 = sphi %s2784_s15, %s3025_s15   ;;  %s2739_s14 = sphi %s2782_s14, %s3024_s14   ;;  %s2735_s13 = sphi %s2780_s13, %s3023_s13   ;;  %s2731_s12 = sphi %s2778_s12, %s3022_s12  }
   0x4   : > { %p23_p0 = scmp.ge.s32.totalorder %s22_s18, 4  ;;  %p41_p1 = scmp.ne.s32.totalorder %s2735_s13, %s2731_s12 }
   0x5   : > { %p42_p2 = scmp.eq.s32.totalorder %s2747_s16, 0  ;;  %s34_s20 = sadd.s32 1, %s2735_s13 }
   0x6   : > { %s3027_s18 = smov (%p23_p0, %s22_s18), 0  ;;  %p1823_p5 = scmp.ge.s32.totalorder %s2747_s16, 4 }
   0x7   : > { %p43_p3 = por %p42_p2, %p41_p1  ;;  %s30_s19 = ssub.s32 %s2743_s15, %s3027_s18 }
   0x8   : > { %p32_p4 = scmp.eq.s32.totalorder %s30_s19, 0  ;;  %143 = sbr.rel (%p1823_p5) target bundleno = 27 (0x1b), region = 20 }
   0xa   : > { %s2814_s21 = scalar_select %p32_p4, %s2735_s13, %s34_s20  }
   0xd   : > { %146 = sbr.rel (!%p43_p3) target bundleno = 27 (0x1b), region = 24  ;;  %s148_s22 = sand.u32 (%p43_p3), 1, %s2735_s13  }
   0xe   : > { %s2418_s23 = sshll.u32 (%p43_p3), %s2743_s15, 6  ;;  %s1824_s24 = sshll.u32 (%p43_p3), %s148_s22, 7 }
   0xf   : > { %s160_s27 = scalar_lea.vmem (%p43_p3), %s3018_s0, %s2418_s23   ;;  %s150_s28 = scalar_lea.vmem (%p43_p3), [#allocation3], %s1824_s24  }
  0x10   : > { %s2749_s29 = smov (%p43_p3), 0  }
  0x12 LB: >> { %v175_v0 = vld [vmem:[%s160_s27] sm:$0xff]  ;;  %v177_v1 = vld [vmem:[%s160_s27 + $0x8] sm:$0xff]  ;;  %v179_v2 = vld [vmem:[%s160_s27 + $0x10] sm:$0xff]  ;;  %s169_s29 = sadd.s32 1, %s2751_s29   ;;  %s2751_s29 = sphi %s2749_s29, %s169_s29  }
  0x13   : >> { %176 = vst [vmem:[%s150_s28] sm:$0xff] %v175_v0  ;;  %v181_v3 = vld [vmem:[%s160_s27 + $0x18] sm:$0xff]  ;;  %v183_v4 = vld [vmem:[%s160_s27 + $0x20] sm:$0xff]  ;;  %v185_v5 = vld [vmem:[%s160_s27 + $0x28] sm:$0xff]  ;;  %p168_p6 = scmp.ge.s32.totalorder %s169_s29, 1 }
  0x14   : >> { %178 = vst [vmem:[%s150_s28 + $0x8] sm:$0xff] %v177_v1  ;;  %v187_v6 = vld [vmem:[%s160_s27 + $0x30] sm:$0xff]  ;;  %v189_v7 = vld [vmem:[%s160_s27 + $0x38] sm:$0xff] }
  0x15   : >> { %180 = vst [vmem:[%s150_s28 + $0x10] sm:$0xff] %v179_v2 }
  0x16   : >> { %182 = vst [vmem:[%s150_s28 + $0x18] sm:$0xff] %v181_v3  ;;  %171 = sbr.rel (!%p168_p6) target bundleno = 18 (0x12), region = 134 }
  0x17   : >> { %184 = vst [vmem:[%s150_s28 + $0x20] sm:$0xff] %v183_v4 }
  0x18   : >> { %186 = vst [vmem:[%s150_s28 + $0x28] sm:$0xff] %v185_v5 }
  0x19   : >> { %188 = vst [vmem:[%s150_s28 + $0x30] sm:$0xff] %v187_v6 }
  0x1a   : >> { %190 = vst [vmem:[%s150_s28 + $0x38] sm:$0xff] %v189_v7 }
  0x1b PF: > { %p1829_p7 = scmp.ge.s32.totalorder %s2747_s16, 1  ;;  %p211_p8 = scmp.lt.s32.totalorder %s2747_s16, 5 }
  0x1d   : > { %p212_p9 = pnand %p1829_p7, %p211_p8 }
  0x1e   : > { %s218_s30 = sand.u32 (!%p212_p9), 1, %s2731_s12   ;;  %s1831_s4 = sshll.u32 (!%p212_p9), %s2739_s14, 8 }
  0x1f   : > { %215 = sbr.rel (%p212_p9) target bundleno = 369 (0x171), region = 51  ;;  %s1830_s5 = sshll.u32 (!%p212_p9), %s218_s30, 7 }
  0x20   : > { %p247_p10 = scmp.lt.s32.totalorder (!%p212_p9), %s1831_s4, 1023  ;;  %s2831_s10 = scalar_lea.vmem (!%p212_p9), [#allocation3], %s1830_s5 }
  0x21   : > { %p1833_p11 = scmp.ne.s32.totalorder (!%p212_p9), %s2739_s14, 0 }
  0x24   : > { %s3029_s4 = smov (!%p247_p10, %s1831_s4), 1023  ;;  %258 = sbr.rel (%p1833_p11) target bundleno = 44 (0x2c), region = 59 }
  0x25   : > { %s1832_s6 = sshll.u32 %s3029_s4, 2 }
  0x26   : > { %s2829_s9 = scalar_lea.vmem %s3019_s1, %s1832_s6 }
  0x29   : > { %v2757_v8 = vmov 0.0  }
  0x2a   : > { %259 = vst [vmem:[#allocation2] sm:$0xff] %v2757_v8 }
  0x2b   : > { %260 = vst [vmem:[#allocation2 + $0x8] sm:$0xff] %v2757_v8 }
  0x2c PF: > { %v2442_v9 = vld [vmem:[%s2829_s9 + $0x38] sm:$0xff]  ;;  %v2441_v13 = vld [vmem:[%s2829_s9 + $0x30] sm:$0xff]  ;;  %v2440_v17 = vld [vmem:[%s2829_s9 + $0x28] sm:$0xff]  ;;  %p2410_p12 = scmp.ne.s32.totalorder %s2739_s14, 3 }
  0x2d   : > { %v2450_v10 = vld [vmem:[%s2829_s9 + $0x78] sm:$0xff]  ;;  %1383 = vmatpush.bf16.msra.mxu0 %v2442_v9  ;;  %v2449_v14 = vld [vmem:[%s2829_s9 + $0x70] sm:$0xff]  ;;  %v2448_v18 = vld [vmem:[%s2829_s9 + $0x68] sm:$0xff] }
  0x2e   : > { %v2458_v11 = vld [vmem:[%s2829_s9 + $0xb8] sm:$0xff]  ;;  %1397 = vmatpush.bf16.msra.mxu1 %v2450_v10  ;;  %v2457_v15 = vld [vmem:[%s2829_s9 + $0xb0] sm:$0xff]  ;;  %v2456_v19 = vld [vmem:[%s2829_s9 + $0xa8] sm:$0xff] }
  0x2f   : > { %v2466_v12 = vld [vmem:[%s2829_s9 + $0xf8] sm:$0xff]  ;;  %1411 = vmatpush.bf16.msra.mxu2 %v2458_v11  ;;  %v2465_v16 = vld [vmem:[%s2829_s9 + $0xf0] sm:$0xff]  ;;  %v2464_v20 = vld [vmem:[%s2829_s9 + $0xe8] sm:$0xff] }
  0x30   : > { %1425 = vmatpush.bf16.msra.mxu3 %v2466_v12  ;;  %v2439_v21 = vld [vmem:[%s2829_s9 + $0x20] sm:$0xff]  ;;  %v2438_v25 = vld [vmem:[%s2829_s9 + $0x18] sm:$0xff]  ;;  %v2437_v29 = vld [vmem:[%s2829_s9 + $0x10] sm:$0xff] }
  0x31   : > { %1384 = vmatpush.bf16.msra.mxu0 %v2441_v13  ;;  %v2447_v22 = vld [vmem:[%s2829_s9 + $0x60] sm:$0xff]  ;;  %v2446_v26 = vld [vmem:[%s2829_s9 + $0x58] sm:$0xff]  ;;  %v2445_v30 = vld [vmem:[%s2829_s9 + $0x50] sm:$0xff] }
  0x32   : > { %1398 = vmatpush.bf16.msra.mxu1 %v2449_v14  ;;  %v2455_v23 = vld [vmem:[%s2829_s9 + $0xa0] sm:$0xff]  ;;  %v2454_v27 = vld [vmem:[%s2829_s9 + $0x98] sm:$0xff]  ;;  %v2453_v31 = vld [vmem:[%s2829_s9 + $0x90] sm:$0xff] }
  0x33   : > { %1412 = vmatpush.bf16.msra.mxu2 %v2457_v15  ;;  %v2463_v24 = vld [vmem:[%s2829_s9 + $0xe0] sm:$0xff]  ;;  %v2462_v28 = vld [vmem:[%s2829_s9 + $0xd8] sm:$0xff]  ;;  %v2461_v32 = vld [vmem:[%s2829_s9 + $0xd0] sm:$0xff] }
  0x34   : > { %1426 = vmatpush.bf16.msra.mxu3 %v2465_v16  ;;  %v2436_v33 = vld [vmem:[%s2829_s9 + $0x8] sm:$0xff]  ;;  %v2435_v37 = vld [vmem:[%s2829_s9] sm:$0xff]  ;;  %v2474_v41 = vld [vmem:[%s2829_s9 + $0x138] sm:$0xff] }
  0x35   : > { %1385 = vmatpush.bf16.msra.mxu0 %v2440_v17  ;;  %v2444_v34 = vld [vmem:[%s2829_s9 + $0x48] sm:$0xff]  ;;  %v2443_v38 = vld [vmem:[%s2829_s9 + $0x40] sm:$0xff]  ;;  %v2482_v42 = vld [vmem:[%s2829_s9 + $0x178] sm:$0xff] }
  0x36   : > { %1399 = vmatpush.bf16.msra.mxu1 %v2448_v18  ;;  %v2452_v35 = vld [vmem:[%s2829_s9 + $0x88] sm:$0xff]  ;;  %v2451_v39 = vld [vmem:[%s2829_s9 + $0x80] sm:$0xff]  ;;  %v1836_v43 = vld [vmem:[%s2831_s10] sm:$0xf] }
  0x37   : > { %1413 = vmatpush.bf16.msra.mxu2 %v2456_v19  ;;  %v2460_v36 = vld [vmem:[%s2829_s9 + $0xc8] sm:$0xff]  ;;  %v2459_v40 = vld [vmem:[%s2829_s9 + $0xc0] sm:$0xff]  ;;  %v2427_v44 = vld [vmem:[%s2831_s10 + $0x3c] sm:$0xf0] }
  0x38   : > { %1427 = vmatpush.bf16.msra.mxu3 %v2464_v20  ;;  %v1844_v45 = vld [vmem:[%s2831_s10 + $0x8] sm:$0xf]  ;;  %v2419_v47 = vld [vmem:[%s2831_s10 + $0x4] sm:$0xf]  ;;  %v2420_v49 = vld [vmem:[%s2831_s10 + $0xc] sm:$0xf]  ;;  %v1837_v53 = vor.u32 %v2427_v44, %v1836_v43 }
  0x39   : > { %1386 = vmatpush.bf16.msra.mxu0 %v2439_v21  ;;  %v2428_v46 = vld [vmem:[%s2831_s10 + $0x44] sm:$0xf0]  ;;  %v1838_v48 = vld [vmem:[%s2831_s10 + $0x40] sm:$0xf0]  ;;  %v1846_v50 = vld [vmem:[%s2831_s10 + $0x48] sm:$0xf0] }
  0x3a   : > { %1400 = vmatpush.bf16.msra.mxu1 %v2447_v22  ;;  %v2490_v51 = vld [vmem:[%s2829_s9 + $0x1b8] sm:$0xff]  ;;  %v1845_v54 = vor.u32 %v2428_v46, %v1844_v45  ;;  %v1841_v55 = vor.u32 %v2419_v47, %v1838_v48  ;;  %v1849_v56 = vor.u32 %v2420_v49, %v1846_v50  ;;  %v2473_v57 = vld [vmem:[%s2829_s9 + $0x130] sm:$0xff]  ;;  %v2472_v61 = vld [vmem:[%s2829_s9 + $0x128] sm:$0xff] }
  0x3b   : > { %1414 = vmatpush.bf16.msra.mxu2 %v2455_v23  ;;  %v2498_v52 = vld [vmem:[%s2829_s9 + $0x1f8] sm:$0xff]  ;;  %v2481_v58 = vld [vmem:[%s2829_s9 + $0x170] sm:$0xff]  ;;  %v2480_v62 = vld [vmem:[%s2829_s9 + $0x168] sm:$0xff] }
  0x3c   : > { %1428 = vmatpush.bf16.msra.mxu3 %v2463_v24  ;;  %v2489_v59 = vld [vmem:[%s2829_s9 + $0x1b0] sm:$0xff]  ;;  %v2488_v63 = vld [vmem:[%s2829_s9 + $0x1a8] sm:$0xff]  ;;  %v2471_v1 = vld [vmem:[%s2829_s9 + $0x120] sm:$0xff] }
  0x3d   : > { %1387 = vmatpush.bf16.msra.mxu0 %v2438_v25  ;;  %v2497_v60 = vld [vmem:[%s2829_s9 + $0x1f0] sm:$0xff]  ;;  %v2496_v0 = vld [vmem:[%s2829_s9 + $0x1e8] sm:$0xff]  ;;  %v2479_v2 = vld [vmem:[%s2829_s9 + $0x160] sm:$0xff] }
  0x3e   : > { %1401 = vmatpush.bf16.msra.mxu1 %v2446_v26  ;;  %v2487_v3 = vld [vmem:[%s2829_s9 + $0x1a0] sm:$0xff]  ;;  %v2470_v5 = vld [vmem:[%s2829_s9 + $0x118] sm:$0xff]  ;;  %v2469_v9 = vld [vmem:[%s2829_s9 + $0x110] sm:$0xff] }
  0x3f   : > { %1415 = vmatpush.bf16.msra.mxu2 %v2454_v27  ;;  %v2495_v4 = vld [vmem:[%s2829_s9 + $0x1e0] sm:$0xff]  ;;  %v2478_v6 = vld [vmem:[%s2829_s9 + $0x158] sm:$0xff]  ;;  %v2477_v10 = vld [vmem:[%s2829_s9 + $0x150] sm:$0xff] }
  0x40   : > { %1429 = vmatpush.bf16.msra.mxu3 %v2462_v28  ;;  %v2486_v7 = vld [vmem:[%s2829_s9 + $0x198] sm:$0xff]  ;;  %v2485_v11 = vld [vmem:[%s2829_s9 + $0x190] sm:$0xff]  ;;  %v2468_v13 = vld [vmem:[%s2829_s9 + $0x108] sm:$0xff] }
  0x41   : > { %1388 = vmatpush.bf16.msra.mxu0 %v2437_v29  ;;  %v2494_v8 = vld [vmem:[%s2829_s9 + $0x1d8] sm:$0xff]  ;;  %v2493_v12 = vld [vmem:[%s2829_s9 + $0x1d0] sm:$0xff]  ;;  %v2476_v14 = vld [vmem:[%s2829_s9 + $0x148] sm:$0xff] }
  0x42   : > { %1402 = vmatpush.bf16.msra.mxu1 %v2445_v30  ;;  %v2484_v15 = vld [vmem:[%s2829_s9 + $0x188] sm:$0xff]  ;;  %v2467_v17 = vld [vmem:[%s2829_s9 + $0x100] sm:$0xff]  ;;  %v2506_v21 = vld [vmem:[%s2829_s9 + $0x238] sm:$0xff] }
  0x43   : > { %1416 = vmatpush.bf16.msra.mxu2 %v2453_v31  ;;  %v2492_v16 = vld [vmem:[%s2829_s9 + $0x1c8] sm:$0xff]  ;;  %v2475_v18 = vld [vmem:[%s2829_s9 + $0x140] sm:$0xff]  ;;  %v2514_v22 = vld [vmem:[%s2829_s9 + $0x278] sm:$0xff] }
  0x44   : > { %1430 = vmatpush.bf16.msra.mxu3 %v2461_v32  ;;  %v2483_v19 = vld [vmem:[%s2829_s9 + $0x180] sm:$0xff]  ;;  %v1860_v25 = vld [vmem:[%s2831_s10 + $0x18] sm:$0xf]  ;;  %v2422_v29 = vld [vmem:[%s2831_s10 + $0x1c] sm:$0xf] }
  0x45   : > { %1389 = vmatpush.bf16.msra.mxu0 %v2436_v33  ;;  %v2491_v20 = vld [vmem:[%s2829_s9 + $0x1c0] sm:$0xff]  ;;  %v2430_v26 = vld [vmem:[%s2831_s10 + $0x54] sm:$0xf0]  ;;  %v1862_v30 = vld [vmem:[%s2831_s10 + $0x58] sm:$0xf0] }
  0x46   : > { %1403 = vmatpush.bf16.msra.mxu1 %v2444_v34  ;;  %v1852_v23 = vld [vmem:[%s2831_s10 + $0x10] sm:$0xf]  ;;  %v2421_v27 = vld [vmem:[%s2831_s10 + $0x14] sm:$0xf]  ;;  %v2522_v31 = vld [vmem:[%s2829_s9 + $0x2b8] sm:$0xff]  ;;  %v1861_v34 = vor.u32 %v2430_v26, %v1860_v25 }
  0x47   : > { %1417 = vmatpush.bf16.msra.mxu2 %v2452_v35  ;;  %v2429_v24 = vld [vmem:[%s2831_s10 + $0x4c] sm:$0xf0]  ;;  %v1854_v28 = vld [vmem:[%s2831_s10 + $0x50] sm:$0xf0]  ;;  %v2530_v32 = vld [vmem:[%s2829_s9 + $0x2f8] sm:$0xff] }
  0x48   : > { %1431 = vmatpush.bf16.msra.mxu3 %v2460_v36  ;;  %v1853_v33 = vor.u32 %v2429_v24, %v1852_v23  ;;  %v1857_v35 = vor.u32 %v2421_v27, %v1854_v28  ;;  %v1865_v36 = vor.u32 %v2422_v29, %v1862_v30  ;;  %v2520_v43 = vld [vmem:[%s2829_s9 + $0x2a8] sm:$0xff]  ;;  %v2503_v45 = vld [vmem:[%s2829_s9 + $0x220] sm:$0xff]  ;;  %v2502_v49 = vld [vmem:[%s2829_s9 + $0x218] sm:$0xff] }
  0x49   : > { %1390 = vmatpush.bf16.msra.mxu0 %v2435_v37  ;;  %v2505_v37 = vld [vmem:[%s2829_s9 + $0x230] sm:$0xff]  ;;  %v2528_v44 = vld [vmem:[%s2829_s9 + $0x2e8] sm:$0xff]  ;;  %v2511_v46 = vld [vmem:[%s2829_s9 + $0x260] sm:$0xff] }
  0x4a   : > { %1404 = vmatpush.bf16.msra.mxu1 %v2443_v38  ;;  %v2513_v38 = vld [vmem:[%s2829_s9 + $0x270] sm:$0xff]  ;;  %v2519_v47 = vld [vmem:[%s2829_s9 + $0x2a0] sm:$0xff]  ;;  %v2510_v50 = vld [vmem:[%s2829_s9 + $0x258] sm:$0xff] }
  0x4b   : > { %1418 = vmatpush.bf16.msra.mxu2 %v2451_v39  ;;  %v2521_v39 = vld [vmem:[%s2829_s9 + $0x2b0] sm:$0xff]  ;;  %v2527_v48 = vld [vmem:[%s2829_s9 + $0x2e0] sm:$0xff]  ;;  %v2552_v23 = vld [vmem:[%s2829_s9 + $0x3a8] sm:$0xff] }
  0x4c   : > { %1432 = vmatpush.bf16.msra.mxu3 %v2459_v40  ;;  %1391 = vmatmul.bf16.vlgmr.msra.gmra.mxu0 %v1837_v53  ;;  %v2529_v40 = vld [vmem:[%s2829_s9 + $0x2f0] sm:$0xff]  ;;  %v2560_v24 = vld [vmem:[%s2829_s9 + $0x3e8] sm:$0xff]  ;;  %v2535_v25 = vld [vmem:[%s2829_s9 + $0x320] sm:$0xff] }
  0x4d   : > { %1439 = vmatpush.bf16.msrb.mxu0 %v2474_v41  ;;  %1405 = vmatmul.bf16.vlgmr.msra.gmra.mxu1 %v1841_v55  ;;  %v2504_v41 = vld [vmem:[%s2829_s9 + $0x228] sm:$0xff]  ;;  %v2501_v53 = vld [vmem:[%s2829_s9 + $0x210] sm:$0xff]  ;;  %v2543_v26 = vld [vmem:[%s2829_s9 + $0x360] sm:$0xff] }
  0x4e   : > { %1453 = vmatpush.bf16.msrb.mxu1 %v2482_v42  ;;  %1419 = vmatmul.bf16.vlgmr.msra.gmra.mxu2 %v1845_v54  ;;  %v2512_v42 = vld [vmem:[%s2829_s9 + $0x268] sm:$0xff]  ;;  %v2509_v54 = vld [vmem:[%s2829_s9 + $0x250] sm:$0xff]  ;;  %v2551_v27 = vld [vmem:[%s2829_s9 + $0x3a0] sm:$0xff] }
  0x4f   : > { %1467 = vmatpush.bf16.msrb.mxu2 %v2490_v51  ;;  %1433 = vmatmul.bf16.vlgmr.msra.gmra.mxu3 %v1849_v56  ;;  %v2518_v51 = vld [vmem:[%s2829_s9 + $0x298] sm:$0xff]  ;;  %v2517_v55 = vld [vmem:[%s2829_s9 + $0x290] sm:$0xff]  ;;  %v2559_v28 = vld [vmem:[%s2829_s9 + $0x3e0] sm:$0xff] }
  0x50   : > { %1481 = vmatpush.bf16.msrb.mxu3 %v2498_v52  ;;  %v2526_v52 = vld [vmem:[%s2829_s9 + $0x2d8] sm:$0xff]  ;;  %v2525_v56 = vld [vmem:[%s2829_s9 + $0x2d0] sm:$0xff] }
  0x51   : > { %1440 = vmatpush.bf16.msrb.mxu0 %v2473_v57  ;;  %v2500_v57 = vld [vmem:[%s2829_s9 + $0x208] sm:$0xff]  ;;  %v2534_v29 = vld [vmem:[%s2829_s9 + $0x318] sm:$0xff] }
  0x52   : > { %1454 = vmatpush.bf16.msrb.mxu1 %v2481_v58  ;;  %v2508_v58 = vld [vmem:[%s2829_s9 + $0x248] sm:$0xff]  ;;  %v2542_v30 = vld [vmem:[%s2829_s9 + $0x358] sm:$0xff] }
  0x53   : > { %1468 = vmatpush.bf16.msrb.mxu2 %v2489_v59  ;;  %v2516_v59 = vld [vmem:[%s2829_s9 + $0x288] sm:$0xff] }
  0x54   : > { %1482 = vmatpush.bf16.msrb.mxu3 %v2497_v60  ;;  %v2524_v60 = vld [vmem:[%s2829_s9 + $0x2c8] sm:$0xff] }
  0x55   : > { %1441 = vmatpush.bf16.msrb.mxu0 %v2472_v61  ;;  %v2499_v61 = vld [vmem:[%s2829_s9 + $0x200] sm:$0xff] }
  0x56   : > { %1455 = vmatpush.bf16.msrb.mxu1 %v2480_v62  ;;  %v2507_v62 = vld [vmem:[%s2829_s9 + $0x240] sm:$0xff] }
  0x57   : > { %1469 = vmatpush.bf16.msrb.mxu2 %v2488_v63  ;;  %v2515_v63 = vld [vmem:[%s2829_s9 + $0x280] sm:$0xff] }
  0x58   : > { %1483 = vmatpush.bf16.msrb.mxu3 %v2496_v0  ;;  %v2523_v0 = vld [vmem:[%s2829_s9 + $0x2c0] sm:$0xff] }
  0x59   : > { %1442 = vmatpush.bf16.msrb.mxu0 %v2471_v1  ;;  %v2538_v1 = vld [vmem:[%s2829_s9 + $0x338] sm:$0xff] }
  0x5a   : > { %1456 = vmatpush.bf16.msrb.mxu1 %v2479_v2  ;;  %v2546_v2 = vld [vmem:[%s2829_s9 + $0x378] sm:$0xff] }
  0x5b   : > { %1470 = vmatpush.bf16.msrb.mxu2 %v2487_v3  ;;  %v1868_v3 = vld [vmem:[%s2831_s10 + $0x20] sm:$0xf] }
  0x5c   : > { %1484 = vmatpush.bf16.msrb.mxu3 %v2495_v4  ;;  %v2431_v4 = vld [vmem:[%s2831_s10 + $0x5c] sm:$0xf0] }
  0x5d   : > { %1443 = vmatpush.bf16.msrb.mxu0 %v2470_v5  ;;  %v1876_v5 = vld [vmem:[%s2831_s10 + $0x28] sm:$0xf] }
  0x5e   : > { %1457 = vmatpush.bf16.msrb.mxu1 %v2478_v6  ;;  %v2432_v6 = vld [vmem:[%s2831_s10 + $0x64] sm:$0xf0] }
  0x5f   : > { %1471 = vmatpush.bf16.msrb.mxu2 %v2486_v7  ;;  %v2423_v7 = vld [vmem:[%s2831_s10 + $0x24] sm:$0xf] }
  0x60   : > { %1485 = vmatpush.bf16.msrb.mxu3 %v2494_v8  ;;  %v1870_v8 = vld [vmem:[%s2831_s10 + $0x60] sm:$0xf0] }
  0x61   : > { %1444 = vmatpush.bf16.msrb.mxu0 %v2469_v9  ;;  %v2424_v9 = vld [vmem:[%s2831_s10 + $0x2c] sm:$0xf] }
  0x62   : > { %1458 = vmatpush.bf16.msrb.mxu1 %v2477_v10  ;;  %v1878_v10 = vld [vmem:[%s2831_s10 + $0x68] sm:$0xf0] }
  0x63   : > { %1472 = vmatpush.bf16.msrb.mxu2 %v2485_v11  ;;  %v2554_v11 = vld [vmem:[%s2829_s9 + $0x3b8] sm:$0xff] }
  0x64   : > { %1486 = vmatpush.bf16.msrb.mxu3 %v2493_v12  ;;  %v2562_v12 = vld [vmem:[%s2829_s9 + $0x3f8] sm:$0xff] }
  0x65   : > { %1445 = vmatpush.bf16.msrb.mxu0 %v2468_v13  ;;  %v1869_v13 = vor.u32 %v2431_v4, %v1868_v3 }
  0x66   : > { %1459 = vmatpush.bf16.msrb.mxu1 %v2476_v14  ;;  %v1877_v14 = vor.u32 %v2432_v6, %v1876_v5 }
  0x67   : > { %1473 = vmatpush.bf16.msrb.mxu2 %v2484_v15  ;;  %v1873_v15 = vor.u32 %v2423_v7, %v1870_v8 }
  0x68   : > { %1487 = vmatpush.bf16.msrb.mxu3 %v2492_v16  ;;  %v1881_v16 = vor.u32 %v2424_v9, %v1878_v10 }
  0x69   : > { %1446 = vmatpush.bf16.msrb.mxu0 %v2467_v17  ;;  %v2537_v17 = vld [vmem:[%s2829_s9 + $0x330] sm:$0xff] }
  0x6a   : > { %1460 = vmatpush.bf16.msrb.mxu1 %v2475_v18  ;;  %v2545_v18 = vld [vmem:[%s2829_s9 + $0x370] sm:$0xff] }
  0x6b   : > { %1474 = vmatpush.bf16.msrb.mxu2 %v2483_v19  ;;  %v2553_v19 = vld [vmem:[%s2829_s9 + $0x3b0] sm:$0xff] }
  0x6c   : > { %1488 = vmatpush.bf16.msrb.mxu3 %v2491_v20  ;;  %1447 = vmatmul.bf16.vlgmr.msrb.gmra.mxu0 %v1853_v33  ;;  %v2561_v20 = vld [vmem:[%s2829_s9 + $0x3f0] sm:$0xff] }
  0x6d   : > { %1495 = vmatpush.bf16.msra.mxu0 %v2506_v21  ;;  %1461 = vmatmul.bf16.vlgmr.msrb.gmra.mxu1 %v1857_v35  ;;  %v2536_v21 = vld [vmem:[%s2829_s9 + $0x328] sm:$0xff]  ;;  %v2533_v33 = vld [vmem:[%s2829_s9 + $0x310] sm:$0xff] }
  0x6e   : > { %1509 = vmatpush.bf16.msra.mxu1 %v2514_v22  ;;  %1475 = vmatmul.bf16.vlgmr.msrb.gmra.mxu2 %v1861_v34  ;;  %v2544_v22 = vld [vmem:[%s2829_s9 + $0x368] sm:$0xff]  ;;  %v2541_v34 = vld [vmem:[%s2829_s9 + $0x350] sm:$0xff] }
  0x6f   : > { %1523 = vmatpush.bf16.msra.mxu2 %v2522_v31  ;;  %1489 = vmatmul.bf16.vlgmr.msrb.gmra.mxu3 %v1865_v36  ;;  %v2550_v31 = vld [vmem:[%s2829_s9 + $0x398] sm:$0xff]  ;;  %v2549_v35 = vld [vmem:[%s2829_s9 + $0x390] sm:$0xff] }
  0x70   : > { %1537 = vmatpush.bf16.msra.mxu3 %v2530_v32  ;;  %v2558_v32 = vld [vmem:[%s2829_s9 + $0x3d8] sm:$0xff]  ;;  %v2557_v36 = vld [vmem:[%s2829_s9 + $0x3d0] sm:$0xff] }
  0x71   : > { %1496 = vmatpush.bf16.msra.mxu0 %v2505_v37  ;;  %v2532_v37 = vld [vmem:[%s2829_s9 + $0x308] sm:$0xff] }
  0x72   : > { %1510 = vmatpush.bf16.msra.mxu1 %v2513_v38  ;;  %v2540_v38 = vld [vmem:[%s2829_s9 + $0x348] sm:$0xff] }
  0x73   : > { %1524 = vmatpush.bf16.msra.mxu2 %v2521_v39  ;;  %v2548_v39 = vld [vmem:[%s2829_s9 + $0x388] sm:$0xff] }
  0x74   : > { %1538 = vmatpush.bf16.msra.mxu3 %v2529_v40  ;;  %v2556_v40 = vld [vmem:[%s2829_s9 + $0x3c8] sm:$0xff] }
  0x75   : > { %1497 = vmatpush.bf16.msra.mxu0 %v2504_v41  ;;  %v2531_v41 = vld [vmem:[%s2829_s9 + $0x300] sm:$0xff] }
  0x76   : > { %1511 = vmatpush.bf16.msra.mxu1 %v2512_v42  ;;  %v2539_v42 = vld [vmem:[%s2829_s9 + $0x340] sm:$0xff] }
  0x77   : > { %1525 = vmatpush.bf16.msra.mxu2 %v2520_v43  ;;  %v2547_v43 = vld [vmem:[%s2829_s9 + $0x380] sm:$0xff] }
  0x78   : > { %1539 = vmatpush.bf16.msra.mxu3 %v2528_v44  ;;  %v2555_v44 = vld [vmem:[%s2829_s9 + $0x3c0] sm:$0xff] }
  0x79   : > { %1498 = vmatpush.bf16.msra.mxu0 %v2503_v45  ;;  %v1884_v45 = vld [vmem:[%s2831_s10 + $0x30] sm:$0xf] }
  0x7a   : > { %1512 = vmatpush.bf16.msra.mxu1 %v2511_v46  ;;  %v2433_v46 = vld [vmem:[%s2831_s10 + $0x6c] sm:$0xf0] }
  0x7b   : > { %1526 = vmatpush.bf16.msra.mxu2 %v2519_v47  ;;  %v2425_v47 = vld [vmem:[%s2831_s10 + $0x34] sm:$0xf] }
  0x7c   : > { %1540 = vmatpush.bf16.msra.mxu3 %v2527_v48  ;;  %v1886_v48 = vld [vmem:[%s2831_s10 + $0x70] sm:$0xf0] }
  0x7d   : > { %1499 = vmatpush.bf16.msra.mxu0 %v2502_v49  ;;  %v1892_v49 = vld [vmem:[%s2831_s10 + $0x38] sm:$0xf] }
  0x7e   : > { %1513 = vmatpush.bf16.msra.mxu1 %v2510_v50  ;;  %v2434_v50 = vld [vmem:[%s2831_s10 + $0x74] sm:$0xf0] }
  0x7f   : > { %1527 = vmatpush.bf16.msra.mxu2 %v2518_v51  ;;  %v2426_v51 = vld [vmem:[%s2831_s10 + $0x3c] sm:$0xf] }
  0x80   : > { %1541 = vmatpush.bf16.msra.mxu3 %v2526_v52  ;;  %v1894_v52 = vld [vmem:[%s2831_s10 + $0x78] sm:$0xf0] }
  0x81   : > { %1500 = vmatpush.bf16.msra.mxu0 %v2501_v53  ;;  %v1885_v53 = vor.u32 %v2433_v46, %v1884_v45 }
  0x82   : > { %1514 = vmatpush.bf16.msra.mxu1 %v2509_v54  ;;  %v1889_v54 = vor.u32 %v2425_v47, %v1886_v48  ;;  %v261_v47 = vld [vmem:[#allocation2] sm:$0xff] }
  0x83   : > { %1528 = vmatpush.bf16.msra.mxu2 %v2517_v55  ;;  %v1893_v55 = vor.u32 %v2434_v50, %v1892_v49 }
  0x84   : > { %1542 = vmatpush.bf16.msra.mxu3 %v2525_v56  ;;  %v1897_v56 = vor.u32 %v2426_v51, %v1894_v52 }
  0x85   : > { %1501 = vmatpush.bf16.msra.mxu0 %v2500_v57 }
  0x86   : > { %1515 = vmatpush.bf16.msra.mxu1 %v2508_v58 }
  0x87   : > { %1529 = vmatpush.bf16.msra.mxu2 %v2516_v59 }
  0x88   : > { %1543 = vmatpush.bf16.msra.mxu3 %v2524_v60 }
  0x89   : > { %1502 = vmatpush.bf16.msra.mxu0 %v2499_v61 }
  0x8a   : > { %1516 = vmatpush.bf16.msra.mxu1 %v2507_v62 }
  0x8b   : > { %1530 = vmatpush.bf16.msra.mxu2 %v2515_v63 }
  0x8c   : > { %1544 = vmatpush.bf16.msra.mxu3 %v2523_v0  ;;  %1503 = vmatmul.bf16.vlgmr.msra.gmra.mxu0 %v1869_v13 }
  0x8d   : > { %1551 = vmatpush.bf16.msrb.mxu0 %v2538_v1  ;;  %1517 = vmatmul.bf16.vlgmr.msra.gmra.mxu1 %v1873_v15 }
  0x8e   : > { %1565 = vmatpush.bf16.msrb.mxu1 %v2546_v2  ;;  %1531 = vmatmul.bf16.vlgmr.msra.gmra.mxu2 %v1877_v14 }
  0x8f   : > { %1579 = vmatpush.bf16.msrb.mxu2 %v2554_v11  ;;  %1545 = vmatmul.bf16.vlgmr.msra.gmra.mxu3 %v1881_v16 }
  0x90   : > { %1593 = vmatpush.bf16.msrb.mxu3 %v2562_v12 }
  0x91   : > { %1552 = vmatpush.bf16.msrb.mxu0 %v2537_v17 }
  0x92   : > { %1566 = vmatpush.bf16.msrb.mxu1 %v2545_v18 }
  0x93   : > { %1580 = vmatpush.bf16.msrb.mxu2 %v2553_v19 }
  0x94   : > { %1594 = vmatpush.bf16.msrb.mxu3 %v2561_v20 }
  0x95   : > { %1553 = vmatpush.bf16.msrb.mxu0 %v2536_v21 }
  0x96   : > { %1567 = vmatpush.bf16.msrb.mxu1 %v2544_v22 }
  0x97   : > { %1581 = vmatpush.bf16.msrb.mxu2 %v2552_v23 }
  0x98   : > { %1595 = vmatpush.bf16.msrb.mxu3 %v2560_v24 }
  0x99   : > { %1554 = vmatpush.bf16.msrb.mxu0 %v2535_v25 }
  0x9a   : > { %1568 = vmatpush.bf16.msrb.mxu1 %v2543_v26 }
  0x9b   : > { %1582 = vmatpush.bf16.msrb.mxu2 %v2551_v27 }
  0x9c   : > { %1596 = vmatpush.bf16.msrb.mxu3 %v2559_v28 }
  0x9d   : > { %1555 = vmatpush.bf16.msrb.mxu0 %v2534_v29 }
  0x9e   : > { %1569 = vmatpush.bf16.msrb.mxu1 %v2542_v30 }
  0x9f   : > { %1583 = vmatpush.bf16.msrb.mxu2 %v2550_v31 }
  0xa0   : > { %1597 = vmatpush.bf16.msrb.mxu3 %v2558_v32 }
  0xa1   : > { %1556 = vmatpush.bf16.msrb.mxu0 %v2533_v33 }
  0xa2   : > { %1570 = vmatpush.bf16.msrb.mxu1 %v2541_v34 }
  0xa3   : > { %1584 = vmatpush.bf16.msrb.mxu2 %v2549_v35 }
  0xa4   : > { %1598 = vmatpush.bf16.msrb.mxu3 %v2557_v36 }
  0xa5   : > { %1557 = vmatpush.bf16.msrb.mxu0 %v2532_v37 }
  0xa6   : > { %1571 = vmatpush.bf16.msrb.mxu1 %v2540_v38 }
  0xa7   : > { %1585 = vmatpush.bf16.msrb.mxu2 %v2548_v39 }
  0xa8   : > { %1599 = vmatpush.bf16.msrb.mxu3 %v2556_v40 }
  0xa9   : > { %1558 = vmatpush.bf16.msrb.mxu0 %v2531_v41 }
  0xaa   : > { %1572 = vmatpush.bf16.msrb.mxu1 %v2539_v42 }
  0xab   : > { %1586 = vmatpush.bf16.msrb.mxu2 %v2547_v43 }
  0xac   : > { %1600 = vmatpush.bf16.msrb.mxu3 %v2555_v44  ;;  %1559 = vmatmul.bf16.vlgmr.msrb.gmra.mxu0 %v1885_v53 }
  0xad   : > { %1573 = vmatmul.bf16.vlgmr.msrb.gmra.mxu1 %v1889_v54 }
  0xae   : > { %1587 = vmatmul.bf16.vlgmr.msrb.gmra.mxu2 %v1893_v55  ;;  %v262_v55 = vld [vmem:[#allocation2 + $0x8] sm:$0xff] }
  0xaf   : > { %1601 = vmatmul.bf16.vlgmr.msrb.gmra.mxu3 %v1897_v56 }
  0xc9   : > { %v1392_v57 = vpop.f32.mrf.mxu0 }
  0xca   : > { %v1406_v58 = vpop.f32.mrf.mxu1 }
  0xcb   : > { %v1407_v1 = vadd.f32 %v1406_v58, %v1392_v57 }
  0xd1   : > { %v1420_v59 = vpop.f32.mrf.mxu2  ;;  %v1394_v61 = vpop.f32.mrf.mxu0 }
  0xd2   : > { %v1434_v60 = vpop.f32.mrf.mxu3  ;;  %v1408_v62 = vpop.f32.mrf.mxu1  ;;  %v1421_v4 = vadd.f32 %v1420_v59, %v1407_v1 }
  0xd3   : > { %v1409_v9 = vadd.f32 %v1408_v62, %v1394_v61 }
  0xd4   : > { %v1435_v7 = vadd.f32 %v1434_v60, %v1421_v4 }
  0xd9   : > { %v1422_v63 = vpop.f32.mrf.mxu2 }
  0xda   : > { %v1436_v0 = vpop.f32.mrf.mxu3  ;;  %v1423_v12 = vadd.f32 %v1422_v63, %v1409_v9 }
  0xdc   : > { %v1437_v17 = vadd.f32 %v1436_v0, %v1423_v12 }
  0xe9   : > { %v1448_v2 = vpop.f32.mrf.mxu0 }
  0xea   : > { %v1462_v3 = vpop.f32.mrf.mxu1  ;;  %v1449_v10 = vadd.f32 %v1448_v2, %v1435_v7 }
  0xec   : > { %v1463_v13 = vadd.f32 %v1462_v3, %v1449_v10 }
  0xf1   : > { %v1476_v5 = vpop.f32.mrf.mxu2  ;;  %v1450_v8 = vpop.f32.mrf.mxu0 }
  0xf2   : > { %v1490_v6 = vpop.f32.mrf.mxu3  ;;  %v1464_v11 = vpop.f32.mrf.mxu1  ;;  %v1477_v18 = vadd.f32 %v1476_v5, %v1463_v13  ;;  %v1451_v20 = vadd.f32 %v1450_v8, %v1437_v17 }
  0xf4   : > { %v1491_v21 = vadd.f32 %v1490_v6, %v1477_v18  ;;  %v1465_v24 = vadd.f32 %v1464_v11, %v1451_v20 }
  0xf9   : > { %v1478_v14 = vpop.f32.mrf.mxu2 }
  0xfa   : > { %v1492_v15 = vpop.f32.mrf.mxu3  ;;  %v1479_v26 = vadd.f32 %v1478_v14, %v1465_v24 }
  0xfc   : > { %v1493_v30 = vadd.f32 %v1492_v15, %v1479_v26 }
 0x109   : > { %v1504_v16 = vpop.f32.mrf.mxu0 }
 0x10a   : > { %v1518_v19 = vpop.f32.mrf.mxu1  ;;  %v1505_v25 = vadd.f32 %v1504_v16, %v1491_v21 }
 0x10c   : > { %v1519_v28 = vadd.f32 %v1518_v19, %v1505_v25 }
 0x111   : > { %v1532_v22 = vpop.f32.mrf.mxu2  ;;  %v1506_v27 = vpop.f32.mrf.mxu0 }
 0x112   : > { %v1546_v23 = vpop.f32.mrf.mxu3  ;;  %v1520_v29 = vpop.f32.mrf.mxu1  ;;  %v1533_v31 = vadd.f32 %v1532_v22, %v1519_v28  ;;  %v1507_v32 = vadd.f32 %v1506_v27, %v1493_v30 }
 0x114   : > { %v1547_v35 = vadd.f32 %v1546_v23, %v1533_v31  ;;  %v1521_v37 = vadd.f32 %v1520_v29, %v1507_v32 }
 0x119   : > { %v1534_v33 = vpop.f32.mrf.mxu2 }
 0x11a   : > { %v1548_v34 = vpop.f32.mrf.mxu3  ;;  %v1535_v40 = vadd.f32 %v1534_v33, %v1521_v37 }
 0x11c   : > { %v1549_v44 = vadd.f32 %v1548_v34, %v1535_v40 }
 0x129   : > { %v1560_v36 = vpop.f32.mrf.mxu0 }
 0x12a   : > { %v1561_v38 = vadd.f32 %v1560_v36, %v1547_v35  ;;  %v1574_v39 = vpop.f32.mrf.mxu1 }
 0x12c   : > { %v1575_v41 = vadd.f32 %v1574_v39, %v1561_v38 }
 0x131   : > { %v1588_v42 = vpop.f32.mrf.mxu2  ;;  %v1562_v46 = vpop.f32.mrf.mxu0 }
 0x132   : > { %v1602_v43 = vpop.f32.mrf.mxu3  ;;  %v1589_v45 = vadd.f32 %v1588_v42, %v1575_v41  ;;  %v1563_v49 = vadd.f32 %v1562_v46, %v1549_v44  ;;  %v1576_v51 = vpop.f32.mrf.mxu1 }
 0x134   : > { %v1603_v48 = vadd.f32 %v1602_v43, %v1589_v45  ;;  %v1577_v52 = vadd.f32 %v1576_v51, %v1563_v49 }
 0x136   : > { %v1607_v50 = vadd.f32 %v1603_v48, %v261_v47 }
 0x138   : > { %1609 = vst [vmem:[#allocation2] sm:$0xff] %v1607_v50 }
 0x139   : > { %v1590_v53 = vpop.f32.mrf.mxu2 }
 0x13a   : > { %v1591_v54 = vadd.f32 %v1590_v53, %v1577_v52  ;;  %v1604_v56 = vpop.f32.mrf.mxu3 }
 0x13c   : > { %v1605_v57 = vadd.f32 %v1604_v56, %v1591_v54  ;;  %1614 = sbr.rel (%p2410_p12) target bundleno = 354 (0x162), region = 63 }
 0x13e   : > { %v1608_v58 = vadd.f32 %v1605_v57, %v262_v55 }
 0x140   : > { %1610 = vst [vmem:[#allocation2 + $0x8] sm:$0xff] %v1608_v58 }
 0x141   : > { %v1615_v59 = vld [vmem:[#allocation2] sm:$0xff] }
 0x142   : > { %v2668_v60 = vld [vmem:[%s3020_s2] ss:$0 sm:$0xff] }
 0x143   : > { %v1621_v62 = vadd.f32 %v2668_v60, %v1615_v59 }
 0x145   : > { %v2411_v0 = vmul.f32 -1.442695, %v1621_v62 }
 0x147   : > { %v1616_v61 = vld [vmem:[#allocation2 + $0x8] sm:$0xff]  ;;  %2669 = vpow2.f32 %v2411_v0 }
 0x148   : > { %v1622_v63 = vadd.f32 %v2668_v60, %v1616_v61 }
 0x14a   : > { %v2412_v1 = vmul.f32 -1.442695, %v1622_v63 }
 0x14c   : > { %2671 = vpow2.f32 %v2412_v1 }
 0x14d   : > { %v2670_v2 = vpop.eup %2669 }
 0x14e   : > { %v1629_v4 = vadd.f32 1.0, %v2670_v2 }
 0x150   : > { %2673 = vrcp.f32 %v1629_v4  ;;  %vm1636_vm0 = vweird.f32 %v1629_v4  ;;  %v1642_v9 = vand.u32 2147483648, %v1629_v4  ;;  %v1640_v11 = vand.u32 2147483647, %v1629_v4 }
 0x152   : > { %v2672_v3 = vpop.eup %2671  ;;  %v1643_v13 = vor.u32 1.1754944e-38, %v1642_v9  ;;  %vm1641_vm3 = vcmp.eq.f32.partialorder %v1640_v11, 8.507059e+37 }
 0x153   : > { %v1630_v5 = vadd.f32 1.0, %v2672_v3 }
 0x155   : > { %2675 = vrcp.f32 %v1630_v5 }
 0x156   : > { %v2674_v6 = vpop.eup %2673 }
 0x157   : > { %v1632_v8 = vmul.f32 %v2674_v6, %v1629_v4  ;;  %vm1637_vm1 = vweird.f32 %v2674_v6 }
 0x158   : > { %vm1638_vm2 = vmor %vm1636_vm0, %vm1637_vm1 }
 0x159   : > { %v1633_v10 = vsub.f32 1.0, %v1632_v8 }
 0x15b   : > { %v2676_v7 = vpop.eup %2675  ;;  %v1634_v12 = vmul.f32 %v2674_v6, %v1633_v10 }
 0x15d   : > { %v1635_v14 = vadd.f32 %v2674_v6, %v1634_v12 }
 0x15f   : > { %v1639_v15 = vsel %vm1638_vm2, %v2674_v6, %v1635_v14 }
 0x160   : > { %v1644_v16 = vsel %vm1641_vm3, %v1643_v13, %v1639_v15 }
 0x161   : > { %1661 = vst [vmem:[#allocation4] sm:$0xff] %v1644_v16 }
 0x162 PF: > { %p2413_p13 = scmp.ne.s32.totalorder %s1821_s17, 3 }
 0x163   : > { %s2753_s14 = smov (!%p2413_p13), 0  }
 0x164   : > { %1665 = sbr.rel (%p2413_p13) target bundleno = 369 (0x171), region = 67 }
 0x169 LB: >> { %v1710_v17 = vld [vmem:[#allocation4] sm:$0xff]  ;;  %s1704_s14 = sadd.s32 1, %s2755_s14   ;;  %s2755_s14 = sphi %s2753_s14, %s1704_s14  }
 0x16a   : >> { %1711 = vst [vmem:[%s3021_s3] sm:$0xff] %v1710_v17  ;;  %p1703_p0 = scmp.ge.s32.totalorder %s1704_s14, 1 }
 0x16c   : > { %1706 = sbr.rel (!%p1703_p0) target bundleno = 361 (0x169), region = 145 }
 0x171 PF: > { %s13_s16 = sadd.s32 1, %s2747_s16   ;;  %s3022_s12 = smov %s2735_s13 }
 0x172   : > { %p10_p1 = scmp.ge.s32.totalorder %s13_s16, 6   ;;  %s3023_s13 = smov %s2814_s21 }
 0x173   : > { %s3024_s14 = smov %s2743_s15  ;;  %s3025_s15 = smov %s3027_s18 }
 0x174   :  { %12 = sbr.rel (!%p10_p1) target bundleno = 3 (0x3), region = 156 }

// kernel: discriminator_forward.8
= control target key start
LH: loop header
LB: loop body
LE: loop exit
PB: predicated region body
PF: predicated region fallthrough
CT: control target
= control target key end

     0   :  { %s7267_s12 = smov 0   ;;  %s7269_s13 = smov 0   ;;  %s8485_s0 = inlined_call_operand.vmem [shape: bf16[2,4,4096], index: 0, kind: input, shape index: {}]   ;;  %s8486_s1 = inlined_call_operand.vmem [shape: bf16[4096,512], index: 1, kind: input, shape index: {}]   ;;  %s8487_s2 = inlined_call_operand.vmem [shape: f32[1,512], index: 2, kind: input, shape index: {}]   ;;  %s8488_s3 = inlined_call_operand.vmem [shape: bf16[2,4,512], index: 3, kind: output, shape index: {}]  }
   0x1   :  { %s7271_s14 = smov 0   ;;  %s7273_s15 = smov 0  }
   0x2   :  { %s7275_s16 = smov 0  }
   0x3 LB: > { %s22_s17 = sadd.s32 1, %s7235_s14  ;;  %s25_s18 = sadd.s32 1, %s7239_s15  ;;  %s7243_s16 = sphi %s7275_s16, %s13_s16   ;;  %s7239_s15 = sphi %s7273_s15, %s8492_s15   ;;  %s7235_s14 = sphi %s7271_s14, %s8491_s14   ;;  %s7231_s13 = sphi %s7269_s13, %s8490_s13   ;;  %s7227_s12 = sphi %s7267_s12, %s8489_s12  }
   0x4   : > { %p23_p0 = scmp.ge.s32.totalorder %s22_s17, 2  ;;  %p4544_p1 = scmp.ge.s32.totalorder %s7243_s16, 1 }
   0x5   : > { %p168_p2 = scmp.lt.s32.totalorder %s7243_s16, 5 }
   0x6   : > { %s8494_s17 = smov (%p23_p0, %s22_s17), 0  ;;  %s8496_s18 = smov (!%p23_p0, %s25_s18), %s7239_s15 }
   0x7   : > { %p169_p3 = pnand %p4544_p1, %p168_p2  ;;  %p27_p4 = scmp.ge.s32.totalorder %s8496_s18, 2 }
   0x8   : > { %s4545_s19 = sshll.u32 (!%p169_p3), %s7227_s12, 4  ;;  %p203_p5 = scmp.lt.s32.totalorder (!%p169_p3), %s7231_s13, 1 }
   0x9   : > { %s8498_s18 = smov (%p27_p4, %s8496_s18), 0  ;;  %172 = sbr.rel (%p169_p3) target bundleno = 828 (0x33c), region = 32 }
   0xa   : > { %p205_p6 = scmp.lt.s32.totalorder (!%p169_p3), %s4545_s19, 31  ;;  %s4548_s20 = sshll.u32 (!%p169_p3), %s7227_s12, 8 }
   0xb   : > { %p213_p7 = scmp.lt.s32.totalorder (!%p169_p3), %s4548_s20, 511  ;;  %p4553_p8 = scmp.ne.s32.totalorder (!%p169_p3), %s7227_s12, 0 }
   0xe   : > { %s8500_s13 = smov (!%p203_p5, %s7231_s13), 1  ;;  %s8502_s19 = smov (!%p205_p6, %s4545_s19), 31 }
   0xf   : > { %s4546_s21 = sshll.u32 %s8500_s13, 5  ;;  %s6608_s23 = sshll.u32 %s8500_s13, 3 }
  0x10   : > { %s208_s22 = sadd.s32 %s4546_s21, %s8502_s19  ;;  %s7304_s27 = scalar_lea.vmem %s8488_s3, %s6608_s23 }
  0x11   : > { %s4547_s24 = sshll.u32 %s208_s22, 1  ;;  %s8504_s20 = smov (!%p213_p7, %s4548_s20), 511 }
  0x12   : > { %s7309_s30 = scalar_lea.vmem %s8485_s0, %s4547_s24  ;;  %s6607_s4 = sshll.u32 %s8504_s20, 4 }
  0x13   : > { %s7314_s7 = scalar_lea.vmem %s8486_s1, %s6607_s4  ;;  %227 = sbr.rel (%p4553_p8) target bundleno = 27 (0x1b), region = 36 }
  0x18   : > { %v7245_v0 = vmov 0.0  }
  0x19   : > { %228 = vst [vmem:[#allocation2] sm:$0xff] %v7245_v0 }
  0x1a   : > { %229 = vst [vmem:[#allocation2 + $0x8] sm:$0xff] %v7245_v0 }
  0x1b PF: > { %v4668_v1 = vld [vmem:[%s7314_s7 + $0xe0] sm:$0xf]  ;;  %v6639_v2 = vld [vmem:[%s7314_s7 + $0xec] sm:$0xf0]  ;;  %vm4187_vm0 = vcmask 1043456   ;;  %p6602_p9 = scmp.ne.s32.totalorder %s7227_s12, 1 }
  0x1c   : > { %v4796_v3 = vld [vmem:[%s7314_s7 + $0x1e0] sm:$0xf]  ;;  %v4669_v4 = vor.u32 %v6639_v2, %v4668_v1  ;;  %v6671_v5 = vld [vmem:[%s7314_s7 + $0x1ec] sm:$0xf0] }
  0x1d   : > { %v4924_v6 = vld [vmem:[%s7314_s7 + $0x2e0] sm:$0xf]  ;;  %v6703_v7 = vld [vmem:[%s7314_s7 + $0x2ec] sm:$0xf0]  ;;  %v4797_v8 = vor.u32 %v6671_v5, %v4796_v3 }
  0x1e   : > { %v4925_v9 = vor.u32 %v6703_v7, %v4924_v6  ;;  %v5052_v10 = vld [vmem:[%s7314_s7 + $0x3e0] sm:$0xf]  ;;  %v6735_v11 = vld [vmem:[%s7314_s7 + $0x3ec] sm:$0xf0]  ;;  %3349 = vmatpush.bf16.msra.mxu0 %v4669_v4 }
  0x1f   : > { %v4652_v12 = vld [vmem:[%s7314_s7 + $0xc0] sm:$0xf]  ;;  %v5053_v13 = vor.u32 %v6735_v11, %v5052_v10  ;;  %v6635_v14 = vld [vmem:[%s7314_s7 + $0xcc] sm:$0xf0]  ;;  %3362 = vmatpush.bf16.msra.mxu1 %v4797_v8 }
  0x20   : > { %v4780_v15 = vld [vmem:[%s7314_s7 + $0x1c0] sm:$0xf]  ;;  %v6667_v16 = vld [vmem:[%s7314_s7 + $0x1cc] sm:$0xf0]  ;;  %3375 = vmatpush.bf16.msra.mxu2 %v4925_v9  ;;  %v4653_v17 = vor.u32 %v6635_v14, %v4652_v12 }
  0x21   : > { %v4781_v18 = vor.u32 %v6667_v16, %v4780_v15  ;;  %v4908_v19 = vld [vmem:[%s7314_s7 + $0x2c0] sm:$0xf]  ;;  %v6699_v20 = vld [vmem:[%s7314_s7 + $0x2cc] sm:$0xf0]  ;;  %3388 = vmatpush.bf16.msra.mxu3 %v5053_v13 }
  0x22   : > { %v5036_v21 = vld [vmem:[%s7314_s7 + $0x3c0] sm:$0xf]  ;;  %v4909_v22 = vor.u32 %v6699_v20, %v4908_v19  ;;  %v6731_v23 = vld [vmem:[%s7314_s7 + $0x3cc] sm:$0xf0]  ;;  %3350 = vmatpush.bf16.msra.mxu0 %v4653_v17 }
  0x23   : > { %v4636_v24 = vld [vmem:[%s7314_s7 + $0xa0] sm:$0xf]  ;;  %v6631_v25 = vld [vmem:[%s7314_s7 + $0xac] sm:$0xf0]  ;;  %v5037_v26 = vor.u32 %v6731_v23, %v5036_v21  ;;  %3363 = vmatpush.bf16.msra.mxu1 %v4781_v18 }
  0x24   : > { %v4764_v27 = vld [vmem:[%s7314_s7 + $0x1a0] sm:$0xf]  ;;  %v6663_v28 = vld [vmem:[%s7314_s7 + $0x1ac] sm:$0xf0]  ;;  %v4637_v30 = vor.u32 %v6631_v25, %v4636_v24  ;;  %3376 = vmatpush.bf16.msra.mxu2 %v4909_v22 }
  0x25   : > { %v4892_v29 = vld [vmem:[%s7314_s7 + $0x2a0] sm:$0xf]  ;;  %v6695_v31 = vld [vmem:[%s7314_s7 + $0x2ac] sm:$0xf0]  ;;  %v4765_v34 = vor.u32 %v6663_v28, %v4764_v27  ;;  %3389 = vmatpush.bf16.msra.mxu3 %v5037_v26 }
  0x26   : > { %v5020_v32 = vld [vmem:[%s7314_s7 + $0x3a0] sm:$0xf]  ;;  %v6727_v33 = vld [vmem:[%s7314_s7 + $0x3ac] sm:$0xf0]  ;;  %v4893_v35 = vor.u32 %v6695_v31, %v4892_v29  ;;  %3351 = vmatpush.bf16.msra.mxu0 %v4637_v30 }
  0x27   : > { %v4620_v36 = vld [vmem:[%s7314_s7 + $0x80] sm:$0xf]  ;;  %v6627_v37 = vld [vmem:[%s7314_s7 + $0x8c] sm:$0xf0]  ;;  %v5021_v39 = vor.u32 %v6727_v33, %v5020_v32  ;;  %3364 = vmatpush.bf16.msra.mxu1 %v4765_v34 }
  0x28   : > { %v4748_v38 = vld [vmem:[%s7314_s7 + $0x180] sm:$0xf]  ;;  %v6659_v40 = vld [vmem:[%s7314_s7 + $0x18c] sm:$0xf0]  ;;  %v4621_v45 = vor.u32 %v6627_v37, %v4620_v36  ;;  %3377 = vmatpush.bf16.msra.mxu2 %v4893_v35 }
  0x29   : > { %v4876_v41 = vld [vmem:[%s7314_s7 + $0x280] sm:$0xf]  ;;  %v6691_v42 = vld [vmem:[%s7314_s7 + $0x28c] sm:$0xf0]  ;;  %v4749_v46 = vor.u32 %v6659_v40, %v4748_v38  ;;  %3390 = vmatpush.bf16.msra.mxu3 %v5021_v39 }
  0x2a   : > { %v5004_v43 = vld [vmem:[%s7314_s7 + $0x380] sm:$0xf]  ;;  %v6723_v44 = vld [vmem:[%s7314_s7 + $0x38c] sm:$0xf0]  ;;  %v4877_v47 = vor.u32 %v6691_v42, %v4876_v41  ;;  %3352 = vmatpush.bf16.msra.mxu0 %v4621_v45 }
  0x2b   : > { %v4604_v48 = vld [vmem:[%s7314_s7 + $0x60] sm:$0xf]  ;;  %v6623_v49 = vld [vmem:[%s7314_s7 + $0x6c] sm:$0xf0]  ;;  %v5005_v51 = vor.u32 %v6723_v44, %v5004_v43  ;;  %3365 = vmatpush.bf16.msra.mxu1 %v4749_v46 }
  0x2c   : > { %v4732_v50 = vld [vmem:[%s7314_s7 + $0x160] sm:$0xf]  ;;  %v6655_v52 = vld [vmem:[%s7314_s7 + $0x16c] sm:$0xf0]  ;;  %v4605_v57 = vor.u32 %v6623_v49, %v4604_v48  ;;  %3378 = vmatpush.bf16.msra.mxu2 %v4877_v47 }
  0x2d   : > { %v4860_v53 = vld [vmem:[%s7314_s7 + $0x260] sm:$0xf]  ;;  %v6687_v54 = vld [vmem:[%s7314_s7 + $0x26c] sm:$0xf0]  ;;  %v4733_v58 = vor.u32 %v6655_v52, %v4732_v50  ;;  %3391 = vmatpush.bf16.msra.mxu3 %v5005_v51 }
  0x2e   : > { %v4988_v55 = vld [vmem:[%s7314_s7 + $0x360] sm:$0xf]  ;;  %v6719_v56 = vld [vmem:[%s7314_s7 + $0x36c] sm:$0xf0]  ;;  %v4861_v59 = vor.u32 %v6687_v54, %v4860_v53  ;;  %3353 = vmatpush.bf16.msra.mxu0 %v4605_v57 }
  0x2f   : > { %v4588_v60 = vld [vmem:[%s7314_s7 + $0x40] sm:$0xf]  ;;  %v6619_v61 = vld [vmem:[%s7314_s7 + $0x4c] sm:$0xf0]  ;;  %v4989_v63 = vor.u32 %v6719_v56, %v4988_v55  ;;  %3366 = vmatpush.bf16.msra.mxu1 %v4733_v58 }
  0x30   : > { %v4716_v62 = vld [vmem:[%s7314_s7 + $0x140] sm:$0xf]  ;;  %v6651_v0 = vld [vmem:[%s7314_s7 + $0x14c] sm:$0xf0]  ;;  %v4589_v5 = vor.u32 %v6619_v61, %v4588_v60  ;;  %3379 = vmatpush.bf16.msra.mxu2 %v4861_v59 }
  0x31   : > { %v4844_v1 = vld [vmem:[%s7314_s7 + $0x240] sm:$0xf]  ;;  %v6683_v2 = vld [vmem:[%s7314_s7 + $0x24c] sm:$0xf0]  ;;  %v4717_v6 = vor.u32 %v6651_v0, %v4716_v62  ;;  %3392 = vmatpush.bf16.msra.mxu3 %v4989_v63 }
  0x32   : > { %v4972_v3 = vld [vmem:[%s7314_s7 + $0x340] sm:$0xf]  ;;  %v6715_v4 = vld [vmem:[%s7314_s7 + $0x34c] sm:$0xf0]  ;;  %v4845_v7 = vor.u32 %v6683_v2, %v4844_v1  ;;  %3354 = vmatpush.bf16.msra.mxu0 %v4589_v5 }
  0x33   : > { %v4572_v8 = vld [vmem:[%s7314_s7 + $0x20] sm:$0xf]  ;;  %v6615_v9 = vld [vmem:[%s7314_s7 + $0x2c] sm:$0xf0]  ;;  %v4973_v11 = vor.u32 %v6715_v4, %v4972_v3  ;;  %3367 = vmatpush.bf16.msra.mxu1 %v4717_v6 }
  0x34   : > { %v4700_v10 = vld [vmem:[%s7314_s7 + $0x120] sm:$0xf]  ;;  %v6647_v12 = vld [vmem:[%s7314_s7 + $0x12c] sm:$0xf0]  ;;  %v4573_v17 = vor.u32 %v6615_v9, %v4572_v8  ;;  %3380 = vmatpush.bf16.msra.mxu2 %v4845_v7 }
  0x35   : > { %v4828_v13 = vld [vmem:[%s7314_s7 + $0x220] sm:$0xf]  ;;  %v6679_v14 = vld [vmem:[%s7314_s7 + $0x22c] sm:$0xf0]  ;;  %v4701_v20 = vor.u32 %v6647_v12, %v4700_v10  ;;  %3393 = vmatpush.bf16.msra.mxu3 %v4973_v11 }
  0x36   : > { %v4956_v15 = vld [vmem:[%s7314_s7 + $0x320] sm:$0xf]  ;;  %v6711_v16 = vld [vmem:[%s7314_s7 + $0x32c] sm:$0xf0]  ;;  %v4829_v21 = vor.u32 %v6679_v14, %v4828_v13  ;;  %3355 = vmatpush.bf16.msra.mxu0 %v4573_v17 }
  0x37   : > { %v4556_v18 = vld [vmem:[%s7314_s7] sm:$0xf]  ;;  %v6611_v19 = vld [vmem:[%s7314_s7 + $0xc] sm:$0xf0]  ;;  %v4957_v25 = vor.u32 %v6711_v16, %v4956_v15  ;;  %3368 = vmatpush.bf16.msra.mxu1 %v4701_v20 }
  0x38   : > { %v4684_v22 = vld [vmem:[%s7314_s7 + $0x100] sm:$0xf]  ;;  %v6643_v23 = vld [vmem:[%s7314_s7 + $0x10c] sm:$0xf0]  ;;  %v4557_v32 = vor.u32 %v6611_v19, %v4556_v18  ;;  %3381 = vmatpush.bf16.msra.mxu2 %v4829_v21 }
  0x39   : > { %v4812_v24 = vld [vmem:[%s7314_s7 + $0x200] sm:$0xf]  ;;  %v6675_v26 = vld [vmem:[%s7314_s7 + $0x20c] sm:$0xf0]  ;;  %v4685_v36 = vor.u32 %v6643_v23, %v4684_v22  ;;  %3394 = vmatpush.bf16.msra.mxu3 %v4957_v25 }
  0x3a   : > { %v4940_v27 = vld [vmem:[%s7314_s7 + $0x300] sm:$0xf]  ;;  %v6707_v28 = vld [vmem:[%s7314_s7 + $0x30c] sm:$0xf0]  ;;  %v4813_v37 = vor.u32 %v6675_v26, %v4812_v24  ;;  %3356 = vmatpush.bf16.msra.mxu0 %v4557_v32 }
  0x3b   : > { %v5180_v29 = vld [vmem:[%s7314_s7 + $0x4e0] sm:$0xf]  ;;  %v6767_v30 = vld [vmem:[%s7314_s7 + $0x4ec] sm:$0xf0]  ;;  %v4941_v40 = vor.u32 %v6707_v28, %v4940_v27  ;;  %3369 = vmatpush.bf16.msra.mxu1 %v4685_v36 }
  0x3c   : > { %v5308_v31 = vld [vmem:[%s7314_s7 + $0x5e0] sm:$0xf]  ;;  %v6799_v33 = vld [vmem:[%s7314_s7 + $0x5ec] sm:$0xf0]  ;;  %v5181_v41 = vor.u32 %v6767_v30, %v5180_v29  ;;  %3382 = vmatpush.bf16.msra.mxu2 %v4813_v37 }
  0x3d   : > { %v5436_v34 = vld [vmem:[%s7314_s7 + $0x6e0] sm:$0xf]  ;;  %v6831_v35 = vld [vmem:[%s7314_s7 + $0x6ec] sm:$0xf0]  ;;  %v5309_v42 = vor.u32 %v6799_v33, %v5308_v31  ;;  %3395 = vmatpush.bf16.msra.mxu3 %v4941_v40 }
  0x3e   : > { %v5564_v38 = vld [vmem:[%s7314_s7 + $0x7e0] sm:$0xf]  ;;  %v6863_v39 = vld [vmem:[%s7314_s7 + $0x7ec] sm:$0xf0]  ;;  %v5437_v43 = vor.u32 %v6831_v35, %v5436_v34  ;;  %3401 = vmatpush.bf16.msrb.mxu0 %v5181_v41 }
  0x3f   : > { %v5164_v44 = vld [vmem:[%s7314_s7 + $0x4c0] sm:$0xf]  ;;  %v6763_v45 = vld [vmem:[%s7314_s7 + $0x4cc] sm:$0xf0]  ;;  %v5565_v47 = vor.u32 %v6863_v39, %v5564_v38  ;;  %3414 = vmatpush.bf16.msrb.mxu1 %v5309_v42 }
  0x40   : > { %v5292_v46 = vld [vmem:[%s7314_s7 + $0x5c0] sm:$0xf]  ;;  %v6795_v48 = vld [vmem:[%s7314_s7 + $0x5cc] sm:$0xf0]  ;;  %v5165_v53 = vor.u32 %v6763_v45, %v5164_v44  ;;  %3427 = vmatpush.bf16.msrb.mxu2 %v5437_v43 }
  0x41   : > { %v5420_v49 = vld [vmem:[%s7314_s7 + $0x6c0] sm:$0xf]  ;;  %v6827_v50 = vld [vmem:[%s7314_s7 + $0x6cc] sm:$0xf0]  ;;  %v5293_v56 = vor.u32 %v6795_v48, %v5292_v46  ;;  %3440 = vmatpush.bf16.msrb.mxu3 %v5565_v47 }
  0x42   : > { %v5548_v51 = vld [vmem:[%s7314_s7 + $0x7c0] sm:$0xf]  ;;  %v6859_v52 = vld [vmem:[%s7314_s7 + $0x7cc] sm:$0xf0]  ;;  %v5421_v57 = vor.u32 %v6827_v50, %v5420_v49  ;;  %3402 = vmatpush.bf16.msrb.mxu0 %v5165_v53 }
  0x43   : > { %v5148_v54 = vld [vmem:[%s7314_s7 + $0x4a0] sm:$0xf]  ;;  %v6759_v55 = vld [vmem:[%s7314_s7 + $0x4ac] sm:$0xf0]  ;;  %v5549_v61 = vor.u32 %v6859_v52, %v5548_v51  ;;  %3415 = vmatpush.bf16.msrb.mxu1 %v5293_v56 }
  0x44   : > { %v5276_v58 = vld [vmem:[%s7314_s7 + $0x5a0] sm:$0xf]  ;;  %v6791_v59 = vld [vmem:[%s7314_s7 + $0x5ac] sm:$0xf0]  ;;  %v5149_v2 = vor.u32 %v6759_v55, %v5148_v54  ;;  %3428 = vmatpush.bf16.msrb.mxu2 %v5421_v57  ;;  %v233_v54 = vld [vmem:[%s7309_s30 + $0x8] sm:$0xff] }
  0x45   : > { %v232_v60 = vld [vmem:[%s7309_s30] sm:$0xff]  ;;  %v6823_v63 = vld [vmem:[%s7314_s7 + $0x6ac] sm:$0xf0]  ;;  %v5277_v4 = vor.u32 %v6791_v59, %v5276_v58  ;;  %3441 = vmatpush.bf16.msrb.mxu3 %v5549_v61  ;;  %752 = vst [vmem:[#allocation1 + $0x20] ss:$4 sm:$0xff] %v233_v54 }
  0x46   : > { %v5404_v62 = vld [vmem:[%s7314_s7 + $0x6a0] sm:$0xf]  ;;  %749 = vst [vmem:[#allocation1] ss:$4 sm:$0xff] %v232_v60  ;;  %v6855_v1 = vld [vmem:[%s7314_s7 + $0x7ac] sm:$0xf0]  ;;  %3403 = vmatpush.bf16.msrb.mxu0 %v5149_v2 }
  0x47   : > { %v5532_v0 = vld [vmem:[%s7314_s7 + $0x7a0] sm:$0xf]  ;;  %v5405_v5 = vor.u32 %v6823_v63, %v5404_v62  ;;  %v6755_v6 = vld [vmem:[%s7314_s7 + $0x48c] sm:$0xf0]  ;;  %3416 = vmatpush.bf16.msrb.mxu1 %v5277_v4 }
  0x48   : > { %v5132_v3 = vld [vmem:[%s7314_s7 + $0x480] sm:$0xf]  ;;  %v6787_v8 = vld [vmem:[%s7314_s7 + $0x58c] sm:$0xf0]  ;;  %v5533_v9 = vor.u32 %v6855_v1, %v5532_v0 }
  0x49   : > { %v5260_v7 = vld [vmem:[%s7314_s7 + $0x580] sm:$0xf]  ;;  %v6819_v11 = vld [vmem:[%s7314_s7 + $0x68c] sm:$0xf0]  ;;  %v5133_v16 = vor.u32 %v6755_v6, %v5132_v3  ;;  %3429 = vmatpush.bf16.msrb.mxu2 %v5405_v5 }
  0x4a   : > { %v5388_v10 = vld [vmem:[%s7314_s7 + $0x680] sm:$0xf]  ;;  %v6851_v13 = vld [vmem:[%s7314_s7 + $0x78c] sm:$0xf0]  ;;  %v5261_v22 = vor.u32 %v6787_v8, %v5260_v7  ;;  %3442 = vmatpush.bf16.msrb.mxu3 %v5533_v9 }
  0x4b   : > { %v5516_v12 = vld [vmem:[%s7314_s7 + $0x780] sm:$0xf]  ;;  %v6751_v15 = vld [vmem:[%s7314_s7 + $0x46c] sm:$0xf0]  ;;  %v5389_v23 = vor.u32 %v6819_v11, %v5388_v10  ;;  %3404 = vmatpush.bf16.msrb.mxu0 %v5133_v16 }
  0x4c   : > { %v5116_v14 = vld [vmem:[%s7314_s7 + $0x460] sm:$0xf]  ;;  %v6783_v18 = vld [vmem:[%s7314_s7 + $0x56c] sm:$0xf0]  ;;  %v5517_v26 = vor.u32 %v6851_v13, %v5516_v12  ;;  %3417 = vmatpush.bf16.msrb.mxu1 %v5261_v22 }
  0x4d   : > { %v5244_v17 = vld [vmem:[%s7314_s7 + $0x560] sm:$0xf]  ;;  %v6815_v20 = vld [vmem:[%s7314_s7 + $0x66c] sm:$0xf0]  ;;  %v5117_v31 = vor.u32 %v6751_v15, %v5116_v14  ;;  %3430 = vmatpush.bf16.msrb.mxu2 %v5389_v23 }
  0x4e   : > { %v5372_v19 = vld [vmem:[%s7314_s7 + $0x660] sm:$0xf]  ;;  %v234_v21 = vld [vmem:[%s7309_s30 + $0x10] sm:$0xff]  ;;  %v7426_v27 = vld.sshfl [vmem:[#allocation1 + $0x18] sm:$0xff pattern:$0x73625140]  ;;  %v5245_v32 = vor.u32 %v6783_v18, %v5244_v17  ;;  %3443 = vmatpush.bf16.msrb.mxu3 %v5517_v26 }
  0x4f   : > { %v7421_v24 = vld.sshfl [vmem:[#allocation1 + $0x10] sm:$0xff pattern:$0x73625140]  ;;  %v7423_v25 = vld.sshfl [vmem:[#allocation1] sm:$0xff pattern:$0x73625140]  ;;  %3396 = vmatmul.bf16.vlgmr.msra.gmra.mxu3 %v7426_v27  ;;  %v5373_v33 = vor.u32 %v6815_v20, %v5372_v19  ;;  %3405 = vmatpush.bf16.msrb.mxu0 %v5117_v31 }
  0x50   : > { %3383 = vmatmul.bf16.vlgmr.msra.gmra.mxu2 %v7421_v24  ;;  %v7428_v28 = vld.sshfl [vmem:[#allocation1 + $0x8] sm:$0xff pattern:$0x73625140]  ;;  %v5500_v29 = vld [vmem:[%s7314_s7 + $0x760] sm:$0xf]  ;;  %3357 = vmatmul.bf16.vlgmr.msra.gmra.mxu0 %v7423_v25  ;;  %v235_v17 = vld [vmem:[%s7309_s30 + $0x18] sm:$0xff] }
  0x51   : > { %v6847_v30 = vld [vmem:[%s7314_s7 + $0x76c] sm:$0xf0]  ;;  %762 = vst [vmem:[#allocation1] ss:$4 sm:$0xff] %v234_v21  ;;  %3370 = vmatmul.bf16.vlgmr.msra.gmra.mxu1 %v7428_v28  ;;  %v5100_v34 = vld [vmem:[%s7314_s7 + $0x440] sm:$0xf]  ;;  %3431 = vmatpush.bf16.msrb.mxu2 %v5373_v33 }
  0x52   : > { %v6747_v35 = vld [vmem:[%s7314_s7 + $0x44c] sm:$0xf0]  ;;  %v5228_v36 = vld [vmem:[%s7314_s7 + $0x540] sm:$0xf]  ;;  %v5501_v37 = vor.u32 %v6847_v30, %v5500_v29  ;;  %3418 = vmatpush.bf16.msrb.mxu1 %v5245_v32 }
  0x53   : > { %v6779_v38 = vld [vmem:[%s7314_s7 + $0x54c] sm:$0xf0]  ;;  %v5356_v39 = vld [vmem:[%s7314_s7 + $0x640] sm:$0xf]  ;;  %v5101_v43 = vor.u32 %v6747_v35, %v5100_v34 }
  0x54   : > { %v6811_v40 = vld [vmem:[%s7314_s7 + $0x64c] sm:$0xf0]  ;;  %v5484_v41 = vld [vmem:[%s7314_s7 + $0x740] sm:$0xf]  ;;  %v5229_v46 = vor.u32 %v6779_v38, %v5228_v36  ;;  %3444 = vmatpush.bf16.msrb.mxu3 %v5501_v37 }
  0x55   : > { %v6843_v42 = vld [vmem:[%s7314_s7 + $0x74c] sm:$0xf0]  ;;  %v5084_v44 = vld [vmem:[%s7314_s7 + $0x420] sm:$0xf]  ;;  %v5357_v47 = vor.u32 %v6811_v40, %v5356_v39  ;;  %3406 = vmatpush.bf16.msrb.mxu0 %v5101_v43 }
  0x56   : > { %v6743_v45 = vld [vmem:[%s7314_s7 + $0x42c] sm:$0xf0]  ;;  %v5212_v48 = vld [vmem:[%s7314_s7 + $0x520] sm:$0xf]  ;;  %v5485_v51 = vor.u32 %v6843_v42, %v5484_v41  ;;  %3419 = vmatpush.bf16.msrb.mxu1 %v5229_v46 }
  0x57   : > { %v6775_v49 = vld [vmem:[%s7314_s7 + $0x52c] sm:$0xf0]  ;;  %v5340_v50 = vld [vmem:[%s7314_s7 + $0x620] sm:$0xf]  ;;  %v5085_v57 = vor.u32 %v6743_v45, %v5084_v44  ;;  %3432 = vmatpush.bf16.msrb.mxu2 %v5357_v47 }
  0x58   : > { %v6807_v52 = vld [vmem:[%s7314_s7 + $0x62c] sm:$0xf0]  ;;  %v5468_v53 = vld [vmem:[%s7314_s7 + $0x720] sm:$0xf]  ;;  %v5213_v61 = vor.u32 %v6775_v49, %v5212_v48  ;;  %3445 = vmatpush.bf16.msrb.mxu3 %v5485_v51 }
  0x59   : > { %v6839_v55 = vld [vmem:[%s7314_s7 + $0x72c] sm:$0xf0]  ;;  %v5068_v56 = vld [vmem:[%s7314_s7 + $0x400] sm:$0xf]  ;;  %v5341_v62 = vor.u32 %v6807_v52, %v5340_v50  ;;  %3407 = vmatpush.bf16.msrb.mxu0 %v5085_v57 }
  0x5a   : > { %v6739_v58 = vld [vmem:[%s7314_s7 + $0x40c] sm:$0xf0]  ;;  %v5196_v59 = vld [vmem:[%s7314_s7 + $0x500] sm:$0xf]  ;;  %v5469_v2 = vor.u32 %v6839_v55, %v5468_v53  ;;  %3420 = vmatpush.bf16.msrb.mxu1 %v5213_v61 }
  0x5b   : > { %v6771_v60 = vld [vmem:[%s7314_s7 + $0x50c] sm:$0xf0]  ;;  %v5324_v63 = vld [vmem:[%s7314_s7 + $0x600] sm:$0xf]  ;;  %v5069_v9 = vor.u32 %v6739_v58, %v5068_v56  ;;  %3433 = vmatpush.bf16.msrb.mxu2 %v5341_v62 }
  0x5c   : > { %v6803_v0 = vld [vmem:[%s7314_s7 + $0x60c] sm:$0xf0]  ;;  %v5452_v1 = vld [vmem:[%s7314_s7 + $0x700] sm:$0xf]  ;;  %v5197_v13 = vor.u32 %v6771_v60, %v5196_v59  ;;  %3446 = vmatpush.bf16.msrb.mxu3 %v5469_v2 }
  0x5d   : > { %v6835_v3 = vld [vmem:[%s7314_s7 + $0x70c] sm:$0xf0]  ;;  %v5692_v4 = vld [vmem:[%s7314_s7 + $0x8e0] sm:$0xf]  ;;  %v5325_v14 = vor.u32 %v6803_v0, %v5324_v63  ;;  %3408 = vmatpush.bf16.msrb.mxu0 %v5069_v9 }
  0x5e   : > { %v6895_v5 = vld [vmem:[%s7314_s7 + $0x8ec] sm:$0xf0]  ;;  %v5820_v6 = vld [vmem:[%s7314_s7 + $0x9e0] sm:$0xf]  ;;  %v5453_v18 = vor.u32 %v6835_v3, %v5452_v1  ;;  %3421 = vmatpush.bf16.msrb.mxu1 %v5197_v13 }
  0x5f   : > { %v6927_v7 = vld [vmem:[%s7314_s7 + $0x9ec] sm:$0xf0]  ;;  %v5948_v8 = vld [vmem:[%s7314_s7 + $0xae0] sm:$0xf]  ;;  %v5693_v19 = vor.u32 %v6895_v5, %v5692_v4  ;;  %3434 = vmatpush.bf16.msrb.mxu2 %v5325_v14 }
  0x60   : > { %v6959_v10 = vld [vmem:[%s7314_s7 + $0xaec] sm:$0xf0]  ;;  %v6076_v11 = vld [vmem:[%s7314_s7 + $0xbe0] sm:$0xf]  ;;  %v5821_v26 = vor.u32 %v6927_v7, %v5820_v6  ;;  %3447 = vmatpush.bf16.msrb.mxu3 %v5453_v18 }
  0x61   : > { %v6991_v12 = vld [vmem:[%s7314_s7 + $0xbec] sm:$0xf0]  ;;  %v5676_v15 = vld [vmem:[%s7314_s7 + $0x8c0] sm:$0xf]  ;;  %v5949_v29 = vor.u32 %v6959_v10, %v5948_v8  ;;  %3453 = vmatpush.bf16.msra.mxu0 %v5693_v19 }
  0x62   : > { %v6891_v16 = vld [vmem:[%s7314_s7 + $0x8cc] sm:$0xf0]  ;;  %v5804_v20 = vld [vmem:[%s7314_s7 + $0x9c0] sm:$0xf]  ;;  %v6077_v32 = vor.u32 %v6991_v12, %v6076_v11  ;;  %3466 = vmatpush.bf16.msra.mxu1 %v5821_v26 }
  0x63   : > { %v6923_v21 = vld [vmem:[%s7314_s7 + $0x9cc] sm:$0xf0]  ;;  %v7475_v23 = vld.sshfl [vmem:[#allocation1 + $0x20] sm:$0xff pattern:$0x73625140]  ;;  %v5677_v37 = vor.u32 %v6891_v16, %v5676_v15  ;;  %3479 = vmatpush.bf16.msra.mxu2 %v5949_v29 }
  0x64   : > { %v7473_v22 = vld.sshfl [vmem:[#allocation1 + $0x30] sm:$0xff pattern:$0x73625140]  ;;  %v7477_v30 = vld.sshfl [vmem:[#allocation1 + $0x38] sm:$0xff pattern:$0x73625140]  ;;  %v5805_v38 = vor.u32 %v6923_v21, %v5804_v20  ;;  %3492 = vmatpush.bf16.msra.mxu3 %v6077_v32  ;;  %3409 = vmatmul.bf16.vlgmr.msrb.gmra.mxu0 %v7475_v23 }
  0x65   : > { %v7479_v31 = vld.sshfl [vmem:[#allocation1 + $0x28] sm:$0xff pattern:$0x73625140]  ;;  %v5932_v33 = vld [vmem:[%s7314_s7 + $0xac0] sm:$0xf]  ;;  %3435 = vmatmul.bf16.vlgmr.msrb.gmra.mxu2 %v7473_v22  ;;  %3448 = vmatmul.bf16.vlgmr.msrb.gmra.mxu3 %v7477_v30 }
  0x66   : > { %v6955_v34 = vld [vmem:[%s7314_s7 + $0xacc] sm:$0xf0]  ;;  %764 = vst [vmem:[#allocation1 + $0x20] ss:$4 sm:$0xff] %v235_v17  ;;  %v6060_v35 = vld [vmem:[%s7314_s7 + $0xbc0] sm:$0xf]  ;;  %3454 = vmatpush.bf16.msra.mxu0 %v5677_v37  ;;  %3422 = vmatmul.bf16.vlgmr.msrb.gmra.mxu1 %v7479_v31 }
  0x67   : > { %v6987_v36 = vld [vmem:[%s7314_s7 + $0xbcc] sm:$0xf0]  ;;  %v5933_v39 = vor.u32 %v6955_v34, %v5932_v33  ;;  %v5660_v40 = vld [vmem:[%s7314_s7 + $0x8a0] sm:$0xf]  ;;  %3467 = vmatpush.bf16.msra.mxu1 %v5805_v38 }
  0x68   : > { %v6887_v41 = vld [vmem:[%s7314_s7 + $0x8ac] sm:$0xf0]  ;;  %v5788_v42 = vld [vmem:[%s7314_s7 + $0x9a0] sm:$0xf]  ;;  %v6061_v43 = vor.u32 %v6987_v36, %v6060_v35 }
  0x69   : > { %v6919_v44 = vld [vmem:[%s7314_s7 + $0x9ac] sm:$0xf0]  ;;  %v5916_v45 = vld [vmem:[%s7314_s7 + $0xaa0] sm:$0xf]  ;;  %v5661_v49 = vor.u32 %v6887_v41, %v5660_v40  ;;  %3480 = vmatpush.bf16.msra.mxu2 %v5933_v39 }
  0x6a   : > { %v6951_v46 = vld [vmem:[%s7314_s7 + $0xaac] sm:$0xf0]  ;;  %v6044_v47 = vld [vmem:[%s7314_s7 + $0xba0] sm:$0xf]  ;;  %v5789_v50 = vor.u32 %v6919_v44, %v5788_v42  ;;  %3493 = vmatpush.bf16.msra.mxu3 %v6061_v43 }
  0x6b   : > { %v6983_v48 = vld [vmem:[%s7314_s7 + $0xbac] sm:$0xf0]  ;;  %v5917_v51 = vor.u32 %v6951_v46, %v5916_v45  ;;  %v5644_v52 = vld [vmem:[%s7314_s7 + $0x880] sm:$0xf]  ;;  %3455 = vmatpush.bf16.msra.mxu0 %v5661_v49 }
  0x6c   : > { %v6883_v53 = vld [vmem:[%s7314_s7 + $0x88c] sm:$0xf0]  ;;  %v5772_v54 = vld [vmem:[%s7314_s7 + $0x980] sm:$0xf]  ;;  %v6045_v55 = vor.u32 %v6983_v48, %v6044_v47  ;;  %3468 = vmatpush.bf16.msra.mxu1 %v5789_v50 }
  0x6d   : > { %v6915_v56 = vld [vmem:[%s7314_s7 + $0x98c] sm:$0xf0]  ;;  %v5900_v57 = vld [vmem:[%s7314_s7 + $0xa80] sm:$0xf]  ;;  %v5645_v61 = vor.u32 %v6883_v53, %v5644_v52  ;;  %3481 = vmatpush.bf16.msra.mxu2 %v5917_v51 }
  0x6e   : > { %v6947_v58 = vld [vmem:[%s7314_s7 + $0xa8c] sm:$0xf0]  ;;  %v6028_v59 = vld [vmem:[%s7314_s7 + $0xb80] sm:$0xf]  ;;  %v5773_v62 = vor.u32 %v6915_v56, %v5772_v54  ;;  %3494 = vmatpush.bf16.msra.mxu3 %v6045_v55 }
  0x6f   : > { %v6979_v60 = vld [vmem:[%s7314_s7 + $0xb8c] sm:$0xf0]  ;;  %v5901_v63 = vor.u32 %v6947_v58, %v5900_v57  ;;  %v5628_v0 = vld [vmem:[%s7314_s7 + $0x860] sm:$0xf]  ;;  %3456 = vmatpush.bf16.msra.mxu0 %v5645_v61 }
  0x70   : > { %v6879_v1 = vld [vmem:[%s7314_s7 + $0x86c] sm:$0xf0]  ;;  %v5756_v2 = vld [vmem:[%s7314_s7 + $0x960] sm:$0xf]  ;;  %v6029_v3 = vor.u32 %v6979_v60, %v6028_v59  ;;  %3469 = vmatpush.bf16.msra.mxu1 %v5773_v62 }
  0x71   : > { %v6911_v4 = vld [vmem:[%s7314_s7 + $0x96c] sm:$0xf0]  ;;  %v5884_v5 = vld [vmem:[%s7314_s7 + $0xa60] sm:$0xf]  ;;  %v5629_v9 = vor.u32 %v6879_v1, %v5628_v0  ;;  %3482 = vmatpush.bf16.msra.mxu2 %v5901_v63 }
  0x72   : > { %v6943_v6 = vld [vmem:[%s7314_s7 + $0xa6c] sm:$0xf0]  ;;  %v6012_v7 = vld [vmem:[%s7314_s7 + $0xb60] sm:$0xf]  ;;  %v5757_v10 = vor.u32 %v6911_v4, %v5756_v2  ;;  %3495 = vmatpush.bf16.msra.mxu3 %v6029_v3 }
  0x73   : > { %v6975_v8 = vld [vmem:[%s7314_s7 + $0xb6c] sm:$0xf0]  ;;  %v5885_v11 = vor.u32 %v6943_v6, %v5884_v5  ;;  %v5612_v12 = vld [vmem:[%s7314_s7 + $0x840] sm:$0xf]  ;;  %3457 = vmatpush.bf16.msra.mxu0 %v5629_v9 }
  0x74   : > { %v6875_v13 = vld [vmem:[%s7314_s7 + $0x84c] sm:$0xf0]  ;;  %v5740_v14 = vld [vmem:[%s7314_s7 + $0x940] sm:$0xf]  ;;  %v6013_v15 = vor.u32 %v6975_v8, %v6012_v7  ;;  %3470 = vmatpush.bf16.msra.mxu1 %v5757_v10 }
  0x75   : > { %v6907_v16 = vld [vmem:[%s7314_s7 + $0x94c] sm:$0xf0]  ;;  %v5868_v17 = vld [vmem:[%s7314_s7 + $0xa40] sm:$0xf]  ;;  %v5613_v21 = vor.u32 %v6875_v13, %v5612_v12  ;;  %3483 = vmatpush.bf16.msra.mxu2 %v5885_v11 }
  0x76   : > { %v6939_v18 = vld [vmem:[%s7314_s7 + $0xa4c] sm:$0xf0]  ;;  %v5996_v19 = vld [vmem:[%s7314_s7 + $0xb40] sm:$0xf]  ;;  %v5741_v26 = vor.u32 %v6907_v16, %v5740_v14  ;;  %3496 = vmatpush.bf16.msra.mxu3 %v6013_v15 }
  0x77   : > { %v6971_v20 = vld [vmem:[%s7314_s7 + $0xb4c] sm:$0xf0]  ;;  %v5869_v29 = vor.u32 %v6939_v18, %v5868_v17  ;;  %v5596_v32 = vld [vmem:[%s7314_s7 + $0x820] sm:$0xf]  ;;  %3458 = vmatpush.bf16.msra.mxu0 %v5613_v21 }
  0x78   : > { %v6871_v33 = vld [vmem:[%s7314_s7 + $0x82c] sm:$0xf0]  ;;  %v5724_v34 = vld [vmem:[%s7314_s7 + $0x920] sm:$0xf]  ;;  %v5997_v35 = vor.u32 %v6971_v20, %v5996_v19  ;;  %3471 = vmatpush.bf16.msra.mxu1 %v5741_v26 }
  0x79   : > { %v6903_v36 = vld [vmem:[%s7314_s7 + $0x92c] sm:$0xf0]  ;;  %v5852_v37 = vld [vmem:[%s7314_s7 + $0xa20] sm:$0xf]  ;;  %v5597_v41 = vor.u32 %v6871_v33, %v5596_v32  ;;  %3484 = vmatpush.bf16.msra.mxu2 %v5869_v29 }
  0x7a   : > { %v6935_v38 = vld [vmem:[%s7314_s7 + $0xa2c] sm:$0xf0]  ;;  %v5980_v39 = vld [vmem:[%s7314_s7 + $0xb20] sm:$0xf]  ;;  %v5725_v44 = vor.u32 %v6903_v36, %v5724_v34  ;;  %3497 = vmatpush.bf16.msra.mxu3 %v5997_v35 }
  0x7b   : > { %v6967_v40 = vld [vmem:[%s7314_s7 + $0xb2c] sm:$0xf0]  ;;  %v5580_v42 = vld [vmem:[%s7314_s7 + $0x800] sm:$0xf]  ;;  %v5853_v45 = vor.u32 %v6935_v38, %v5852_v37  ;;  %3459 = vmatpush.bf16.msra.mxu0 %v5597_v41 }
  0x7c   : > { %v6867_v43 = vld [vmem:[%s7314_s7 + $0x80c] sm:$0xf0]  ;;  %v5708_v46 = vld [vmem:[%s7314_s7 + $0x900] sm:$0xf]  ;;  %v5981_v49 = vor.u32 %v6967_v40, %v5980_v39  ;;  %3472 = vmatpush.bf16.msra.mxu1 %v5725_v44 }
  0x7d   : > { %v6899_v47 = vld [vmem:[%s7314_s7 + $0x90c] sm:$0xf0]  ;;  %v5836_v48 = vld [vmem:[%s7314_s7 + $0xa00] sm:$0xf]  ;;  %v5581_v56 = vor.u32 %v6867_v43, %v5580_v42  ;;  %3485 = vmatpush.bf16.msra.mxu2 %v5853_v45 }
  0x7e   : > { %v6931_v50 = vld [vmem:[%s7314_s7 + $0xa0c] sm:$0xf0]  ;;  %v5964_v51 = vld [vmem:[%s7314_s7 + $0xb00] sm:$0xf]  ;;  %v5709_v60 = vor.u32 %v6899_v47, %v5708_v46  ;;  %3498 = vmatpush.bf16.msra.mxu3 %v5981_v49 }
  0x7f   : > { %v6963_v52 = vld [vmem:[%s7314_s7 + $0xb0c] sm:$0xf0]  ;;  %v6204_v53 = vld [vmem:[%s7314_s7 + $0xce0] sm:$0xf]  ;;  %v5837_v61 = vor.u32 %v6931_v50, %v5836_v48  ;;  %3460 = vmatpush.bf16.msra.mxu0 %v5581_v56 }
  0x80   : > { %v7023_v54 = vld [vmem:[%s7314_s7 + $0xcec] sm:$0xf0]  ;;  %v6332_v55 = vld [vmem:[%s7314_s7 + $0xde0] sm:$0xf]  ;;  %v5965_v0 = vor.u32 %v6963_v52, %v5964_v51  ;;  %3473 = vmatpush.bf16.msra.mxu1 %v5709_v60 }
  0x81   : > { %v7055_v57 = vld [vmem:[%s7314_s7 + $0xdec] sm:$0xf0]  ;;  %v6460_v58 = vld [vmem:[%s7314_s7 + $0xee0] sm:$0xf]  ;;  %v6205_v1 = vor.u32 %v7023_v54, %v6204_v53  ;;  %3486 = vmatpush.bf16.msra.mxu2 %v5837_v61 }
  0x82   : > { %v7087_v59 = vld [vmem:[%s7314_s7 + $0xeec] sm:$0xf0]  ;;  %v6588_v62 = vld [vmem:[%s7314_s7 + $0xfe0] sm:$0xf]  ;;  %v6333_v2 = vor.u32 %v7055_v57, %v6332_v55  ;;  %3499 = vmatpush.bf16.msra.mxu3 %v5965_v0 }
  0x83   : > { %v7119_v63 = vld [vmem:[%s7314_s7 + $0xfec] sm:$0xf0]  ;;  %v6461_v3 = vor.u32 %v7087_v59, %v6460_v58  ;;  %v765_v4 = vld.sshfl [vmem:[#allocation1] sm:$0xff pattern:$0x73625140]  ;;  %3505 = vmatpush.bf16.msrb.mxu0 %v6205_v1 }
  0x84   : > { %v6188_v5 = vld [vmem:[%s7314_s7 + $0xcc0] sm:$0xf]  ;;  %v7019_v6 = vld [vmem:[%s7314_s7 + $0xccc] sm:$0xf0]  ;;  %v6589_v8 = vor.u32 %v7119_v63, %v6588_v62  ;;  %3518 = vmatpush.bf16.msrb.mxu1 %v6333_v2  ;;  %3461 = vmatmul.bf16.vlgmr.msra.gmra.mxu0 %v765_v4 }
  0x85   : > { %v6316_v7 = vld [vmem:[%s7314_s7 + $0xdc0] sm:$0xf]  ;;  %v767_v9 = vld.sshfl [vmem:[#allocation1 + $0x10] sm:$0xff pattern:$0x73625140]  ;;  %v6189_v17 = vor.u32 %v7019_v6, %v6188_v5  ;;  %3531 = vmatpush.bf16.msrb.mxu2 %v6461_v3 }
  0x86   : > { %v7051_v10 = vld [vmem:[%s7314_s7 + $0xdcc] sm:$0xf0]  ;;  %v6444_v11 = vld [vmem:[%s7314_s7 + $0xec0] sm:$0xf]  ;;  %3544 = vmatpush.bf16.msrb.mxu3 %v6589_v8  ;;  %3487 = vmatmul.bf16.vlgmr.msra.gmra.mxu2 %v767_v9 }
  0x87   : > { %v7083_v12 = vld [vmem:[%s7314_s7 + $0xecc] sm:$0xf0]  ;;  %v6572_v13 = vld [vmem:[%s7314_s7 + $0xfc0] sm:$0xf]  ;;  %v6317_v18 = vor.u32 %v7051_v10, %v6316_v7  ;;  %3506 = vmatpush.bf16.msrb.mxu0 %v6189_v17 }
  0x88   : > { %v7115_v14 = vld [vmem:[%s7314_s7 + $0xfcc] sm:$0xf0]  ;;  %v766_v15 = vld.sshfl [vmem:[#allocation1 + $0x8] sm:$0xff pattern:$0x73625140]  ;;  %v6445_v19 = vor.u32 %v7083_v12, %v6444_v11 }
  0x89   : > { %v768_v16 = vld.sshfl [vmem:[#allocation1 + $0x18] sm:$0xff pattern:$0x73625140]  ;;  %v6172_v20 = vld [vmem:[%s7314_s7 + $0xca0] sm:$0xf]  ;;  %v6573_v29 = vor.u32 %v7115_v14, %v6572_v13  ;;  %3474 = vmatmul.bf16.vlgmr.msra.gmra.mxu1 %v766_v15 }
  0x8a   : > { %v7015_v21 = vld [vmem:[%s7314_s7 + $0xcac] sm:$0xf0]  ;;  %v6300_v26 = vld [vmem:[%s7314_s7 + $0xda0] sm:$0xf]  ;;  %3500 = vmatmul.bf16.vlgmr.msra.gmra.mxu3 %v768_v16  ;;  %3519 = vmatpush.bf16.msrb.mxu1 %v6317_v18 }
  0x8b   : > { %v7047_v32 = vld [vmem:[%s7314_s7 + $0xdac] sm:$0xf0]  ;;  %v6428_v33 = vld [vmem:[%s7314_s7 + $0xea0] sm:$0xf]  ;;  %v6173_v37 = vor.u32 %v7015_v21, %v6172_v20  ;;  %3532 = vmatpush.bf16.msrb.mxu2 %v6445_v19  ;;  %3545 = vmatpush.bf16.msrb.mxu3 %v6573_v29 }
  0x8c   : > { %v7079_v34 = vld [vmem:[%s7314_s7 + $0xeac] sm:$0xf0]  ;;  %v6556_v35 = vld [vmem:[%s7314_s7 + $0xfa0] sm:$0xf]  ;;  %v6301_v38 = vor.u32 %v7047_v32, %v6300_v26 }
  0x8d   : > { %v7111_v36 = vld [vmem:[%s7314_s7 + $0xfac] sm:$0xf0]  ;;  %v6429_v39 = vor.u32 %v7079_v34, %v6428_v33  ;;  %v6156_v40 = vld [vmem:[%s7314_s7 + $0xc80] sm:$0xf]  ;;  %3507 = vmatpush.bf16.msrb.mxu0 %v6173_v37 }
  0x8e   : > { %v7011_v41 = vld [vmem:[%s7314_s7 + $0xc8c] sm:$0xf0]  ;;  %v6284_v42 = vld [vmem:[%s7314_s7 + $0xd80] sm:$0xf]  ;;  %v6557_v43 = vor.u32 %v7111_v36, %v6556_v35  ;;  %3520 = vmatpush.bf16.msrb.mxu1 %v6301_v38 }
  0x8f   : > { %v7043_v44 = vld [vmem:[%s7314_s7 + $0xd8c] sm:$0xf0]  ;;  %v6412_v45 = vld [vmem:[%s7314_s7 + $0xe80] sm:$0xf]  ;;  %v6157_v49 = vor.u32 %v7011_v41, %v6156_v40  ;;  %3533 = vmatpush.bf16.msrb.mxu2 %v6429_v39  ;;  %v6637_v41 = vld [vmem:[%s7314_s7 + $0xe4] sm:$0xf] }
  0x90   : > { %v7075_v46 = vld [vmem:[%s7314_s7 + $0xe8c] sm:$0xf0]  ;;  %v6540_v47 = vld [vmem:[%s7314_s7 + $0xf80] sm:$0xf]  ;;  %v6285_v50 = vor.u32 %v7043_v44, %v6284_v42  ;;  %3546 = vmatpush.bf16.msrb.mxu3 %v6557_v43  ;;  %v4670_v42 = vld [vmem:[%s7314_s7 + $0xf0] sm:$0xf0] }
  0x91   : > { %v7107_v48 = vld [vmem:[%s7314_s7 + $0xf8c] sm:$0xf0]  ;;  %v6413_v51 = vor.u32 %v7075_v46, %v6412_v45  ;;  %v6140_v52 = vld [vmem:[%s7314_s7 + $0xc60] sm:$0xf]  ;;  %3508 = vmatpush.bf16.msrb.mxu0 %v6157_v49  ;;  %v6669_v43 = vld [vmem:[%s7314_s7 + $0x1e4] sm:$0xf] }
  0x92   : > { %v7007_v53 = vld [vmem:[%s7314_s7 + $0xc6c] sm:$0xf0]  ;;  %v6268_v54 = vld [vmem:[%s7314_s7 + $0xd60] sm:$0xf]  ;;  %v6541_v55 = vor.u32 %v7107_v48, %v6540_v47  ;;  %3521 = vmatpush.bf16.msrb.mxu1 %v6285_v50  ;;  %v4798_v45 = vld [vmem:[%s7314_s7 + $0x1f0] sm:$0xf0] }
  0x93   : > { %v7039_v56 = vld [vmem:[%s7314_s7 + $0xd6c] sm:$0xf0]  ;;  %v6396_v57 = vld [vmem:[%s7314_s7 + $0xe60] sm:$0xf]  ;;  %v6141_v61 = vor.u32 %v7007_v53, %v6140_v52  ;;  %3534 = vmatpush.bf16.msrb.mxu2 %v6413_v51  ;;  %v6701_v46 = vld [vmem:[%s7314_s7 + $0x2e4] sm:$0xf]  ;;  %v4673_v53 = vor.u32 %v6637_v41, %v4670_v42 }
  0x94   : > { %v7071_v58 = vld [vmem:[%s7314_s7 + $0xe6c] sm:$0xf0]  ;;  %v6524_v59 = vld [vmem:[%s7314_s7 + $0xf60] sm:$0xf]  ;;  %v6269_v62 = vor.u32 %v7039_v56, %v6268_v54  ;;  %3547 = vmatpush.bf16.msrb.mxu3 %v6541_v55  ;;  %v4926_v47 = vld [vmem:[%s7314_s7 + $0x2f0] sm:$0xf0]  ;;  %v4801_v54 = vor.u32 %v6669_v43, %v4798_v45 }
  0x95   : > { %v7103_v60 = vld [vmem:[%s7314_s7 + $0xf6c] sm:$0xf0]  ;;  %v6397_v63 = vor.u32 %v7071_v58, %v6396_v57  ;;  %v6124_v0 = vld [vmem:[%s7314_s7 + $0xc40] sm:$0xf]  ;;  %3509 = vmatpush.bf16.msrb.mxu0 %v6141_v61  ;;  %v6733_v50 = vld [vmem:[%s7314_s7 + $0x3e4] sm:$0xf]  ;;  %v4929_v55 = vor.u32 %v6701_v46, %v4926_v47 }
  0x96   : > { %v7003_v1 = vld [vmem:[%s7314_s7 + $0xc4c] sm:$0xf0]  ;;  %v6252_v2 = vld [vmem:[%s7314_s7 + $0xd40] sm:$0xf]  ;;  %v6525_v3 = vor.u32 %v7103_v60, %v6524_v59  ;;  %3522 = vmatpush.bf16.msrb.mxu1 %v6269_v62  ;;  %v5054_v51 = vld [vmem:[%s7314_s7 + $0x3f0] sm:$0xf0] }
  0x97   : > { %v7035_v4 = vld [vmem:[%s7314_s7 + $0xd4c] sm:$0xf0]  ;;  %v6380_v5 = vld [vmem:[%s7314_s7 + $0xe40] sm:$0xf]  ;;  %v6125_v9 = vor.u32 %v7003_v1, %v6124_v0  ;;  %3535 = vmatpush.bf16.msrb.mxu2 %v6397_v63  ;;  %v6633_v57 = vld [vmem:[%s7314_s7 + $0xc4] sm:$0xf]  ;;  %v5057_v60 = vor.u32 %v6733_v50, %v5054_v51 }
  0x98   : > { %v7067_v6 = vld [vmem:[%s7314_s7 + $0xe4c] sm:$0xf0]  ;;  %v6508_v7 = vld [vmem:[%s7314_s7 + $0xf40] sm:$0xf]  ;;  %v6253_v10 = vor.u32 %v7035_v4, %v6252_v2  ;;  %3548 = vmatpush.bf16.msrb.mxu3 %v6525_v3  ;;  %v4654_v58 = vld [vmem:[%s7314_s7 + $0xd0] sm:$0xf0] }
  0x99   : > { %v7099_v8 = vld [vmem:[%s7314_s7 + $0xf4c] sm:$0xf0]  ;;  %v6381_v11 = vor.u32 %v7067_v6, %v6380_v5  ;;  %v6108_v12 = vld [vmem:[%s7314_s7 + $0xc20] sm:$0xf]  ;;  %3510 = vmatpush.bf16.msrb.mxu0 %v6125_v9  ;;  %v6665_v59 = vld [vmem:[%s7314_s7 + $0x1c4] sm:$0xf]  ;;  %v4657_v5 = vor.u32 %v6633_v57, %v4654_v58 }
  0x9a   : > { %v6999_v13 = vld [vmem:[%s7314_s7 + $0xc2c] sm:$0xf0]  ;;  %v6236_v14 = vld [vmem:[%s7314_s7 + $0xd20] sm:$0xf]  ;;  %v6509_v15 = vor.u32 %v7099_v8, %v6508_v7  ;;  %3523 = vmatpush.bf16.msrb.mxu1 %v6253_v10  ;;  %v4782_v62 = vld [vmem:[%s7314_s7 + $0x1d0] sm:$0xf0] }
  0x9b   : > { %v7031_v16 = vld [vmem:[%s7314_s7 + $0xd2c] sm:$0xf0]  ;;  %v6364_v17 = vld [vmem:[%s7314_s7 + $0xe20] sm:$0xf]  ;;  %v6109_v21 = vor.u32 %v6999_v13, %v6108_v12  ;;  %3536 = vmatpush.bf16.msrb.mxu2 %v6381_v11  ;;  %v6697_v63 = vld [vmem:[%s7314_s7 + $0x2c4] sm:$0xf]  ;;  %v4785_v6 = vor.u32 %v6665_v59, %v4782_v62 }
  0x9c   : > { %v7063_v18 = vld [vmem:[%s7314_s7 + $0xe2c] sm:$0xf0]  ;;  %v6492_v19 = vld [vmem:[%s7314_s7 + $0xf20] sm:$0xf]  ;;  %v6237_v32 = vor.u32 %v7031_v16, %v6236_v14  ;;  %3549 = vmatpush.bf16.msrb.mxu3 %v6509_v15  ;;  %v4910_v0 = vld [vmem:[%s7314_s7 + $0x2d0] sm:$0xf0] }
  0x9d   : > { %v7095_v20 = vld [vmem:[%s7314_s7 + $0xf2c] sm:$0xf0]  ;;  %v6092_v26 = vld [vmem:[%s7314_s7 + $0xc00] sm:$0xf]  ;;  %v6365_v33 = vor.u32 %v7063_v18, %v6364_v17  ;;  %3511 = vmatpush.bf16.msrb.mxu0 %v6109_v21  ;;  %v6729_v1 = vld [vmem:[%s7314_s7 + $0x3c4] sm:$0xf]  ;;  %v4913_v7 = vor.u32 %v6697_v63, %v4910_v0 }
  0x9e   : > { %v6995_v29 = vld [vmem:[%s7314_s7 + $0xc0c] sm:$0xf0]  ;;  %v6220_v34 = vld [vmem:[%s7314_s7 + $0xd00] sm:$0xf]  ;;  %v6493_v37 = vor.u32 %v7095_v20, %v6492_v19  ;;  %3524 = vmatpush.bf16.msrb.mxu1 %v6237_v32  ;;  %v5038_v2 = vld [vmem:[%s7314_s7 + $0x3d0] sm:$0xf0] }
  0x9f   : > { %v7027_v35 = vld [vmem:[%s7314_s7 + $0xd0c] sm:$0xf0]  ;;  %v6348_v36 = vld [vmem:[%s7314_s7 + $0xe00] sm:$0xf]  ;;  %v6093_v44 = vor.u32 %v6995_v29, %v6092_v26  ;;  %3537 = vmatpush.bf16.msrb.mxu2 %v6365_v33  ;;  %v6629_v8 = vld [vmem:[%s7314_s7 + $0xa4] sm:$0xf]  ;;  %v5041_v11 = vor.u32 %v6729_v1, %v5038_v2 }
  0xa0   : > { %v7059_v38 = vld [vmem:[%s7314_s7 + $0xe0c] sm:$0xf0]  ;;  %v6476_v39 = vld [vmem:[%s7314_s7 + $0xf00] sm:$0xf]  ;;  %v6221_v48 = vor.u32 %v7027_v35, %v6220_v34  ;;  %3550 = vmatpush.bf16.msrb.mxu3 %v6493_v37  ;;  %v4638_v9 = vld [vmem:[%s7314_s7 + $0xb0] sm:$0xf0] }
  0xa1   : > { %v7091_v40 = vld [vmem:[%s7314_s7 + $0xf0c] sm:$0xf0]  ;;  %v6349_v49 = vor.u32 %v7059_v38, %v6348_v36  ;;  %v769_v56 = vld.sshfl [vmem:[#allocation1 + $0x20] sm:$0xff pattern:$0x73625140]  ;;  %3512 = vmatpush.bf16.msrb.mxu0 %v6093_v44  ;;  %v4641_v17 = vor.u32 %v6629_v8, %v4638_v9 }
  0xa2   : > { %v6477_v52 = vor.u32 %v7091_v40, %v6476_v39  ;;  %v771_v61 = vld.sshfl [vmem:[#allocation1 + $0x30] sm:$0xff pattern:$0x73625140]  ;;  %3525 = vmatpush.bf16.msrb.mxu1 %v6221_v48  ;;  %v770_v3 = vld.sshfl [vmem:[#allocation1 + $0x28] sm:$0xff pattern:$0x73625140] }
  0xa3   : > { %3538 = vmatpush.bf16.msrb.mxu2 %v6349_v49  ;;  %v772_v4 = vld.sshfl [vmem:[#allocation1 + $0x38] sm:$0xff pattern:$0x73625140]  ;;  %v6661_v10 = vld [vmem:[%s7314_s7 + $0x1a4] sm:$0xf] }
  0xa4   : > { %3551 = vmatpush.bf16.msrb.mxu3 %v6477_v52  ;;  %3513 = vmatmul.bf16.vlgmr.msrb.gmra.mxu0 %v769_v56  ;;  %v4766_v12 = vld [vmem:[%s7314_s7 + $0x1b0] sm:$0xf0]  ;;  %v6693_v13 = vld [vmem:[%s7314_s7 + $0x2a4] sm:$0xf] }
  0xa5   : > { %3557 = vmatpush.bf16.msra.mxu0 %v4673_v53  ;;  %v4894_v14 = vld [vmem:[%s7314_s7 + $0x2b0] sm:$0xf0]  ;;  %3526 = vmatmul.bf16.vlgmr.msrb.gmra.mxu1 %v770_v3  ;;  %v6725_v15 = vld [vmem:[%s7314_s7 + $0x3a4] sm:$0xf]  ;;  %v4769_v18 = vor.u32 %v6661_v10, %v4766_v12 }
  0xa6   : > { %3570 = vmatpush.bf16.msra.mxu1 %v4801_v54  ;;  %3539 = vmatmul.bf16.vlgmr.msrb.gmra.mxu2 %v771_v61  ;;  %v5022_v16 = vld [vmem:[%s7314_s7 + $0x3b0] sm:$0xf0]  ;;  %v4897_v19 = vor.u32 %v6693_v13, %v4894_v14  ;;  %v6625_v20 = vld [vmem:[%s7314_s7 + $0x84] sm:$0xf] }
  0xa7   : > { %3583 = vmatpush.bf16.msra.mxu2 %v4929_v55  ;;  %3552 = vmatmul.bf16.vlgmr.msrb.gmra.mxu3 %v772_v4  ;;  %v4622_v21 = vld [vmem:[%s7314_s7 + $0x90] sm:$0xf0]  ;;  %v6657_v26 = vld [vmem:[%s7314_s7 + $0x184] sm:$0xf]  ;;  %v5025_v29 = vor.u32 %v6725_v15, %v5022_v16 }
  0xa8   : > { %3596 = vmatpush.bf16.msra.mxu3 %v5057_v60  ;;  %v4750_v32 = vld [vmem:[%s7314_s7 + $0x190] sm:$0xf0]  ;;  %v6689_v33 = vld [vmem:[%s7314_s7 + $0x284] sm:$0xf]  ;;  %v4625_v37 = vor.u32 %v6625_v20, %v4622_v21 }
  0xa9   : > { %3558 = vmatpush.bf16.msra.mxu0 %v4657_v5  ;;  %v4878_v34 = vld [vmem:[%s7314_s7 + $0x290] sm:$0xf0]  ;;  %v6721_v35 = vld [vmem:[%s7314_s7 + $0x384] sm:$0xf]  ;;  %v4753_v38 = vor.u32 %v6657_v26, %v4750_v32 }
  0xaa   : > { %3571 = vmatpush.bf16.msra.mxu1 %v4785_v6  ;;  %v5006_v36 = vld [vmem:[%s7314_s7 + $0x390] sm:$0xf0]  ;;  %v4881_v39 = vor.u32 %v6689_v33, %v4878_v34  ;;  %v6621_v40 = vld [vmem:[%s7314_s7 + $0x64] sm:$0xf] }
  0xab   : > { %3584 = vmatpush.bf16.msra.mxu2 %v4913_v7  ;;  %v4606_v41 = vld [vmem:[%s7314_s7 + $0x70] sm:$0xf0]  ;;  %v6653_v42 = vld [vmem:[%s7314_s7 + $0x164] sm:$0xf]  ;;  %v5009_v43 = vor.u32 %v6721_v35, %v5006_v36 }
  0xac   : > { %3597 = vmatpush.bf16.msra.mxu3 %v5041_v11  ;;  %v4734_v44 = vld [vmem:[%s7314_s7 + $0x170] sm:$0xf0]  ;;  %v6685_v45 = vld [vmem:[%s7314_s7 + $0x264] sm:$0xf]  ;;  %v4609_v49 = vor.u32 %v6621_v40, %v4606_v41 }
  0xad   : > { %3559 = vmatpush.bf16.msra.mxu0 %v4641_v17  ;;  %v4862_v46 = vld [vmem:[%s7314_s7 + $0x270] sm:$0xf0]  ;;  %v6717_v47 = vld [vmem:[%s7314_s7 + $0x364] sm:$0xf]  ;;  %v4737_v50 = vor.u32 %v6653_v42, %v4734_v44 }
  0xae   : > { %3572 = vmatpush.bf16.msra.mxu1 %v4769_v18  ;;  %v4990_v48 = vld [vmem:[%s7314_s7 + $0x370] sm:$0xf0]  ;;  %v4865_v51 = vor.u32 %v6685_v45, %v4862_v46  ;;  %v6617_v52 = vld [vmem:[%s7314_s7 + $0x44] sm:$0xf] }
  0xaf   : > { %3585 = vmatpush.bf16.msra.mxu2 %v4897_v19  ;;  %v4590_v53 = vld [vmem:[%s7314_s7 + $0x50] sm:$0xf0]  ;;  %v6649_v54 = vld [vmem:[%s7314_s7 + $0x144] sm:$0xf]  ;;  %v4993_v55 = vor.u32 %v6717_v47, %v4990_v48 }
  0xb0   : > { %3598 = vmatpush.bf16.msra.mxu3 %v5025_v29  ;;  %v4718_v56 = vld [vmem:[%s7314_s7 + $0x150] sm:$0xf0]  ;;  %v6681_v57 = vld [vmem:[%s7314_s7 + $0x244] sm:$0xf]  ;;  %v4593_v61 = vor.u32 %v6617_v52, %v4590_v53 }
  0xb1   : > { %3560 = vmatpush.bf16.msra.mxu0 %v4625_v37  ;;  %v4846_v58 = vld [vmem:[%s7314_s7 + $0x250] sm:$0xf0]  ;;  %v6713_v59 = vld [vmem:[%s7314_s7 + $0x344] sm:$0xf]  ;;  %v4721_v62 = vor.u32 %v6649_v54, %v4718_v56 }
  0xb2   : > { %3573 = vmatpush.bf16.msra.mxu1 %v4753_v38  ;;  %v4974_v60 = vld [vmem:[%s7314_s7 + $0x350] sm:$0xf0]  ;;  %v4849_v63 = vor.u32 %v6681_v57, %v4846_v58  ;;  %v6613_v0 = vld [vmem:[%s7314_s7 + $0x24] sm:$0xf] }
  0xb3   : > { %3586 = vmatpush.bf16.msra.mxu2 %v4881_v39  ;;  %v4574_v1 = vld [vmem:[%s7314_s7 + $0x30] sm:$0xf0]  ;;  %v6645_v2 = vld [vmem:[%s7314_s7 + $0x124] sm:$0xf]  ;;  %v4977_v3 = vor.u32 %v6713_v59, %v4974_v60 }
  0xb4   : > { %3599 = vmatpush.bf16.msra.mxu3 %v5009_v43  ;;  %v4702_v4 = vld [vmem:[%s7314_s7 + $0x130] sm:$0xf0]  ;;  %v6677_v5 = vld [vmem:[%s7314_s7 + $0x224] sm:$0xf]  ;;  %v4577_v9 = vor.u32 %v6613_v0, %v4574_v1 }
  0xb5   : > { %3561 = vmatpush.bf16.msra.mxu0 %v4609_v49  ;;  %v4830_v6 = vld [vmem:[%s7314_s7 + $0x230] sm:$0xf0]  ;;  %v6709_v7 = vld [vmem:[%s7314_s7 + $0x324] sm:$0xf]  ;;  %v4705_v12 = vor.u32 %v6645_v2, %v4702_v4 }
  0xb6   : > { %3574 = vmatpush.bf16.msra.mxu1 %v4737_v50  ;;  %v4958_v8 = vld [vmem:[%s7314_s7 + $0x330] sm:$0xf0]  ;;  %v6609_v10 = vld [vmem:[%s7314_s7 + $0x4] sm:$0xf]  ;;  %v4833_v13 = vor.u32 %v6677_v5, %v4830_v6 }
  0xb7   : > { %3587 = vmatpush.bf16.msra.mxu2 %v4865_v51  ;;  %v4558_v11 = vld [vmem:[%s7314_s7 + $0x10] sm:$0xf0]  ;;  %v6641_v14 = vld [vmem:[%s7314_s7 + $0x104] sm:$0xf]  ;;  %v4961_v17 = vor.u32 %v6709_v7, %v4958_v8 }
  0xb8   : > { %3600 = vmatpush.bf16.msra.mxu3 %v4993_v55  ;;  %v4686_v15 = vld [vmem:[%s7314_s7 + $0x110] sm:$0xf0]  ;;  %v6673_v16 = vld [vmem:[%s7314_s7 + $0x204] sm:$0xf]  ;;  %v4561_v32 = vor.u32 %v6609_v10, %v4558_v11 }
  0xb9   : > { %3562 = vmatpush.bf16.msra.mxu0 %v4593_v61  ;;  %v4814_v18 = vld [vmem:[%s7314_s7 + $0x210] sm:$0xf0]  ;;  %v6705_v19 = vld [vmem:[%s7314_s7 + $0x304] sm:$0xf]  ;;  %v4689_v36 = vor.u32 %v6641_v14, %v4686_v15 }
  0xba   : > { %3575 = vmatpush.bf16.msra.mxu1 %v4721_v62  ;;  %v4942_v20 = vld [vmem:[%s7314_s7 + $0x310] sm:$0xf0]  ;;  %v6765_v21 = vld [vmem:[%s7314_s7 + $0x4e4] sm:$0xf]  ;;  %v4817_v37 = vor.u32 %v6673_v16, %v4814_v18 }
  0xbb   : > { %3588 = vmatpush.bf16.msra.mxu2 %v4849_v63  ;;  %v5182_v26 = vld [vmem:[%s7314_s7 + $0x4f0] sm:$0xf0]  ;;  %v6797_v29 = vld [vmem:[%s7314_s7 + $0x5e4] sm:$0xf]  ;;  %v4945_v40 = vor.u32 %v6705_v19, %v4942_v20 }
  0xbc   : > { %3601 = vmatpush.bf16.msra.mxu3 %v4977_v3  ;;  %v5310_v33 = vld [vmem:[%s7314_s7 + $0x5f0] sm:$0xf0]  ;;  %v6829_v34 = vld [vmem:[%s7314_s7 + $0x6e4] sm:$0xf]  ;;  %v5185_v41 = vor.u32 %v6765_v21, %v5182_v26 }
  0xbd   : > { %3563 = vmatpush.bf16.msra.mxu0 %v4577_v9  ;;  %v5438_v35 = vld [vmem:[%s7314_s7 + $0x6f0] sm:$0xf0]  ;;  %v6861_v38 = vld [vmem:[%s7314_s7 + $0x7e4] sm:$0xf]  ;;  %v5313_v42 = vor.u32 %v6797_v29, %v5310_v33 }
  0xbe   : > { %3576 = vmatpush.bf16.msra.mxu1 %v4705_v12  ;;  %v5566_v39 = vld [vmem:[%s7314_s7 + $0x7f0] sm:$0xf0]  ;;  %v5441_v43 = vor.u32 %v6829_v34, %v5438_v35  ;;  %v6761_v44 = vld [vmem:[%s7314_s7 + $0x4c4] sm:$0xf] }
  0xbf   : > { %3589 = vmatpush.bf16.msra.mxu2 %v4833_v13  ;;  %v5166_v45 = vld [vmem:[%s7314_s7 + $0x4d0] sm:$0xf0]  ;;  %v6793_v46 = vld [vmem:[%s7314_s7 + $0x5c4] sm:$0xf]  ;;  %v5569_v47 = vor.u32 %v6861_v38, %v5566_v39 }
  0xc0   : > { %3602 = vmatpush.bf16.msra.mxu3 %v4961_v17  ;;  %v5294_v48 = vld [vmem:[%s7314_s7 + $0x5d0] sm:$0xf0]  ;;  %v6825_v49 = vld [vmem:[%s7314_s7 + $0x6c4] sm:$0xf]  ;;  %v5169_v53 = vor.u32 %v6761_v44, %v5166_v45 }
  0xc1   : > { %3564 = vmatpush.bf16.msra.mxu0 %v4561_v32  ;;  %v5422_v50 = vld [vmem:[%s7314_s7 + $0x6d0] sm:$0xf0]  ;;  %v6857_v51 = vld [vmem:[%s7314_s7 + $0x7c4] sm:$0xf]  ;;  %v5297_v54 = vor.u32 %v6793_v46, %v5294_v48 }
  0xc2   : > { %3577 = vmatpush.bf16.msra.mxu1 %v4689_v36  ;;  %v5550_v52 = vld [vmem:[%s7314_s7 + $0x7d0] sm:$0xf0]  ;;  %v5425_v55 = vor.u32 %v6825_v49, %v5422_v50  ;;  %v6757_v56 = vld [vmem:[%s7314_s7 + $0x4a4] sm:$0xf] }
  0xc3   : > { %3590 = vmatpush.bf16.msra.mxu2 %v4817_v37  ;;  %v5150_v57 = vld [vmem:[%s7314_s7 + $0x4b0] sm:$0xf0]  ;;  %v6789_v58 = vld [vmem:[%s7314_s7 + $0x5a4] sm:$0xf]  ;;  %v5553_v59 = vor.u32 %v6857_v51, %v5550_v52 }
  0xc4   : > { %3603 = vmatpush.bf16.msra.mxu3 %v4945_v40  ;;  %v5278_v60 = vld [vmem:[%s7314_s7 + $0x5b0] sm:$0xf0]  ;;  %v6821_v61 = vld [vmem:[%s7314_s7 + $0x6a4] sm:$0xf]  ;;  %3565 = vmatmul.bf16.vlgmr.msra.gmra.mxu0 %v7423_v25  ;;  %v5153_v1 = vor.u32 %v6757_v56, %v5150_v57 }
  0xc5   : > { %3609 = vmatpush.bf16.msrb.mxu0 %v5185_v41  ;;  %v5406_v62 = vld [vmem:[%s7314_s7 + $0x6b0] sm:$0xf0]  ;;  %v6853_v63 = vld [vmem:[%s7314_s7 + $0x7a4] sm:$0xf]  ;;  %3578 = vmatmul.bf16.vlgmr.msra.gmra.mxu1 %v7428_v28  ;;  %v5281_v2 = vor.u32 %v6789_v58, %v5278_v60 }
  0xc6   : > { %3622 = vmatpush.bf16.msrb.mxu1 %v5313_v42  ;;  %3591 = vmatmul.bf16.vlgmr.msra.gmra.mxu2 %v7421_v24  ;;  %v5534_v0 = vld [vmem:[%s7314_s7 + $0x7b0] sm:$0xf0]  ;;  %v5409_v3 = vor.u32 %v6821_v61, %v5406_v62  ;;  %v6753_v4 = vld [vmem:[%s7314_s7 + $0x484] sm:$0xf] }
  0xc7   : > { %3635 = vmatpush.bf16.msrb.mxu2 %v5441_v43  ;;  %3604 = vmatmul.bf16.vlgmr.msra.gmra.mxu3 %v7426_v27  ;;  %v5134_v5 = vld [vmem:[%s7314_s7 + $0x490] sm:$0xf0]  ;;  %v6785_v6 = vld [vmem:[%s7314_s7 + $0x584] sm:$0xf]  ;;  %v5537_v7 = vor.u32 %v6853_v63, %v5534_v0 }
  0xc8   : > { %3648 = vmatpush.bf16.msrb.mxu3 %v5569_v47  ;;  %v5262_v8 = vld [vmem:[%s7314_s7 + $0x590] sm:$0xf0]  ;;  %v6817_v9 = vld [vmem:[%s7314_s7 + $0x684] sm:$0xf]  ;;  %v5137_v13 = vor.u32 %v6753_v4, %v5134_v5 }
  0xc9   : > { %3610 = vmatpush.bf16.msrb.mxu0 %v5169_v53  ;;  %v5390_v10 = vld [vmem:[%s7314_s7 + $0x690] sm:$0xf0]  ;;  %v6849_v11 = vld [vmem:[%s7314_s7 + $0x784] sm:$0xf]  ;;  %v5265_v14 = vor.u32 %v6785_v6, %v5262_v8 }
  0xca   : > { %3623 = vmatpush.bf16.msrb.mxu1 %v5297_v54  ;;  %v5518_v12 = vld [vmem:[%s7314_s7 + $0x790] sm:$0xf0]  ;;  %v5393_v15 = vor.u32 %v6817_v9, %v5390_v10  ;;  %v6749_v16 = vld [vmem:[%s7314_s7 + $0x464] sm:$0xf] }
  0xcb   : > { %3636 = vmatpush.bf16.msrb.mxu2 %v5425_v55  ;;  %v5118_v17 = vld [vmem:[%s7314_s7 + $0x470] sm:$0xf0]  ;;  %v6781_v18 = vld [vmem:[%s7314_s7 + $0x564] sm:$0xf]  ;;  %v5521_v19 = vor.u32 %v6849_v11, %v5518_v12 }
  0xcc   : > { %3649 = vmatpush.bf16.msrb.mxu3 %v5553_v59  ;;  %v5246_v20 = vld [vmem:[%s7314_s7 + $0x570] sm:$0xf0]  ;;  %v6813_v21 = vld [vmem:[%s7314_s7 + $0x664] sm:$0xf]  ;;  %v5121_v33 = vor.u32 %v6749_v16, %v5118_v17 }
  0xcd   : > { %3611 = vmatpush.bf16.msrb.mxu0 %v5153_v1  ;;  %v5374_v26 = vld [vmem:[%s7314_s7 + $0x670] sm:$0xf0]  ;;  %v6845_v29 = vld [vmem:[%s7314_s7 + $0x764] sm:$0xf]  ;;  %v5249_v34 = vor.u32 %v6781_v18, %v5246_v20  ;;  %v3358_v46 = vpop.f32.mrf.mxu0 }
  0xce   : > { %3624 = vmatpush.bf16.msrb.mxu1 %v5281_v2  ;;  %v5502_v32 = vld [vmem:[%s7314_s7 + $0x770] sm:$0xf0]  ;;  %v5377_v35 = vor.u32 %v6813_v21, %v5374_v26  ;;  %v6745_v36 = vld [vmem:[%s7314_s7 + $0x444] sm:$0xf]  ;;  %v3371_v52 = vpop.f32.mrf.mxu1 }
  0xcf   : > { %3637 = vmatpush.bf16.msrb.mxu2 %v5409_v3  ;;  %v5102_v37 = vld [vmem:[%s7314_s7 + $0x450] sm:$0xf0]  ;;  %v6777_v38 = vld [vmem:[%s7314_s7 + $0x544] sm:$0xf]  ;;  %v5505_v39 = vor.u32 %v6845_v29, %v5502_v32  ;;  %v3372_v57 = vadd.f32 %v3371_v52, %v3358_v46 }
  0xd0   : > { %3650 = vmatpush.bf16.msrb.mxu3 %v5537_v7  ;;  %v5230_v40 = vld [vmem:[%s7314_s7 + $0x550] sm:$0xf0]  ;;  %v6809_v41 = vld [vmem:[%s7314_s7 + $0x644] sm:$0xf]  ;;  %v5105_v45 = vor.u32 %v6745_v36, %v5102_v37 }
  0xd1   : > { %3612 = vmatpush.bf16.msrb.mxu0 %v5137_v13  ;;  %v5358_v42 = vld [vmem:[%s7314_s7 + $0x650] sm:$0xf0]  ;;  %v6841_v43 = vld [vmem:[%s7314_s7 + $0x744] sm:$0xf]  ;;  %v5233_v47 = vor.u32 %v6777_v38, %v5230_v40 }
  0xd2   : > { %3625 = vmatpush.bf16.msrb.mxu1 %v5265_v14  ;;  %v5486_v44 = vld [vmem:[%s7314_s7 + $0x750] sm:$0xf0]  ;;  %v5361_v48 = vor.u32 %v6809_v41, %v5358_v42  ;;  %v6741_v49 = vld [vmem:[%s7314_s7 + $0x424] sm:$0xf]  ;;  %v3397_v10 = vpop.f32.mrf.mxu3 }
  0xd3   : > { %3638 = vmatpush.bf16.msrb.mxu2 %v5393_v15  ;;  %v5086_v50 = vld [vmem:[%s7314_s7 + $0x430] sm:$0xf0]  ;;  %v6773_v51 = vld [vmem:[%s7314_s7 + $0x524] sm:$0xf]  ;;  %v5489_v53 = vor.u32 %v6841_v43, %v5486_v44  ;;  %v3384_v4 = vpop.f32.mrf.mxu2 }
  0xd4   : > { %3651 = vmatpush.bf16.msrb.mxu3 %v5521_v19  ;;  %v5214_v54 = vld [vmem:[%s7314_s7 + $0x530] sm:$0xf0]  ;;  %v6805_v55 = vld [vmem:[%s7314_s7 + $0x624] sm:$0xf]  ;;  %v5089_v60 = vor.u32 %v6741_v49, %v5086_v50  ;;  %v3385_v9 = vadd.f32 %v3384_v4, %v3372_v57 }
  0xd5   : > { %3613 = vmatpush.bf16.msrb.mxu0 %v5121_v33  ;;  %v5342_v56 = vld [vmem:[%s7314_s7 + $0x630] sm:$0xf0]  ;;  %v6837_v58 = vld [vmem:[%s7314_s7 + $0x724] sm:$0xf]  ;;  %v5217_v63 = vor.u32 %v6773_v51, %v5214_v54  ;;  %v3360_v19 = vpop.f32.mrf.mxu0 }
  0xd6   : > { %3626 = vmatpush.bf16.msrb.mxu1 %v5249_v34  ;;  %v5470_v59 = vld [vmem:[%s7314_s7 + $0x730] sm:$0xf0]  ;;  %v6737_v61 = vld [vmem:[%s7314_s7 + $0x404] sm:$0xf]  ;;  %v5345_v0 = vor.u32 %v6805_v55, %v5342_v56  ;;  %v7739_v18 = vadd.f32 %v3397_v10, %v3385_v9  ;;  %v3373_v32 = vpop.f32.mrf.mxu1 }
  0xd7   : > { %3639 = vmatpush.bf16.msrb.mxu2 %v5377_v35  ;;  %v5070_v62 = vld [vmem:[%s7314_s7 + $0x410] sm:$0xf0]  ;;  %v6769_v1 = vld [vmem:[%s7314_s7 + $0x504] sm:$0xf]  ;;  %v5473_v5 = vor.u32 %v6837_v58, %v5470_v59 }
  0xd8   : > { %3652 = vmatpush.bf16.msrb.mxu3 %v5505_v39  ;;  %v5198_v2 = vld [vmem:[%s7314_s7 + $0x510] sm:$0xf0]  ;;  %v6801_v3 = vld [vmem:[%s7314_s7 + $0x604] sm:$0xf]  ;;  %v5073_v14 = vor.u32 %v6737_v61, %v5070_v62 }
  0xd9   : > { %3614 = vmatpush.bf16.msrb.mxu0 %v5105_v45  ;;  %v5326_v6 = vld [vmem:[%s7314_s7 + $0x610] sm:$0xf0]  ;;  %v6833_v7 = vld [vmem:[%s7314_s7 + $0x704] sm:$0xf]  ;;  %v5201_v20 = vor.u32 %v6769_v1, %v5198_v2 }
  0xda   : > { %3627 = vmatpush.bf16.msrb.mxu1 %v5233_v47  ;;  %v5454_v8 = vld [vmem:[%s7314_s7 + $0x710] sm:$0xf0]  ;;  %v6893_v11 = vld [vmem:[%s7314_s7 + $0x8e4] sm:$0xf]  ;;  %v5329_v21 = vor.u32 %v6801_v3, %v5326_v6 }
  0xdb   : > { %3640 = vmatpush.bf16.msrb.mxu2 %v5361_v48  ;;  %v5694_v12 = vld [vmem:[%s7314_s7 + $0x8f0] sm:$0xf0]  ;;  %v6925_v13 = vld [vmem:[%s7314_s7 + $0x9e4] sm:$0xf]  ;;  %v5457_v33 = vor.u32 %v6833_v7, %v5454_v8  ;;  %v3386_v46 = vpop.f32.mrf.mxu2  ;;  %v3399_v48 = vpop.f32.mrf.mxu3 }
  0xdc   : > { %3653 = vmatpush.bf16.msrb.mxu3 %v5489_v53  ;;  %v5822_v15 = vld [vmem:[%s7314_s7 + $0x9f0] sm:$0xf0]  ;;  %v6957_v16 = vld [vmem:[%s7314_s7 + $0xae4] sm:$0xf]  ;;  %v5697_v34 = vor.u32 %v6893_v11, %v5694_v12 }
  0xdd   : > { %3615 = vmatpush.bf16.msrb.mxu0 %v5089_v60  ;;  %v5950_v17 = vld [vmem:[%s7314_s7 + $0xaf0] sm:$0xf0]  ;;  %v6989_v26 = vld [vmem:[%s7314_s7 + $0xbe4] sm:$0xf]  ;;  %v5825_v35 = vor.u32 %v6925_v13, %v5822_v15 }
  0xde   : > { %3628 = vmatpush.bf16.msrb.mxu1 %v5217_v63  ;;  %v6078_v29 = vld [vmem:[%s7314_s7 + $0xbf0] sm:$0xf0]  ;;  %v5953_v36 = vor.u32 %v6957_v16, %v5950_v17  ;;  %v6889_v37 = vld [vmem:[%s7314_s7 + $0x8c4] sm:$0xf] }
  0xdf   : > { %3641 = vmatpush.bf16.msrb.mxu2 %v5345_v0  ;;  %v5678_v38 = vld [vmem:[%s7314_s7 + $0x8d0] sm:$0xf0]  ;;  %v6921_v39 = vld [vmem:[%s7314_s7 + $0x9c4] sm:$0xf]  ;;  %v6081_v40 = vor.u32 %v6989_v26, %v6078_v29 }
  0xe0   : > { %3654 = vmatpush.bf16.msrb.mxu3 %v5473_v5  ;;  %v5806_v41 = vld [vmem:[%s7314_s7 + $0x9d0] sm:$0xf0]  ;;  %v6953_v42 = vld [vmem:[%s7314_s7 + $0xac4] sm:$0xf]  ;;  %v5681_v47 = vor.u32 %v6889_v37, %v5678_v38 }
  0xe1   : > { %3616 = vmatpush.bf16.msrb.mxu0 %v5073_v14  ;;  %v5934_v43 = vld [vmem:[%s7314_s7 + $0xad0] sm:$0xf0]  ;;  %v6985_v44 = vld [vmem:[%s7314_s7 + $0xbc4] sm:$0xf]  ;;  %v5809_v49 = vor.u32 %v6921_v39, %v5806_v41  ;;  %v3410_v9 = vpop.f32.mrf.mxu0 }
  0xe2   : > { %3629 = vmatpush.bf16.msrb.mxu1 %v5201_v20  ;;  %v6062_v45 = vld [vmem:[%s7314_s7 + $0xbd0] sm:$0xf0]  ;;  %v5937_v50 = vor.u32 %v6953_v42, %v5934_v43  ;;  %v6885_v51 = vld [vmem:[%s7314_s7 + $0x8a4] sm:$0xf]  ;;  %v3411_v15 = vadd.f32 %v3410_v9, %v7739_v18 }
  0xe3   : > { %3642 = vmatpush.bf16.msrb.mxu2 %v5329_v21  ;;  %v5662_v52 = vld [vmem:[%s7314_s7 + $0x8b0] sm:$0xf0]  ;;  %v6917_v53 = vld [vmem:[%s7314_s7 + $0x9a4] sm:$0xf]  ;;  %v6065_v54 = vor.u32 %v6985_v44, %v6062_v45  ;;  %v3423_v16 = vpop.f32.mrf.mxu1 }
  0xe4   : > { %3655 = vmatpush.bf16.msrb.mxu3 %v5457_v33  ;;  %v5790_v55 = vld [vmem:[%s7314_s7 + $0x9b0] sm:$0xf0]  ;;  %v6949_v56 = vld [vmem:[%s7314_s7 + $0xaa4] sm:$0xf]  ;;  %3617 = vmatmul.bf16.vlgmr.msrb.gmra.mxu0 %v7475_v23  ;;  %v5665_v60 = vor.u32 %v6885_v51, %v5662_v52  ;;  %v3424_v32 = vadd.f32 %v3423_v16, %v3411_v15 }
  0xe5   : > { %3661 = vmatpush.bf16.msra.mxu0 %v5697_v34  ;;  %v5918_v57 = vld [vmem:[%s7314_s7 + $0xab0] sm:$0xf0]  ;;  %v6981_v58 = vld [vmem:[%s7314_s7 + $0xba4] sm:$0xf]  ;;  %3630 = vmatmul.bf16.vlgmr.msrb.gmra.mxu1 %v7479_v31  ;;  %v5793_v61 = vor.u32 %v6917_v53, %v5790_v55 }
  0xe6   : > { %3674 = vmatpush.bf16.msra.mxu1 %v5825_v35  ;;  %3643 = vmatmul.bf16.vlgmr.msrb.gmra.mxu2 %v7473_v22  ;;  %v6046_v59 = vld [vmem:[%s7314_s7 + $0xbb0] sm:$0xf0]  ;;  %v5921_v62 = vor.u32 %v6949_v56, %v5918_v57  ;;  %v6881_v63 = vld [vmem:[%s7314_s7 + $0x884] sm:$0xf] }
  0xe7   : > { %3687 = vmatpush.bf16.msra.mxu2 %v5953_v36  ;;  %3656 = vmatmul.bf16.vlgmr.msrb.gmra.mxu3 %v7477_v30  ;;  %v5646_v0 = vld [vmem:[%s7314_s7 + $0x890] sm:$0xf0]  ;;  %v6913_v1 = vld [vmem:[%s7314_s7 + $0x984] sm:$0xf]  ;;  %v6049_v2 = vor.u32 %v6981_v58, %v6046_v59 }
  0xe8   : > { %3700 = vmatpush.bf16.msra.mxu3 %v6081_v40  ;;  %v5774_v3 = vld [vmem:[%s7314_s7 + $0x990] sm:$0xf0]  ;;  %v6945_v4 = vld [vmem:[%s7314_s7 + $0xa84] sm:$0xf]  ;;  %v5649_v8 = vor.u32 %v6881_v63, %v5646_v0  ;;  %v3436_v38 = vpop.f32.mrf.mxu2  ;;  %v3449_v44 = vpop.f32.mrf.mxu3 }
  0xe9   : > { %3662 = vmatpush.bf16.msra.mxu0 %v5681_v47  ;;  %v5902_v5 = vld [vmem:[%s7314_s7 + $0xa90] sm:$0xf0]  ;;  %v6977_v6 = vld [vmem:[%s7314_s7 + $0xb84] sm:$0xf]  ;;  %v5777_v10 = vor.u32 %v6913_v1, %v5774_v3  ;;  %v3437_v43 = vadd.f32 %v3436_v38, %v3424_v32 }
  0xea   : > { %3675 = vmatpush.bf16.msra.mxu1 %v5809_v49  ;;  %v6030_v7 = vld [vmem:[%s7314_s7 + $0xb90] sm:$0xf0]  ;;  %v5905_v11 = vor.u32 %v6945_v4, %v5902_v5  ;;  %v6877_v12 = vld [vmem:[%s7314_s7 + $0x864] sm:$0xf]  ;;  %v3412_v49 = vpop.f32.mrf.mxu0 }
  0xeb   : > { %3688 = vmatpush.bf16.msra.mxu2 %v5937_v50  ;;  %v5630_v13 = vld [vmem:[%s7314_s7 + $0x870] sm:$0xf0]  ;;  %v6909_v14 = vld [vmem:[%s7314_s7 + $0x964] sm:$0xf]  ;;  %v6033_v17 = vor.u32 %v6977_v6, %v6030_v7  ;;  %v7788_v48 = vadd.f32 %v3449_v44, %v3437_v43  ;;  %v3425_v55 = vpop.f32.mrf.mxu1 }
  0xec   : > { %3701 = vmatpush.bf16.msra.mxu3 %v6065_v54  ;;  %v5758_v19 = vld [vmem:[%s7314_s7 + $0x970] sm:$0xf0]  ;;  %v6941_v20 = vld [vmem:[%s7314_s7 + $0xa64] sm:$0xf]  ;;  %v5633_v33 = vor.u32 %v6877_v12, %v5630_v13 }
  0xed   : > { %3663 = vmatpush.bf16.msra.mxu0 %v5665_v60  ;;  %v5886_v21 = vld [vmem:[%s7314_s7 + $0xa70] sm:$0xf0]  ;;  %v6973_v26 = vld [vmem:[%s7314_s7 + $0xb64] sm:$0xf]  ;;  %v5761_v18 = vor.u32 %v6909_v14, %v5758_v19 }
  0xee   : > { %3676 = vmatpush.bf16.msra.mxu1 %v5793_v61  ;;  %v6014_v29 = vld [vmem:[%s7314_s7 + $0xb70] sm:$0xf0]  ;;  %v5889_v34 = vor.u32 %v6941_v20, %v5886_v21  ;;  %v6873_v35 = vld [vmem:[%s7314_s7 + $0x844] sm:$0xf] }
  0xef   : > { %3689 = vmatpush.bf16.msra.mxu2 %v5921_v62  ;;  %v5614_v36 = vld [vmem:[%s7314_s7 + $0x850] sm:$0xf0]  ;;  %v6905_v37 = vld [vmem:[%s7314_s7 + $0x944] sm:$0xf]  ;;  %v6017_v39 = vor.u32 %v6973_v26, %v6014_v29 }
  0xf0   : > { %3702 = vmatpush.bf16.msra.mxu3 %v6049_v2  ;;  %v5742_v40 = vld [vmem:[%s7314_s7 + $0x950] sm:$0xf0]  ;;  %v6937_v41 = vld [vmem:[%s7314_s7 + $0xa44] sm:$0xf]  ;;  %v5617_v47 = vor.u32 %v6873_v35, %v5614_v36  ;;  %v3438_v6 = vpop.f32.mrf.mxu2 }
  0xf1   : > { %3664 = vmatpush.bf16.msra.mxu0 %v5649_v8  ;;  %v5870_v42 = vld [vmem:[%s7314_s7 + $0xa50] sm:$0xf0]  ;;  %v6969_v45 = vld [vmem:[%s7314_s7 + $0xb44] sm:$0xf]  ;;  %v5745_v50 = vor.u32 %v6905_v37, %v5742_v40 }
  0xf2   : > { %3677 = vmatpush.bf16.msra.mxu1 %v5777_v10  ;;  %v5998_v46 = vld [vmem:[%s7314_s7 + $0xb50] sm:$0xf0]  ;;  %v5873_v51 = vor.u32 %v6937_v41, %v5870_v42  ;;  %v6869_v52 = vld [vmem:[%s7314_s7 + $0x824] sm:$0xf] }
  0xf3   : > { %3690 = vmatpush.bf16.msra.mxu2 %v5905_v11  ;;  %v5598_v53 = vld [vmem:[%s7314_s7 + $0x830] sm:$0xf0]  ;;  %v6901_v54 = vld [vmem:[%s7314_s7 + $0x924] sm:$0xf]  ;;  %v6001_v56 = vor.u32 %v6969_v45, %v5998_v46  ;;  %v3451_v11 = vpop.f32.mrf.mxu3 }
  0xf4   : > { %3703 = vmatpush.bf16.msra.mxu3 %v6033_v17  ;;  %v5726_v57 = vld [vmem:[%s7314_s7 + $0x930] sm:$0xf0]  ;;  %v6933_v58 = vld [vmem:[%s7314_s7 + $0xa24] sm:$0xf]  ;;  %v5601_v62 = vor.u32 %v6869_v52, %v5598_v53 }
  0xf5   : > { %3665 = vmatpush.bf16.msra.mxu0 %v5633_v33  ;;  %v5854_v59 = vld [vmem:[%s7314_s7 + $0xa30] sm:$0xf0]  ;;  %v6965_v60 = vld [vmem:[%s7314_s7 + $0xb24] sm:$0xf]  ;;  %v5729_v1 = vor.u32 %v6901_v54, %v5726_v57 }
  0xf6   : > { %3678 = vmatpush.bf16.msra.mxu1 %v5761_v18  ;;  %v5982_v61 = vld [vmem:[%s7314_s7 + $0xb30] sm:$0xf0]  ;;  %v6865_v63 = vld [vmem:[%s7314_s7 + $0x804] sm:$0xf]  ;;  %v5857_v2 = vor.u32 %v6933_v58, %v5854_v59 }
  0xf7   : > { %3691 = vmatpush.bf16.msra.mxu2 %v5889_v34  ;;  %v5582_v0 = vld [vmem:[%s7314_s7 + $0x810] sm:$0xf0]  ;;  %v6897_v3 = vld [vmem:[%s7314_s7 + $0x904] sm:$0xf]  ;;  %v5985_v7 = vor.u32 %v6965_v60, %v5982_v61 }
  0xf8   : > { %3704 = vmatpush.bf16.msra.mxu3 %v6017_v39  ;;  %v5710_v4 = vld [vmem:[%s7314_s7 + $0x910] sm:$0xf0]  ;;  %v6929_v5 = vld [vmem:[%s7314_s7 + $0xa04] sm:$0xf]  ;;  %v5585_v15 = vor.u32 %v6865_v63, %v5582_v0 }
  0xf9   : > { %3666 = vmatpush.bf16.msra.mxu0 %v5617_v47  ;;  %v5838_v8 = vld [vmem:[%s7314_s7 + $0xa10] sm:$0xf0]  ;;  %v6961_v9 = vld [vmem:[%s7314_s7 + $0xb04] sm:$0xf]  ;;  %v5713_v20 = vor.u32 %v6897_v3, %v5710_v4 }
  0xfa   : > { %3679 = vmatpush.bf16.msra.mxu1 %v5745_v50  ;;  %v5966_v10 = vld [vmem:[%s7314_s7 + $0xb10] sm:$0xf0]  ;;  %v7021_v12 = vld [vmem:[%s7314_s7 + $0xce4] sm:$0xf]  ;;  %v5841_v21 = vor.u32 %v6929_v5, %v5838_v8 }
  0xfb   : > { %3692 = vmatpush.bf16.msra.mxu2 %v5873_v51  ;;  %v6206_v13 = vld [vmem:[%s7314_s7 + $0xcf0] sm:$0xf0]  ;;  %v7053_v14 = vld [vmem:[%s7314_s7 + $0xde4] sm:$0xf]  ;;  %v5969_v32 = vor.u32 %v6961_v9, %v5966_v10 }
  0xfc   : > { %3705 = vmatpush.bf16.msra.mxu3 %v6001_v56  ;;  %v6334_v16 = vld [vmem:[%s7314_s7 + $0xdf0] sm:$0xf0]  ;;  %v7085_v17 = vld [vmem:[%s7314_s7 + $0xee4] sm:$0xf]  ;;  %v6209_v33 = vor.u32 %v7021_v12, %v6206_v13 }
  0xfd   : > { %3667 = vmatpush.bf16.msra.mxu0 %v5601_v62  ;;  %v6462_v19 = vld [vmem:[%s7314_s7 + $0xef0] sm:$0xf0]  ;;  %v7117_v26 = vld [vmem:[%s7314_s7 + $0xfe4] sm:$0xf]  ;;  %v6337_v18 = vor.u32 %v7053_v14, %v6334_v16 }
  0xfe   : > { %3680 = vmatpush.bf16.msra.mxu1 %v5729_v1  ;;  %v6590_v29 = vld [vmem:[%s7314_s7 + $0xff0] sm:$0xf0]  ;;  %v6465_v34 = vor.u32 %v7085_v17, %v6462_v19  ;;  %v7017_v35 = vld [vmem:[%s7314_s7 + $0xcc4] sm:$0xf] }
  0xff   : > { %3693 = vmatpush.bf16.msra.mxu2 %v5857_v2  ;;  %v6190_v36 = vld [vmem:[%s7314_s7 + $0xcd0] sm:$0xf0]  ;;  %v7049_v37 = vld [vmem:[%s7314_s7 + $0xdc4] sm:$0xf]  ;;  %v6593_v38 = vor.u32 %v7117_v26, %v6590_v29 }
 0x100   : > { %3706 = vmatpush.bf16.msra.mxu3 %v5985_v7  ;;  %v6318_v39 = vld [vmem:[%s7314_s7 + $0xdd0] sm:$0xf0]  ;;  %v7081_v40 = vld [vmem:[%s7314_s7 + $0xec4] sm:$0xf]  ;;  %v6193_v44 = vor.u32 %v7017_v35, %v6190_v36 }
 0x101   : > { %3668 = vmatpush.bf16.msra.mxu0 %v5585_v15  ;;  %v6446_v41 = vld [vmem:[%s7314_s7 + $0xed0] sm:$0xf0]  ;;  %v7113_v42 = vld [vmem:[%s7314_s7 + $0xfc4] sm:$0xf]  ;;  %v6321_v45 = vor.u32 %v7049_v37, %v6318_v39  ;;  %v3462_v7 = vpop.f32.mrf.mxu0 }
 0x102   : > { %3681 = vmatpush.bf16.msra.mxu1 %v5713_v20  ;;  %v6574_v43 = vld [vmem:[%s7314_s7 + $0xfd0] sm:$0xf0]  ;;  %v6449_v46 = vor.u32 %v7081_v40, %v6446_v41  ;;  %v7013_v47 = vld [vmem:[%s7314_s7 + $0xca4] sm:$0xf]  ;;  %v3463_v10 = vadd.f32 %v3462_v7, %v7788_v48 }
 0x103   : > { %3694 = vmatpush.bf16.msra.mxu2 %v5841_v21  ;;  %v6174_v49 = vld [vmem:[%s7314_s7 + $0xcb0] sm:$0xf0]  ;;  %v7045_v50 = vld [vmem:[%s7314_s7 + $0xda4] sm:$0xf]  ;;  %v6577_v52 = vor.u32 %v7113_v42, %v6574_v43 }
 0x104   : > { %3707 = vmatpush.bf16.msra.mxu3 %v5969_v32  ;;  %v7163_v51 = vld.sshfl [vmem:[#allocation1] sm:$0xff pattern:$0x73625140]  ;;  %v6302_v53 = vld [vmem:[%s7314_s7 + $0xdb0] sm:$0xf0]  ;;  %v6177_v61 = vor.u32 %v7013_v47, %v6174_v49 }
 0x105   : > { %3713 = vmatpush.bf16.msrb.mxu0 %v6209_v33  ;;  %v7077_v54 = vld [vmem:[%s7314_s7 + $0xea4] sm:$0xf]  ;;  %v6430_v55 = vld [vmem:[%s7314_s7 + $0xeb0] sm:$0xf0]  ;;  %v6305_v62 = vor.u32 %v7045_v50, %v6302_v53 }
 0x106   : > { %3726 = vmatpush.bf16.msrb.mxu1 %v6337_v18  ;;  %3669 = vmatmul.bf16.vlgmr.msra.gmra.mxu0 %v7163_v51  ;;  %v7164_v56 = vld.sshfl [vmem:[#allocation1 + $0x10] sm:$0xff pattern:$0x73625140]  ;;  %v7165_v57 = vld.sshfl [vmem:[#allocation1 + $0x8] sm:$0xff pattern:$0x73625140]  ;;  %v6433_v63 = vor.u32 %v7077_v54, %v6430_v55  ;;  %v3475_v12 = vpop.f32.mrf.mxu1 }
 0x107   : > { %3739 = vmatpush.bf16.msrb.mxu2 %v6465_v34  ;;  %3682 = vmatmul.bf16.vlgmr.msra.gmra.mxu1 %v7165_v57  ;;  %v7109_v58 = vld [vmem:[%s7314_s7 + $0xfa4] sm:$0xf]  ;;  %v6558_v59 = vld [vmem:[%s7314_s7 + $0xfb0] sm:$0xf0]  ;;  %v3476_v20 = vadd.f32 %v3475_v12, %v3463_v10  ;;  %v4676_v12 = vld [vmem:[%s7314_s7 + $0xe8] sm:$0xf] }
 0x108   : > { %3752 = vmatpush.bf16.msrb.mxu3 %v6593_v38  ;;  %3695 = vmatmul.bf16.vlgmr.msra.gmra.mxu2 %v7164_v56  ;;  %v7166_v60 = vld.sshfl [vmem:[#allocation1 + $0x18] sm:$0xff pattern:$0x73625140]  ;;  %v7009_v0 = vld [vmem:[%s7314_s7 + $0xc84] sm:$0xf]  ;;  %v6561_v3 = vor.u32 %v7109_v58, %v6558_v59 }
 0x109   : > { %3708 = vmatmul.bf16.vlgmr.msra.gmra.mxu3 %v7166_v60  ;;  %3714 = vmatpush.bf16.msrb.mxu0 %v6193_v44  ;;  %v6158_v1 = vld [vmem:[%s7314_s7 + $0xc90] sm:$0xf0]  ;;  %v7041_v2 = vld [vmem:[%s7314_s7 + $0xd84] sm:$0xf]  ;;  %v3488_v39 = vpop.f32.mrf.mxu2  ;;  %v3464_v47 = vpop.f32.mrf.mxu0 }
 0x10a   : > { %3727 = vmatpush.bf16.msrb.mxu1 %v6321_v45  ;;  %v6286_v4 = vld [vmem:[%s7314_s7 + $0xd90] sm:$0xf0]  ;;  %v7073_v5 = vld [vmem:[%s7314_s7 + $0xe84] sm:$0xf]  ;;  %v6161_v11 = vor.u32 %v7009_v0, %v6158_v1  ;;  %v3489_v43 = vadd.f32 %v3488_v39, %v3476_v20  ;;  %v6704_v20 = vld [vmem:[%s7314_s7 + $0x2f4] sm:$0xf0] }
 0x10b   : > { %3740 = vmatpush.bf16.msrb.mxu2 %v6449_v46  ;;  %v6414_v6 = vld [vmem:[%s7314_s7 + $0xe90] sm:$0xf0]  ;;  %v7105_v8 = vld [vmem:[%s7314_s7 + $0xf84] sm:$0xf]  ;;  %v6289_v13 = vor.u32 %v7041_v2, %v6286_v4  ;;  %v6668_v39 = vld [vmem:[%s7314_s7 + $0x1d4] sm:$0xf0] }
 0x10c   : > { %3753 = vmatpush.bf16.msrb.mxu3 %v6577_v52  ;;  %v6542_v9 = vld [vmem:[%s7314_s7 + $0xf90] sm:$0xf0]  ;;  %v6417_v14 = vor.u32 %v7073_v5, %v6414_v6  ;;  %v7005_v15 = vld [vmem:[%s7314_s7 + $0xc64] sm:$0xf]  ;;  %v4644_v47 = vld [vmem:[%s7314_s7 + $0xa8] sm:$0xf] }
 0x10d   : > { %3715 = vmatpush.bf16.msrb.mxu0 %v6177_v61  ;;  %v6142_v16 = vld [vmem:[%s7314_s7 + $0xc70] sm:$0xf0]  ;;  %v7037_v17 = vld [vmem:[%s7314_s7 + $0xd64] sm:$0xf]  ;;  %v6545_v19 = vor.u32 %v7105_v8, %v6542_v9  ;;  %v3501_v44 = vpop.f32.mrf.mxu3 }
 0x10e   : > { %3728 = vmatpush.bf16.msrb.mxu1 %v6305_v62  ;;  %v6270_v21 = vld [vmem:[%s7314_s7 + $0xd70] sm:$0xf0]  ;;  %v7069_v26 = vld [vmem:[%s7314_s7 + $0xe64] sm:$0xf]  ;;  %v6145_v33 = vor.u32 %v7005_v15, %v6142_v16  ;;  %v3477_v50 = vpop.f32.mrf.mxu1  ;;  %v7855_v51 = vadd.f32 %v3501_v44, %v3489_v43  ;;  %v6732_v43 = vld [vmem:[%s7314_s7 + $0x3d4] sm:$0xf0] }
 0x10f   : > { %3741 = vmatpush.bf16.msrb.mxu2 %v6433_v63  ;;  %v6398_v48 = vld [vmem:[%s7314_s7 + $0xe70] sm:$0xf0]  ;;  %v7101_v29 = vld [vmem:[%s7314_s7 + $0xf64] sm:$0xf]  ;;  %v6273_v18 = vor.u32 %v7037_v17, %v6270_v21  ;;  %v6672_v17 = vld [vmem:[%s7314_s7 + $0x1f4] sm:$0xf0] }
 0x110   : > { %3754 = vmatpush.bf16.msrb.mxu3 %v6561_v3  ;;  %v6526_v32 = vld [vmem:[%s7314_s7 + $0xf70] sm:$0xf0]  ;;  %v6401_v34 = vor.u32 %v7069_v26, %v6398_v48  ;;  %v7001_v35 = vld [vmem:[%s7314_s7 + $0xc44] sm:$0xf]  ;;  %v5060_v48 = vld [vmem:[%s7314_s7 + $0x3e8] sm:$0xf] }
 0x111   : > { %3716 = vmatpush.bf16.msrb.mxu0 %v6161_v11  ;;  %v6126_v36 = vld [vmem:[%s7314_s7 + $0xc50] sm:$0xf0]  ;;  %v7033_v37 = vld [vmem:[%s7314_s7 + $0xd44] sm:$0xf]  ;;  %v6529_v38 = vor.u32 %v7101_v29, %v6526_v32  ;;  %v3490_v11 = vpop.f32.mrf.mxu2  ;;  %v6736_v29 = vld [vmem:[%s7314_s7 + $0x3f4] sm:$0xf0] }
 0x112   : > { %3729 = vmatpush.bf16.msrb.mxu1 %v6289_v13  ;;  %v6254_v40 = vld [vmem:[%s7314_s7 + $0xd50] sm:$0xf0]  ;;  %v7065_v41 = vld [vmem:[%s7314_s7 + $0xe44] sm:$0xf]  ;;  %v6129_v49 = vor.u32 %v7001_v35, %v6126_v36  ;;  %v6640_v13 = vld [vmem:[%s7314_s7 + $0xf4] sm:$0xf0] }
 0x113   : > { %3742 = vmatpush.bf16.msrb.mxu2 %v6417_v14  ;;  %v6382_v42 = vld [vmem:[%s7314_s7 + $0xe50] sm:$0xf0]  ;;  %v7097_v45 = vld [vmem:[%s7314_s7 + $0xf44] sm:$0xf]  ;;  %v6257_v52 = vor.u32 %v7033_v37, %v6254_v40  ;;  %v4804_v14 = vld [vmem:[%s7314_s7 + $0x1e8] sm:$0xf] }
 0x114   : > { %3755 = vmatpush.bf16.msrb.mxu3 %v6545_v19  ;;  %v6510_v46 = vld [vmem:[%s7314_s7 + $0xf50] sm:$0xf0]  ;;  %v6385_v53 = vor.u32 %v7065_v41, %v6382_v42  ;;  %v6997_v54 = vld [vmem:[%s7314_s7 + $0xc24] sm:$0xf]  ;;  %v4932_v19 = vld [vmem:[%s7314_s7 + $0x2e8] sm:$0xf] }
 0x115   : > { %3717 = vmatpush.bf16.msrb.mxu0 %v6145_v33  ;;  %v6110_v55 = vld [vmem:[%s7314_s7 + $0xc30] sm:$0xf0]  ;;  %v7029_v56 = vld [vmem:[%s7314_s7 + $0xd24] sm:$0xf]  ;;  %v6513_v57 = vor.u32 %v7097_v45, %v6510_v46  ;;  %v3503_v15 = vpop.f32.mrf.mxu3  ;;  %v4677_v33 = vor.u32 %v6640_v13, %v4676_v12  ;;  %v4660_v35 = vld [vmem:[%s7314_s7 + $0xc8] sm:$0xf] }
 0x116   : > { %3730 = vmatpush.bf16.msrb.mxu1 %v6273_v18  ;;  %v6238_v58 = vld [vmem:[%s7314_s7 + $0xd30] sm:$0xf0]  ;;  %v7061_v59 = vld [vmem:[%s7314_s7 + $0xe24] sm:$0xf]  ;;  %v6113_v63 = vor.u32 %v6997_v54, %v6110_v55  ;;  %v4805_v18 = vor.u32 %v6672_v17, %v4804_v14  ;;  %v6636_v36 = vld [vmem:[%s7314_s7 + $0xd4] sm:$0xf0] }
 0x117   : > { %3743 = vmatpush.bf16.msrb.mxu2 %v6401_v34  ;;  %v6366_v60 = vld [vmem:[%s7314_s7 + $0xe30] sm:$0xf0]  ;;  %v7093_v61 = vld [vmem:[%s7314_s7 + $0xf24] sm:$0xf]  ;;  %v6241_v2 = vor.u32 %v7029_v56, %v6238_v58  ;;  %v4933_v34 = vor.u32 %v6704_v20, %v4932_v19  ;;  %v4788_v37 = vld [vmem:[%s7314_s7 + $0x1c8] sm:$0xf]  ;;  %v4661_v44 = vor.u32 %v6636_v36, %v4660_v35 }
 0x118   : > { %3756 = vmatpush.bf16.msrb.mxu3 %v6529_v38  ;;  %v6494_v62 = vld [vmem:[%s7314_s7 + $0xf30] sm:$0xf0]  ;;  %v6993_v0 = vld [vmem:[%s7314_s7 + $0xc04] sm:$0xf]  ;;  %v6369_v3 = vor.u32 %v7061_v59, %v6366_v60  ;;  %v5061_v38 = vor.u32 %v6736_v29, %v5060_v48  ;;  %v4916_v40 = vld [vmem:[%s7314_s7 + $0x2c8] sm:$0xf]  ;;  %v4789_v45 = vor.u32 %v6668_v39, %v4788_v37 }
 0x119   : > { %3718 = vmatpush.bf16.msrb.mxu0 %v6129_v49  ;;  %v6094_v1 = vld [vmem:[%s7314_s7 + $0xc10] sm:$0xf0]  ;;  %v7025_v4 = vld [vmem:[%s7314_s7 + $0xd04] sm:$0xf]  ;;  %v6497_v7 = vor.u32 %v7093_v61, %v6494_v62  ;;  %v6700_v41 = vld [vmem:[%s7314_s7 + $0x2d4] sm:$0xf0] }
 0x11a   : > { %3731 = vmatpush.bf16.msrb.mxu1 %v6257_v52  ;;  %v6222_v5 = vld [vmem:[%s7314_s7 + $0xd10] sm:$0xf0]  ;;  %v7057_v6 = vld [vmem:[%s7314_s7 + $0xe04] sm:$0xf]  ;;  %v6097_v16 = vor.u32 %v6993_v0, %v6094_v1  ;;  %v5044_v42 = vld [vmem:[%s7314_s7 + $0x3c8] sm:$0xf]  ;;  %v4917_v46 = vor.u32 %v6700_v41, %v4916_v40 }
 0x11b   : > { %3744 = vmatpush.bf16.msrb.mxu2 %v6385_v53  ;;  %v6350_v8 = vld [vmem:[%s7314_s7 + $0xe10] sm:$0xf0]  ;;  %v7089_v9 = vld [vmem:[%s7314_s7 + $0xf04] sm:$0xf]  ;;  %v6225_v21 = vor.u32 %v7025_v4, %v6222_v5  ;;  %v6632_v49 = vld [vmem:[%s7314_s7 + $0xb4] sm:$0xf0]  ;;  %v5045_v53 = vor.u32 %v6732_v43, %v5044_v42 }
 0x11c   : > { %3757 = vmatpush.bf16.msrb.mxu3 %v6513_v57  ;;  %v6478_v10 = vld [vmem:[%s7314_s7 + $0xf10] sm:$0xf0]  ;;  %v6353_v26 = vor.u32 %v7057_v6, %v6350_v8  ;;  %v4772_v50 = vld [vmem:[%s7314_s7 + $0x1a8] sm:$0xf]  ;;  %v6664_v54 = vld [vmem:[%s7314_s7 + $0x1b4] sm:$0xf0]  ;;  %v4645_v62 = vor.u32 %v6632_v49, %v4644_v47 }
 0x11d   : > { %3719 = vmatpush.bf16.msrb.mxu0 %v6113_v63  ;;  %v6481_v32 = vor.u32 %v7089_v9, %v6478_v10  ;;  %v7167_v52 = vld.sshfl [vmem:[#allocation1 + $0x20] sm:$0xff pattern:$0x73625140]  ;;  %v4900_v55 = vld [vmem:[%s7314_s7 + $0x2a8] sm:$0xf]  ;;  %v4773_v63 = vor.u32 %v6664_v54, %v4772_v50 }
 0x11e   : > { %3732 = vmatpush.bf16.msrb.mxu1 %v6241_v2  ;;  %v6696_v56 = vld [vmem:[%s7314_s7 + $0x2b4] sm:$0xf0]  ;;  %v7168_v57 = vld.sshfl [vmem:[#allocation1 + $0x30] sm:$0xff pattern:$0x73625140] }
 0x11f   : > { %3745 = vmatpush.bf16.msrb.mxu2 %v6369_v3  ;;  %v7169_v58 = vld.sshfl [vmem:[#allocation1 + $0x28] sm:$0xff pattern:$0x73625140]  ;;  %v6728_v60 = vld [vmem:[%s7314_s7 + $0x3b4] sm:$0xf0]  ;;  %v4901_v0 = vor.u32 %v6696_v56, %v4900_v55 }
 0x120   : > { %3758 = vmatpush.bf16.msrb.mxu3 %v6497_v7  ;;  %v5028_v59 = vld [vmem:[%s7314_s7 + $0x3a8] sm:$0xf]  ;;  %v7170_v61 = vld.sshfl [vmem:[#allocation1 + $0x38] sm:$0xff pattern:$0x73625140] }
 0x121   : > { %3720 = vmatpush.bf16.msrb.mxu0 %v6097_v16  ;;  %v4628_v1 = vld [vmem:[%s7314_s7 + $0x88] sm:$0xf]  ;;  %v6628_v2 = vld [vmem:[%s7314_s7 + $0x94] sm:$0xf0]  ;;  %v5029_v4 = vor.u32 %v6728_v60, %v5028_v59  ;;  %v3514_v8 = vpop.f32.mrf.mxu0 }
 0x122   : > { %3733 = vmatpush.bf16.msrb.mxu1 %v6225_v21  ;;  %v4756_v3 = vld [vmem:[%s7314_s7 + $0x188] sm:$0xf]  ;;  %v6660_v5 = vld [vmem:[%s7314_s7 + $0x194] sm:$0xf0]  ;;  %v3515_v11 = vadd.f32 %v3514_v8, %v7855_v51  ;;  %v4629_v12 = vor.u32 %v6628_v2, %v4628_v1  ;;  %v3527_v13 = vpop.f32.mrf.mxu1 }
 0x123   : > { %3746 = vmatpush.bf16.msrb.mxu2 %v6353_v26  ;;  %v4884_v6 = vld [vmem:[%s7314_s7 + $0x288] sm:$0xf]  ;;  %v6692_v7 = vld [vmem:[%s7314_s7 + $0x294] sm:$0xf0]  ;;  %v4757_v14 = vor.u32 %v6660_v5, %v4756_v3 }
 0x124   : > { %3759 = vmatpush.bf16.msrb.mxu3 %v6481_v32  ;;  %3721 = vmatmul.bf16.vlgmr.msrb.gmra.mxu0 %v7167_v52  ;;  %v5012_v9 = vld [vmem:[%s7314_s7 + $0x388] sm:$0xf]  ;;  %v6724_v10 = vld [vmem:[%s7314_s7 + $0x394] sm:$0xf0]  ;;  %v4885_v15 = vor.u32 %v6692_v7, %v4884_v6  ;;  %v3528_v21 = vadd.f32 %v3527_v13, %v3515_v11 }
 0x125   : > { %3765 = vmatpush.bf16.msra.mxu0 %v4677_v33  ;;  %3734 = vmatmul.bf16.vlgmr.msrb.gmra.mxu1 %v7169_v58  ;;  %v4612_v16 = vld [vmem:[%s7314_s7 + $0x68] sm:$0xf]  ;;  %v6624_v17 = vld [vmem:[%s7314_s7 + $0x74] sm:$0xf0]  ;;  %v5013_v20 = vor.u32 %v6724_v10, %v5012_v9 }
 0x126   : > { %3778 = vmatpush.bf16.msra.mxu1 %v4805_v18  ;;  %3747 = vmatmul.bf16.vlgmr.msrb.gmra.mxu2 %v7168_v57  ;;  %v4740_v19 = vld [vmem:[%s7314_s7 + $0x168] sm:$0xf]  ;;  %v6656_v26 = vld [vmem:[%s7314_s7 + $0x174] sm:$0xf0]  ;;  %v4613_v33 = vor.u32 %v6624_v17, %v4612_v16 }
 0x127   : > { %3791 = vmatpush.bf16.msra.mxu2 %v4933_v34  ;;  %3760 = vmatmul.bf16.vlgmr.msrb.gmra.mxu3 %v7170_v61  ;;  %v4868_v48 = vld [vmem:[%s7314_s7 + $0x268] sm:$0xf]  ;;  %v6688_v51 = vld [vmem:[%s7314_s7 + $0x274] sm:$0xf0]  ;;  %v4741_v18 = vor.u32 %v6656_v26, %v4740_v19 }
 0x128   : > { %3804 = vmatpush.bf16.msra.mxu3 %v5061_v38  ;;  %v4996_v29 = vld [vmem:[%s7314_s7 + $0x368] sm:$0xf]  ;;  %v6720_v32 = vld [vmem:[%s7314_s7 + $0x374] sm:$0xf0]  ;;  %v4869_v34 = vor.u32 %v6688_v51, %v4868_v48 }
 0x129   : > { %3766 = vmatpush.bf16.msra.mxu0 %v4661_v44  ;;  %v4596_v35 = vld [vmem:[%s7314_s7 + $0x48] sm:$0xf]  ;;  %v6620_v36 = vld [vmem:[%s7314_s7 + $0x54] sm:$0xf0]  ;;  %v4997_v38 = vor.u32 %v6720_v32, %v4996_v29  ;;  %v3540_v39 = vpop.f32.mrf.mxu2  ;;  %v3516_v47 = vpop.f32.mrf.mxu0 }
 0x12a   : > { %3779 = vmatpush.bf16.msra.mxu1 %v4789_v45  ;;  %v4724_v37 = vld [vmem:[%s7314_s7 + $0x148] sm:$0xf]  ;;  %v6652_v40 = vld [vmem:[%s7314_s7 + $0x154] sm:$0xf0]  ;;  %v3541_v43 = vadd.f32 %v3540_v39, %v3528_v21  ;;  %v3553_v44 = vpop.f32.mrf.mxu3  ;;  %v4597_v49 = vor.u32 %v6620_v36, %v4596_v35  ;;  %v3529_v50 = vpop.f32.mrf.mxu1 }
 0x12b   : > { %3792 = vmatpush.bf16.msra.mxu2 %v4917_v46  ;;  %v4852_v41 = vld [vmem:[%s7314_s7 + $0x248] sm:$0xf]  ;;  %v6684_v42 = vld [vmem:[%s7314_s7 + $0x254] sm:$0xf0] }
 0x12c   : > { %3805 = vmatpush.bf16.msra.mxu3 %v5045_v53  ;;  %v4980_v45 = vld [vmem:[%s7314_s7 + $0x348] sm:$0xf]  ;;  %v6716_v46 = vld [vmem:[%s7314_s7 + $0x354] sm:$0xf0]  ;;  %v7922_v52 = vadd.f32 %v3553_v44, %v3541_v43  ;;  %v4725_v53 = vor.u32 %v6652_v40, %v4724_v37  ;;  %v4853_v54 = vor.u32 %v6684_v42, %v4852_v41 }
 0x12d   : > { %3767 = vmatpush.bf16.msra.mxu0 %v4645_v62  ;;  %v4580_v55 = vld [vmem:[%s7314_s7 + $0x28] sm:$0xf]  ;;  %v6616_v56 = vld [vmem:[%s7314_s7 + $0x34] sm:$0xf0]  ;;  %v4981_v58 = vor.u32 %v6716_v46, %v4980_v45 }
 0x12e   : > { %3780 = vmatpush.bf16.msra.mxu1 %v4773_v63  ;;  %v4708_v57 = vld [vmem:[%s7314_s7 + $0x128] sm:$0xf]  ;;  %v6648_v59 = vld [vmem:[%s7314_s7 + $0x134] sm:$0xf0] }
 0x12f   : > { %3793 = vmatpush.bf16.msra.mxu2 %v4901_v0  ;;  %v4836_v60 = vld [vmem:[%s7314_s7 + $0x228] sm:$0xf]  ;;  %v6680_v61 = vld [vmem:[%s7314_s7 + $0x234] sm:$0xf0]  ;;  %v4581_v0 = vor.u32 %v6616_v56, %v4580_v55  ;;  %v4709_v3 = vor.u32 %v6648_v59, %v4708_v57 }
 0x130   : > { %3806 = vmatpush.bf16.msra.mxu3 %v5029_v4  ;;  %v4964_v62 = vld [vmem:[%s7314_s7 + $0x328] sm:$0xf]  ;;  %v6712_v63 = vld [vmem:[%s7314_s7 + $0x334] sm:$0xf0]  ;;  %v4837_v4 = vor.u32 %v6680_v61, %v4836_v60 }
 0x131   : > { %3768 = vmatpush.bf16.msra.mxu0 %v4629_v12  ;;  %v4564_v1 = vld [vmem:[%s7314_s7 + $0x8] sm:$0xf]  ;;  %v6612_v2 = vld [vmem:[%s7314_s7 + $0x14] sm:$0xf0]  ;;  %v4965_v8 = vor.u32 %v6712_v63, %v4964_v62  ;;  %v3542_v12 = vpop.f32.mrf.mxu2 }
 0x132   : > { %3781 = vmatpush.bf16.msra.mxu1 %v4757_v14  ;;  %v4692_v5 = vld [vmem:[%s7314_s7 + $0x108] sm:$0xf]  ;;  %v6644_v6 = vld [vmem:[%s7314_s7 + $0x114] sm:$0xf0]  ;;  %v3555_v16 = vpop.f32.mrf.mxu3  ;;  %v4565_v17 = vor.u32 %v6612_v2, %v4564_v1 }
 0x133   : > { %3794 = vmatpush.bf16.msra.mxu2 %v4885_v15  ;;  %v4820_v7 = vld [vmem:[%s7314_s7 + $0x208] sm:$0xf]  ;;  %v6676_v9 = vld [vmem:[%s7314_s7 + $0x214] sm:$0xf0]  ;;  %v4693_v26 = vor.u32 %v6644_v6, %v4692_v5 }
 0x134   : > { %3807 = vmatpush.bf16.msra.mxu3 %v5013_v20  ;;  %v4948_v10 = vld [vmem:[%s7314_s7 + $0x308] sm:$0xf]  ;;  %v6708_v11 = vld [vmem:[%s7314_s7 + $0x314] sm:$0xf0]  ;;  %v4821_v48 = vor.u32 %v6676_v9, %v4820_v7 }
 0x135   : > { %3769 = vmatpush.bf16.msra.mxu0 %v4613_v33  ;;  %v5188_v13 = vld [vmem:[%s7314_s7 + $0x4e8] sm:$0xf]  ;;  %v6768_v14 = vld [vmem:[%s7314_s7 + $0x4f4] sm:$0xf0]  ;;  %v4949_v32 = vor.u32 %v6708_v11, %v4948_v10 }
 0x136   : > { %3782 = vmatpush.bf16.msra.mxu1 %v4741_v18  ;;  %v5316_v15 = vld [vmem:[%s7314_s7 + $0x5e8] sm:$0xf]  ;;  %v6800_v19 = vld [vmem:[%s7314_s7 + $0x5f4] sm:$0xf0]  ;;  %v5189_v33 = vor.u32 %v6768_v14, %v5188_v13 }
 0x137   : > { %3795 = vmatpush.bf16.msra.mxu2 %v4869_v34  ;;  %v5444_v20 = vld [vmem:[%s7314_s7 + $0x6e8] sm:$0xf]  ;;  %v6832_v21 = vld [vmem:[%s7314_s7 + $0x6f4] sm:$0xf0]  ;;  %v5317_v18 = vor.u32 %v6800_v19, %v5316_v15 }
 0x138   : > { %3808 = vmatpush.bf16.msra.mxu3 %v4997_v38  ;;  %v5572_v51 = vld [vmem:[%s7314_s7 + $0x7e8] sm:$0xf]  ;;  %v6864_v29 = vld [vmem:[%s7314_s7 + $0x7f4] sm:$0xf0]  ;;  %v5445_v34 = vor.u32 %v6832_v21, %v5444_v20 }
 0x139   : > { %3770 = vmatpush.bf16.msra.mxu0 %v4597_v49  ;;  %v5172_v35 = vld [vmem:[%s7314_s7 + $0x4c8] sm:$0xf]  ;;  %v6764_v36 = vld [vmem:[%s7314_s7 + $0x4d4] sm:$0xf0]  ;;  %v5573_v38 = vor.u32 %v6864_v29, %v5572_v51 }
 0x13a   : > { %3783 = vmatpush.bf16.msra.mxu1 %v4725_v53  ;;  %v5300_v37 = vld [vmem:[%s7314_s7 + $0x5c8] sm:$0xf]  ;;  %v6796_v39 = vld [vmem:[%s7314_s7 + $0x5d4] sm:$0xf0]  ;;  %v5173_v44 = vor.u32 %v6764_v36, %v5172_v35 }
 0x13b   : > { %3796 = vmatpush.bf16.msra.mxu2 %v4853_v54  ;;  %v5428_v40 = vld [vmem:[%s7314_s7 + $0x6c8] sm:$0xf]  ;;  %v6828_v41 = vld [vmem:[%s7314_s7 + $0x6d4] sm:$0xf0]  ;;  %v5301_v45 = vor.u32 %v6796_v39, %v5300_v37 }
 0x13c   : > { %3809 = vmatpush.bf16.msra.mxu3 %v4981_v58  ;;  %v5556_v42 = vld [vmem:[%s7314_s7 + $0x7c8] sm:$0xf]  ;;  %v6860_v43 = vld [vmem:[%s7314_s7 + $0x7d4] sm:$0xf0]  ;;  %v5429_v46 = vor.u32 %v6828_v41, %v5428_v40 }
 0x13d   : > { %3771 = vmatpush.bf16.msra.mxu0 %v4581_v0  ;;  %v5156_v47 = vld [vmem:[%s7314_s7 + $0x4a8] sm:$0xf]  ;;  %v6760_v49 = vld [vmem:[%s7314_s7 + $0x4b4] sm:$0xf0]  ;;  %v5557_v53 = vor.u32 %v6860_v43, %v5556_v42 }
 0x13e   : > { %3784 = vmatpush.bf16.msra.mxu1 %v4709_v3  ;;  %v5284_v50 = vld [vmem:[%s7314_s7 + $0x5a8] sm:$0xf]  ;;  %v6792_v54 = vld [vmem:[%s7314_s7 + $0x5b4] sm:$0xf0]  ;;  %v5157_v59 = vor.u32 %v6760_v49, %v5156_v47 }
 0x13f   : > { %3797 = vmatpush.bf16.msra.mxu2 %v4837_v4  ;;  %v5412_v55 = vld [vmem:[%s7314_s7 + $0x6a8] sm:$0xf]  ;;  %v6824_v56 = vld [vmem:[%s7314_s7 + $0x6b4] sm:$0xf0]  ;;  %v5285_v60 = vor.u32 %v6792_v54, %v5284_v50 }
 0x140   : > { %3810 = vmatpush.bf16.msra.mxu3 %v4965_v8  ;;  %v5540_v57 = vld [vmem:[%s7314_s7 + $0x7a8] sm:$0xf]  ;;  %v6856_v58 = vld [vmem:[%s7314_s7 + $0x7b4] sm:$0xf0]  ;;  %v5413_v61 = vor.u32 %v6824_v56, %v5412_v55 }
 0x141   : > { %3772 = vmatpush.bf16.msra.mxu0 %v4565_v17  ;;  %v5140_v62 = vld [vmem:[%s7314_s7 + $0x488] sm:$0xf]  ;;  %v6756_v63 = vld [vmem:[%s7314_s7 + $0x494] sm:$0xf0]  ;;  %v5541_v1 = vor.u32 %v6856_v58, %v5540_v57  ;;  %v3566_v8 = vpop.f32.mrf.mxu0 }
 0x142   : > { %3785 = vmatpush.bf16.msra.mxu1 %v4693_v26  ;;  %v5268_v0 = vld [vmem:[%s7314_s7 + $0x588] sm:$0xf]  ;;  %v6788_v2 = vld [vmem:[%s7314_s7 + $0x594] sm:$0xf0]  ;;  %v5141_v7 = vor.u32 %v6756_v63, %v5140_v62  ;;  %v3579_v14 = vpop.f32.mrf.mxu1 }
 0x143   : > { %3798 = vmatpush.bf16.msra.mxu2 %v4821_v48  ;;  %v5396_v3 = vld [vmem:[%s7314_s7 + $0x688] sm:$0xf]  ;;  %v6820_v4 = vld [vmem:[%s7314_s7 + $0x694] sm:$0xf0]  ;;  %v5269_v9 = vor.u32 %v6788_v2, %v5268_v0  ;;  %v3580_v20 = vadd.f32 %v3579_v14, %v3566_v8 }
 0x144   : > { %3811 = vmatpush.bf16.msra.mxu3 %v4949_v32  ;;  %3773 = vmatmul.bf16.vlgmr.msra.gmra.mxu0 %v7423_v25  ;;  %v5524_v5 = vld [vmem:[%s7314_s7 + $0x788] sm:$0xf]  ;;  %v6852_v6 = vld [vmem:[%s7314_s7 + $0x794] sm:$0xf0]  ;;  %v5397_v10 = vor.u32 %v6820_v4, %v5396_v3 }
 0x145   : > { %3817 = vmatpush.bf16.msrb.mxu0 %v5189_v33  ;;  %3786 = vmatmul.bf16.vlgmr.msra.gmra.mxu1 %v7428_v28  ;;  %v5124_v11 = vld [vmem:[%s7314_s7 + $0x468] sm:$0xf]  ;;  %v6752_v12 = vld [vmem:[%s7314_s7 + $0x474] sm:$0xf0]  ;;  %v5525_v15 = vor.u32 %v6852_v6, %v5524_v5 }
 0x146   : > { %3830 = vmatpush.bf16.msrb.mxu1 %v5317_v18  ;;  %3799 = vmatmul.bf16.vlgmr.msra.gmra.mxu2 %v7421_v24  ;;  %v5252_v13 = vld [vmem:[%s7314_s7 + $0x568] sm:$0xf]  ;;  %v6784_v16 = vld [vmem:[%s7314_s7 + $0x574] sm:$0xf0]  ;;  %v5125_v48 = vor.u32 %v6752_v12, %v5124_v11 }
 0x147   : > { %3843 = vmatpush.bf16.msrb.mxu2 %v5445_v34  ;;  %3812 = vmatmul.bf16.vlgmr.msra.gmra.mxu3 %v7426_v27  ;;  %v5380_v17 = vld [vmem:[%s7314_s7 + $0x668] sm:$0xf]  ;;  %v6816_v19 = vld [vmem:[%s7314_s7 + $0x674] sm:$0xf0]  ;;  %v5253_v51 = vor.u32 %v6784_v16, %v5252_v13 }
 0x148   : > { %3856 = vmatpush.bf16.msrb.mxu3 %v5573_v38  ;;  %v5508_v21 = vld [vmem:[%s7314_s7 + $0x768] sm:$0xf]  ;;  %v6848_v26 = vld [vmem:[%s7314_s7 + $0x774] sm:$0xf0]  ;;  %v5381_v29 = vor.u32 %v6816_v19, %v5380_v17 }
 0x149   : > { %3818 = vmatpush.bf16.msrb.mxu0 %v5173_v44  ;;  %v5108_v32 = vld [vmem:[%s7314_s7 + $0x448] sm:$0xf]  ;;  %v6748_v33 = vld [vmem:[%s7314_s7 + $0x454] sm:$0xf0]  ;;  %v3592_v34 = vpop.f32.mrf.mxu2  ;;  %v5509_v35 = vor.u32 %v6848_v26, %v5508_v21 }
 0x14a   : > { %3831 = vmatpush.bf16.msrb.mxu1 %v5301_v45  ;;  %v5236_v18 = vld [vmem:[%s7314_s7 + $0x548] sm:$0xf]  ;;  %v6780_v36 = vld [vmem:[%s7314_s7 + $0x554] sm:$0xf0]  ;;  %v3593_v39 = vadd.f32 %v3592_v34, %v3580_v20  ;;  %v3605_v40 = vpop.f32.mrf.mxu3  ;;  %v5109_v43 = vor.u32 %v6748_v33, %v5108_v32  ;;  %v3568_v45 = vpop.f32.mrf.mxu0 }
 0x14b   : > { %3844 = vmatpush.bf16.msrb.mxu2 %v5429_v46  ;;  %v5364_v37 = vld [vmem:[%s7314_s7 + $0x648] sm:$0xf]  ;;  %v6812_v38 = vld [vmem:[%s7314_s7 + $0x654] sm:$0xf0]  ;;  %v5237_v46 = vor.u32 %v6780_v36, %v5236_v18  ;;  %v3581_v54 = vpop.f32.mrf.mxu1 }
 0x14c   : > { %3857 = vmatpush.bf16.msrb.mxu3 %v5557_v53  ;;  %v5492_v41 = vld [vmem:[%s7314_s7 + $0x748] sm:$0xf]  ;;  %v6844_v42 = vld [vmem:[%s7314_s7 + $0x754] sm:$0xf0]  ;;  %v7992_v44 = vadd.f32 %v3605_v40, %v3593_v39  ;;  %v5365_v47 = vor.u32 %v6812_v38, %v5364_v37 }
 0x14d   : > { %3819 = vmatpush.bf16.msrb.mxu0 %v5157_v59  ;;  %v5092_v49 = vld [vmem:[%s7314_s7 + $0x428] sm:$0xf]  ;;  %v6744_v50 = vld [vmem:[%s7314_s7 + $0x434] sm:$0xf0]  ;;  %v5493_v55 = vor.u32 %v6844_v42, %v5492_v41 }
 0x14e   : > { %3832 = vmatpush.bf16.msrb.mxu1 %v5285_v60  ;;  %v5220_v53 = vld [vmem:[%s7314_s7 + $0x528] sm:$0xf]  ;;  %v6776_v56 = vld [vmem:[%s7314_s7 + $0x534] sm:$0xf0] }
 0x14f   : > { %3845 = vmatpush.bf16.msrb.mxu2 %v5413_v61  ;;  %v5348_v57 = vld [vmem:[%s7314_s7 + $0x628] sm:$0xf]  ;;  %v6808_v58 = vld [vmem:[%s7314_s7 + $0x634] sm:$0xf0]  ;;  %v5093_v61 = vor.u32 %v6744_v50, %v5092_v49  ;;  %v5221_v0 = vor.u32 %v6776_v56, %v5220_v53 }
 0x150   : > { %3858 = vmatpush.bf16.msrb.mxu3 %v5541_v1  ;;  %v5476_v59 = vld [vmem:[%s7314_s7 + $0x728] sm:$0xf]  ;;  %v6840_v60 = vld [vmem:[%s7314_s7 + $0x734] sm:$0xf0]  ;;  %v5349_v1 = vor.u32 %v6808_v58, %v5348_v57 }
 0x151   : > { %3820 = vmatpush.bf16.msrb.mxu0 %v5141_v7  ;;  %v5076_v62 = vld [vmem:[%s7314_s7 + $0x408] sm:$0xf]  ;;  %v6740_v63 = vld [vmem:[%s7314_s7 + $0x414] sm:$0xf0]  ;;  %v3594_v5 = vpop.f32.mrf.mxu2  ;;  %v5477_v6 = vor.u32 %v6840_v60, %v5476_v59 }
 0x152   : > { %3833 = vmatpush.bf16.msrb.mxu1 %v5269_v9  ;;  %v5204_v2 = vld [vmem:[%s7314_s7 + $0x508] sm:$0xf]  ;;  %v6772_v3 = vld [vmem:[%s7314_s7 + $0x514] sm:$0xf0]  ;;  %v5077_v14 = vor.u32 %v6740_v63, %v5076_v62 }
 0x153   : > { %3846 = vmatpush.bf16.msrb.mxu2 %v5397_v10  ;;  %v5332_v4 = vld [vmem:[%s7314_s7 + $0x608] sm:$0xf]  ;;  %v6804_v7 = vld [vmem:[%s7314_s7 + $0x614] sm:$0xf0]  ;;  %v3607_v10 = vpop.f32.mrf.mxu3  ;;  %v5205_v19 = vor.u32 %v6772_v3, %v5204_v2 }
 0x154   : > { %3859 = vmatpush.bf16.msrb.mxu3 %v5525_v15  ;;  %v5460_v8 = vld [vmem:[%s7314_s7 + $0x708] sm:$0xf]  ;;  %v6836_v9 = vld [vmem:[%s7314_s7 + $0x714] sm:$0xf0]  ;;  %v5333_v20 = vor.u32 %v6804_v7, %v5332_v4 }
 0x155   : > { %3821 = vmatpush.bf16.msrb.mxu0 %v5125_v48  ;;  %v5700_v11 = vld [vmem:[%s7314_s7 + $0x8e8] sm:$0xf]  ;;  %v6896_v12 = vld [vmem:[%s7314_s7 + $0x8f4] sm:$0xf0]  ;;  %v5461_v48 = vor.u32 %v6836_v9, %v5460_v8 }
 0x156   : > { %3834 = vmatpush.bf16.msrb.mxu1 %v5253_v51  ;;  %v5828_v13 = vld [vmem:[%s7314_s7 + $0x9e8] sm:$0xf]  ;;  %v6928_v15 = vld [vmem:[%s7314_s7 + $0x9f4] sm:$0xf0]  ;;  %v5701_v51 = vor.u32 %v6896_v12, %v5700_v11 }
 0x157   : > { %3847 = vmatpush.bf16.msrb.mxu2 %v5381_v29  ;;  %v5956_v16 = vld [vmem:[%s7314_s7 + $0xae8] sm:$0xf]  ;;  %v6960_v17 = vld [vmem:[%s7314_s7 + $0xaf4] sm:$0xf0]  ;;  %v5829_v29 = vor.u32 %v6928_v15, %v5828_v13 }
 0x158   : > { %3860 = vmatpush.bf16.msrb.mxu3 %v5509_v35  ;;  %v6084_v21 = vld [vmem:[%s7314_s7 + $0xbe8] sm:$0xf]  ;;  %v6992_v26 = vld [vmem:[%s7314_s7 + $0xbf4] sm:$0xf0]  ;;  %v5957_v32 = vor.u32 %v6960_v17, %v5956_v16 }
 0x159   : > { %3822 = vmatpush.bf16.msrb.mxu0 %v5109_v43  ;;  %v5684_v33 = vld [vmem:[%s7314_s7 + $0x8c8] sm:$0xf]  ;;  %v6892_v18 = vld [vmem:[%s7314_s7 + $0x8d4] sm:$0xf0]  ;;  %v6085_v35 = vor.u32 %v6992_v26, %v6084_v21 }
 0x15a   : > { %3835 = vmatpush.bf16.msrb.mxu1 %v5237_v46  ;;  %v5812_v34 = vld [vmem:[%s7314_s7 + $0x9c8] sm:$0xf]  ;;  %v6924_v36 = vld [vmem:[%s7314_s7 + $0x9d4] sm:$0xf0]  ;;  %v5685_v41 = vor.u32 %v6892_v18, %v5684_v33 }
 0x15b   : > { %3848 = vmatpush.bf16.msrb.mxu2 %v5365_v47  ;;  %v5940_v37 = vld [vmem:[%s7314_s7 + $0xac8] sm:$0xf]  ;;  %v6956_v38 = vld [vmem:[%s7314_s7 + $0xad4] sm:$0xf0]  ;;  %v5813_v42 = vor.u32 %v6924_v36, %v5812_v34 }
 0x15c   : > { %3861 = vmatpush.bf16.msrb.mxu3 %v5493_v55  ;;  %v6068_v39 = vld [vmem:[%s7314_s7 + $0xbc8] sm:$0xf]  ;;  %v6988_v40 = vld [vmem:[%s7314_s7 + $0xbd4] sm:$0xf0]  ;;  %v5941_v43 = vor.u32 %v6956_v38, %v5940_v37 }
 0x15d   : > { %3823 = vmatpush.bf16.msrb.mxu0 %v5093_v61  ;;  %v5668_v45 = vld [vmem:[%s7314_s7 + $0x8a8] sm:$0xf]  ;;  %v6888_v46 = vld [vmem:[%s7314_s7 + $0x8b4] sm:$0xf0]  ;;  %v6069_v49 = vor.u32 %v6988_v40, %v6068_v39 }
 0x15e   : > { %3836 = vmatpush.bf16.msrb.mxu1 %v5221_v0  ;;  %v5796_v47 = vld [vmem:[%s7314_s7 + $0x9a8] sm:$0xf]  ;;  %v6920_v50 = vld [vmem:[%s7314_s7 + $0x9b4] sm:$0xf0]  ;;  %v5669_v57 = vor.u32 %v6888_v46, %v5668_v45 }
 0x15f   : > { %3849 = vmatpush.bf16.msrb.mxu2 %v5349_v1  ;;  %v5924_v53 = vld [vmem:[%s7314_s7 + $0xaa8] sm:$0xf]  ;;  %v6952_v54 = vld [vmem:[%s7314_s7 + $0xab4] sm:$0xf0]  ;;  %v5797_v58 = vor.u32 %v6920_v50, %v5796_v47 }
 0x160   : > { %3862 = vmatpush.bf16.msrb.mxu3 %v5477_v6  ;;  %v6052_v55 = vld [vmem:[%s7314_s7 + $0xba8] sm:$0xf]  ;;  %v6984_v56 = vld [vmem:[%s7314_s7 + $0xbb4] sm:$0xf0]  ;;  %v5925_v59 = vor.u32 %v6952_v54, %v5924_v53 }
 0x161   : > { %3824 = vmatpush.bf16.msrb.mxu0 %v5077_v14  ;;  %v5652_v60 = vld [vmem:[%s7314_s7 + $0x888] sm:$0xf]  ;;  %v6884_v61 = vld [vmem:[%s7314_s7 + $0x894] sm:$0xf0]  ;;  %v6053_v63 = vor.u32 %v6984_v56, %v6052_v55  ;;  %v8046_v6 = vpop.f32.mrf.mxu0 }
 0x162   : > { %3837 = vmatpush.bf16.msrb.mxu1 %v5205_v19  ;;  %v5780_v62 = vld [vmem:[%s7314_s7 + $0x988] sm:$0xf]  ;;  %v6916_v0 = vld [vmem:[%s7314_s7 + $0x994] sm:$0xf0]  ;;  %v5653_v5 = vor.u32 %v6884_v61, %v5652_v60  ;;  %v8051_v12 = vpop.f32.mrf.mxu1 }
 0x163   : > { %3850 = vmatpush.bf16.msrb.mxu2 %v5333_v20  ;;  %v5908_v1 = vld [vmem:[%s7314_s7 + $0xa88] sm:$0xf]  ;;  %v6948_v2 = vld [vmem:[%s7314_s7 + $0xa94] sm:$0xf0]  ;;  %v5781_v7 = vor.u32 %v6916_v0, %v5780_v62 }
 0x164   : > { %3863 = vmatpush.bf16.msrb.mxu3 %v5461_v48  ;;  %3825 = vmatmul.bf16.vlgmr.msrb.gmra.mxu0 %v7475_v23  ;;  %v6036_v3 = vld [vmem:[%s7314_s7 + $0xb88] sm:$0xf]  ;;  %v6980_v4 = vld [vmem:[%s7314_s7 + $0xb94] sm:$0xf0]  ;;  %v5909_v8 = vor.u32 %v6948_v2, %v5908_v1 }
 0x165   : > { %3869 = vmatpush.bf16.msra.mxu0 %v5701_v51  ;;  %3838 = vmatmul.bf16.vlgmr.msrb.gmra.mxu1 %v7479_v31  ;;  %v5636_v9 = vld [vmem:[%s7314_s7 + $0x868] sm:$0xf]  ;;  %v6880_v10 = vld [vmem:[%s7314_s7 + $0x874] sm:$0xf0]  ;;  %v6037_v13 = vor.u32 %v6980_v4, %v6036_v3 }
 0x166   : > { %3882 = vmatpush.bf16.msra.mxu1 %v5829_v29  ;;  %3851 = vmatmul.bf16.vlgmr.msrb.gmra.mxu2 %v7473_v22  ;;  %v5764_v11 = vld [vmem:[%s7314_s7 + $0x968] sm:$0xf]  ;;  %v6912_v14 = vld [vmem:[%s7314_s7 + $0x974] sm:$0xf0]  ;;  %v5637_v20 = vor.u32 %v6880_v10, %v5636_v9 }
 0x167   : > { %3895 = vmatpush.bf16.msra.mxu2 %v5957_v32  ;;  %3864 = vmatmul.bf16.vlgmr.msrb.gmra.mxu3 %v7477_v30  ;;  %v5892_v15 = vld [vmem:[%s7314_s7 + $0xa68] sm:$0xf]  ;;  %v6944_v16 = vld [vmem:[%s7314_s7 + $0xa74] sm:$0xf0]  ;;  %v5765_v21 = vor.u32 %v6912_v14, %v5764_v11 }
 0x168   : > { %3908 = vmatpush.bf16.msra.mxu3 %v6085_v35  ;;  %v6020_v17 = vld [vmem:[%s7314_s7 + $0xb68] sm:$0xf]  ;;  %v6976_v19 = vld [vmem:[%s7314_s7 + $0xb74] sm:$0xf0]  ;;  %v5893_v26 = vor.u32 %v6944_v16, %v5892_v15 }
 0x169   : > { %3870 = vmatpush.bf16.msra.mxu0 %v5685_v41  ;;  %v5620_v48 = vld [vmem:[%s7314_s7 + $0x848] sm:$0xf]  ;;  %v6876_v51 = vld [vmem:[%s7314_s7 + $0x854] sm:$0xf0]  ;;  %v8061_v32 = vpop.f32.mrf.mxu2  ;;  %v6021_v33 = vor.u32 %v6976_v19, %v6020_v17  ;;  %v3620_v40 = vpop.f32.mrf.mxu0 }
 0x16a   : > { %3883 = vmatpush.bf16.msra.mxu1 %v5813_v42  ;;  %v5748_v29 = vld [vmem:[%s7314_s7 + $0x948] sm:$0xf]  ;;  %v6908_v18 = vld [vmem:[%s7314_s7 + $0x954] sm:$0xf0]  ;;  %v8066_v36 = vpop.f32.mrf.mxu3  ;;  %v5621_v39 = vor.u32 %v6876_v51, %v5620_v48  ;;  %v3633_v47 = vpop.f32.mrf.mxu1 }
 0x16b   : > { %3896 = vmatpush.bf16.msra.mxu2 %v5941_v43  ;;  %v5876_v34 = vld [vmem:[%s7314_s7 + $0xa48] sm:$0xf]  ;;  %v6940_v35 = vld [vmem:[%s7314_s7 + $0xa54] sm:$0xf0]  ;;  %v5749_v41 = vor.u32 %v6908_v18, %v5748_v29 }
 0x16c   : > { %3909 = vmatpush.bf16.msra.mxu3 %v6069_v49  ;;  %v6004_v37 = vld [vmem:[%s7314_s7 + $0xb48] sm:$0xf]  ;;  %v6972_v38 = vld [vmem:[%s7314_s7 + $0xb54] sm:$0xf0]  ;;  %v5877_v42 = vor.u32 %v6940_v35, %v5876_v34 }
 0x16d   : > { %3871 = vmatpush.bf16.msra.mxu0 %v5669_v57  ;;  %v5604_v43 = vld [vmem:[%s7314_s7 + $0x828] sm:$0xf]  ;;  %v6872_v45 = vld [vmem:[%s7314_s7 + $0x834] sm:$0xf0]  ;;  %v6005_v49 = vor.u32 %v6972_v38, %v6004_v37 }
 0x16e   : > { %3884 = vmatpush.bf16.msra.mxu1 %v5797_v58  ;;  %v5732_v46 = vld [vmem:[%s7314_s7 + $0x928] sm:$0xf]  ;;  %v6904_v50 = vld [vmem:[%s7314_s7 + $0x934] sm:$0xf0]  ;;  %v5605_v57 = vor.u32 %v6872_v45, %v5604_v43 }
 0x16f   : > { %3897 = vmatpush.bf16.msra.mxu2 %v5925_v59  ;;  %v5860_v53 = vld [vmem:[%s7314_s7 + $0xa28] sm:$0xf]  ;;  %v6936_v54 = vld [vmem:[%s7314_s7 + $0xa34] sm:$0xf0]  ;;  %v5733_v60 = vor.u32 %v6904_v50, %v5732_v46 }
 0x170   : > { %3910 = vmatpush.bf16.msra.mxu3 %v6053_v63  ;;  %v5988_v55 = vld [vmem:[%s7314_s7 + $0xb28] sm:$0xf]  ;;  %v6968_v56 = vld [vmem:[%s7314_s7 + $0xb34] sm:$0xf0]  ;;  %v5861_v61 = vor.u32 %v6936_v54, %v5860_v53 }
 0x171   : > { %3872 = vmatpush.bf16.msra.mxu0 %v5653_v5  ;;  %v5588_v58 = vld [vmem:[%s7314_s7 + $0x808] sm:$0xf]  ;;  %v6868_v59 = vld [vmem:[%s7314_s7 + $0x814] sm:$0xf0]  ;;  %v3646_v1 = vpop.f32.mrf.mxu2  ;;  %v5989_v2 = vor.u32 %v6968_v56, %v5988_v55 }
 0x172   : > { %3885 = vmatpush.bf16.msra.mxu1 %v5781_v7  ;;  %v5716_v62 = vld [vmem:[%s7314_s7 + $0x908] sm:$0xf]  ;;  %v6900_v63 = vld [vmem:[%s7314_s7 + $0x914] sm:$0xf0]  ;;  %v3659_v7 = vpop.f32.mrf.mxu3  ;;  %v5589_v11 = vor.u32 %v6868_v59, %v5588_v58 }
 0x173   : > { %3898 = vmatpush.bf16.msra.mxu2 %v5909_v8  ;;  %v5844_v0 = vld [vmem:[%s7314_s7 + $0xa08] sm:$0xf]  ;;  %v6932_v3 = vld [vmem:[%s7314_s7 + $0xa14] sm:$0xf0]  ;;  %v5717_v16 = vor.u32 %v6900_v63, %v5716_v62 }
 0x174   : > { %3911 = vmatpush.bf16.msra.mxu3 %v6037_v13  ;;  %v5972_v4 = vld [vmem:[%s7314_s7 + $0xb08] sm:$0xf]  ;;  %v6964_v5 = vld [vmem:[%s7314_s7 + $0xb14] sm:$0xf0]  ;;  %v5845_v17 = vor.u32 %v6932_v3, %v5844_v0 }
 0x175   : > { %3873 = vmatpush.bf16.msra.mxu0 %v5637_v20  ;;  %v6212_v8 = vld [vmem:[%s7314_s7 + $0xce8] sm:$0xf]  ;;  %v7024_v9 = vld [vmem:[%s7314_s7 + $0xcf4] sm:$0xf0] }
 0x176   : > { %3886 = vmatpush.bf16.msra.mxu1 %v5765_v21  ;;  %v6340_v10 = vld [vmem:[%s7314_s7 + $0xde8] sm:$0xf]  ;;  %v7056_v13 = vld [vmem:[%s7314_s7 + $0xdf4] sm:$0xf0]  ;;  %v5973_v21 = vor.u32 %v6964_v5, %v5972_v4 }
 0x177   : > { %3899 = vmatpush.bf16.msra.mxu2 %v5893_v26  ;;  %v6468_v14 = vld [vmem:[%s7314_s7 + $0xee8] sm:$0xf]  ;;  %v7088_v15 = vld [vmem:[%s7314_s7 + $0xef4] sm:$0xf0]  ;;  %v6213_v26 = vor.u32 %v7024_v9, %v6212_v8  ;;  %v6341_v48 = vor.u32 %v7056_v13, %v6340_v10 }
 0x178   : > { %3912 = vmatpush.bf16.msra.mxu3 %v6021_v33  ;;  %v6596_v19 = vld [vmem:[%s7314_s7 + $0xfe8] sm:$0xf]  ;;  %v7120_v20 = vld [vmem:[%s7314_s7 + $0xff4] sm:$0xf0]  ;;  %v6469_v51 = vor.u32 %v7088_v15, %v6468_v14 }
 0x179   : > { %3874 = vmatpush.bf16.msra.mxu0 %v5621_v39  ;;  %v6196_v29 = vld [vmem:[%s7314_s7 + $0xcc8] sm:$0xf]  ;;  %v7020_v33 = vld [vmem:[%s7314_s7 + $0xcd4] sm:$0xf0]  ;;  %v6597_v34 = vor.u32 %v7120_v20, %v6596_v19 }
 0x17a   : > { %3887 = vmatpush.bf16.msra.mxu1 %v5749_v41  ;;  %v6324_v18 = vld [vmem:[%s7314_s7 + $0xdc8] sm:$0xf]  ;;  %v7052_v35 = vld [vmem:[%s7314_s7 + $0xdd4] sm:$0xf0]  ;;  %v6197_v41 = vor.u32 %v7020_v33, %v6196_v29 }
 0x17b   : > { %3900 = vmatpush.bf16.msra.mxu2 %v5877_v42  ;;  %v6452_v37 = vld [vmem:[%s7314_s7 + $0xec8] sm:$0xf]  ;;  %v7084_v38 = vld [vmem:[%s7314_s7 + $0xed4] sm:$0xf0]  ;;  %v6325_v42 = vor.u32 %v7052_v35, %v6324_v18  ;;  %v3619_v18 = vadd.f32 %v8046_v6, %v7992_v44 }
 0x17c   : > { %3913 = vmatpush.bf16.msra.mxu3 %v6005_v49  ;;  %v6580_v39 = vld [vmem:[%s7314_s7 + $0xfc8] sm:$0xf]  ;;  %v7116_v40 = vld [vmem:[%s7314_s7 + $0xfd4] sm:$0xf0]  ;;  %v6453_v43 = vor.u32 %v7084_v38, %v6452_v37 }
 0x17d   : > { %3875 = vmatpush.bf16.msra.mxu0 %v5605_v57  ;;  %v6180_v45 = vld [vmem:[%s7314_s7 + $0xca8] sm:$0xf]  ;;  %v7016_v46 = vld [vmem:[%s7314_s7 + $0xcb4] sm:$0xf0]  ;;  %v6581_v50 = vor.u32 %v7116_v40, %v6580_v39 }
 0x17e   : > { %3888 = vmatpush.bf16.msra.mxu1 %v5733_v60  ;;  %v6308_v47 = vld [vmem:[%s7314_s7 + $0xda8] sm:$0xf]  ;;  %v7171_v49 = vld.sshfl [vmem:[#allocation1] sm:$0xff pattern:$0x73625140] }
 0x17f   : > { %3901 = vmatpush.bf16.msra.mxu2 %v5861_v61  ;;  %v7048_v53 = vld [vmem:[%s7314_s7 + $0xdb4] sm:$0xf0]  ;;  %v6436_v54 = vld [vmem:[%s7314_s7 + $0xea8] sm:$0xf]  ;;  %v6181_v61 = vor.u32 %v7016_v46, %v6180_v45 }
 0x180   : > { %3914 = vmatpush.bf16.msra.mxu3 %v5989_v2  ;;  %v7080_v55 = vld [vmem:[%s7314_s7 + $0xeb4] sm:$0xf0]  ;;  %v7172_v56 = vld.sshfl [vmem:[#allocation1 + $0x10] sm:$0xff pattern:$0x73625140]  ;;  %v6309_v62 = vor.u32 %v7048_v53, %v6308_v47  ;;  %v3632_v53 = vadd.f32 %v8051_v12, %v3619_v18 }
 0x181   : > { %3876 = vmatpush.bf16.msra.mxu0 %v5589_v11  ;;  %v7173_v57 = vld.sshfl [vmem:[#allocation1 + $0x8] sm:$0xff pattern:$0x73625140]  ;;  %v7112_v59 = vld [vmem:[%s7314_s7 + $0xfb4] sm:$0xf0]  ;;  %v6437_v63 = vor.u32 %v7080_v55, %v6436_v54 }
 0x182   : > { %3889 = vmatpush.bf16.msra.mxu1 %v5717_v16  ;;  %v6564_v58 = vld [vmem:[%s7314_s7 + $0xfa8] sm:$0xf]  ;;  %v7174_v60 = vld.sshfl [vmem:[#allocation1 + $0x18] sm:$0xff pattern:$0x73625140] }
 0x183   : > { %3902 = vmatpush.bf16.msra.mxu2 %v5845_v17  ;;  %v6164_v0 = vld [vmem:[%s7314_s7 + $0xc88] sm:$0xf]  ;;  %v7012_v1 = vld [vmem:[%s7314_s7 + $0xc94] sm:$0xf0]  ;;  %v6565_v3 = vor.u32 %v7112_v59, %v6564_v58  ;;  %v8116_v8 = vpop.f32.mrf.mxu0 }
 0x184   : > { %3915 = vmatpush.bf16.msra.mxu3 %v5973_v21  ;;  %3877 = vmatmul.bf16.vlgmr.msra.gmra.mxu0 %v7171_v49  ;;  %v6292_v2 = vld [vmem:[%s7314_s7 + $0xd88] sm:$0xf]  ;;  %v7044_v4 = vld [vmem:[%s7314_s7 + $0xd94] sm:$0xf0]  ;;  %v6165_v11 = vor.u32 %v7012_v1, %v6164_v0  ;;  %v8120_v13 = vpop.f32.mrf.mxu1 }
 0x185   : > { %3921 = vmatpush.bf16.msrb.mxu0 %v6213_v26  ;;  %3890 = vmatmul.bf16.vlgmr.msra.gmra.mxu1 %v7173_v57  ;;  %v6420_v5 = vld [vmem:[%s7314_s7 + $0xe88] sm:$0xf]  ;;  %v7076_v7 = vld [vmem:[%s7314_s7 + $0xe94] sm:$0xf0]  ;;  %v6293_v14 = vor.u32 %v7044_v4, %v6292_v2 }
 0x186   : > { %3934 = vmatpush.bf16.msrb.mxu1 %v6341_v48  ;;  %3903 = vmatmul.bf16.vlgmr.msra.gmra.mxu2 %v7172_v56  ;;  %v6548_v9 = vld [vmem:[%s7314_s7 + $0xf88] sm:$0xf]  ;;  %v7108_v10 = vld [vmem:[%s7314_s7 + $0xf94] sm:$0xf0]  ;;  %v6421_v15 = vor.u32 %v7076_v7, %v6420_v5 }
 0x187   : > { %3947 = vmatpush.bf16.msrb.mxu2 %v6469_v51  ;;  %3916 = vmatmul.bf16.vlgmr.msra.gmra.mxu3 %v7174_v60  ;;  %v6148_v16 = vld [vmem:[%s7314_s7 + $0xc68] sm:$0xf]  ;;  %v7008_v17 = vld [vmem:[%s7314_s7 + $0xc74] sm:$0xf0]  ;;  %v6549_v20 = vor.u32 %v7108_v10, %v6548_v9 }
 0x188   : > { %3960 = vmatpush.bf16.msrb.mxu3 %v6597_v34  ;;  %v6276_v19 = vld [vmem:[%s7314_s7 + $0xd68] sm:$0xf]  ;;  %v7040_v21 = vld [vmem:[%s7314_s7 + $0xd74] sm:$0xf0]  ;;  %v6149_v33 = vor.u32 %v7008_v17, %v6148_v16 }
 0x189   : > { %3922 = vmatpush.bf16.msrb.mxu0 %v6197_v41  ;;  %v6404_v26 = vld [vmem:[%s7314_s7 + $0xe68] sm:$0xf]  ;;  %v7072_v48 = vld [vmem:[%s7314_s7 + $0xe74] sm:$0xf0]  ;;  %v6277_v34 = vor.u32 %v7040_v21, %v6276_v19  ;;  %v4678_v19 = vld [vmem:[%s7314_s7 + $0xf8] sm:$0xf0] }
 0x18a   : > { %3935 = vmatpush.bf16.msrb.mxu1 %v6325_v42  ;;  %v6532_v51 = vld [vmem:[%s7314_s7 + $0xf68] sm:$0xf]  ;;  %v7104_v29 = vld [vmem:[%s7314_s7 + $0xf74] sm:$0xf0]  ;;  %v6405_v35 = vor.u32 %v7072_v48, %v6404_v26  ;;  %v4806_v48 = vld [vmem:[%s7314_s7 + $0x1f8] sm:$0xf0] }
 0x18b   : > { %3948 = vmatpush.bf16.msrb.mxu2 %v6453_v43  ;;  %v6132_v37 = vld [vmem:[%s7314_s7 + $0xc48] sm:$0xf]  ;;  %v7004_v38 = vld [vmem:[%s7314_s7 + $0xc54] sm:$0xf0]  ;;  %v6533_v40 = vor.u32 %v7104_v29, %v6532_v51  ;;  %v8135_v41 = vpop.f32.mrf.mxu2  ;;  %v3672_v47 = vpop.f32.mrf.mxu0  ;;  %v6702_v51 = vld [vmem:[%s7314_s7 + $0x2ec] sm:$0xf] }
 0x18c   : > { %3961 = vmatpush.bf16.msrb.mxu3 %v6581_v50  ;;  %v6260_v39 = vld [vmem:[%s7314_s7 + $0xd48] sm:$0xf]  ;;  %v7036_v42 = vld [vmem:[%s7314_s7 + $0xd54] sm:$0xf0]  ;;  %v8140_v46 = vpop.f32.mrf.mxu3  ;;  %v6133_v49 = vor.u32 %v7004_v38, %v6132_v37  ;;  %v3685_v50 = vpop.f32.mrf.mxu1  ;;  %v4934_v29 = vld [vmem:[%s7314_s7 + $0x2f8] sm:$0xf0] }
 0x18d   : > { %3923 = vmatpush.bf16.msrb.mxu0 %v6181_v61  ;;  %v6388_v43 = vld [vmem:[%s7314_s7 + $0xe48] sm:$0xf]  ;;  %v7068_v45 = vld [vmem:[%s7314_s7 + $0xe54] sm:$0xf0]  ;;  %v6261_v54 = vor.u32 %v7036_v42, %v6260_v39  ;;  %v5062_v37 = vld [vmem:[%s7314_s7 + $0x3f8] sm:$0xf0] }
 0x18e   : > { %3936 = vmatpush.bf16.msrb.mxu1 %v6309_v62  ;;  %v6516_v44 = vld [vmem:[%s7314_s7 + $0xf48] sm:$0xf]  ;;  %v7100_v6 = vld [vmem:[%s7314_s7 + $0xf54] sm:$0xf0]  ;;  %v6389_v55 = vor.u32 %v7068_v45, %v6388_v43  ;;  %v4937_v43 = vor.u32 %v6702_v51, %v4934_v29  ;;  %v6634_v45 = vld [vmem:[%s7314_s7 + $0xcc] sm:$0xf] }
 0x18f   : > { %3949 = vmatpush.bf16.msrb.mxu2 %v6437_v63  ;;  %v6116_v56 = vld [vmem:[%s7314_s7 + $0xc28] sm:$0xf]  ;;  %v7000_v57 = vld [vmem:[%s7314_s7 + $0xc34] sm:$0xf0]  ;;  %v6517_v59 = vor.u32 %v7100_v6, %v6516_v44  ;;  %v6666_v44 = vld [vmem:[%s7314_s7 + $0x1cc] sm:$0xf] }
 0x190   : > { %3962 = vmatpush.bf16.msrb.mxu3 %v6565_v3  ;;  %v6244_v58 = vld [vmem:[%s7314_s7 + $0xd28] sm:$0xf]  ;;  %v7032_v60 = vld [vmem:[%s7314_s7 + $0xd34] sm:$0xf0]  ;;  %v6117_v0 = vor.u32 %v7000_v57, %v6116_v56  ;;  %v3645_v3 = vadd.f32 %v8061_v32, %v3632_v53  ;;  %v6638_v32 = vld [vmem:[%s7314_s7 + $0xec] sm:$0xf] }
 0x191   : > { %3924 = vmatpush.bf16.msrb.mxu0 %v6165_v11  ;;  %v6372_v61 = vld [vmem:[%s7314_s7 + $0xe28] sm:$0xf]  ;;  %v7064_v62 = vld [vmem:[%s7314_s7 + $0xe34] sm:$0xf0]  ;;  %v6245_v4 = vor.u32 %v7032_v60, %v6244_v58  ;;  %v4681_v39 = vor.u32 %v6638_v32, %v4678_v19  ;;  %v4790_v47 = vld [vmem:[%s7314_s7 + $0x1d8] sm:$0xf0] }
 0x192   : > { %3937 = vmatpush.bf16.msrb.mxu1 %v6293_v14  ;;  %v6500_v63 = vld [vmem:[%s7314_s7 + $0xf28] sm:$0xf]  ;;  %v7096_v12 = vld [vmem:[%s7314_s7 + $0xf34] sm:$0xf0]  ;;  %v6373_v5 = vor.u32 %v7064_v62, %v6372_v61  ;;  %v4918_v50 = vld [vmem:[%s7314_s7 + $0x2d8] sm:$0xf0]  ;;  %v4793_v56 = vor.u32 %v6666_v44, %v4790_v47 }
 0x193   : > { %3950 = vmatpush.bf16.msrb.mxu2 %v6421_v15  ;;  %v6100_v1 = vld [vmem:[%s7314_s7 + $0xc08] sm:$0xf]  ;;  %v6996_v2 = vld [vmem:[%s7314_s7 + $0xc14] sm:$0xf0]  ;;  %v6501_v11 = vor.u32 %v7096_v12, %v6500_v63  ;;  %v3698_v17 = vpop.f32.mrf.mxu2  ;;  %v6730_v53 = vld [vmem:[%s7314_s7 + $0x3cc] sm:$0xf] }
 0x194   : > { %3963 = vmatpush.bf16.msrb.mxu3 %v6549_v20  ;;  %v6228_v7 = vld [vmem:[%s7314_s7 + $0xd08] sm:$0xf]  ;;  %v7028_v9 = vld [vmem:[%s7314_s7 + $0xd14] sm:$0xf0]  ;;  %v6670_v20 = vld [vmem:[%s7314_s7 + $0x1ec] sm:$0xf]  ;;  %v3711_v21 = vpop.f32.mrf.mxu3  ;;  %v6101_v26 = vor.u32 %v6996_v2, %v6100_v1 }
 0x195   : > { %3925 = vmatpush.bf16.msrb.mxu0 %v6149_v33  ;;  %v6356_v10 = vld [vmem:[%s7314_s7 + $0xe08] sm:$0xf]  ;;  %v7060_v14 = vld [vmem:[%s7314_s7 + $0xe14] sm:$0xf0]  ;;  %v3658_v33 = vadd.f32 %v8066_v36, %v3645_v3  ;;  %v6229_v18 = vor.u32 %v7028_v9, %v6228_v7  ;;  %v4809_v42 = vor.u32 %v6670_v20, %v4806_v48  ;;  %v4662_v36 = vld [vmem:[%s7314_s7 + $0xd8] sm:$0xf0] }
 0x196   : > { %3938 = vmatpush.bf16.msrb.mxu1 %v6277_v34  ;;  %v6484_v15 = vld [vmem:[%s7314_s7 + $0xf08] sm:$0xf]  ;;  %v7092_v16 = vld [vmem:[%s7314_s7 + $0xf14] sm:$0xf0]  ;;  %v6357_v34 = vor.u32 %v7060_v14, %v6356_v10  ;;  %v6630_v58 = vld [vmem:[%s7314_s7 + $0xac] sm:$0xf] }
 0x197   : > { %3951 = vmatpush.bf16.msrb.mxu2 %v6405_v35  ;;  %v6734_v35 = vld [vmem:[%s7314_s7 + $0x3ec] sm:$0xf]  ;;  %v6485_v38 = vor.u32 %v7092_v16, %v6484_v15  ;;  %v7175_v61 = vld.sshfl [vmem:[#allocation1 + $0x20] sm:$0xff pattern:$0x73625140] }
 0x198   : > { %3964 = vmatpush.bf16.msrb.mxu3 %v6533_v40  ;;  %v3671_v40 = vadd.f32 %v8116_v8, %v3658_v33  ;;  %v5065_v6 = vor.u32 %v6734_v35, %v5062_v37  ;;  %v4665_v8 = vor.u32 %v6634_v45, %v4662_v36  ;;  %v6662_v60 = vld [vmem:[%s7314_s7 + $0x1ac] sm:$0xf]  ;;  %v4774_v63 = vld [vmem:[%s7314_s7 + $0x1b8] sm:$0xf0] }
 0x199   : > { %3926 = vmatpush.bf16.msrb.mxu0 %v6133_v49  ;;  %v6698_v49 = vld [vmem:[%s7314_s7 + $0x2cc] sm:$0xf]  ;;  %v4758_v16 = vld [vmem:[%s7314_s7 + $0x198] sm:$0xf0] }
 0x19a   : > { %3939 = vmatpush.bf16.msrb.mxu1 %v6261_v54  ;;  %v5046_v54 = vld [vmem:[%s7314_s7 + $0x3d8] sm:$0xf0]  ;;  %v4921_v57 = vor.u32 %v6698_v49, %v4918_v50  ;;  %v6694_v12 = vld [vmem:[%s7314_s7 + $0x2ac] sm:$0xf] }
 0x19b   : > { %3952 = vmatpush.bf16.msrb.mxu2 %v6389_v55  ;;  %v3684_v55 = vadd.f32 %v8120_v13, %v3671_v40  ;;  %v5049_v62 = vor.u32 %v6730_v53, %v5046_v54  ;;  %v7176_v13 = vld.sshfl [vmem:[#allocation1 + $0x30] sm:$0xff pattern:$0x73625140]  ;;  %v7177_v2 = vld.sshfl [vmem:[#allocation1 + $0x28] sm:$0xff pattern:$0x73625140] }
 0x19c   : > { %3965 = vmatpush.bf16.msrb.mxu3 %v6517_v59  ;;  %v4646_v59 = vld [vmem:[%s7314_s7 + $0xb8] sm:$0xf0]  ;;  %v6726_v3 = vld [vmem:[%s7314_s7 + $0x3ac] sm:$0xf] }
 0x19d   : > { %3927 = vmatpush.bf16.msrb.mxu0 %v6117_v0  ;;  %v4902_v0 = vld [vmem:[%s7314_s7 + $0x2b8] sm:$0xf0]  ;;  %v3697_v1 = vadd.f32 %v8135_v41, %v3684_v55  ;;  %v4649_v7 = vor.u32 %v6630_v58, %v4646_v59  ;;  %v4777_v41 = vor.u32 %v6662_v60, %v4774_v63  ;;  %v6626_v10 = vld [vmem:[%s7314_s7 + $0x8c] sm:$0xf] }
 0x19e   : > { %3940 = vmatpush.bf16.msrb.mxu1 %v6245_v4  ;;  %v5030_v4 = vld [vmem:[%s7314_s7 + $0x3b8] sm:$0xf0]  ;;  %v4905_v9 = vor.u32 %v6694_v12, %v4902_v0  ;;  %v6658_v14 = vld [vmem:[%s7314_s7 + $0x18c] sm:$0xf] }
 0x19f   : > { %3953 = vmatpush.bf16.msrb.mxu2 %v6373_v5  ;;  %v7178_v5 = vld.sshfl [vmem:[#allocation1 + $0x38] sm:$0xff pattern:$0x73625140]  ;;  %v5033_v15 = vor.u32 %v6726_v3, %v5030_v4  ;;  %v6690_v17 = vld [vmem:[%s7314_s7 + $0x28c] sm:$0xf]  ;;  %v3710_v19 = vadd.f32 %v8140_v46, %v3697_v1  ;;  %v4761_v33 = vor.u32 %v6658_v14, %v4758_v16 }
 0x1a0   : > { %3966 = vmatpush.bf16.msrb.mxu3 %v6501_v11  ;;  %v4630_v11 = vld [vmem:[%s7314_s7 + $0x98] sm:$0xf0]  ;;  %v6722_v21 = vld [vmem:[%s7314_s7 + $0x38c] sm:$0xf] }
 0x1a1   : > { %3928 = vmatpush.bf16.msrb.mxu0 %v6101_v26  ;;  %v4886_v32 = vld [vmem:[%s7314_s7 + $0x298] sm:$0xf0]  ;;  %v3722_v20 = vpop.f32.mrf.mxu0  ;;  %v4633_v48 = vor.u32 %v6626_v10, %v4630_v11  ;;  %v6654_v46 = vld [vmem:[%s7314_s7 + $0x16c] sm:$0xf] }
 0x1a2   : > { %3941 = vmatpush.bf16.msrb.mxu1 %v6229_v18  ;;  %v5014_v26 = vld [vmem:[%s7314_s7 + $0x398] sm:$0xf0]  ;;  %v3735_v51 = vpop.f32.mrf.mxu1  ;;  %v3723_v29 = vadd.f32 %v3722_v20, %v3710_v19  ;;  %v4889_v18 = vor.u32 %v6690_v17, %v4886_v32  ;;  %v6618_v47 = vld [vmem:[%s7314_s7 + $0x4c] sm:$0xf] }
 0x1a3   : > { %3954 = vmatpush.bf16.msrb.mxu2 %v6357_v34  ;;  %v6622_v34 = vld [vmem:[%s7314_s7 + $0x6c] sm:$0xf]  ;;  %v4614_v35 = vld [vmem:[%s7314_s7 + $0x78] sm:$0xf0]  ;;  %v5017_v37 = vor.u32 %v6722_v21, %v5014_v26 }
 0x1a4   : > { %3967 = vmatpush.bf16.msrb.mxu3 %v6485_v38  ;;  %3929 = vmatmul.bf16.vlgmr.msrb.gmra.mxu0 %v7175_v61  ;;  %v4742_v38 = vld [vmem:[%s7314_s7 + $0x178] sm:$0xf0]  ;;  %v4617_v45 = vor.u32 %v6622_v34, %v4614_v35  ;;  %v3736_v36 = vadd.f32 %v3735_v51, %v3723_v29  ;;  %v6650_v50 = vld [vmem:[%s7314_s7 + $0x14c] sm:$0xf] }
 0x1a5   : > { %3973 = vmatpush.bf16.msra.mxu0 %v4681_v39  ;;  %3942 = vmatmul.bf16.vlgmr.msrb.gmra.mxu1 %v7177_v2  ;;  %v6686_v39 = vld [vmem:[%s7314_s7 + $0x26c] sm:$0xf]  ;;  %v4870_v40 = vld [vmem:[%s7314_s7 + $0x278] sm:$0xf0]  ;;  %v4745_v44 = vor.u32 %v6654_v46, %v4742_v38 }
 0x1a6   : > { %3986 = vmatpush.bf16.msra.mxu1 %v4809_v42  ;;  %3955 = vmatmul.bf16.vlgmr.msrb.gmra.mxu2 %v7176_v13  ;;  %v6718_v42 = vld [vmem:[%s7314_s7 + $0x36c] sm:$0xf]  ;;  %v4598_v49 = vld [vmem:[%s7314_s7 + $0x58] sm:$0xf0] }
 0x1a7   : > { %3999 = vmatpush.bf16.msra.mxu2 %v4937_v43  ;;  %3968 = vmatmul.bf16.vlgmr.msrb.gmra.mxu3 %v7178_v5  ;;  %v4998_v43 = vld [vmem:[%s7314_s7 + $0x378] sm:$0xf0]  ;;  %v6682_v55 = vld [vmem:[%s7314_s7 + $0x24c] sm:$0xf] }
 0x1a8   : > { %4012 = vmatpush.bf16.msra.mxu3 %v5065_v6  ;;  %v4873_v6 = vor.u32 %v6686_v39, %v4870_v40  ;;  %v5001_v53 = vor.u32 %v6718_v42, %v4998_v43  ;;  %v6714_v59 = vld [vmem:[%s7314_s7 + $0x34c] sm:$0xf]  ;;  %v4982_v60 = vld [vmem:[%s7314_s7 + $0x358] sm:$0xf0] }
 0x1a9   : > { %3974 = vmatpush.bf16.msra.mxu0 %v4665_v8  ;;  %v3748_v54 = vpop.f32.mrf.mxu2  ;;  %v4726_v8 = vld [vmem:[%s7314_s7 + $0x158] sm:$0xf0]  ;;  %v3724_v61 = vpop.f32.mrf.mxu0  ;;  %v6614_v13 = vld [vmem:[%s7314_s7 + $0x2c] sm:$0xf]  ;;  %v4985_v4 = vor.u32 %v6714_v59, %v4982_v60 }
 0x1aa   : > { %3987 = vmatpush.bf16.msra.mxu1 %v4793_v56  ;;  %v4854_v56 = vld [vmem:[%s7314_s7 + $0x258] sm:$0xf0]  ;;  %v3761_v58 = vpop.f32.mrf.mxu3  ;;  %v3737_v63 = vpop.f32.mrf.mxu1  ;;  %v4729_v0 = vor.u32 %v6650_v50, %v4726_v8  ;;  %v6646_v3 = vld [vmem:[%s7314_s7 + $0x12c] sm:$0xf] }
 0x1ab   : > { %4000 = vmatpush.bf16.msra.mxu2 %v4921_v57  ;;  %v3749_v57 = vadd.f32 %v3748_v54, %v3736_v36  ;;  %v4857_v1 = vor.u32 %v6682_v55, %v4854_v56  ;;  %v4582_v2 = vld [vmem:[%s7314_s7 + $0x38] sm:$0xf0]  ;;  %v6710_v11 = vld [vmem:[%s7314_s7 + $0x32c] sm:$0xf] }
 0x1ac   : > { %4013 = vmatpush.bf16.msra.mxu3 %v5049_v62  ;;  %v4601_v62 = vor.u32 %v6618_v47, %v4598_v49  ;;  %v4710_v5 = vld [vmem:[%s7314_s7 + $0x138] sm:$0xf0]  ;;  %v6610_v16 = vld [vmem:[%s7314_s7 + $0xc] sm:$0xf] }
 0x1ad   : > { %3975 = vmatpush.bf16.msra.mxu0 %v4649_v7  ;;  %v3762_v12 = vadd.f32 %v3761_v58, %v3749_v57  ;;  %v6678_v7 = vld [vmem:[%s7314_s7 + $0x22c] sm:$0xf]  ;;  %v4966_v14 = vld [vmem:[%s7314_s7 + $0x338] sm:$0xf0]  ;;  %v4713_v20 = vor.u32 %v6646_v3, %v4710_v5 }
 0x1ae   : > { %3988 = vmatpush.bf16.msra.mxu1 %v4777_v41  ;;  %v4838_v41 = vld [vmem:[%s7314_s7 + $0x238] sm:$0xf0]  ;;  %v6642_v32 = vld [vmem:[%s7314_s7 + $0x10c] sm:$0xf] }
 0x1af   : > { %4001 = vmatpush.bf16.msra.mxu2 %v4905_v9  ;;  %v230_v9 = vld [vmem:[#allocation2] sm:$0xff]  ;;  %v4185_v10 = vrot.slane %v3762_v12, 4  ;;  %v4566_v17 = vld [vmem:[%s7314_s7 + $0x18] sm:$0xf0]  ;;  %v4841_v21 = vor.u32 %v6678_v7, %v4838_v41 }
 0x1b0   : > { %4014 = vmatpush.bf16.msra.mxu3 %v5033_v15  ;;  %v4585_v15 = vor.u32 %v6614_v13, %v4582_v2  ;;  %v4694_v26 = vld [vmem:[%s7314_s7 + $0x118] sm:$0xf0]  ;;  %v6766_v35 = vld [vmem:[%s7314_s7 + $0x4ec] sm:$0xf]  ;;  %v4569_v40 = vor.u32 %v6610_v16, %v4566_v17 }
 0x1b1   : > { %3976 = vmatpush.bf16.msra.mxu0 %v4633_v48  ;;  %v4188_v19 = vsel %vm4187_vm0, %v7922_v52, %v4185_v10  ;;  %v6674_v48 = vld [vmem:[%s7314_s7 + $0x20c] sm:$0xf]  ;;  %v4822_v51 = vld [vmem:[%s7314_s7 + $0x218] sm:$0xf0]  ;;  %v3750_v52 = vpop.f32.mrf.mxu2 }
 0x1b2   : > { %3989 = vmatpush.bf16.msra.mxu1 %v4761_v33  ;;  %v4192_v29 = vadd.f32 %v4188_v19, %v230_v9  ;;  %v4969_v33 = vor.u32 %v6710_v11, %v4966_v14  ;;  %v4950_v34 = vld [vmem:[%s7314_s7 + $0x318] sm:$0xf0]  ;;  %v3763_v39 = vpop.f32.mrf.mxu3  ;;  %v6830_v42 = vld [vmem:[%s7314_s7 + $0x6ec] sm:$0xf]  ;;  %v4825_v36 = vor.u32 %v6674_v48, %v4822_v51 }
 0x1b3   : > { %4002 = vmatpush.bf16.msra.mxu2 %v4889_v18  ;;  %v6706_v18 = vld [vmem:[%s7314_s7 + $0x30c] sm:$0xf]  ;;  %v5190_v46 = vld [vmem:[%s7314_s7 + $0x4f8] sm:$0xf0] }
 0x1b4   : > { %4015 = vmatpush.bf16.msra.mxu3 %v5017_v37  ;;  %v6798_v37 = vld [vmem:[%s7314_s7 + $0x5ec] sm:$0xf]  ;;  %v5318_v38 = vld [vmem:[%s7314_s7 + $0x5f8] sm:$0xf0]  ;;  %4194 = vst [vmem:[#allocation2] sm:$0xff] %v4192_v29  ;;  %v4953_v47 = vor.u32 %v6706_v18, %v4950_v34  ;;  %v5193_v49 = vor.u32 %v6766_v35, %v5190_v46 }
 0x1b5   : > { %3977 = vmatpush.bf16.msra.mxu0 %v4617_v45  ;;  %v5446_v43 = vld [vmem:[%s7314_s7 + $0x6f8] sm:$0xf0]  ;;  %v4697_v45 = vor.u32 %v6642_v32, %v4694_v26  ;;  %v5321_v50 = vor.u32 %v6798_v37, %v5318_v38  ;;  %v6762_v54 = vld [vmem:[%s7314_s7 + $0x4cc] sm:$0xf] }
 0x1b6   : > { %3990 = vmatpush.bf16.msra.mxu1 %v4745_v44  ;;  %v6862_v44 = vld [vmem:[%s7314_s7 + $0x7ec] sm:$0xf]  ;;  %v5174_v8 = vld [vmem:[%s7314_s7 + $0x4d8] sm:$0xf0] }
 0x1b7   : > { %4003 = vmatpush.bf16.msra.mxu2 %v4873_v6  ;;  %v5574_v6 = vld [vmem:[%s7314_s7 + $0x7f8] sm:$0xf0]  ;;  %v6794_v55 = vld [vmem:[%s7314_s7 + $0x5cc] sm:$0xf] }
 0x1b8   : > { %4016 = vmatpush.bf16.msra.mxu3 %v5001_v53  ;;  %v5449_v53 = vor.u32 %v6830_v42, %v5446_v43  ;;  %v5577_v56 = vor.u32 %v6862_v44, %v5574_v6  ;;  %v5302_v57 = vld [vmem:[%s7314_s7 + $0x5d8] sm:$0xf0]  ;;  %v6826_v58 = vld [vmem:[%s7314_s7 + $0x6cc] sm:$0xf] }
 0x1b9   : > { %3978 = vmatpush.bf16.msra.mxu0 %v4601_v62  ;;  %v5430_v59 = vld [vmem:[%s7314_s7 + $0x6d8] sm:$0xf0]  ;;  %v6858_v60 = vld [vmem:[%s7314_s7 + $0x7cc] sm:$0xf]  ;;  %v5177_v62 = vor.u32 %v6762_v54, %v5174_v8  ;;  %v5305_v63 = vor.u32 %v6794_v55, %v5302_v57 }
 0x1ba   : > { %3991 = vmatpush.bf16.msra.mxu1 %v4729_v0  ;;  %v5558_v61 = vld [vmem:[%s7314_s7 + $0x7d8] sm:$0xf0]  ;;  %v5433_v12 = vor.u32 %v6826_v58, %v5430_v59  ;;  %v6758_v0 = vld [vmem:[%s7314_s7 + $0x4ac] sm:$0xf] }
 0x1bb   : > { %4004 = vmatpush.bf16.msra.mxu2 %v4857_v1  ;;  %v5158_v1 = vld [vmem:[%s7314_s7 + $0x4b8] sm:$0xf0]  ;;  %v6790_v13 = vld [vmem:[%s7314_s7 + $0x5ac] sm:$0xf]  ;;  %v5561_v2 = vor.u32 %v6858_v60, %v5558_v61 }
 0x1bc   : > { %4017 = vmatpush.bf16.msra.mxu3 %v4985_v4  ;;  %v5286_v3 = vld [vmem:[%s7314_s7 + $0x5b8] sm:$0xf0]  ;;  %v6822_v4 = vld [vmem:[%s7314_s7 + $0x6ac] sm:$0xf]  ;;  %v5161_v9 = vor.u32 %v6758_v0, %v5158_v1 }
 0x1bd   : > { %3979 = vmatpush.bf16.msra.mxu0 %v4585_v15  ;;  %v5414_v5 = vld [vmem:[%s7314_s7 + $0x6b8] sm:$0xf0]  ;;  %v6854_v7 = vld [vmem:[%s7314_s7 + $0x7ac] sm:$0xf]  ;;  %v5289_v10 = vor.u32 %v6790_v13, %v5286_v3 }
 0x1be   : > { %3992 = vmatpush.bf16.msra.mxu1 %v4713_v20  ;;  %v5542_v41 = vld [vmem:[%s7314_s7 + $0x7b8] sm:$0xf0]  ;;  %v5417_v11 = vor.u32 %v6822_v4, %v5414_v5  ;;  %v6786_v15 = vld [vmem:[%s7314_s7 + $0x58c] sm:$0xf] }
 0x1bf   : > { %4005 = vmatpush.bf16.msra.mxu2 %v4841_v21  ;;  %v5142_v14 = vld [vmem:[%s7314_s7 + $0x498] sm:$0xf0]  ;;  %v6850_v32 = vld [vmem:[%s7314_s7 + $0x78c] sm:$0xf] }
 0x1c0   : > { %4018 = vmatpush.bf16.msra.mxu3 %v4969_v33  ;;  %v5270_v16 = vld [vmem:[%s7314_s7 + $0x598] sm:$0xf0]  ;;  %v6750_v48 = vld [vmem:[%s7314_s7 + $0x46c] sm:$0xf] }
 0x1c1   : > { %3980 = vmatpush.bf16.msra.mxu0 %v4569_v40  ;;  %v5398_v17 = vld [vmem:[%s7314_s7 + $0x698] sm:$0xf0]  ;;  %v3774_v20 = vpop.f32.mrf.mxu0  ;;  %v5273_v21 = vor.u32 %v6786_v15, %v5270_v16  ;;  %v6782_v29 = vld [vmem:[%s7314_s7 + $0x56c] sm:$0xf] }
 0x1c2   : > { %3993 = vmatpush.bf16.msra.mxu1 %v4697_v45  ;;  %v5526_v19 = vld [vmem:[%s7314_s7 + $0x798] sm:$0xf0]  ;;  %v3787_v33 = vpop.f32.mrf.mxu1  ;;  %v6814_v35 = vld [vmem:[%s7314_s7 + $0x66c] sm:$0xf] }
 0x1c3   : > { %4006 = vmatpush.bf16.msra.mxu2 %v4825_v36  ;;  %v5126_v51 = vld [vmem:[%s7314_s7 + $0x478] sm:$0xf0]  ;;  %v5529_v18 = vor.u32 %v6850_v32, %v5526_v19  ;;  %v3788_v46 = vadd.f32 %v3787_v33, %v3774_v20  ;;  %v6846_v37 = vld [vmem:[%s7314_s7 + $0x76c] sm:$0xf] }
 0x1c4   : > { %4019 = vmatpush.bf16.msra.mxu3 %v4953_v47  ;;  %3981 = vmatmul.bf16.vlgmr.msra.gmra.mxu0 %v7423_v25  ;;  %v5545_v25 = vor.u32 %v6854_v7, %v5542_v41  ;;  %v5254_v34 = vld [vmem:[%s7314_s7 + $0x578] sm:$0xf0]  ;;  %v5129_v39 = vor.u32 %v6750_v48, %v5126_v51  ;;  %v6746_v43 = vld [vmem:[%s7314_s7 + $0x44c] sm:$0xf] }
 0x1c5   : > { %4025 = vmatpush.bf16.msrb.mxu0 %v5193_v49  ;;  %3994 = vmatmul.bf16.vlgmr.msra.gmra.mxu1 %v7428_v28  ;;  %v5382_v52 = vld [vmem:[%s7314_s7 + $0x678] sm:$0xf0]  ;;  %v5257_v40 = vor.u32 %v6782_v29, %v5254_v34  ;;  %v6778_v36 = vld [vmem:[%s7314_s7 + $0x54c] sm:$0xf] }
 0x1c6   : > { %4038 = vmatpush.bf16.msrb.mxu1 %v5321_v50  ;;  %4007 = vmatmul.bf16.vlgmr.msra.gmra.mxu2 %v7421_v24  ;;  %v6754_v24 = vld [vmem:[%s7314_s7 + $0x48c] sm:$0xf]  ;;  %v5510_v38 = vld [vmem:[%s7314_s7 + $0x778] sm:$0xf0]  ;;  %v5385_v42 = vor.u32 %v6814_v35, %v5382_v52 }
 0x1c7   : > { %4051 = vmatpush.bf16.msrb.mxu2 %v5449_v53  ;;  %4020 = vmatmul.bf16.vlgmr.msra.gmra.mxu3 %v7426_v27  ;;  %v6818_v27 = vld [vmem:[%s7314_s7 + $0x68c] sm:$0xf]  ;;  %v5145_v28 = vor.u32 %v6754_v24, %v5142_v14  ;;  %v5110_v45 = vld [vmem:[%s7314_s7 + $0x458] sm:$0xf0]  ;;  %v5513_v6 = vor.u32 %v6846_v37, %v5510_v38 }
 0x1c8   : > { %4064 = vmatpush.bf16.msrb.mxu3 %v5577_v56  ;;  %v5401_v26 = vor.u32 %v6818_v27, %v5398_v17  ;;  %v5238_v47 = vld [vmem:[%s7314_s7 + $0x558] sm:$0xf0]  ;;  %v6810_v49 = vld [vmem:[%s7314_s7 + $0x64c] sm:$0xf]  ;;  %v5113_v56 = vor.u32 %v6746_v43, %v5110_v45 }
 0x1c9   : > { %4026 = vmatpush.bf16.msrb.mxu0 %v5177_v62  ;;  %v3800_v44 = vpop.f32.mrf.mxu2  ;;  %v5366_v50 = vld [vmem:[%s7314_s7 + $0x658] sm:$0xf0]  ;;  %v6842_v8 = vld [vmem:[%s7314_s7 + $0x74c] sm:$0xf]  ;;  %v3776_v58 = vpop.f32.mrf.mxu0  ;;  %v5241_v59 = vor.u32 %v6778_v36, %v5238_v47 }
 0x1ca   : > { %4039 = vmatpush.bf16.msrb.mxu1 %v5305_v63  ;;  %v3801_v53 = vadd.f32 %v3800_v44, %v3788_v46  ;;  %v3813_v54 = vpop.f32.mrf.mxu3  ;;  %v5494_v55 = vld [vmem:[%s7314_s7 + $0x758] sm:$0xf0]  ;;  %v5369_v60 = vor.u32 %v6810_v49, %v5366_v50  ;;  %v6742_v61 = vld [vmem:[%s7314_s7 + $0x42c] sm:$0xf] }
 0x1cb   : > { %4052 = vmatpush.bf16.msrb.mxu2 %v5433_v12  ;;  %v5094_v62 = vld [vmem:[%s7314_s7 + $0x438] sm:$0xf0]  ;;  %v6774_v63 = vld [vmem:[%s7314_s7 + $0x52c] sm:$0xf]  ;;  %v3789_v12 = vpop.f32.mrf.mxu1  ;;  %v5497_v0 = vor.u32 %v6842_v8, %v5494_v55 }
 0x1cc   : > { %4065 = vmatpush.bf16.msrb.mxu3 %v5561_v2  ;;  %v8285_v57 = vadd.f32 %v3813_v54, %v3801_v53  ;;  %v5222_v1 = vld [vmem:[%s7314_s7 + $0x538] sm:$0xf0]  ;;  %v6806_v13 = vld [vmem:[%s7314_s7 + $0x62c] sm:$0xf]  ;;  %v5097_v5 = vor.u32 %v6742_v61, %v5094_v62 }
 0x1cd   : > { %4027 = vmatpush.bf16.msrb.mxu0 %v5161_v9  ;;  %v5350_v2 = vld [vmem:[%s7314_s7 + $0x638] sm:$0xf0]  ;;  %v6838_v3 = vld [vmem:[%s7314_s7 + $0x72c] sm:$0xf]  ;;  %v5225_v9 = vor.u32 %v6774_v63, %v5222_v1 }
 0x1ce   : > { %4040 = vmatpush.bf16.msrb.mxu1 %v5289_v10  ;;  %v5478_v4 = vld [vmem:[%s7314_s7 + $0x738] sm:$0xf0]  ;;  %v6738_v7 = vld [vmem:[%s7314_s7 + $0x40c] sm:$0xf]  ;;  %v5353_v10 = vor.u32 %v6806_v13, %v5350_v2 }
 0x1cf   : > { %4053 = vmatpush.bf16.msrb.mxu2 %v5417_v11  ;;  %v5078_v41 = vld [vmem:[%s7314_s7 + $0x418] sm:$0xf0]  ;;  %v6770_v11 = vld [vmem:[%s7314_s7 + $0x50c] sm:$0xf] }
 0x1d0   : > { %4066 = vmatpush.bf16.msrb.mxu3 %v5545_v25  ;;  %v5206_v24 = vld [vmem:[%s7314_s7 + $0x518] sm:$0xf0]  ;;  %v6802_v14 = vld [vmem:[%s7314_s7 + $0x60c] sm:$0xf]  ;;  %v5481_v25 = vor.u32 %v6838_v3, %v5478_v4 }
 0x1d1   : > { %4028 = vmatpush.bf16.msrb.mxu0 %v5145_v28  ;;  %v3802_v15 = vpop.f32.mrf.mxu2  ;;  %v5334_v16 = vld [vmem:[%s7314_s7 + $0x618] sm:$0xf0]  ;;  %v6834_v27 = vld [vmem:[%s7314_s7 + $0x70c] sm:$0xf]  ;;  %v5209_v29 = vor.u32 %v6770_v11, %v5206_v24 }
 0x1d2   : > { %4041 = vmatpush.bf16.msrb.mxu1 %v5273_v21  ;;  %v5462_v17 = vld [vmem:[%s7314_s7 + $0x718] sm:$0xf0]  ;;  %v3815_v32 = vpop.f32.mrf.mxu3  ;;  %v6894_v19 = vld [vmem:[%s7314_s7 + $0x8ec] sm:$0xf]  ;;  %v5081_v21 = vor.u32 %v6738_v7, %v5078_v41  ;;  %v5337_v33 = vor.u32 %v6802_v14, %v5334_v16 }
 0x1d3   : > { %4054 = vmatpush.bf16.msrb.mxu2 %v5401_v26  ;;  %v5702_v28 = vld [vmem:[%s7314_s7 + $0x8f8] sm:$0xf0]  ;;  %v6926_v20 = vld [vmem:[%s7314_s7 + $0x9ec] sm:$0xf]  ;;  %v5465_v35 = vor.u32 %v6834_v27, %v5462_v17 }
 0x1d4   : > { %4067 = vmatpush.bf16.msrb.mxu3 %v5529_v18  ;;  %v5830_v26 = vld [vmem:[%s7314_s7 + $0x9f8] sm:$0xf0]  ;;  %v6958_v48 = vld [vmem:[%s7314_s7 + $0xaec] sm:$0xf]  ;;  %v5705_v52 = vor.u32 %v6894_v19, %v5702_v28 }
 0x1d5   : > { %4029 = vmatpush.bf16.msrb.mxu0 %v5129_v39  ;;  %v5958_v51 = vld [vmem:[%s7314_s7 + $0xaf8] sm:$0xf0]  ;;  %v6990_v18 = vld [vmem:[%s7314_s7 + $0xbec] sm:$0xf]  ;;  %v5833_v46 = vor.u32 %v6926_v20, %v5830_v26 }
 0x1d6   : > { %4042 = vmatpush.bf16.msrb.mxu1 %v5257_v40  ;;  %v6086_v34 = vld [vmem:[%s7314_s7 + $0xbf8] sm:$0xf0]  ;;  %v5961_v37 = vor.u32 %v6958_v48, %v5958_v51  ;;  %v6890_v38 = vld [vmem:[%s7314_s7 + $0x8cc] sm:$0xf] }
 0x1d7   : > { %4055 = vmatpush.bf16.msrb.mxu2 %v5385_v42  ;;  %v5686_v39 = vld [vmem:[%s7314_s7 + $0x8d8] sm:$0xf0]  ;;  %v6922_v40 = vld [vmem:[%s7314_s7 + $0x9cc] sm:$0xf]  ;;  %v6089_v42 = vor.u32 %v6990_v18, %v6086_v34 }
 0x1d8   : > { %4068 = vmatpush.bf16.msrb.mxu3 %v5513_v6  ;;  %v5814_v43 = vld [vmem:[%s7314_s7 + $0x9d8] sm:$0xf0]  ;;  %v6954_v45 = vld [vmem:[%s7314_s7 + $0xacc] sm:$0xf]  ;;  %v5689_v47 = vor.u32 %v6890_v38, %v5686_v39 }
 0x1d9   : > { %4030 = vmatpush.bf16.msrb.mxu0 %v5113_v56  ;;  %v5942_v36 = vld [vmem:[%s7314_s7 + $0xad8] sm:$0xf0]  ;;  %v6986_v44 = vld [vmem:[%s7314_s7 + $0xbcc] sm:$0xf]  ;;  %v5817_v49 = vor.u32 %v6922_v40, %v5814_v43 }
 0x1da   : > { %4043 = vmatpush.bf16.msrb.mxu1 %v5241_v59  ;;  %v6070_v6 = vld [vmem:[%s7314_s7 + $0xbd8] sm:$0xf0]  ;;  %v5945_v50 = vor.u32 %v6954_v45, %v5942_v36  ;;  %v6886_v53 = vld [vmem:[%s7314_s7 + $0x8ac] sm:$0xf] }
 0x1db   : > { %4056 = vmatpush.bf16.msrb.mxu2 %v5369_v60  ;;  %v5670_v54 = vld [vmem:[%s7314_s7 + $0x8b8] sm:$0xf0]  ;;  %v6918_v8 = vld [vmem:[%s7314_s7 + $0x9ac] sm:$0xf]  ;;  %v6073_v55 = vor.u32 %v6986_v44, %v6070_v6 }
 0x1dc   : > { %4069 = vmatpush.bf16.msrb.mxu3 %v5497_v0  ;;  %v5798_v56 = vld [vmem:[%s7314_s7 + $0x9b8] sm:$0xf0]  ;;  %v6950_v58 = vld [vmem:[%s7314_s7 + $0xaac] sm:$0xf]  ;;  %v5673_v62 = vor.u32 %v6886_v53, %v5670_v54 }
 0x1dd   : > { %4031 = vmatpush.bf16.msrb.mxu0 %v5097_v5  ;;  %v5926_v59 = vld [vmem:[%s7314_s7 + $0xab8] sm:$0xf0]  ;;  %v6982_v60 = vld [vmem:[%s7314_s7 + $0xbac] sm:$0xf] }
 0x1de   : > { %4044 = vmatpush.bf16.msrb.mxu1 %v5225_v9  ;;  %v6054_v61 = vld [vmem:[%s7314_s7 + $0xbb8] sm:$0xf0]  ;;  %v5929_v63 = vor.u32 %v6950_v58, %v5926_v59  ;;  %v6882_v12 = vld [vmem:[%s7314_s7 + $0x88c] sm:$0xf] }
 0x1df   : > { %4057 = vmatpush.bf16.msrb.mxu2 %v5353_v10  ;;  %v5654_v0 = vld [vmem:[%s7314_s7 + $0x898] sm:$0xf0]  ;;  %v6946_v13 = vld [vmem:[%s7314_s7 + $0xa8c] sm:$0xf] }
 0x1e0   : > { %4070 = vmatpush.bf16.msrb.mxu3 %v5481_v25  ;;  %v5782_v1 = vld [vmem:[%s7314_s7 + $0x998] sm:$0xf0]  ;;  %v6978_v3 = vld [vmem:[%s7314_s7 + $0xb8c] sm:$0xf] }
 0x1e1   : > { %4032 = vmatpush.bf16.msrb.mxu0 %v5081_v21  ;;  %v5910_v2 = vld [vmem:[%s7314_s7 + $0xa98] sm:$0xf0]  ;;  %v3826_v5 = vpop.f32.mrf.mxu0  ;;  %v6878_v9 = vld [vmem:[%s7314_s7 + $0x86c] sm:$0xf] }
 0x1e2   : > { %4045 = vmatpush.bf16.msrb.mxu1 %v5209_v29  ;;  %v6038_v4 = vld [vmem:[%s7314_s7 + $0xb98] sm:$0xf0]  ;;  %v5913_v41 = vor.u32 %v6946_v13, %v5910_v2  ;;  %v6910_v11 = vld [vmem:[%s7314_s7 + $0x96c] sm:$0xf]  ;;  %v3827_v24 = vadd.f32 %v3826_v5, %v8285_v57  ;;  %v3839_v14 = vpop.f32.mrf.mxu1 }
 0x1e3   : > { %4058 = vmatpush.bf16.msrb.mxu2 %v5337_v33  ;;  %v5638_v10 = vld [vmem:[%s7314_s7 + $0x878] sm:$0xf0]  ;;  %v6041_v15 = vor.u32 %v6978_v3, %v6038_v4  ;;  %v6942_v16 = vld [vmem:[%s7314_s7 + $0xa6c] sm:$0xf] }
 0x1e4   : > { %4071 = vmatpush.bf16.msrb.mxu3 %v5465_v35  ;;  %4033 = vmatmul.bf16.vlgmr.msrb.gmra.mxu0 %v7475_v23  ;;  %v6914_v23 = vld [vmem:[%s7314_s7 + $0x98c] sm:$0xf]  ;;  %v5766_v25 = vld [vmem:[%s7314_s7 + $0x978] sm:$0xf0]  ;;  %v3840_v19 = vadd.f32 %v3839_v14, %v3827_v24  ;;  %v5641_v28 = vor.u32 %v6878_v9, %v5638_v10 }
 0x1e5   : > { %4077 = vmatpush.bf16.msra.mxu0 %v5705_v52  ;;  %4046 = vmatmul.bf16.vlgmr.msrb.gmra.mxu1 %v7479_v31  ;;  %v5657_v31 = vor.u32 %v6882_v12, %v5654_v0  ;;  %v5785_v7 = vor.u32 %v6914_v23, %v5782_v1  ;;  %v5894_v27 = vld [vmem:[%s7314_s7 + $0xa78] sm:$0xf0]  ;;  %v6974_v17 = vld [vmem:[%s7314_s7 + $0xb6c] sm:$0xf]  ;;  %v5769_v57 = vor.u32 %v6910_v11, %v5766_v25 }
 0x1e6   : > { %4090 = vmatpush.bf16.msra.mxu1 %v5833_v46  ;;  %4059 = vmatmul.bf16.vlgmr.msrb.gmra.mxu2 %v7473_v22  ;;  %v5801_v22 = vor.u32 %v6918_v8, %v5798_v56  ;;  %v6022_v32 = vld [vmem:[%s7314_s7 + $0xb78] sm:$0xf0]  ;;  %v5897_v20 = vor.u32 %v6942_v16, %v5894_v27  ;;  %v6874_v21 = vld [vmem:[%s7314_s7 + $0x84c] sm:$0xf] }
 0x1e7   : > { %4103 = vmatpush.bf16.msra.mxu2 %v5961_v37  ;;  %4072 = vmatmul.bf16.vlgmr.msrb.gmra.mxu3 %v7477_v30  ;;  %v6057_v30 = vor.u32 %v6982_v60, %v6054_v61  ;;  %v5622_v26 = vld [vmem:[%s7314_s7 + $0x858] sm:$0xf0]  ;;  %v6906_v48 = vld [vmem:[%s7314_s7 + $0x94c] sm:$0xf]  ;;  %v6025_v29 = vor.u32 %v6974_v17, %v6022_v32 }
 0x1e8   : > { %4116 = vmatpush.bf16.msra.mxu3 %v6089_v42  ;;  %v5750_v33 = vld [vmem:[%s7314_s7 + $0x958] sm:$0xf0]  ;;  %v6938_v18 = vld [vmem:[%s7314_s7 + $0xa4c] sm:$0xf]  ;;  %v5625_v38 = vor.u32 %v6874_v21, %v5622_v26 }
 0x1e9   : > { %4078 = vmatpush.bf16.msra.mxu0 %v5689_v47  ;;  %v3852_v51 = vpop.f32.mrf.mxu2  ;;  %v5878_v34 = vld [vmem:[%s7314_s7 + $0xa58] sm:$0xf0]  ;;  %v6970_v46 = vld [vmem:[%s7314_s7 + $0xb4c] sm:$0xf]  ;;  %v3828_v40 = vpop.f32.mrf.mxu0  ;;  %v5753_v42 = vor.u32 %v6906_v48, %v5750_v33 }
 0x1ea   : > { %4091 = vmatpush.bf16.msra.mxu1 %v5817_v49  ;;  %v3853_v35 = vadd.f32 %v3852_v51, %v3840_v19  ;;  %v3865_v52 = vpop.f32.mrf.mxu3  ;;  %v6006_v37 = vld [vmem:[%s7314_s7 + $0xb58] sm:$0xf0]  ;;  %v5881_v43 = vor.u32 %v6938_v18, %v5878_v34  ;;  %v6870_v45 = vld [vmem:[%s7314_s7 + $0x82c] sm:$0xf]  ;;  %v3841_v6 = vpop.f32.mrf.mxu1 }
 0x1eb   : > { %4104 = vmatpush.bf16.msra.mxu2 %v5945_v50  ;;  %v5606_v36 = vld [vmem:[%s7314_s7 + $0x838] sm:$0xf0]  ;;  %v6902_v44 = vld [vmem:[%s7314_s7 + $0x92c] sm:$0xf]  ;;  %v6009_v47 = vor.u32 %v6970_v46, %v6006_v37 }
 0x1ec   : > { %4117 = vmatpush.bf16.msra.mxu3 %v6073_v55  ;;  %v8356_v39 = vadd.f32 %v3865_v52, %v3853_v35  ;;  %v5734_v49 = vld [vmem:[%s7314_s7 + $0x938] sm:$0xf0]  ;;  %v6934_v50 = vld [vmem:[%s7314_s7 + $0xa2c] sm:$0xf]  ;;  %v5609_v55 = vor.u32 %v6870_v45, %v5606_v36 }
 0x1ed   : > { %4079 = vmatpush.bf16.msra.mxu0 %v5673_v62  ;;  %v5862_v53 = vld [vmem:[%s7314_s7 + $0xa38] sm:$0xf0]  ;;  %v6966_v54 = vld [vmem:[%s7314_s7 + $0xb2c] sm:$0xf]  ;;  %v5737_v59 = vor.u32 %v6902_v44, %v5734_v49 }
 0x1ee   : > { %4092 = vmatpush.bf16.msra.mxu1 %v5801_v22  ;;  %v5990_v8 = vld [vmem:[%s7314_s7 + $0xb38] sm:$0xf0]  ;;  %v6866_v56 = vld [vmem:[%s7314_s7 + $0x80c] sm:$0xf]  ;;  %v5865_v60 = vor.u32 %v6934_v50, %v5862_v53 }
 0x1ef   : > { %4105 = vmatpush.bf16.msra.mxu2 %v5929_v63  ;;  %v5590_v58 = vld [vmem:[%s7314_s7 + $0x818] sm:$0xf0]  ;;  %v6898_v61 = vld [vmem:[%s7314_s7 + $0x90c] sm:$0xf]  ;;  %v5993_v12 = vor.u32 %v6966_v54, %v5990_v8 }
 0x1f0   : > { %4118 = vmatpush.bf16.msra.mxu3 %v6057_v30  ;;  %v5718_v62 = vld [vmem:[%s7314_s7 + $0x918] sm:$0xf0]  ;;  %v6930_v22 = vld [vmem:[%s7314_s7 + $0xa0c] sm:$0xf]  ;;  %v5593_v4 = vor.u32 %v6866_v56, %v5590_v58 }
 0x1f1   : > { %4080 = vmatpush.bf16.msra.mxu0 %v5657_v31  ;;  %v3854_v63 = vpop.f32.mrf.mxu2  ;;  %v5846_v0 = vld [vmem:[%s7314_s7 + $0xa18] sm:$0xf0]  ;;  %v6962_v23 = vld [vmem:[%s7314_s7 + $0xb0c] sm:$0xf] }
 0x1f2   : > { %4093 = vmatpush.bf16.msra.mxu1 %v5785_v7  ;;  %v5974_v30 = vld [vmem:[%s7314_s7 + $0xb18] sm:$0xf0]  ;;  %v3867_v1 = vpop.f32.mrf.mxu3  ;;  %v7022_v13 = vld [vmem:[%s7314_s7 + $0xcec] sm:$0xf]  ;;  %v5849_v9 = vor.u32 %v6930_v22, %v5846_v0 }
 0x1f3   : > { %4106 = vmatpush.bf16.msra.mxu2 %v5913_v41  ;;  %v6214_v2 = vld [vmem:[%s7314_s7 + $0xcf8] sm:$0xf0]  ;;  %v7054_v3 = vld [vmem:[%s7314_s7 + $0xdec] sm:$0xf]  ;;  %v5721_v41 = vor.u32 %v6898_v61, %v5718_v62  ;;  %v5977_v24 = vor.u32 %v6962_v23, %v5974_v30 }
 0x1f4   : > { %4119 = vmatpush.bf16.msra.mxu3 %v6041_v15  ;;  %v6342_v31 = vld [vmem:[%s7314_s7 + $0xdf8] sm:$0xf0]  ;;  %v7086_v5 = vld [vmem:[%s7314_s7 + $0xeec] sm:$0xf]  ;;  %v6217_v14 = vor.u32 %v7022_v13, %v6214_v2 }
 0x1f5   : > { %4081 = vmatpush.bf16.msra.mxu0 %v5641_v28  ;;  %v6470_v7 = vld [vmem:[%s7314_s7 + $0xef8] sm:$0xf0]  ;;  %v7118_v10 = vld [vmem:[%s7314_s7 + $0xfec] sm:$0xf]  ;;  %v6345_v15 = vor.u32 %v7054_v3, %v6342_v31 }
 0x1f6   : > { %4094 = vmatpush.bf16.msra.mxu1 %v5769_v57  ;;  %v6598_v11 = vld [vmem:[%s7314_s7 + $0xff8] sm:$0xf0]  ;;  %v6473_v25 = vor.u32 %v7086_v5, %v6470_v7  ;;  %v7018_v16 = vld [vmem:[%s7314_s7 + $0xccc] sm:$0xf] }
 0x1f7   : > { %4107 = vmatpush.bf16.msra.mxu2 %v5897_v20  ;;  %v6198_v27 = vld [vmem:[%s7314_s7 + $0xcd8] sm:$0xf0]  ;;  %v7050_v17 = vld [vmem:[%s7314_s7 + $0xdcc] sm:$0xf]  ;;  %v6601_v32 = vor.u32 %v7118_v10, %v6598_v11 }
 0x1f8   : > { %4120 = vmatpush.bf16.msra.mxu3 %v6025_v29  ;;  %v6326_v19 = vld [vmem:[%s7314_s7 + $0xdd8] sm:$0xf0]  ;;  %v7082_v28 = vld [vmem:[%s7314_s7 + $0xecc] sm:$0xf]  ;;  %v6201_v26 = vor.u32 %v7018_v16, %v6198_v27 }
 0x1f9   : > { %4082 = vmatpush.bf16.msra.mxu0 %v5625_v38  ;;  %v6454_v57 = vld [vmem:[%s7314_s7 + $0xed8] sm:$0xf0]  ;;  %v7114_v20 = vld [vmem:[%s7314_s7 + $0xfcc] sm:$0xf]  ;;  %v6329_v48 = vor.u32 %v7050_v17, %v6326_v19 }
 0x1fa   : > { %4095 = vmatpush.bf16.msra.mxu1 %v5753_v42  ;;  %v6582_v21 = vld [vmem:[%s7314_s7 + $0xfd8] sm:$0xf0]  ;;  %v6457_v51 = vor.u32 %v7082_v28, %v6454_v57  ;;  %v7014_v29 = vld [vmem:[%s7314_s7 + $0xcac] sm:$0xf] }
 0x1fb   : > { %4108 = vmatpush.bf16.msra.mxu2 %v5881_v43  ;;  %v6182_v33 = vld [vmem:[%s7314_s7 + $0xcb8] sm:$0xf0]  ;;  %v7046_v18 = vld [vmem:[%s7314_s7 + $0xdac] sm:$0xf]  ;;  %v6585_v35 = vor.u32 %v7114_v20, %v6582_v21 }
 0x1fc   : > { %4121 = vmatpush.bf16.msra.mxu3 %v6009_v47  ;;  %v7179_v34 = vld.sshfl [vmem:[#allocation1] sm:$0xff pattern:$0x73625140]  ;;  %v6310_v52 = vld [vmem:[%s7314_s7 + $0xdb8] sm:$0xf0]  ;;  %v6185_v36 = vor.u32 %v7014_v29, %v6182_v33 }
 0x1fd   : > { %4083 = vmatpush.bf16.msra.mxu0 %v5609_v55  ;;  %v7078_v46 = vld [vmem:[%s7314_s7 + $0xeac] sm:$0xf]  ;;  %v6438_v37 = vld [vmem:[%s7314_s7 + $0xeb8] sm:$0xf0]  ;;  %v6313_v44 = vor.u32 %v7046_v18, %v6310_v52 }
 0x1fe   : > { %4096 = vmatpush.bf16.msra.mxu1 %v5737_v59  ;;  %v7180_v38 = vld.sshfl [vmem:[#allocation1 + $0x10] sm:$0xff pattern:$0x73625140]  ;;  %v7181_v40 = vld.sshfl [vmem:[#allocation1 + $0x8] sm:$0xff pattern:$0x73625140]  ;;  %v6441_v6 = vor.u32 %v7078_v46, %v6438_v37 }
 0x1ff   : > { %4109 = vmatpush.bf16.msra.mxu2 %v5865_v60  ;;  %v7110_v42 = vld [vmem:[%s7314_s7 + $0xfac] sm:$0xf]  ;;  %v6566_v43 = vld [vmem:[%s7314_s7 + $0xfb8] sm:$0xf0] }
 0x200   : > { %4122 = vmatpush.bf16.msra.mxu3 %v5993_v12  ;;  %v7182_v45 = vld.sshfl [vmem:[#allocation1 + $0x18] sm:$0xff pattern:$0x73625140]  ;;  %v7010_v47 = vld [vmem:[%s7314_s7 + $0xc8c] sm:$0xf]  ;;  %v6569_v53 = vor.u32 %v7110_v42, %v6566_v43 }
 0x201   : > { %4084 = vmatpush.bf16.msra.mxu0 %v5593_v4  ;;  %v6166_v49 = vld [vmem:[%s7314_s7 + $0xc98] sm:$0xf0]  ;;  %v7042_v50 = vld [vmem:[%s7314_s7 + $0xd8c] sm:$0xf]  ;;  %v3878_v56 = vpop.f32.mrf.mxu0 }
 0x202   : > { %4097 = vmatpush.bf16.msra.mxu1 %v5721_v41  ;;  %v6294_v54 = vld [vmem:[%s7314_s7 + $0xd98] sm:$0xf0]  ;;  %v7074_v8 = vld [vmem:[%s7314_s7 + $0xe8c] sm:$0xf]  ;;  %v3879_v60 = vadd.f32 %v3878_v56, %v8356_v39  ;;  %v6169_v61 = vor.u32 %v7010_v47, %v6166_v49  ;;  %v3891_v62 = vpop.f32.mrf.mxu1 }
 0x203   : > { %4110 = vmatpush.bf16.msra.mxu2 %v5849_v9  ;;  %v6422_v55 = vld [vmem:[%s7314_s7 + $0xe98] sm:$0xf0]  ;;  %v7106_v58 = vld [vmem:[%s7314_s7 + $0xf8c] sm:$0xf]  ;;  %v6297_v22 = vor.u32 %v7042_v50, %v6294_v54 }
 0x204   : > { %4123 = vmatpush.bf16.msra.mxu3 %v5977_v24  ;;  %4085 = vmatmul.bf16.vlgmr.msra.gmra.mxu0 %v7179_v34  ;;  %v6550_v59 = vld [vmem:[%s7314_s7 + $0xf98] sm:$0xf0]  ;;  %v6425_v63 = vor.u32 %v7074_v8, %v6422_v55  ;;  %v7006_v12 = vld [vmem:[%s7314_s7 + $0xc6c] sm:$0xf]  ;;  %v3892_v1 = vadd.f32 %v3891_v62, %v3879_v60 }
 0x205   : > { %4129 = vmatpush.bf16.msrb.mxu0 %v6217_v14  ;;  %4098 = vmatmul.bf16.vlgmr.msra.gmra.mxu1 %v7181_v40  ;;  %v6150_v0 = vld [vmem:[%s7314_s7 + $0xc78] sm:$0xf0]  ;;  %v7038_v23 = vld [vmem:[%s7314_s7 + $0xd6c] sm:$0xf]  ;;  %v6553_v30 = vor.u32 %v7106_v58, %v6550_v59 }
 0x206   : > { %4142 = vmatpush.bf16.msrb.mxu1 %v6345_v15  ;;  %4111 = vmatmul.bf16.vlgmr.msra.gmra.mxu2 %v7180_v38  ;;  %v6278_v13 = vld [vmem:[%s7314_s7 + $0xd78] sm:$0xf0]  ;;  %v7070_v2 = vld [vmem:[%s7314_s7 + $0xe6c] sm:$0xf]  ;;  %v6153_v31 = vor.u32 %v7006_v12, %v6150_v0 }
 0x207   : > { %4155 = vmatpush.bf16.msrb.mxu2 %v6473_v25  ;;  %4124 = vmatmul.bf16.vlgmr.msra.gmra.mxu3 %v7182_v45  ;;  %v6406_v39 = vld [vmem:[%s7314_s7 + $0xe78] sm:$0xf0]  ;;  %v7102_v3 = vld [vmem:[%s7314_s7 + $0xf6c] sm:$0xf]  ;;  %v6281_v5 = vor.u32 %v7038_v23, %v6278_v13 }
 0x208   : > { %4168 = vmatpush.bf16.msrb.mxu3 %v6601_v32  ;;  %v6534_v4 = vld [vmem:[%s7314_s7 + $0xf78] sm:$0xf0]  ;;  %v6409_v7 = vor.u32 %v7070_v2, %v6406_v39  ;;  %v7002_v41 = vld [vmem:[%s7314_s7 + $0xc4c] sm:$0xf] }
 0x209   : > { %4130 = vmatpush.bf16.msrb.mxu0 %v6201_v26  ;;  %v6134_v9 = vld [vmem:[%s7314_s7 + $0xc58] sm:$0xf0]  ;;  %v7034_v10 = vld [vmem:[%s7314_s7 + $0xd4c] sm:$0xf]  ;;  %v6537_v11 = vor.u32 %v7102_v3, %v6534_v4  ;;  %v3904_v24 = vpop.f32.mrf.mxu2  ;;  %v3880_v19 = vpop.f32.mrf.mxu0 }
 0x20a   : > { %4143 = vmatpush.bf16.msrb.mxu1 %v6329_v48  ;;  %v6262_v14 = vld [vmem:[%s7314_s7 + $0xd58] sm:$0xf0]  ;;  %v7066_v15 = vld [vmem:[%s7314_s7 + $0xe4c] sm:$0xf]  ;;  %v3905_v16 = vadd.f32 %v3904_v24, %v3892_v1  ;;  %v3917_v27 = vpop.f32.mrf.mxu3  ;;  %v6137_v28 = vor.u32 %v7002_v41, %v6134_v9  ;;  %v3893_v57 = vpop.f32.mrf.mxu1 }
 0x20b   : > { %4156 = vmatpush.bf16.msrb.mxu2 %v6457_v51  ;;  %v6390_v25 = vld [vmem:[%s7314_s7 + $0xe58] sm:$0xf0]  ;;  %v7098_v17 = vld [vmem:[%s7314_s7 + $0xf4c] sm:$0xf]  ;;  %v6265_v21 = vor.u32 %v7034_v10, %v6262_v14 }
 0x20c   : > { %4169 = vmatpush.bf16.msrb.mxu3 %v6585_v35  ;;  %v6518_v32 = vld [vmem:[%s7314_s7 + $0xf58] sm:$0xf0]  ;;  %v3918_v20 = vadd.f32 %v3917_v27, %v3905_v16  ;;  %v6393_v26 = vor.u32 %v7066_v15, %v6390_v25  ;;  %v6998_v48 = vld [vmem:[%s7314_s7 + $0xc2c] sm:$0xf] }
 0x20d   : > { %4131 = vmatpush.bf16.msrb.mxu0 %v6185_v36  ;;  %v6118_v51 = vld [vmem:[%s7314_s7 + $0xc38] sm:$0xf0]  ;;  %v7030_v29 = vld [vmem:[%s7314_s7 + $0xd2c] sm:$0xf]  ;;  %v6521_v33 = vor.u32 %v7098_v17, %v6518_v32 }
 0x20e   : > { %4144 = vmatpush.bf16.msrb.mxu1 %v6313_v44  ;;  %v6246_v18 = vld [vmem:[%s7314_s7 + $0xd38] sm:$0xf0]  ;;  %v7062_v34 = vld [vmem:[%s7314_s7 + $0xe2c] sm:$0xf]  ;;  %v6121_v37 = vor.u32 %v6998_v48, %v6118_v51 }
 0x20f   : > { %4157 = vmatpush.bf16.msrb.mxu2 %v6441_v6  ;;  %v6374_v35 = vld [vmem:[%s7314_s7 + $0xe38] sm:$0xf0]  ;;  %v7094_v52 = vld [vmem:[%s7314_s7 + $0xf2c] sm:$0xf]  ;;  %v6249_v38 = vor.u32 %v7030_v29, %v6246_v18 }
 0x210   : > { %4170 = vmatpush.bf16.msrb.mxu3 %v6569_v53  ;;  %v6502_v46 = vld [vmem:[%s7314_s7 + $0xf38] sm:$0xf0]  ;;  %v6377_v40 = vor.u32 %v7062_v34, %v6374_v35  ;;  %v6994_v42 = vld [vmem:[%s7314_s7 + $0xc0c] sm:$0xf] }
 0x211   : > { %4132 = vmatpush.bf16.msrb.mxu0 %v6169_v61  ;;  %v6102_v43 = vld [vmem:[%s7314_s7 + $0xc18] sm:$0xf0]  ;;  %v7026_v45 = vld [vmem:[%s7314_s7 + $0xd0c] sm:$0xf]  ;;  %v6505_v36 = vor.u32 %v7094_v52, %v6502_v46  ;;  %v3906_v49 = vpop.f32.mrf.mxu2 }
 0x212   : > { %4145 = vmatpush.bf16.msrb.mxu1 %v6297_v22  ;;  %v6230_v44 = vld [vmem:[%s7314_s7 + $0xd18] sm:$0xf0]  ;;  %v7058_v6 = vld [vmem:[%s7314_s7 + $0xe0c] sm:$0xf]  ;;  %v3919_v54 = vpop.f32.mrf.mxu3  ;;  %v6105_v8 = vor.u32 %v6994_v42, %v6102_v43 }
 0x213   : > { %4158 = vmatpush.bf16.msrb.mxu2 %v6425_v63  ;;  %v6358_v47 = vld [vmem:[%s7314_s7 + $0xe18] sm:$0xf0]  ;;  %v7090_v50 = vld [vmem:[%s7314_s7 + $0xf0c] sm:$0xf]  ;;  %v6233_v55 = vor.u32 %v7026_v45, %v6230_v44 }
 0x214   : > { %4171 = vmatpush.bf16.msrb.mxu3 %v6553_v30  ;;  %v6486_v53 = vld [vmem:[%s7314_s7 + $0xf18] sm:$0xf0]  ;;  %v6361_v56 = vor.u32 %v7058_v6, %v6358_v47  ;;  %v7183_v59 = vld.sshfl [vmem:[#allocation1 + $0x20] sm:$0xff pattern:$0x73625140] }
 0x215   : > { %4133 = vmatpush.bf16.msrb.mxu0 %v6153_v31  ;;  %v6489_v58 = vor.u32 %v7090_v50, %v6486_v53  ;;  %v7184_v60 = vld.sshfl [vmem:[#allocation1 + $0x28] sm:$0xff pattern:$0x73625140]  ;;  %v7185_v61 = vld.sshfl [vmem:[#allocation1 + $0x30] sm:$0xff pattern:$0x73625140] }
 0x216   : > { %4146 = vmatpush.bf16.msrb.mxu1 %v6281_v5  ;;  %v7186_v62 = vld.sshfl [vmem:[#allocation1 + $0x38] sm:$0xff pattern:$0x73625140] }
 0x217   : > { %4159 = vmatpush.bf16.msrb.mxu2 %v6409_v7 }
 0x218   : > { %4172 = vmatpush.bf16.msrb.mxu3 %v6537_v11 }
 0x219   : > { %4134 = vmatpush.bf16.msrb.mxu0 %v6137_v28 }
 0x21a   : > { %4147 = vmatpush.bf16.msrb.mxu1 %v6265_v21 }
 0x21b   : > { %4160 = vmatpush.bf16.msrb.mxu2 %v6393_v26 }
 0x21c   : > { %4173 = vmatpush.bf16.msrb.mxu3 %v6521_v33 }
 0x21d   : > { %4135 = vmatpush.bf16.msrb.mxu0 %v6121_v37 }
 0x21e   : > { %4148 = vmatpush.bf16.msrb.mxu1 %v6249_v38 }
 0x21f   : > { %4161 = vmatpush.bf16.msrb.mxu2 %v6377_v40 }
 0x220   : > { %4174 = vmatpush.bf16.msrb.mxu3 %v6505_v36 }
 0x221   : > { %4136 = vmatpush.bf16.msrb.mxu0 %v6105_v8  ;;  %v3930_v22 = vpop.f32.mrf.mxu0 }
 0x222   : > { %4149 = vmatpush.bf16.msrb.mxu1 %v6233_v55  ;;  %v3931_v63 = vadd.f32 %v3930_v22, %v3918_v20  ;;  %v3943_v12 = vpop.f32.mrf.mxu1  ;;  %v231_v55 = vld [vmem:[#allocation2 + $0x8] sm:$0xff] }
 0x223   : > { %4162 = vmatpush.bf16.msrb.mxu2 %v6361_v56 }
 0x224   : > { %4175 = vmatpush.bf16.msrb.mxu3 %v6489_v58  ;;  %4137 = vmatmul.bf16.vlgmr.msrb.gmra.mxu0 %v7183_v59  ;;  %v3944_v0 = vadd.f32 %v3943_v12, %v3931_v63 }
 0x225   : > { %4150 = vmatmul.bf16.vlgmr.msrb.gmra.mxu1 %v7184_v60 }
 0x226   : > { %4163 = vmatmul.bf16.vlgmr.msrb.gmra.mxu2 %v7185_v61 }
 0x227   : > { %4176 = vmatmul.bf16.vlgmr.msrb.gmra.mxu3 %v7186_v62 }
 0x229   : > { %v3956_v23 = vpop.f32.mrf.mxu2  ;;  %v3932_v13 = vpop.f32.mrf.mxu0 }
 0x22a   : > { %v3957_v30 = vadd.f32 %v3956_v23, %v3944_v0  ;;  %v3969_v1 = vpop.f32.mrf.mxu3  ;;  %v3945_v2 = vpop.f32.mrf.mxu1 }
 0x22c   : > { %v3970_v39 = vadd.f32 %v3969_v1, %v3957_v30 }
 0x231   : > { %v3958_v3 = vpop.f32.mrf.mxu2 }
 0x232   : > { %v3971_v4 = vpop.f32.mrf.mxu3 }
 0x241   : > { %v3982_v31 = vpop.f32.mrf.mxu0 }
 0x242   : > { %v3995_v5 = vpop.f32.mrf.mxu1 }
 0x243   : > { %v3996_v7 = vadd.f32 %v3995_v5, %v3982_v31 }
 0x249   : > { %v4008_v41 = vpop.f32.mrf.mxu2  ;;  %v3984_v24 = vpop.f32.mrf.mxu0 }
 0x24a   : > { %v4009_v9 = vadd.f32 %v4008_v41, %v3996_v7  ;;  %v4021_v10 = vpop.f32.mrf.mxu3  ;;  %v3997_v14 = vpop.f32.mrf.mxu1 }
 0x24c   : > { %v4022_v11 = vadd.f32 %v4021_v10, %v4009_v9 }
 0x251   : > { %v4010_v15 = vpop.f32.mrf.mxu2 }
 0x252   : > { %v4023_v25 = vpop.f32.mrf.mxu3 }
 0x261   : > { %v4034_v16 = vpop.f32.mrf.mxu0 }
 0x262   : > { %v4047_v27 = vpop.f32.mrf.mxu1  ;;  %v4035_v48 = vadd.f32 %v4034_v16, %v4022_v11 }
 0x264   : > { %v4048_v18 = vadd.f32 %v4047_v27, %v4035_v48 }
 0x269   : > { %v4060_v17 = vpop.f32.mrf.mxu2  ;;  %v4036_v19 = vpop.f32.mrf.mxu0 }
 0x26a   : > { %v4073_v32 = vpop.f32.mrf.mxu3  ;;  %v4049_v28 = vpop.f32.mrf.mxu1  ;;  %v4061_v35 = vadd.f32 %v4060_v17, %v4048_v18 }
 0x26c   : > { %v4074_v37 = vadd.f32 %v4073_v32, %v4061_v35 }
 0x271   : > { %v4062_v57 = vpop.f32.mrf.mxu2 }
 0x272   : > { %v4075_v20 = vpop.f32.mrf.mxu3 }
 0x281   : > { %v4086_v21 = vpop.f32.mrf.mxu0 }
 0x282   : > { %v4099_v26 = vpop.f32.mrf.mxu1  ;;  %v4087_v38 = vadd.f32 %v4086_v21, %v4074_v37 }
 0x284   : > { %v4100_v40 = vadd.f32 %v4099_v26, %v4087_v38 }
 0x289   : > { %v4112_v51 = vpop.f32.mrf.mxu2  ;;  %v4088_v33 = vpop.f32.mrf.mxu0 }
 0x28a   : > { %v4125_v29 = vpop.f32.mrf.mxu3  ;;  %v4101_v34 = vpop.f32.mrf.mxu1  ;;  %v4113_v42 = vadd.f32 %v4112_v51, %v4100_v40 }
 0x28c   : > { %v4126_v43 = vadd.f32 %v4125_v29, %v4113_v42 }
 0x291   : > { %v4114_v52 = vpop.f32.mrf.mxu2 }
 0x292   : > { %v4127_v46 = vpop.f32.mrf.mxu3 }
 0x2a1   : > { %v4138_v45 = vpop.f32.mrf.mxu0 }
 0x2a2   : > { %v4151_v36 = vpop.f32.mrf.mxu1  ;;  %v4139_v44 = vadd.f32 %v4138_v45, %v4126_v43 }
 0x2a4   : > { %v4152_v6 = vadd.f32 %v4151_v36, %v4139_v44 }
 0x2a9   : > { %v4164_v47 = vpop.f32.mrf.mxu2  ;;  %v4140_v53 = vpop.f32.mrf.mxu0 }
 0x2aa   : > { %v4165_v49 = vadd.f32 %v4164_v47, %v4152_v6  ;;  %v4177_v50 = vpop.f32.mrf.mxu3  ;;  %v4153_v54 = vpop.f32.mrf.mxu1 }
 0x2ac   : > { %v4178_v8 = vadd.f32 %v4177_v50, %v4165_v49 }
 0x2ae   : > { %v4186_v56 = vrot.slane %v4178_v8, 4 }
 0x2af   : > { %4199 = sbr.rel (%p6602_p9) target bundleno = 828 (0x33c), region = 40 }
 0x2b0   : > { %v4189_v58 = vsel %vm4187_vm0, %v3970_v39, %v4186_v56 }
 0x2b1   : > { %v4193_v59 = vadd.f32 %v4189_v58, %v231_v55  ;;  %v4166_v60 = vpop.f32.mrf.mxu2 }
 0x2b2   : > { %v4179_v61 = vpop.f32.mrf.mxu3 }
 0x2b3   : > { %4195 = vst [vmem:[#allocation2 + $0x8] sm:$0xff] %v4193_v59 }
 0x2b4   : > { %v4202_v62 = vld [vmem:[%s8487_s2] sm:$0xf]  ;;  %v7246_v12 = vmov 4.0   ;;  %v4200_v30 = vld [vmem:[#allocation2] sm:$0xff] }
 0x2b5   : > { %v4204_v22 = vperm.slane %v4202_v62, 0  ;;  %v4205_v63 = vperm.slane %v4202_v62, 1  ;;  %7187 = vrcp.f32 %v7246_v12  ;;  %v4206_v0 = vperm.slane %v4202_v62, 2 }
 0x2b6   : > { %v4207_v23 = vperm.slane %v4202_v62, 3 }
 0x2b7   : > { %v4208_v1 = vrot.slane %v4205_v63, 4 }
 0x2b8   : > { %v4209_v2 = vrot.slane %v4207_v23, 4 }
 0x2b9   : > { %v4210_v39 = vsel %vm4187_vm0, %v4204_v22, %v4208_v1 }
 0x2ba   : > { %v4201_v13 = vld [vmem:[#allocation2 + $0x8] sm:$0xff]  ;;  %v4214_v3 = vadd.f32 %v4210_v39, %v4200_v30  ;;  %v4211_v4 = vsel %vm4187_vm0, %v4206_v0, %v4209_v2 }
 0x2bb   : > { %v7188_v31 = vpop.eup %7187  ;;  %v4215_v5 = vadd.f32 %v4211_v4, %v4201_v13 }
 0x2bc   : > { %4218 = vst [vmem:[#allocation1] ss:$2 sm:$0xff] %v4214_v3  ;;  %v4258_v7 = vmul.f32 4.0, %v7188_v31  ;;  %vm4262_vm1 = vweird.f32 %v7188_v31 }
 0x2bd   : > { %4220 = vst [vmem:[#allocation1 + $0x10] ss:$2 sm:$0xff] %v4215_v5 }
 0x2be   : > { %v4259_v41 = vsub.f32 1.0, %v4258_v7 }
 0x2c0   : > { %v4260_v17 = vmul.f32 %v7188_v31, %v4259_v41 }
 0x2c2   : > { %v4261_v29 = vadd.f32 %v7188_v31, %v4260_v17 }
 0x2c3   : > { %v4221_v9 = vld.sshfl [vmem:[#allocation1] sm:$0xff pattern:$0x75316420]  ;;  %v4222_v10 = vld.sshfl [vmem:[#allocation1 + $0x8] sm:$0xff pattern:$0x75316420] }
 0x2c4   : > { %v4229_v11 = vsel %vm4187_vm0, %v4221_v9, 0.0  ;;  %v4236_v24 = vsel %vm4187_vm0, %v4222_v10, 0.0  ;;  %v4223_v14 = vld.sshfl [vmem:[#allocation1 + $0x10] sm:$0xff pattern:$0x75316420]  ;;  %v4263_v40 = vsel %vm4262_vm1, %v7188_v31, %v4261_v29 }
 0x2c5   : > { %v4230_v15 = vrot.slane %v4229_v11, 4  ;;  %v4237_v25 = vrot.slane %v4236_v24, 4  ;;  %v4224_v16 = vld.sshfl [vmem:[#allocation1 + $0x18] sm:$0xff pattern:$0x75316420]  ;;  %v4243_v27 = vsel %vm4187_vm0, %v4223_v14, 0.0 }
 0x2c6   : > { %v4244_v32 = vrot.slane %v4243_v27, 4  ;;  %v4250_v19 = vsel %vm4187_vm0, %v4224_v16, 0.0 }
 0x2c7   : > { %v4231_v28 = vadd.f32 %v4230_v15, %v4229_v11  ;;  %v4238_v57 = vadd.f32 %v4237_v25, %v4236_v24  ;;  %v4251_v20 = vrot.slane %v4250_v19, 4 }
 0x2c8   : > { %v4245_v21 = vadd.f32 %v4244_v32, %v4243_v27 }
 0x2c9   : > { %v4232_v26 = vrot.slane %v4231_v28, 2  ;;  %v4239_v48 = vrot.slane %v4238_v57, 2  ;;  %v4252_v51 = vadd.f32 %v4251_v20, %v4250_v19 }
 0x2ca   : > { %v4246_v33 = vrot.slane %v4245_v21, 2 }
 0x2cb   : > { %v4233_v18 = vadd.f32 %v4232_v26, %v4231_v28  ;;  %v4240_v34 = vadd.f32 %v4239_v48, %v4238_v57  ;;  %v4253_v35 = vrot.slane %v4252_v51, 2 }
 0x2cc   : > { %v4247_v52 = vadd.f32 %v4246_v33, %v4245_v21 }
 0x2cd   : > { %v4234_v46 = vrot.slane %v4233_v18, 1  ;;  %v4241_v37 = vrot.slane %v4240_v34, 1  ;;  %v4254_v38 = vadd.f32 %v4253_v35, %v4252_v51 }
 0x2ce   : > { %v4248_v42 = vrot.slane %v4247_v52, 1 }
 0x2cf   : > { %v4235_v43 = vadd.f32 %v4234_v46, %v4233_v18  ;;  %v4242_v45 = vadd.f32 %v4241_v37, %v4240_v34  ;;  %v4255_v36 = vrot.slane %v4254_v38, 1 }
 0x2d0   : > { %v4249_v6 = vadd.f32 %v4248_v42, %v4247_v52 }
 0x2d1   : > { %v4265_v44 = vmul.f32 %v4263_v40, %v4242_v45  ;;  %v4256_v47 = vadd.f32 %v4255_v36, %v4254_v38  ;;  %v4264_v49 = vmul.f32 %v4263_v40, %v4235_v43 }
 0x2d2   : > { %v4266_v8 = vmul.f32 %v4263_v40, %v4249_v6 }
 0x2d3   : > { %v4272_v50 = vrot.slane %v4265_v44, 4  ;;  %v4267_v53 = vmul.f32 %v4263_v40, %v4256_v47 }
 0x2d5   : > { %v4274_v54 = vsel %vm4187_vm0, %v4264_v49, %v4272_v50  ;;  %v4273_v55 = vrot.slane %v4267_v53, 4 }
 0x2d6   : > { %v8451_v56 = vsub.f32 %v4214_v3, %v4274_v54 }
 0x2d7   : > { %v4275_v58 = vsel %vm4187_vm0, %v4266_v8, %v4273_v55 }
 0x2d8   : > { %v4280_v59 = vmul.f32 %v8451_v56, %v8451_v56  ;;  %v8456_v60 = vsub.f32 %v4215_v5, %v4275_v58 }
 0x2da   : > { %4284 = vst [vmem:[#allocation1] ss:$2 sm:$0xff] %v4280_v59  ;;  %v4281_v61 = vmul.f32 %v8456_v60, %v8456_v60 }
 0x2dc   : > { %4286 = vst [vmem:[#allocation1 + $0x10] ss:$2 sm:$0xff] %v4281_v61 }
 0x2e1   : > { %v4287_v62 = vld.sshfl [vmem:[#allocation1] sm:$0xff pattern:$0x75316420]  ;;  %v4288_v22 = vld.sshfl [vmem:[#allocation1 + $0x8] sm:$0xff pattern:$0x75316420] }
 0x2e2   : > { %v4295_v63 = vsel %vm4187_vm0, %v4287_v62, 0.0  ;;  %v4302_v12 = vsel %vm4187_vm0, %v4288_v22, 0.0 }
 0x2e3   : > { %v4296_v0 = vrot.slane %v4295_v63, 4  ;;  %v4303_v23 = vrot.slane %v4302_v12, 4  ;;  %v4289_v30 = vld.sshfl [vmem:[#allocation1 + $0x10] sm:$0xff pattern:$0x75316420] }
 0x2e4   : > { %v4290_v1 = vld.sshfl [vmem:[#allocation1 + $0x18] sm:$0xff pattern:$0x75316420]  ;;  %v4309_v13 = vsel %vm4187_vm0, %v4289_v30, 0.0 }
 0x2e5   : > { %v4297_v2 = vadd.f32 %v4296_v0, %v4295_v63  ;;  %v4304_v39 = vadd.f32 %v4303_v23, %v4302_v12  ;;  %v4310_v3 = vrot.slane %v4309_v13, 4  ;;  %v4316_v4 = vsel %vm4187_vm0, %v4290_v1, 0.0 }
 0x2e6   : > { %v4317_v31 = vrot.slane %v4316_v4, 4 }
 0x2e7   : > { %v4298_v5 = vrot.slane %v4297_v2, 2  ;;  %v4305_v7 = vrot.slane %v4304_v39, 2  ;;  %v4311_v41 = vadd.f32 %v4310_v3, %v4309_v13 }
 0x2e8   : > { %v4318_v9 = vadd.f32 %v4317_v31, %v4316_v4 }
 0x2e9   : > { %v4299_v10 = vadd.f32 %v4298_v5, %v4297_v2  ;;  %v4306_v11 = vadd.f32 %v4305_v7, %v4304_v39  ;;  %v4312_v24 = vrot.slane %v4311_v41, 2 }
 0x2ea   : > { %v4319_v14 = vrot.slane %v4318_v9, 2 }
 0x2eb   : > { %v4300_v15 = vrot.slane %v4299_v10, 1  ;;  %v4307_v25 = vrot.slane %v4306_v11, 1  ;;  %v4313_v16 = vadd.f32 %v4312_v24, %v4311_v41 }
 0x2ec   : > { %v4320_v27 = vadd.f32 %v4319_v14, %v4318_v9 }
 0x2ed   : > { %v4301_v17 = vadd.f32 %v4300_v15, %v4299_v10  ;;  %v4308_v32 = vadd.f32 %v4307_v25, %v4306_v11  ;;  %v4314_v19 = vrot.slane %v4313_v16, 1 }
 0x2ee   : > { %v4321_v28 = vrot.slane %v4320_v27, 1 }
 0x2ef   : > { %v4323_v57 = vmul.f32 %v4301_v17, %v4263_v40  ;;  %v4324_v20 = vmul.f32 %v4308_v32, %v4263_v40  ;;  %v4315_v21 = vadd.f32 %v4314_v19, %v4313_v16 }
 0x2f0   : > { %v4322_v26 = vadd.f32 %v4321_v28, %v4320_v27 }
 0x2f1   : > { %v4327_v48 = vadd.f32 1e-05, %v4323_v57  ;;  %v4328_v51 = vadd.f32 1e-05, %v4324_v20  ;;  %v4325_v29 = vmul.f32 %v4315_v21, %v4263_v40 }
 0x2f2   : > { %v4326_v33 = vmul.f32 %v4322_v26, %v4263_v40 }
 0x2f3   : > { %7189 = vrsqrt.f32 %v4327_v48  ;;  %v4329_v18 = vadd.f32 1e-05, %v4325_v29  ;;  %vm4347_vm4 = vweird.f32 %v4328_v51  ;;  %vm4337_vm6 = vweird.f32 %v4327_v48 }
 0x2f4   : > { %7191 = vrsqrt.f32 %v4328_v51  ;;  %v4330_v34 = vadd.f32 1e-05, %v4326_v33 }
 0x2f5   : > { %7193 = vrsqrt.f32 %v4329_v18  ;;  %vm4357_vm12 = vweird.f32 %v4329_v18 }
 0x2f6   : > { %7195 = vrsqrt.f32 %v4330_v34  ;;  %vm4367_vm8 = vweird.f32 %v4330_v34 }
 0x2f9   : > { %v7190_v35 = vpop.eup %7189 }
 0x2fa   : > { %v7192_v52 = vpop.eup %7191  ;;  %v4332_v46 = vmul.f32 %v7190_v35, %v4327_v48  ;;  %vm4338_vm3 = vweird.f32 %v7190_v35 }
 0x2fb   : > { %v7194_v37 = vpop.eup %7193  ;;  %v4342_v38 = vmul.f32 %v7192_v52, %v4328_v51  ;;  %vm4348_vm2 = vweird.f32 %v7192_v52  ;;  %vm4339_vm9 = vmor %vm4337_vm6, %vm4338_vm3 }
 0x2fc   : > { %v7196_v42 = vpop.eup %7195  ;;  %v4333_v43 = vmul.f32 %v7190_v35, %v4332_v46  ;;  %v4352_v45 = vmul.f32 %v7194_v37, %v4329_v18  ;;  %vm4349_vm7 = vmor %vm4347_vm4, %vm4348_vm2  ;;  %vm4358_vm10 = vweird.f32 %v7194_v37 }
 0x2fd   : > { %v4343_v36 = vmul.f32 %v7192_v52, %v4342_v38  ;;  %v4362_v44 = vmul.f32 %v7196_v42, %v4330_v34  ;;  %vm4368_vm5 = vweird.f32 %v7196_v42  ;;  %vm4359_vm13 = vmor %vm4357_vm12, %vm4358_vm10 }
 0x2fe   : > { %v4334_v6 = vmul.f32 0.5, %v4333_v43  ;;  %v4353_v47 = vmul.f32 %v7194_v37, %v4352_v45  ;;  %vm4369_vm11 = vmor %vm4367_vm8, %vm4368_vm5  ;;  %vm4449_vm8 = vcmask 1045508  }
 0x2ff   : > { %v4344_v49 = vmul.f32 0.5, %v4343_v36  ;;  %v4363_v40 = vmul.f32 %v7196_v42, %v4362_v44 }
 0x300   : > { %v4335_v50 = vsub.f32 1.5, %v4334_v6  ;;  %v4354_v53 = vmul.f32 0.5, %v4353_v47 }
 0x301   : > { %v4345_v54 = vsub.f32 1.5, %v4344_v49  ;;  %v4364_v8 = vmul.f32 0.5, %v4363_v40 }
 0x302   : > { %v4355_v55 = vsub.f32 1.5, %v4354_v53  ;;  %v4336_v58 = vmul.f32 %v7190_v35, %v4335_v50 }
 0x303   : > { %v4346_v59 = vmul.f32 %v7192_v52, %v4345_v54  ;;  %v4365_v61 = vsub.f32 1.5, %v4364_v8 }
 0x304   : > { %v4356_v22 = vmul.f32 %v7194_v37, %v4355_v55  ;;  %v4340_v0 = vsel %vm4339_vm9, %v7190_v35, %v4336_v58 }
 0x305   : > { %v4350_v62 = vsel %vm4349_vm7, %v7192_v52, %v4346_v59  ;;  %v4366_v63 = vmul.f32 %v7196_v42, %v4365_v61  ;;  %vm4445_vm7 = vcmask 1041408  }
 0x306   : > { %v4375_v12 = vrot.slane %v4350_v62, 4  ;;  %v4360_v2 = vsel %vm4359_vm13, %v7194_v37, %v4356_v22 }
 0x307   : > { %v4370_v23 = vsel %vm4369_vm11, %v7196_v42, %v4366_v63 }
 0x308   : > { %v4377_v30 = vsel %vm4187_vm0, %v4340_v0, %v4375_v12  ;;  %v4376_v1 = vrot.slane %v4370_v23, 4 }
 0x309   : > { %v4381_v13 = vmul.f32 %v4377_v30, %v8451_v56 }
 0x30a   : > { %v4378_v39 = vsel %vm4187_vm0, %v4360_v2, %v4376_v1 }
 0x30b   : > { %v6603_v3 = vmul.f32 -0.4, %v4381_v13  ;;  %v4382_v4 = vmul.f32 %v4378_v39, %v8456_v60 }
 0x30d   : > { %v4387_v31 = vmul.f32 1.442695, %v6603_v3  ;;  %v6604_v5 = vmul.f32 -0.4, %v4382_v4 }
 0x30f   : > { %7197 = vpow2.f32 %v4387_v31  ;;  %v4389_v7 = vmul.f32 1.442695, %v6604_v5 }
 0x311   : > { %7199 = vpow2.f32 %v4389_v7 }
 0x315   : > { %v7198_v41 = vpop.eup %7197 }
 0x316   : > { %v4391_v9 = vadd.f32 1.0, %v7198_v41 }
 0x317   : > { %v7200_v10 = vpop.eup %7199 }
 0x318   : > { %7201 = vrcp.f32 %v4391_v9  ;;  %v4392_v11 = vadd.f32 1.0, %v7200_v10  ;;  %v4404_v25 = vand.u32 2147483648, %v4391_v9  ;;  %v4402_v60 = vand.u32 2147483647, %v4391_v9 }
 0x319   : > { %vm4398_vm15 = vweird.f32 %v4391_v9 }
 0x31a   : > { %7203 = vrcp.f32 %v4392_v11  ;;  %v4419_v19 = vand.u32 2147483648, %v4392_v11  ;;  %v4405_v28 = vor.u32 1.1754944e-38, %v4404_v25  ;;  %v4417_v20 = vand.u32 2147483647, %v4392_v11 }
 0x31b   : > { %vm4403_vm3 = vcmp.eq.f32.partialorder %v4402_v60, 8.507059e+37  ;;  %vm4413_vm4 = vweird.f32 %v4392_v11 }
 0x31c   : > { %v4420_v29 = vor.u32 1.1754944e-38, %v4419_v19  ;;  %vm4418_vm6 = vcmp.eq.f32.partialorder %v4417_v20, 8.507059e+37 }
 0x31e   : > { %v7202_v24 = vpop.eup %7201 }
 0x31f   : > { %v4394_v14 = vmul.f32 %v7202_v24, %v4391_v9  ;;  %vm4399_vm14 = vweird.f32 %v7202_v24 }
 0x320   : > { %v7204_v56 = vpop.eup %7203  ;;  %vm4400_vm1 = vmor %vm4398_vm15, %vm4399_vm14 }
 0x321   : > { %v4395_v15 = vsub.f32 1.0, %v4394_v14  ;;  %v4409_v16 = vmul.f32 %v7204_v56, %v4392_v11  ;;  %vm4414_vm2 = vweird.f32 %v7204_v56 }
 0x322   : > { %vm4415_vm5 = vmor %vm4413_vm4, %vm4414_vm2 }
 0x323   : > { %v4396_v27 = vmul.f32 %v7202_v24, %v4395_v15  ;;  %v4410_v17 = vsub.f32 1.0, %v4409_v16 }
 0x325   : > { %v4397_v32 = vadd.f32 %v7202_v24, %v4396_v27  ;;  %v4411_v57 = vmul.f32 %v7204_v56, %v4410_v17 }
 0x327   : > { %v4401_v21 = vsel %vm4400_vm1, %v7202_v24, %v4397_v32  ;;  %v4412_v48 = vadd.f32 %v7204_v56, %v4411_v57 }
 0x328   : > { %v4406_v26 = vsel %vm4403_vm3, %v4405_v28, %v4401_v21 }
 0x329   : > { %v4423_v51 = vmul.f32 %v4406_v26, %v4381_v13  ;;  %v4416_v33 = vsel %vm4415_vm5, %v7204_v56, %v4412_v48 }
 0x32a   : > { %v4421_v18 = vsel %vm4418_vm6, %v4420_v29, %v4416_v33 }
 0x32b   : > { %4427 = vst [vmem:[#allocation1] ss:$2 sm:$0xff] %v4423_v51  ;;  %v4424_v34 = vmul.f32 %v4421_v18, %v4382_v4 }
 0x32d   : > { %4429 = vst [vmem:[#allocation1 + $0x10] ss:$2 sm:$0xff] %v4424_v34 }
 0x332   : > { %v4430_v35 = vld.sshfl [vmem:[#allocation1] sm:$0xff pattern:$0x75316420]  ;;  %v4431_v52 = vld.sshfl [vmem:[#allocation1 + $0x8] sm:$0xff pattern:$0x75316420] }
 0x333   : > { %v4438_v46 = vpack.c.bf16 %v4431_v52, %v4430_v35 }
 0x334   : > { %v4432_v37 = vld.sshfl [vmem:[#allocation1 + $0x10] sm:$0xff pattern:$0x75316420]  ;;  %v4433_v38 = vld.sshfl [vmem:[#allocation1 + $0x18] sm:$0xff pattern:$0x75316420] }
 0x335   : > { %v4439_v42 = vpack.c.bf16 %v4433_v38, %v4432_v37  ;;  %v4442_v43 = vrot.slane %v4438_v46, 2 }
 0x337   : > { %v4443_v45 = vrot.slane %v4439_v42, 4  ;;  %v4444_v36 = vrot.slane %v4439_v42, 6  ;;  %v4448_v44 = vsel %vm4445_vm7, %v4438_v46, %v4442_v43 }
 0x339   : > { %v4452_v6 = vsel %vm4449_vm8, %v4443_v45, %v4444_v36 }
 0x33a   : > { %v4453_v47 = vsel %vm4187_vm0, %v4448_v44, %v4452_v6 }
 0x33b   : > { %4455 = vst [vmem:[%s7304_s27] sm:$0xff] %v4453_v47 }
 0x33c PF: > { %s13_s16 = sadd.s32 1, %s7243_s16   ;;  %s8489_s12 = smov %s7235_s14 }
 0x33d   : > { %p10_p10 = scmp.ge.s32.totalorder %s13_s16, 6   ;;  %s8490_s13 = smov %s7239_s15 }
 0x33e   : > { %s8491_s14 = smov %s8494_s17  ;;  %s8492_s15 = smov %s8498_s18 }
 0x33f   :  { %12 = sbr.rel (!%p10_p10) target bundleno = 3 (0x3), region = 77 }

</bundles_post_ra>
